<compile_context>
chip_gen: v5e
topology: v5e:2x2
jax: 0.10.0
libtpu: 0.0.40
codegen_flags: <defaults>
</compile_context>

<pallas_src>
import functools

import jax
import jax.numpy as jnp
import numpy as np
from jax import lax
from jax.experimental import pallas as pl
from jax.experimental.pallas import tpu as pltpu


def _round_up(x, m):
    return (x + m - 1) // m * m


def _gru_chunk_kernel(x_ref, len_ref, h0_ref, bcomb_ref, bhn_ref,
                      wih_ref, whh_ref, out_ref, hid_ref, h_scr, gi_scr):
    """One grid step == one chunk of T timesteps over the whole (padded) batch.

    x_ref     : (T, Bp, D)    bf16  input chunk (time-major)
    len_ref   : (Bp, 1)       int32 sequence lengths
    h0_ref    : (1, Bp, Hp)   f32   initial hidden state
    bcomb_ref : (1, 3Hp)      f32   b_ih with b_hh's r/z columns folded in
    bhn_ref   : (1, Hp)       f32   n-gate hidden bias
    wih_ref   : (D, 3Hp)      bf16  fused input->hidden weights  [r|z|n]
    whh_ref   : (Hp, 3Hp)     bf16  fused hidden->hidden weights [r|z|n]
    out_ref   : (T, Bp, Hp)   bf16  outputs for this chunk
    hid_ref   : (1, Bp, Hp)   f32   final hidden (written only on last chunk)
    h_scr     : (Bp, Hp)      f32   VMEM scratch carrying h across chunks
    gi_scr    : (T, Bp, 3Hp)  f32   per-chunk hoisted input projections
    """
    c = pl.program_id(0)
    T, Bp, D = x_ref.shape
    Hp = hid_ref.shape[-1]

    @pl.when(c == 0)
    def _init():
        h_scr[...] = h0_ref[0]

    # Hoisted per chunk (constant-index blocks stay VMEM resident).
    lens = len_ref[...]                      # (Bp, 1) int32
    b_hn = bhn_ref[...]                      # (1, Hp)  f32
    steps_left = lens - c * T                # (Bp, 1)  int32

    # --- one batched MXU push for all T timesteps' input projections ---
    # (T, Bp, D) -> (T*Bp, D) is a no-copy relayout because Bp == 16 (bf16 tile).
    x_flat = x_ref[...].reshape(T * Bp, D)                              # bf16
    gi_all = jnp.dot(x_flat, wih_ref[...],
                     preferred_element_type=jnp.float32) + bcomb_ref[...]
    gi_scr[...] = gi_all.reshape(T, Bp, 3 * Hp)

    h = h_scr[...]                                                      # f32
    for lt in range(T):   # static unroll; per-step path = 1 small matmul + gates
        gi = gi_scr[lt]                                                 # (Bp, 3Hp) f32
        gh = jnp.dot(h.astype(jnp.bfloat16), whh_ref[...],
                     preferred_element_type=jnp.float32)                # (Bp, 3Hp) f32
        # PyTorch GRU gate order r, z, n; slices are lane-aligned (Hp % 128 == 0).
        r = jax.nn.sigmoid(gi[:, :Hp] + gh[:, :Hp])
        z = jax.nn.sigmoid(gi[:, Hp:2 * Hp] + gh[:, Hp:2 * Hp])
        n = jnp.tanh(gi[:, 2 * Hp:] + r * (gh[:, 2 * Hp:] + b_hn))
        h_new = (1.0 - z) * n + z * h                                   # f32 gate math

        valid = steps_left > lt                  # (Bp, 1) bool, broadcasts over Hp
        out_ref[lt] = jnp.where(valid, h_new, 0.0).astype(out_ref.dtype)
        h = jnp.where(valid, h_new, h)           # freeze finished sequences
    h_scr[...] = h

    @pl.when(c == pl.num_programs(0) - 1)
    def _finalize():
        hid_ref[0] = h


def context_rnn_pallas(encoder_hidden, conversation_length, params, hidden=None,
                       *, time_chunk=16, max_len=None):
    """ContextRNN.forward equivalent (num_layers=1, unidirectional GRU).

    encoder_hidden      : (B, S, D) float32  (batch_first, like PyTorch)
    conversation_length : (B,)      integer sequence lengths
    params              : PyTorch-shaped GRU params:
                          weight_ih_l0 (3H, D), weight_hh_l0 (3H, H),
                          bias_ih_l0 (3H,), bias_hh_l0 (3H,)
    hidden              : optional (1, B, H) initial hidden state
    Returns (outputs, hidden): outputs (B, max_len or S, H) f32, hidden (1, B, H) f32.
    """
    B, S, D = encoder_hidden.shape
    H = params["weight_hh_l0"].shape[1]

    # Hardware-friendly padding: B -> multiple of 16 (native bf16 sublane tile,
    # makes the in-kernel reshapes no-copy), H -> multiple of 128 (lanes) so
    # gate slices and output stores are lane-dense.
    Bp = _round_up(B, 16)
    Hp = _round_up(H, 128)
    T = min(time_chunk, S)
    Sp = _round_up(S, T)

    # --- glue: fuse + relayout parameters (plain JAX, done once per call) ---
    # (3H, In) -> (In_pad, 3*Hp), gate-major columns [r | z | n], zero-padded.
    def relayout_w(w, in_dim_pad):
        in_dim = w.shape[1]
        w = w.reshape(3, H, in_dim).transpose(2, 0, 1)            # (In, 3, H)
        w = jnp.pad(w, ((0, in_dim_pad - in_dim), (0, 0), (0, Hp - H)))
        return w.reshape(in_dim_pad, 3 * Hp).astype(jnp.bfloat16)

    w_ih_cat = relayout_w(params["weight_ih_l0"], D)              # (D, 3Hp)
    w_hh_cat = relayout_w(params["weight_hh_l0"], Hp)             # (Hp, 3Hp)

    def pad_b(b):
        return jnp.pad(b.reshape(3, H).astype(jnp.float32), ((0, 0), (0, Hp - H)))

    b_ih3 = pad_b(params["bias_ih_l0"])                           # (3, Hp)
    b_hh3 = pad_b(params["bias_hh_l0"])                           # (3, Hp)
    # Fold b_hh's r/z columns into the input-side bias (added once per chunk in
    # the batched gi matmul); only the n-gate hidden bias stays per step.
    b_comb = jnp.concatenate(
        [b_ih3[0] + b_hh3[0], b_ih3[1] + b_hh3[1], b_ih3[2]]).reshape(1, 3 * Hp)
    b_hn = b_hh3[2].reshape(1, Hp)

    # Time-major, padded, bf16 input (D is small so this pass is cheap; the big
    # (Sp,Bp,Hp) output writeback is the bf16 one).
    x = jnp.transpose(encoder_hidden, (1, 0, 2))                  # (S, B, D)
    x = jnp.pad(x, ((0, Sp - S), (0, Bp - B), (0, 0))).astype(jnp.bfloat16)
    lens = jnp.pad(conversation_length.astype(jnp.int32), (0, Bp - B)).reshape(Bp, 1)

    if hidden is None:
        h0 = jnp.zeros((1, Bp, Hp), jnp.float32)
    else:
        h0 = jnp.pad(hidden.astype(jnp.float32),
                     ((0, 0), (0, Bp - B), (0, Hp - H)))

    grid_spec = pltpu.PrefetchScalarGridSpec(
        num_scalar_prefetch=0,
        grid=(Sp // T,),
        in_specs=[
            pl.BlockSpec((T, Bp, D), lambda c: (c, 0, 0)),        # x chunk
            pl.BlockSpec((Bp, 1), lambda c: (0, 0)),              # lengths
            pl.BlockSpec((1, Bp, Hp), lambda c: (0, 0, 0)),       # initial hidden
            pl.BlockSpec((1, 3 * Hp), lambda c: (0, 0)),          # fused bias [r|z|n]
            pl.BlockSpec((1, Hp), lambda c: (0, 0)),              # n-gate hidden bias
            pl.BlockSpec((D, 3 * Hp), lambda c: (0, 0)),          # W_ih (fetched once)
            pl.BlockSpec((Hp, 3 * Hp), lambda c: (0, 0)),         # W_hh (fetched once)
        ],
        out_specs=[
            pl.BlockSpec((T, Bp, Hp), lambda c: (c, 0, 0)),       # bf16 outputs
            pl.BlockSpec((1, Bp, Hp), lambda c: (0, 0, 0)),       # final hidden
        ],
        scratch_shapes=[
            pltpu.VMEM((Bp, Hp), jnp.float32),                    # hidden carry
            pltpu.VMEM((T, Bp, 3 * Hp), jnp.float32),             # hoisted gi per chunk
        ],
    )

    outputs_tm, hidden_out = pl.pallas_call(
        _gru_chunk_kernel,
        out_shape=(
            jax.ShapeDtypeStruct((Sp, Bp, Hp), jnp.bfloat16),
            jax.ShapeDtypeStruct((1, Bp, Hp), jnp.float32),
        ),
        grid_spec=grid_spec,
        compiler_params=pltpu.CompilerParams(
            dimension_semantics=("arbitrary",),     # time is sequential
            vmem_limit_bytes=32 * 1024 * 1024,      # <= 48 MiB: safe on v5e/v6e/v7x
        ),
    )(x, lens, h0, b_comb, b_hn, w_ih_cat, w_hh_cat)

    # Un-pad; time-major -> batch_first (bf16 pass), then cast to f32.
    out_len = S if max_len is None else max_len
    outputs = jnp.transpose(outputs_tm, (1, 0, 2))[:B, :out_len, :H].astype(jnp.float32)
    hidden_out = hidden_out[:, :B, :H]
    # TODO(synk): pad_packed_sequence truncates to max(conversation_length); that
    # needs a host/static value, so pass it via `max_len` (keeps this jittable).
    return outputs, hidden_out


def gru_reference(x, lengths, w_ih, w_hh, b_ih, b_hh):
    """Pure-JAX masked GRU matching the kernel's numerics
    (bf16 at the matmul boundary, f32 accumulation + gate math)."""
    B, S, D = x.shape
    w_ih_t = w_ih.T.astype(jnp.bfloat16)   # (D, 3H), columns [r|z|n]
    w_hh_t = w_hh.T.astype(jnp.bfloat16)   # (H, 3H)
    H = w_hh.shape[1]

    def cell(h, inp):
        xt, t = inp
        gi = jnp.dot(xt.astype(jnp.bfloat16), w_ih_t,
                     preferred_element_type=jnp.float32) + b_ih
        gh = jnp.dot(h.astype(jnp.bfloat16), w_hh_t,
                     preferred_element_type=jnp.float32) + b_hh
        i_r, i_z, i_n = jnp.split(gi, 3, axis=-1)
        h_r, h_z, h_n = jnp.split(gh, 3, axis=-1)
        r = jax.nn.sigmoid(i_r + h_r)
        z = jax.nn.sigmoid(i_z + h_z)
        n = jnp.tanh(i_n + r * h_n)
        h_new = (1.0 - z) * n + z * h
        valid = (t < lengths)[:, None]
        out = jnp.where(valid, h_new, 0.0)
        h = jnp.where(valid, h_new, h)
        return h, out

    h0 = jnp.zeros((B, H), jnp.float32)
    hT, outs = lax.scan(cell, h0, (jnp.swapaxes(x, 0, 1), jnp.arange(S)))
    return jnp.swapaxes(outs, 0, 1), hT[None]


def init_gru_params(key, input_size, hidden_size):
    """Deterministic PyTorch-style GRU parameter init: U(-1/sqrt(H), 1/sqrt(H))."""
    k = 1.0 / np.sqrt(hidden_size)
    k_wih, k_whh, k_bih, k_bhh = jax.random.split(key, 4)
    return {
        "weight_ih_l0": jax.random.uniform(
            k_wih, (3 * hidden_size, input_size), jnp.float32, -k, k),
        "weight_hh_l0": jax.random.uniform(
            k_whh, (3 * hidden_size, hidden_size), jnp.float32, -k, k),
        "bias_ih_l0": jax.random.uniform(
            k_bih, (3 * hidden_size,), jnp.float32, -k, k),
        "bias_hh_l0": jax.random.uniform(
            k_bhh, (3 * hidden_size,), jnp.float32, -k, k),
    }


if __name__ == "__main__":
    # Small shapes consistent with ContextRNN.forward:
    #   encoder_hidden: (batch, seq, input_size), conversation_length: (batch,)
    B, S, D, H = 4, 32, 16, 32   # input_size=16, context_size(hidden)=32

    key = jax.random.PRNGKey(0)
    k_x, k_p = jax.random.split(key)
    encoder_hidden = jax.random.normal(k_x, (B, S, D), jnp.float32)
    # One full-length sequence so pad_packed_sequence's truncation to
    # max(conversation_length) is a no-op at these shapes.
    conversation_length = jnp.array([32, 5, 17, 9], dtype=jnp.int32)

    params = init_gru_params(k_p, D, H)

    fwd = jax.jit(functools.partial(context_rnn_pallas, time_chunk=16))
    outputs, hidden = fwd(encoder_hidden, conversation_length, params)
    outputs = jax.block_until_ready(outputs)
    hidden = jax.block_until_ready(hidden)

    assert outputs.shape == (B, S, H), outputs.shape
    assert hidden.shape == (1, B, H), hidden.shape

    # Correctness check against a pure-JAX masked GRU reference.
    ref_out, ref_hid = gru_reference(
        encoder_hidden, conversation_length,
        params["weight_ih_l0"], params["weight_hh_l0"],
        params["bias_ih_l0"], params["bias_hh_l0"])
    # Outputs pass through a bf16 store in the kernel (<= 0.4% rounding);
    # the hidden state is carried in f32 and compared tighter.
    np.testing.assert_allclose(np.asarray(outputs), np.asarray(ref_out),
                               rtol=1e-2, atol=1e-2)
    np.testing.assert_allclose(np.asarray(hidden), np.asarray(ref_hid),
                               rtol=2e-3, atol=2e-3)

    print("KERNEL_OK")
</pallas_src>

<mosaic_0001>
module attributes {stable_mosaic.version = 11 : i64} {
  func.func @_gru_chunk_kernel(%arg0: i32, %arg1: memref<16x16x16xbf16, #tpu.memory_space<vmem>>, %arg2: memref<16x1xi32, #tpu.memory_space<vmem>>, %arg3: memref<1x16x128xf32, #tpu.memory_space<vmem>>, %arg4: memref<1x384xf32, #tpu.memory_space<vmem>>, %arg5: memref<1x128xf32, #tpu.memory_space<vmem>>, %arg6: memref<16x384xbf16, #tpu.memory_space<vmem>>, %arg7: memref<128x384xbf16, #tpu.memory_space<vmem>>, %arg8: memref<16x16x128xbf16, #tpu.memory_space<vmem>>, %arg9: memref<1x16x128xf32, #tpu.memory_space<vmem>>, %arg10: memref<16x128xf32, #tpu.memory_space<vmem>>, %arg11: memref<16x16x384xf32, #tpu.memory_space<vmem>>) attributes {dimension_semantics = [#tpu.dimension_semantics<arbitrary>], iteration_bounds = array<i64: 2>, scalar_prefetch = 0 : i64, scratch_operands = 2 : i64, tpu.core_type = #tpu.core_type<tc>, window_params = [{transform_indices = @transform_0, window_bounds = array<i64: 16, 16, 16>}, {pipeline_mode = #tpu.pipeline_mode<synchronous>, transform_indices = @transform_1, window_bounds = array<i64: 16, 1>}, {pipeline_mode = #tpu.pipeline_mode<synchronous>, transform_indices = @transform_2, window_bounds = array<i64: 1, 16, 128>}, {pipeline_mode = #tpu.pipeline_mode<synchronous>, transform_indices = @transform_3, window_bounds = array<i64: 1, 384>}, {pipeline_mode = #tpu.pipeline_mode<synchronous>, transform_indices = @transform_4, window_bounds = array<i64: 1, 128>}, {pipeline_mode = #tpu.pipeline_mode<synchronous>, transform_indices = @transform_5, window_bounds = array<i64: 16, 384>}, {pipeline_mode = #tpu.pipeline_mode<synchronous>, transform_indices = @transform_6, window_bounds = array<i64: 128, 384>}, {transform_indices = @transform_7, window_bounds = array<i64: 16, 16, 128>}, {pipeline_mode = #tpu.pipeline_mode<synchronous>, transform_indices = @transform_8, window_bounds = array<i64: 1, 16, 128>}]} {
    %c0_i32 = arith.constant 0 : i32
    %0 = arith.cmpi eq, %arg0, %c0_i32 : i32
    %1 = arith.extui %0 : i1 to i32
    %c0_i32_0 = arith.constant 0 : i32
    %2 = arith.cmpi ne, %1, %c0_i32_0 : i32
    scf.if %2 {
      %c0_214 = arith.constant 0 : index
      %c0_215 = arith.constant 0 : index
      %c0_216 = arith.constant 0 : index
      %758 = vector.load %arg3[%c0_214, %c0_215, %c0_216] : memref<1x16x128xf32, #tpu.memory_space<vmem>>, vector<1x16x128xf32>
      %759 = vector.shape_cast %758 : vector<1x16x128xf32> to vector<16x128xf32>
      %c0_217 = arith.constant 0 : index
      %c0_218 = arith.constant 0 : index
      %760 = vector.load %arg10[%c0_217, %c0_218] : memref<16x128xf32, #tpu.memory_space<vmem>>, vector<16x128xf32>
      tpu.vector_store %arg10[%c0_217, %c0_218], %759 {strides = array<i32>} : memref<16x128xf32, #tpu.memory_space<vmem>>, vector<16x128xf32>,
    } else {
    }
    %c0 = arith.constant 0 : index
    %c0_1 = arith.constant 0 : index
    %3 = vector.load %arg2[%c0, %c0_1] : memref<16x1xi32, #tpu.memory_space<vmem>>, vector<16x1xi32>
    %c0_2 = arith.constant 0 : index
    %c0_3 = arith.constant 0 : index
    %4 = vector.load %arg5[%c0_2, %c0_3] : memref<1x128xf32, #tpu.memory_space<vmem>>, vector<1x128xf32>
    %c16_i32 = arith.constant 16 : i32
    %5 = arith.muli %arg0, %c16_i32 : i32
    %6 = vector.broadcast %5 : i32 to vector<16x1xi32>
    %7 = arith.subi %3, %6 : vector<16x1xi32>
    %c0_4 = arith.constant 0 : index
    %c0_5 = arith.constant 0 : index
    %c0_6 = arith.constant 0 : index
    %8 = vector.load %arg1[%c0_4, %c0_5, %c0_6] : memref<16x16x16xbf16, #tpu.memory_space<vmem>>, vector<16x16x16xbf16>
    %9 = vector.shape_cast %8 : vector<16x16x16xbf16> to vector<256x16xbf16>
    %c0_7 = arith.constant 0 : index
    %c0_8 = arith.constant 0 : index
    %10 = vector.load %arg6[%c0_7, %c0_8] : memref<16x384xbf16, #tpu.memory_space<vmem>>, vector<16x384xbf16>
    %cst = arith.constant dense<0.000000e+00> : vector<256x384xf32>
    %11 = tpu.matmul %9, %10, %cst {dimension_numbers = #tpu.dot_dimension_numbers<[1], [0], [0], [1], [0, 0, 1, 1], [], []>} : vector<256x16xbf16>, vector<16x384xbf16>, vector<256x384xf32> -> vector<256x384xf32>
    %c0_9 = arith.constant 0 : index
    %c0_10 = arith.constant 0 : index
    %12 = vector.load %arg4[%c0_9, %c0_10] : memref<1x384xf32, #tpu.memory_space<vmem>>, vector<1x384xf32>
    %13 = vector.broadcast %12 : vector<1x384xf32> to vector<256x384xf32>
    %14 = arith.addf %11, %13 : vector<256x384xf32>
    %15 = vector.shape_cast %14 : vector<256x384xf32> to vector<16x16x384xf32>
    %c0_11 = arith.constant 0 : index
    %c0_12 = arith.constant 0 : index
    %c0_13 = arith.constant 0 : index
    %16 = vector.load %arg11[%c0_11, %c0_12, %c0_13] : memref<16x16x384xf32, #tpu.memory_space<vmem>>, vector<16x16x384xf32>
    tpu.vector_store %arg11[%c0_11, %c0_12, %c0_13], %15 {strides = array<i32>} : memref<16x16x384xf32, #tpu.memory_space<vmem>>, vector<16x16x384xf32>,
    %c0_14 = arith.constant 0 : index
    %c0_15 = arith.constant 0 : index
    %17 = vector.load %arg10[%c0_14, %c0_15] : memref<16x128xf32, #tpu.memory_space<vmem>>, vector<16x128xf32>
    %c0_16 = arith.constant 0 : index
    %c0_17 = arith.constant 0 : index
    %c0_18 = arith.constant 0 : index
    %18 = vector.load %arg11[%c0_16, %c0_17, %c0_18] : memref<16x16x384xf32, #tpu.memory_space<vmem>>, vector<1x16x384xf32>
    %19 = vector.shape_cast %18 : vector<1x16x384xf32> to vector<16x384xf32>
    %20 = arith.truncf %17 : vector<16x128xf32> to vector<16x128xbf16>
    %c0_19 = arith.constant 0 : index
    %c0_20 = arith.constant 0 : index
    %21 = vector.load %arg7[%c0_19, %c0_20] : memref<128x384xbf16, #tpu.memory_space<vmem>>, vector<128x384xbf16>
    %cst_21 = arith.constant dense<0.000000e+00> : vector<16x384xf32>
    %22 = tpu.matmul %20, %21, %cst_21 {dimension_numbers = #tpu.dot_dimension_numbers<[1], [0], [0], [1], [0, 0, 1, 1], [], []>} : vector<16x128xbf16>, vector<128x384xbf16>, vector<16x384xf32> -> vector<16x384xf32>
    %23 = vector.extract_strided_slice %19 {offsets = [0, 0], sizes = [16, 128], strides = [1, 1]} : vector<16x384xf32> to vector<16x128xf32>
    %24 = vector.extract_strided_slice %22 {offsets = [0, 0], sizes = [16, 128], strides = [1, 1]} : vector<16x384xf32> to vector<16x128xf32>
    %25 = arith.addf %23, %24 : vector<16x128xf32>
    %26 = arith.negf %25 : vector<16x128xf32>
    %27 = math.exp %26 : vector<16x128xf32>
    %cst_22 = arith.constant 1.000000e+00 : f32
    %28 = vector.broadcast %cst_22 : f32 to vector<16x128xf32>
    %29 = arith.addf %28, %27 : vector<16x128xf32>
    %30 = arith.divf %28, %29 : vector<16x128xf32>
    %31 = vector.extract_strided_slice %19 {offsets = [0, 128], sizes = [16, 128], strides = [1, 1]} : vector<16x384xf32> to vector<16x128xf32>
    %32 = vector.extract_strided_slice %22 {offsets = [0, 128], sizes = [16, 128], strides = [1, 1]} : vector<16x384xf32> to vector<16x128xf32>
    %33 = arith.addf %31, %32 : vector<16x128xf32>
    %34 = arith.negf %33 : vector<16x128xf32>
    %35 = math.exp %34 : vector<16x128xf32>
    %cst_23 = arith.constant 1.000000e+00 : f32
    %36 = vector.broadcast %cst_23 : f32 to vector<16x128xf32>
    %37 = arith.addf %36, %35 : vector<16x128xf32>
    %38 = arith.divf %36, %37 : vector<16x128xf32>
    %39 = vector.extract_strided_slice %19 {offsets = [0, 256], sizes = [16, 128], strides = [1, 1]} : vector<16x384xf32> to vector<16x128xf32>
    %40 = vector.extract_strided_slice %22 {offsets = [0, 256], sizes = [16, 128], strides = [1, 1]} : vector<16x384xf32> to vector<16x128xf32>
    %41 = vector.broadcast %4 : vector<1x128xf32> to vector<16x128xf32>
    %42 = arith.addf %40, %41 : vector<16x128xf32>
    %43 = arith.mulf %30, %42 : vector<16x128xf32>
    %44 = arith.addf %39, %43 : vector<16x128xf32>
    %45 = math.tanh %44 : vector<16x128xf32>
    %cst_24 = arith.constant 1.000000e+00 : f32
    %46 = vector.broadcast %cst_24 : f32 to vector<16x128xf32>
    %47 = arith.subf %46, %38 : vector<16x128xf32>
    %48 = arith.mulf %47, %45 : vector<16x128xf32>
    %49 = arith.mulf %38, %17 : vector<16x128xf32>
    %50 = arith.addf %48, %49 : vector<16x128xf32>
    %c0_i32_25 = arith.constant 0 : i32
    %51 = vector.broadcast %c0_i32_25 : i32 to vector<16x1xi32>
    %52 = arith.cmpi sgt, %7, %51 : vector<16x1xi32>
    %cst_26 = arith.constant 0.000000e+00 : f32
    %53 = vector.shape_cast %52 : vector<16x1xi1> to vector<16x1xi1>
    %54 = vector.broadcast %53 : vector<16x1xi1> to vector<16x128xi1>
    %55 = vector.broadcast %cst_26 : f32 to vector<16x128xf32>
    %56 = arith.select %54, %50, %55 : vector<16x128xi1>, vector<16x128xf32>
    %57 = arith.truncf %56 : vector<16x128xf32> to vector<16x128xbf16>
    %c0_27 = arith.constant 0 : index
    %c0_28 = arith.constant 0 : index
    %c0_29 = arith.constant 0 : index
    %58 = vector.load %arg8[%c0_27, %c0_28, %c0_29] : memref<16x16x128xbf16, #tpu.memory_space<vmem>>, vector<1x16x128xbf16>
    %59 = vector.shape_cast %58 : vector<1x16x128xbf16> to vector<16x128xbf16>
    %60 = vector.shape_cast %57 : vector<16x128xbf16> to vector<1x16x128xbf16>
    tpu.vector_store %arg8[%c0_27, %c0_28, %c0_29], %60 {strides = array<i32>} : memref<16x16x128xbf16, #tpu.memory_space<vmem>>, vector<1x16x128xbf16>,
    %61 = vector.shape_cast %52 : vector<16x1xi1> to vector<16x1xi1>
    %62 = vector.broadcast %61 : vector<16x1xi1> to vector<16x128xi1>
    %63 = arith.select %62, %50, %17 : vector<16x128xi1>, vector<16x128xf32>
    %c1 = arith.constant 1 : index
    %c0_30 = arith.constant 0 : index
    %c0_31 = arith.constant 0 : index
    %64 = vector.load %arg11[%c1, %c0_30, %c0_31] : memref<16x16x384xf32, #tpu.memory_space<vmem>>, vector<1x16x384xf32>
    %65 = vector.shape_cast %64 : vector<1x16x384xf32> to vector<16x384xf32>
    %66 = arith.truncf %63 : vector<16x128xf32> to vector<16x128xbf16>
    %c0_32 = arith.constant 0 : index
    %c0_33 = arith.constant 0 : index
    %67 = vector.load %arg7[%c0_32, %c0_33] : memref<128x384xbf16, #tpu.memory_space<vmem>>, vector<128x384xbf16>
    %cst_34 = arith.constant dense<0.000000e+00> : vector<16x384xf32>
    %68 = tpu.matmul %66, %67, %cst_34 {dimension_numbers = #tpu.dot_dimension_numbers<[1], [0], [0], [1], [0, 0, 1, 1], [], []>} : vector<16x128xbf16>, vector<128x384xbf16>, vector<16x384xf32> -> vector<16x384xf32>
    %69 = vector.extract_strided_slice %65 {offsets = [0, 0], sizes = [16, 128], strides = [1, 1]} : vector<16x384xf32> to vector<16x128xf32>
    %70 = vector.extract_strided_slice %68 {offsets = [0, 0], sizes = [16, 128], strides = [1, 1]} : vector<16x384xf32> to vector<16x128xf32>
    %71 = arith.addf %69, %70 : vector<16x128xf32>
    %72 = arith.negf %71 : vector<16x128xf32>
    %73 = math.exp %72 : vector<16x128xf32>
    %cst_35 = arith.constant 1.000000e+00 : f32
    %74 = vector.broadcast %cst_35 : f32 to vector<16x128xf32>
    %75 = arith.addf %74, %73 : vector<16x128xf32>
    %76 = arith.divf %74, %75 : vector<16x128xf32>
    %77 = vector.extract_strided_slice %65 {offsets = [0, 128], sizes = [16, 128], strides = [1, 1]} : vector<16x384xf32> to vector<16x128xf32>
    %78 = vector.extract_strided_slice %68 {offsets = [0, 128], sizes = [16, 128], strides = [1, 1]} : vector<16x384xf32> to vector<16x128xf32>
    %79 = arith.addf %77, %78 : vector<16x128xf32>
    %80 = arith.negf %79 : vector<16x128xf32>
    %81 = math.exp %80 : vector<16x128xf32>
    %cst_36 = arith.constant 1.000000e+00 : f32
    %82 = vector.broadcast %cst_36 : f32 to vector<16x128xf32>
    %83 = arith.addf %82, %81 : vector<16x128xf32>
    %84 = arith.divf %82, %83 : vector<16x128xf32>
    %85 = vector.extract_strided_slice %65 {offsets = [0, 256], sizes = [16, 128], strides = [1, 1]} : vector<16x384xf32> to vector<16x128xf32>
    %86 = vector.extract_strided_slice %68 {offsets = [0, 256], sizes = [16, 128], strides = [1, 1]} : vector<16x384xf32> to vector<16x128xf32>
    %87 = vector.broadcast %4 : vector<1x128xf32> to vector<16x128xf32>
    %88 = arith.addf %86, %87 : vector<16x128xf32>
    %89 = arith.mulf %76, %88 : vector<16x128xf32>
    %90 = arith.addf %85, %89 : vector<16x128xf32>
    %91 = math.tanh %90 : vector<16x128xf32>
    %cst_37 = arith.constant 1.000000e+00 : f32
    %92 = vector.broadcast %cst_37 : f32 to vector<16x128xf32>
    %93 = arith.subf %92, %84 : vector<16x128xf32>
    %94 = arith.mulf %93, %91 : vector<16x128xf32>
    %95 = arith.mulf %84, %63 : vector<16x128xf32>
    %96 = arith.addf %94, %95 : vector<16x128xf32>
    %c1_i32 = arith.constant 1 : i32
    %97 = vector.broadcast %c1_i32 : i32 to vector<16x1xi32>
    %98 = arith.cmpi sgt, %7, %97 : vector<16x1xi32>
    %cst_38 = arith.constant 0.000000e+00 : f32
    %99 = vector.shape_cast %98 : vector<16x1xi1> to vector<16x1xi1>
    %100 = vector.broadcast %99 : vector<16x1xi1> to vector<16x128xi1>
    %101 = vector.broadcast %cst_38 : f32 to vector<16x128xf32>
    %102 = arith.select %100, %96, %101 : vector<16x128xi1>, vector<16x128xf32>
    %103 = arith.truncf %102 : vector<16x128xf32> to vector<16x128xbf16>
    %c1_39 = arith.constant 1 : index
    %c0_40 = arith.constant 0 : index
    %c0_41 = arith.constant 0 : index
    %104 = vector.load %arg8[%c1_39, %c0_40, %c0_41] : memref<16x16x128xbf16, #tpu.memory_space<vmem>>, vector<1x16x128xbf16>
    %105 = vector.shape_cast %104 : vector<1x16x128xbf16> to vector<16x128xbf16>
    %106 = vector.shape_cast %103 : vector<16x128xbf16> to vector<1x16x128xbf16>
    tpu.vector_store %arg8[%c1_39, %c0_40, %c0_41], %106 {strides = array<i32>} : memref<16x16x128xbf16, #tpu.memory_space<vmem>>, vector<1x16x128xbf16>,
    %107 = vector.shape_cast %98 : vector<16x1xi1> to vector<16x1xi1>
    %108 = vector.broadcast %107 : vector<16x1xi1> to vector<16x128xi1>
    %109 = arith.select %108, %96, %63 : vector<16x128xi1>, vector<16x128xf32>
    %c2 = arith.constant 2 : index
    %c0_42 = arith.constant 0 : index
    %c0_43 = arith.constant 0 : index
    %110 = vector.load %arg11[%c2, %c0_42, %c0_43] : memref<16x16x384xf32, #tpu.memory_space<vmem>>, vector<1x16x384xf32>
    %111 = vector.shape_cast %110 : vector<1x16x384xf32> to vector<16x384xf32>
    %112 = arith.truncf %109 : vector<16x128xf32> to vector<16x128xbf16>
    %c0_44 = arith.constant 0 : index
    %c0_45 = arith.constant 0 : index
    %113 = vector.load %arg7[%c0_44, %c0_45] : memref<128x384xbf16, #tpu.memory_space<vmem>>, vector<128x384xbf16>
    %cst_46 = arith.constant dense<0.000000e+00> : vector<16x384xf32>
    %114 = tpu.matmul %112, %113, %cst_46 {dimension_numbers = #tpu.dot_dimension_numbers<[1], [0], [0], [1], [0, 0, 1, 1], [], []>} : vector<16x128xbf16>, vector<128x384xbf16>, vector<16x384xf32> -> vector<16x384xf32>
    %115 = vector.extract_strided_slice %111 {offsets = [0, 0], sizes = [16, 128], strides = [1, 1]} : vector<16x384xf32> to vector<16x128xf32>
    %116 = vector.extract_strided_slice %114 {offsets = [0, 0], sizes = [16, 128], strides = [1, 1]} : vector<16x384xf32> to vector<16x128xf32>
    %117 = arith.addf %115, %116 : vector<16x128xf32>
    %118 = arith.negf %117 : vector<16x128xf32>
    %119 = math.exp %118 : vector<16x128xf32>
    %cst_47 = arith.constant 1.000000e+00 : f32
    %120 = vector.broadcast %cst_47 : f32 to vector<16x128xf32>
    %121 = arith.addf %120, %119 : vector<16x128xf32>
    %122 = arith.divf %120, %121 : vector<16x128xf32>
    %123 = vector.extract_strided_slice %111 {offsets = [0, 128], sizes = [16, 128], strides = [1, 1]} : vector<16x384xf32> to vector<16x128xf32>
    %124 = vector.extract_strided_slice %114 {offsets = [0, 128], sizes = [16, 128], strides = [1, 1]} : vector<16x384xf32> to vector<16x128xf32>
    %125 = arith.addf %123, %124 : vector<16x128xf32>
    %126 = arith.negf %125 : vector<16x128xf32>
    %127 = math.exp %126 : vector<16x128xf32>
    %cst_48 = arith.constant 1.000000e+00 : f32
    %128 = vector.broadcast %cst_48 : f32 to vector<16x128xf32>
    %129 = arith.addf %128, %127 : vector<16x128xf32>
    %130 = arith.divf %128, %129 : vector<16x128xf32>
    %131 = vector.extract_strided_slice %111 {offsets = [0, 256], sizes = [16, 128], strides = [1, 1]} : vector<16x384xf32> to vector<16x128xf32>
    %132 = vector.extract_strided_slice %114 {offsets = [0, 256], sizes = [16, 128], strides = [1, 1]} : vector<16x384xf32> to vector<16x128xf32>
    %133 = vector.broadcast %4 : vector<1x128xf32> to vector<16x128xf32>
    %134 = arith.addf %132, %133 : vector<16x128xf32>
    %135 = arith.mulf %122, %134 : vector<16x128xf32>
    %136 = arith.addf %131, %135 : vector<16x128xf32>
    %137 = math.tanh %136 : vector<16x128xf32>
    %cst_49 = arith.constant 1.000000e+00 : f32
    %138 = vector.broadcast %cst_49 : f32 to vector<16x128xf32>
    %139 = arith.subf %138, %130 : vector<16x128xf32>
    %140 = arith.mulf %139, %137 : vector<16x128xf32>
    %141 = arith.mulf %130, %109 : vector<16x128xf32>
    %142 = arith.addf %140, %141 : vector<16x128xf32>
    %c2_i32 = arith.constant 2 : i32
    %143 = vector.broadcast %c2_i32 : i32 to vector<16x1xi32>
    %144 = arith.cmpi sgt, %7, %143 : vector<16x1xi32>
    %cst_50 = arith.constant 0.000000e+00 : f32
    %145 = vector.shape_cast %144 : vector<16x1xi1> to vector<16x1xi1>
    %146 = vector.broadcast %145 : vector<16x1xi1> to vector<16x128xi1>
    %147 = vector.broadcast %cst_50 : f32 to vector<16x128xf32>
    %148 = arith.select %146, %142, %147 : vector<16x128xi1>, vector<16x128xf32>
    %149 = arith.truncf %148 : vector<16x128xf32> to vector<16x128xbf16>
    %c2_51 = arith.constant 2 : index
    %c0_52 = arith.constant 0 : index
    %c0_53 = arith.constant 0 : index
    %150 = vector.load %arg8[%c2_51, %c0_52, %c0_53] : memref<16x16x128xbf16, #tpu.memory_space<vmem>>, vector<1x16x128xbf16>
    %151 = vector.shape_cast %150 : vector<1x16x128xbf16> to vector<16x128xbf16>
    %152 = vector.shape_cast %149 : vector<16x128xbf16> to vector<1x16x128xbf16>
    tpu.vector_store %arg8[%c2_51, %c0_52, %c0_53], %152 {strides = array<i32>} : memref<16x16x128xbf16, #tpu.memory_space<vmem>>, vector<1x16x128xbf16>,
    %153 = vector.shape_cast %144 : vector<16x1xi1> to vector<16x1xi1>
    %154 = vector.broadcast %153 : vector<16x1xi1> to vector<16x128xi1>
    %155 = arith.select %154, %142, %109 : vector<16x128xi1>, vector<16x128xf32>
    %c3 = arith.constant 3 : index
    %c0_54 = arith.constant 0 : index
    %c0_55 = arith.constant 0 : index
    %156 = vector.load %arg11[%c3, %c0_54, %c0_55] : memref<16x16x384xf32, #tpu.memory_space<vmem>>, vector<1x16x384xf32>
    %157 = vector.shape_cast %156 : vector<1x16x384xf32> to vector<16x384xf32>
    %158 = arith.truncf %155 : vector<16x128xf32> to vector<16x128xbf16>
    %c0_56 = arith.constant 0 : index
    %c0_57 = arith.constant 0 : index
    %159 = vector.load %arg7[%c0_56, %c0_57] : memref<128x384xbf16, #tpu.memory_space<vmem>>, vector<128x384xbf16>
    %cst_58 = arith.constant dense<0.000000e+00> : vector<16x384xf32>
    %160 = tpu.matmul %158, %159, %cst_58 {dimension_numbers = #tpu.dot_dimension_numbers<[1], [0], [0], [1], [0, 0, 1, 1], [], []>} : vector<16x128xbf16>, vector<128x384xbf16>, vector<16x384xf32> -> vector<16x384xf32>
    %161 = vector.extract_strided_slice %157 {offsets = [0, 0], sizes = [16, 128], strides = [1, 1]} : vector<16x384xf32> to vector<16x128xf32>
    %162 = vector.extract_strided_slice %160 {offsets = [0, 0], sizes = [16, 128], strides = [1, 1]} : vector<16x384xf32> to vector<16x128xf32>
    %163 = arith.addf %161, %162 : vector<16x128xf32>
    %164 = arith.negf %163 : vector<16x128xf32>
    %165 = math.exp %164 : vector<16x128xf32>
    %cst_59 = arith.constant 1.000000e+00 : f32
    %166 = vector.broadcast %cst_59 : f32 to vector<16x128xf32>
    %167 = arith.addf %166, %165 : vector<16x128xf32>
    %168 = arith.divf %166, %167 : vector<16x128xf32>
    %169 = vector.extract_strided_slice %157 {offsets = [0, 128], sizes = [16, 128], strides = [1, 1]} : vector<16x384xf32> to vector<16x128xf32>
    %170 = vector.extract_strided_slice %160 {offsets = [0, 128], sizes = [16, 128], strides = [1, 1]} : vector<16x384xf32> to vector<16x128xf32>
    %171 = arith.addf %169, %170 : vector<16x128xf32>
    %172 = arith.negf %171 : vector<16x128xf32>
    %173 = math.exp %172 : vector<16x128xf32>
    %cst_60 = arith.constant 1.000000e+00 : f32
    %174 = vector.broadcast %cst_60 : f32 to vector<16x128xf32>
    %175 = arith.addf %174, %173 : vector<16x128xf32>
    %176 = arith.divf %174, %175 : vector<16x128xf32>
    %177 = vector.extract_strided_slice %157 {offsets = [0, 256], sizes = [16, 128], strides = [1, 1]} : vector<16x384xf32> to vector<16x128xf32>
    %178 = vector.extract_strided_slice %160 {offsets = [0, 256], sizes = [16, 128], strides = [1, 1]} : vector<16x384xf32> to vector<16x128xf32>
    %179 = vector.broadcast %4 : vector<1x128xf32> to vector<16x128xf32>
    %180 = arith.addf %178, %179 : vector<16x128xf32>
    %181 = arith.mulf %168, %180 : vector<16x128xf32>
    %182 = arith.addf %177, %181 : vector<16x128xf32>
    %183 = math.tanh %182 : vector<16x128xf32>
    %cst_61 = arith.constant 1.000000e+00 : f32
    %184 = vector.broadcast %cst_61 : f32 to vector<16x128xf32>
    %185 = arith.subf %184, %176 : vector<16x128xf32>
    %186 = arith.mulf %185, %183 : vector<16x128xf32>
    %187 = arith.mulf %176, %155 : vector<16x128xf32>
    %188 = arith.addf %186, %187 : vector<16x128xf32>
    %c3_i32 = arith.constant 3 : i32
    %189 = vector.broadcast %c3_i32 : i32 to vector<16x1xi32>
    %190 = arith.cmpi sgt, %7, %189 : vector<16x1xi32>
    %cst_62 = arith.constant 0.000000e+00 : f32
    %191 = vector.shape_cast %190 : vector<16x1xi1> to vector<16x1xi1>
    %192 = vector.broadcast %191 : vector<16x1xi1> to vector<16x128xi1>
    %193 = vector.broadcast %cst_62 : f32 to vector<16x128xf32>
    %194 = arith.select %192, %188, %193 : vector<16x128xi1>, vector<16x128xf32>
    %195 = arith.truncf %194 : vector<16x128xf32> to vector<16x128xbf16>
    %c3_63 = arith.constant 3 : index
    %c0_64 = arith.constant 0 : index
    %c0_65 = arith.constant 0 : index
    %196 = vector.load %arg8[%c3_63, %c0_64, %c0_65] : memref<16x16x128xbf16, #tpu.memory_space<vmem>>, vector<1x16x128xbf16>
    %197 = vector.shape_cast %196 : vector<1x16x128xbf16> to vector<16x128xbf16>
    %198 = vector.shape_cast %195 : vector<16x128xbf16> to vector<1x16x128xbf16>
    tpu.vector_store %arg8[%c3_63, %c0_64, %c0_65], %198 {strides = array<i32>} : memref<16x16x128xbf16, #tpu.memory_space<vmem>>, vector<1x16x128xbf16>,
    %199 = vector.shape_cast %190 : vector<16x1xi1> to vector<16x1xi1>
    %200 = vector.broadcast %199 : vector<16x1xi1> to vector<16x128xi1>
    %201 = arith.select %200, %188, %155 : vector<16x128xi1>, vector<16x128xf32>
    %c4 = arith.constant 4 : index
    %c0_66 = arith.constant 0 : index
    %c0_67 = arith.constant 0 : index
    %202 = vector.load %arg11[%c4, %c0_66, %c0_67] : memref<16x16x384xf32, #tpu.memory_space<vmem>>, vector<1x16x384xf32>
    %203 = vector.shape_cast %202 : vector<1x16x384xf32> to vector<16x384xf32>
    %204 = arith.truncf %201 : vector<16x128xf32> to vector<16x128xbf16>
    %c0_68 = arith.constant 0 : index
    %c0_69 = arith.constant 0 : index
    %205 = vector.load %arg7[%c0_68, %c0_69] : memref<128x384xbf16, #tpu.memory_space<vmem>>, vector<128x384xbf16>
    %cst_70 = arith.constant dense<0.000000e+00> : vector<16x384xf32>
    %206 = tpu.matmul %204, %205, %cst_70 {dimension_numbers = #tpu.dot_dimension_numbers<[1], [0], [0], [1], [0, 0, 1, 1], [], []>} : vector<16x128xbf16>, vector<128x384xbf16>, vector<16x384xf32> -> vector<16x384xf32>
    %207 = vector.extract_strided_slice %203 {offsets = [0, 0], sizes = [16, 128], strides = [1, 1]} : vector<16x384xf32> to vector<16x128xf32>
    %208 = vector.extract_strided_slice %206 {offsets = [0, 0], sizes = [16, 128], strides = [1, 1]} : vector<16x384xf32> to vector<16x128xf32>
    %209 = arith.addf %207, %208 : vector<16x128xf32>
    %210 = arith.negf %209 : vector<16x128xf32>
    %211 = math.exp %210 : vector<16x128xf32>
    %cst_71 = arith.constant 1.000000e+00 : f32
    %212 = vector.broadcast %cst_71 : f32 to vector<16x128xf32>
    %213 = arith.addf %212, %211 : vector<16x128xf32>
    %214 = arith.divf %212, %213 : vector<16x128xf32>
    %215 = vector.extract_strided_slice %203 {offsets = [0, 128], sizes = [16, 128], strides = [1, 1]} : vector<16x384xf32> to vector<16x128xf32>
    %216 = vector.extract_strided_slice %206 {offsets = [0, 128], sizes = [16, 128], strides = [1, 1]} : vector<16x384xf32> to vector<16x128xf32>
    %217 = arith.addf %215, %216 : vector<16x128xf32>
    %218 = arith.negf %217 : vector<16x128xf32>
    %219 = math.exp %218 : vector<16x128xf32>
    %cst_72 = arith.constant 1.000000e+00 : f32
    %220 = vector.broadcast %cst_72 : f32 to vector<16x128xf32>
    %221 = arith.addf %220, %219 : vector<16x128xf32>
    %222 = arith.divf %220, %221 : vector<16x128xf32>
    %223 = vector.extract_strided_slice %203 {offsets = [0, 256], sizes = [16, 128], strides = [1, 1]} : vector<16x384xf32> to vector<16x128xf32>
    %224 = vector.extract_strided_slice %206 {offsets = [0, 256], sizes = [16, 128], strides = [1, 1]} : vector<16x384xf32> to vector<16x128xf32>
    %225 = vector.broadcast %4 : vector<1x128xf32> to vector<16x128xf32>
    %226 = arith.addf %224, %225 : vector<16x128xf32>
    %227 = arith.mulf %214, %226 : vector<16x128xf32>
    %228 = arith.addf %223, %227 : vector<16x128xf32>
    %229 = math.tanh %228 : vector<16x128xf32>
    %cst_73 = arith.constant 1.000000e+00 : f32
    %230 = vector.broadcast %cst_73 : f32 to vector<16x128xf32>
    %231 = arith.subf %230, %222 : vector<16x128xf32>
    %232 = arith.mulf %231, %229 : vector<16x128xf32>
    %233 = arith.mulf %222, %201 : vector<16x128xf32>
    %234 = arith.addf %232, %233 : vector<16x128xf32>
    %c4_i32 = arith.constant 4 : i32
    %235 = vector.broadcast %c4_i32 : i32 to vector<16x1xi32>
    %236 = arith.cmpi sgt, %7, %235 : vector<16x1xi32>
    %cst_74 = arith.constant 0.000000e+00 : f32
    %237 = vector.shape_cast %236 : vector<16x1xi1> to vector<16x1xi1>
    %238 = vector.broadcast %237 : vector<16x1xi1> to vector<16x128xi1>
    %239 = vector.broadcast %cst_74 : f32 to vector<16x128xf32>
    %240 = arith.select %238, %234, %239 : vector<16x128xi1>, vector<16x128xf32>
    %241 = arith.truncf %240 : vector<16x128xf32> to vector<16x128xbf16>
    %c4_75 = arith.constant 4 : index
    %c0_76 = arith.constant 0 : index
    %c0_77 = arith.constant 0 : index
    %242 = vector.load %arg8[%c4_75, %c0_76, %c0_77] : memref<16x16x128xbf16, #tpu.memory_space<vmem>>, vector<1x16x128xbf16>
    %243 = vector.shape_cast %242 : vector<1x16x128xbf16> to vector<16x128xbf16>
    %244 = vector.shape_cast %241 : vector<16x128xbf16> to vector<1x16x128xbf16>
    tpu.vector_store %arg8[%c4_75, %c0_76, %c0_77], %244 {strides = array<i32>} : memref<16x16x128xbf16, #tpu.memory_space<vmem>>, vector<1x16x128xbf16>,
    %245 = vector.shape_cast %236 : vector<16x1xi1> to vector<16x1xi1>
    %246 = vector.broadcast %245 : vector<16x1xi1> to vector<16x128xi1>
    %247 = arith.select %246, %234, %201 : vector<16x128xi1>, vector<16x128xf32>
    %c5 = arith.constant 5 : index
    %c0_78 = arith.constant 0 : index
    %c0_79 = arith.constant 0 : index
    %248 = vector.load %arg11[%c5, %c0_78, %c0_79] : memref<16x16x384xf32, #tpu.memory_space<vmem>>, vector<1x16x384xf32>
    %249 = vector.shape_cast %248 : vector<1x16x384xf32> to vector<16x384xf32>
    %250 = arith.truncf %247 : vector<16x128xf32> to vector<16x128xbf16>
    %c0_80 = arith.constant 0 : index
    %c0_81 = arith.constant 0 : index
    %251 = vector.load %arg7[%c0_80, %c0_81] : memref<128x384xbf16, #tpu.memory_space<vmem>>, vector<128x384xbf16>
    %cst_82 = arith.constant dense<0.000000e+00> : vector<16x384xf32>
    %252 = tpu.matmul %250, %251, %cst_82 {dimension_numbers = #tpu.dot_dimension_numbers<[1], [0], [0], [1], [0, 0, 1, 1], [], []>} : vector<16x128xbf16>, vector<128x384xbf16>, vector<16x384xf32> -> vector<16x384xf32>
    %253 = vector.extract_strided_slice %249 {offsets = [0, 0], sizes = [16, 128], strides = [1, 1]} : vector<16x384xf32> to vector<16x128xf32>
    %254 = vector.extract_strided_slice %252 {offsets = [0, 0], sizes = [16, 128], strides = [1, 1]} : vector<16x384xf32> to vector<16x128xf32>
    %255 = arith.addf %253, %254 : vector<16x128xf32>
    %256 = arith.negf %255 : vector<16x128xf32>
    %257 = math.exp %256 : vector<16x128xf32>
    %cst_83 = arith.constant 1.000000e+00 : f32
    %258 = vector.broadcast %cst_83 : f32 to vector<16x128xf32>
    %259 = arith.addf %258, %257 : vector<16x128xf32>
    %260 = arith.divf %258, %259 : vector<16x128xf32>
    %261 = vector.extract_strided_slice %249 {offsets = [0, 128], sizes = [16, 128], strides = [1, 1]} : vector<16x384xf32> to vector<16x128xf32>
    %262 = vector.extract_strided_slice %252 {offsets = [0, 128], sizes = [16, 128], strides = [1, 1]} : vector<16x384xf32> to vector<16x128xf32>
    %263 = arith.addf %261, %262 : vector<16x128xf32>
    %264 = arith.negf %263 : vector<16x128xf32>
    %265 = math.exp %264 : vector<16x128xf32>
    %cst_84 = arith.constant 1.000000e+00 : f32
    %266 = vector.broadcast %cst_84 : f32 to vector<16x128xf32>
    %267 = arith.addf %266, %265 : vector<16x128xf32>
    %268 = arith.divf %266, %267 : vector<16x128xf32>
    %269 = vector.extract_strided_slice %249 {offsets = [0, 256], sizes = [16, 128], strides = [1, 1]} : vector<16x384xf32> to vector<16x128xf32>
    %270 = vector.extract_strided_slice %252 {offsets = [0, 256], sizes = [16, 128], strides = [1, 1]} : vector<16x384xf32> to vector<16x128xf32>
    %271 = vector.broadcast %4 : vector<1x128xf32> to vector<16x128xf32>
    %272 = arith.addf %270, %271 : vector<16x128xf32>
    %273 = arith.mulf %260, %272 : vector<16x128xf32>
    %274 = arith.addf %269, %273 : vector<16x128xf32>
    %275 = math.tanh %274 : vector<16x128xf32>
    %cst_85 = arith.constant 1.000000e+00 : f32
    %276 = vector.broadcast %cst_85 : f32 to vector<16x128xf32>
    %277 = arith.subf %276, %268 : vector<16x128xf32>
    %278 = arith.mulf %277, %275 : vector<16x128xf32>
    %279 = arith.mulf %268, %247 : vector<16x128xf32>
    %280 = arith.addf %278, %279 : vector<16x128xf32>
    %c5_i32 = arith.constant 5 : i32
    %281 = vector.broadcast %c5_i32 : i32 to vector<16x1xi32>
    %282 = arith.cmpi sgt, %7, %281 : vector<16x1xi32>
    %cst_86 = arith.constant 0.000000e+00 : f32
    %283 = vector.shape_cast %282 : vector<16x1xi1> to vector<16x1xi1>
    %284 = vector.broadcast %283 : vector<16x1xi1> to vector<16x128xi1>
    %285 = vector.broadcast %cst_86 : f32 to vector<16x128xf32>
    %286 = arith.select %284, %280, %285 : vector<16x128xi1>, vector<16x128xf32>
    %287 = arith.truncf %286 : vector<16x128xf32> to vector<16x128xbf16>
    %c5_87 = arith.constant 5 : index
    %c0_88 = arith.constant 0 : index
    %c0_89 = arith.constant 0 : index
    %288 = vector.load %arg8[%c5_87, %c0_88, %c0_89] : memref<16x16x128xbf16, #tpu.memory_space<vmem>>, vector<1x16x128xbf16>
    %289 = vector.shape_cast %288 : vector<1x16x128xbf16> to vector<16x128xbf16>
    %290 = vector.shape_cast %287 : vector<16x128xbf16> to vector<1x16x128xbf16>
    tpu.vector_store %arg8[%c5_87, %c0_88, %c0_89], %290 {strides = array<i32>} : memref<16x16x128xbf16, #tpu.memory_space<vmem>>, vector<1x16x128xbf16>,
    %291 = vector.shape_cast %282 : vector<16x1xi1> to vector<16x1xi1>
    %292 = vector.broadcast %291 : vector<16x1xi1> to vector<16x128xi1>
    %293 = arith.select %292, %280, %247 : vector<16x128xi1>, vector<16x128xf32>
    %c6 = arith.constant 6 : index
    %c0_90 = arith.constant 0 : index
    %c0_91 = arith.constant 0 : index
    %294 = vector.load %arg11[%c6, %c0_90, %c0_91] : memref<16x16x384xf32, #tpu.memory_space<vmem>>, vector<1x16x384xf32>
    %295 = vector.shape_cast %294 : vector<1x16x384xf32> to vector<16x384xf32>
    %296 = arith.truncf %293 : vector<16x128xf32> to vector<16x128xbf16>
    %c0_92 = arith.constant 0 : index
    %c0_93 = arith.constant 0 : index
    %297 = vector.load %arg7[%c0_92, %c0_93] : memref<128x384xbf16, #tpu.memory_space<vmem>>, vector<128x384xbf16>
    %cst_94 = arith.constant dense<0.000000e+00> : vector<16x384xf32>
    %298 = tpu.matmul %296, %297, %cst_94 {dimension_numbers = #tpu.dot_dimension_numbers<[1], [0], [0], [1], [0, 0, 1, 1], [], []>} : vector<16x128xbf16>, vector<128x384xbf16>, vector<16x384xf32> -> vector<16x384xf32>
    %299 = vector.extract_strided_slice %295 {offsets = [0, 0], sizes = [16, 128], strides = [1, 1]} : vector<16x384xf32> to vector<16x128xf32>
    %300 = vector.extract_strided_slice %298 {offsets = [0, 0], sizes = [16, 128], strides = [1, 1]} : vector<16x384xf32> to vector<16x128xf32>
    %301 = arith.addf %299, %300 : vector<16x128xf32>
    %302 = arith.negf %301 : vector<16x128xf32>
    %303 = math.exp %302 : vector<16x128xf32>
    %cst_95 = arith.constant 1.000000e+00 : f32
    %304 = vector.broadcast %cst_95 : f32 to vector<16x128xf32>
    %305 = arith.addf %304, %303 : vector<16x128xf32>
    %306 = arith.divf %304, %305 : vector<16x128xf32>
    %307 = vector.extract_strided_slice %295 {offsets = [0, 128], sizes = [16, 128], strides = [1, 1]} : vector<16x384xf32> to vector<16x128xf32>
    %308 = vector.extract_strided_slice %298 {offsets = [0, 128], sizes = [16, 128], strides = [1, 1]} : vector<16x384xf32> to vector<16x128xf32>
    %309 = arith.addf %307, %308 : vector<16x128xf32>
    %310 = arith.negf %309 : vector<16x128xf32>
    %311 = math.exp %310 : vector<16x128xf32>
    %cst_96 = arith.constant 1.000000e+00 : f32
    %312 = vector.broadcast %cst_96 : f32 to vector<16x128xf32>
    %313 = arith.addf %312, %311 : vector<16x128xf32>
    %314 = arith.divf %312, %313 : vector<16x128xf32>
    %315 = vector.extract_strided_slice %295 {offsets = [0, 256], sizes = [16, 128], strides = [1, 1]} : vector<16x384xf32> to vector<16x128xf32>
    %316 = vector.extract_strided_slice %298 {offsets = [0, 256], sizes = [16, 128], strides = [1, 1]} : vector<16x384xf32> to vector<16x128xf32>
    %317 = vector.broadcast %4 : vector<1x128xf32> to vector<16x128xf32>
    %318 = arith.addf %316, %317 : vector<16x128xf32>
    %319 = arith.mulf %306, %318 : vector<16x128xf32>
    %320 = arith.addf %315, %319 : vector<16x128xf32>
    %321 = math.tanh %320 : vector<16x128xf32>
    %cst_97 = arith.constant 1.000000e+00 : f32
    %322 = vector.broadcast %cst_97 : f32 to vector<16x128xf32>
    %323 = arith.subf %322, %314 : vector<16x128xf32>
    %324 = arith.mulf %323, %321 : vector<16x128xf32>
    %325 = arith.mulf %314, %293 : vector<16x128xf32>
    %326 = arith.addf %324, %325 : vector<16x128xf32>
    %c6_i32 = arith.constant 6 : i32
    %327 = vector.broadcast %c6_i32 : i32 to vector<16x1xi32>
    %328 = arith.cmpi sgt, %7, %327 : vector<16x1xi32>
    %cst_98 = arith.constant 0.000000e+00 : f32
    %329 = vector.shape_cast %328 : vector<16x1xi1> to vector<16x1xi1>
    %330 = vector.broadcast %329 : vector<16x1xi1> to vector<16x128xi1>
    %331 = vector.broadcast %cst_98 : f32 to vector<16x128xf32>
    %332 = arith.select %330, %326, %331 : vector<16x128xi1>, vector<16x128xf32>
    %333 = arith.truncf %332 : vector<16x128xf32> to vector<16x128xbf16>
    %c6_99 = arith.constant 6 : index
    %c0_100 = arith.constant 0 : index
    %c0_101 = arith.constant 0 : index
    %334 = vector.load %arg8[%c6_99, %c0_100, %c0_101] : memref<16x16x128xbf16, #tpu.memory_space<vmem>>, vector<1x16x128xbf16>
    %335 = vector.shape_cast %334 : vector<1x16x128xbf16> to vector<16x128xbf16>
    %336 = vector.shape_cast %333 : vector<16x128xbf16> to vector<1x16x128xbf16>
    tpu.vector_store %arg8[%c6_99, %c0_100, %c0_101], %336 {strides = array<i32>} : memref<16x16x128xbf16, #tpu.memory_space<vmem>>, vector<1x16x128xbf16>,
    %337 = vector.shape_cast %328 : vector<16x1xi1> to vector<16x1xi1>
    %338 = vector.broadcast %337 : vector<16x1xi1> to vector<16x128xi1>
    %339 = arith.select %338, %326, %293 : vector<16x128xi1>, vector<16x128xf32>
    %c7 = arith.constant 7 : index
    %c0_102 = arith.constant 0 : index
    %c0_103 = arith.constant 0 : index
    %340 = vector.load %arg11[%c7, %c0_102, %c0_103] : memref<16x16x384xf32, #tpu.memory_space<vmem>>, vector<1x16x384xf32>
    %341 = vector.shape_cast %340 : vector<1x16x384xf32> to vector<16x384xf32>
    %342 = arith.truncf %339 : vector<16x128xf32> to vector<16x128xbf16>
    %c0_104 = arith.constant 0 : index
    %c0_105 = arith.constant 0 : index
    %343 = vector.load %arg7[%c0_104, %c0_105] : memref<128x384xbf16, #tpu.memory_space<vmem>>, vector<128x384xbf16>
    %cst_106 = arith.constant dense<0.000000e+00> : vector<16x384xf32>
    %344 = tpu.matmul %342, %343, %cst_106 {dimension_numbers = #tpu.dot_dimension_numbers<[1], [0], [0], [1], [0, 0, 1, 1], [], []>} : vector<16x128xbf16>, vector<128x384xbf16>, vector<16x384xf32> -> vector<16x384xf32>
    %345 = vector.extract_strided_slice %341 {offsets = [0, 0], sizes = [16, 128], strides = [1, 1]} : vector<16x384xf32> to vector<16x128xf32>
    %346 = vector.extract_strided_slice %344 {offsets = [0, 0], sizes = [16, 128], strides = [1, 1]} : vector<16x384xf32> to vector<16x128xf32>
    %347 = arith.addf %345, %346 : vector<16x128xf32>
    %348 = arith.negf %347 : vector<16x128xf32>
    %349 = math.exp %348 : vector<16x128xf32>
    %cst_107 = arith.constant 1.000000e+00 : f32
    %350 = vector.broadcast %cst_107 : f32 to vector<16x128xf32>
    %351 = arith.addf %350, %349 : vector<16x128xf32>
    %352 = arith.divf %350, %351 : vector<16x128xf32>
    %353 = vector.extract_strided_slice %341 {offsets = [0, 128], sizes = [16, 128], strides = [1, 1]} : vector<16x384xf32> to vector<16x128xf32>
    %354 = vector.extract_strided_slice %344 {offsets = [0, 128], sizes = [16, 128], strides = [1, 1]} : vector<16x384xf32> to vector<16x128xf32>
    %355 = arith.addf %353, %354 : vector<16x128xf32>
    %356 = arith.negf %355 : vector<16x128xf32>
    %357 = math.exp %356 : vector<16x128xf32>
    %cst_108 = arith.constant 1.000000e+00 : f32
    %358 = vector.broadcast %cst_108 : f32 to vector<16x128xf32>
    %359 = arith.addf %358, %357 : vector<16x128xf32>
    %360 = arith.divf %358, %359 : vector<16x128xf32>
    %361 = vector.extract_strided_slice %341 {offsets = [0, 256], sizes = [16, 128], strides = [1, 1]} : vector<16x384xf32> to vector<16x128xf32>
    %362 = vector.extract_strided_slice %344 {offsets = [0, 256], sizes = [16, 128], strides = [1, 1]} : vector<16x384xf32> to vector<16x128xf32>
    %363 = vector.broadcast %4 : vector<1x128xf32> to vector<16x128xf32>
    %364 = arith.addf %362, %363 : vector<16x128xf32>
    %365 = arith.mulf %352, %364 : vector<16x128xf32>
    %366 = arith.addf %361, %365 : vector<16x128xf32>
    %367 = math.tanh %366 : vector<16x128xf32>
    %cst_109 = arith.constant 1.000000e+00 : f32
    %368 = vector.broadcast %cst_109 : f32 to vector<16x128xf32>
    %369 = arith.subf %368, %360 : vector<16x128xf32>
    %370 = arith.mulf %369, %367 : vector<16x128xf32>
    %371 = arith.mulf %360, %339 : vector<16x128xf32>
    %372 = arith.addf %370, %371 : vector<16x128xf32>
    %c7_i32 = arith.constant 7 : i32
    %373 = vector.broadcast %c7_i32 : i32 to vector<16x1xi32>
    %374 = arith.cmpi sgt, %7, %373 : vector<16x1xi32>
    %cst_110 = arith.constant 0.000000e+00 : f32
    %375 = vector.shape_cast %374 : vector<16x1xi1> to vector<16x1xi1>
    %376 = vector.broadcast %375 : vector<16x1xi1> to vector<16x128xi1>
    %377 = vector.broadcast %cst_110 : f32 to vector<16x128xf32>
    %378 = arith.select %376, %372, %377 : vector<16x128xi1>, vector<16x128xf32>
    %379 = arith.truncf %378 : vector<16x128xf32> to vector<16x128xbf16>
    %c7_111 = arith.constant 7 : index
    %c0_112 = arith.constant 0 : index
    %c0_113 = arith.constant 0 : index
    %380 = vector.load %arg8[%c7_111, %c0_112, %c0_113] : memref<16x16x128xbf16, #tpu.memory_space<vmem>>, vector<1x16x128xbf16>
    %381 = vector.shape_cast %380 : vector<1x16x128xbf16> to vector<16x128xbf16>
    %382 = vector.shape_cast %379 : vector<16x128xbf16> to vector<1x16x128xbf16>
    tpu.vector_store %arg8[%c7_111, %c0_112, %c0_113], %382 {strides = array<i32>} : memref<16x16x128xbf16, #tpu.memory_space<vmem>>, vector<1x16x128xbf16>,
    %383 = vector.shape_cast %374 : vector<16x1xi1> to vector<16x1xi1>
    %384 = vector.broadcast %383 : vector<16x1xi1> to vector<16x128xi1>
    %385 = arith.select %384, %372, %339 : vector<16x128xi1>, vector<16x128xf32>
    %c8 = arith.constant 8 : index
    %c0_114 = arith.constant 0 : index
    %c0_115 = arith.constant 0 : index
    %386 = vector.load %arg11[%c8, %c0_114, %c0_115] : memref<16x16x384xf32, #tpu.memory_space<vmem>>, vector<1x16x384xf32>
    %387 = vector.shape_cast %386 : vector<1x16x384xf32> to vector<16x384xf32>
    %388 = arith.truncf %385 : vector<16x128xf32> to vector<16x128xbf16>
    %c0_116 = arith.constant 0 : index
    %c0_117 = arith.constant 0 : index
    %389 = vector.load %arg7[%c0_116, %c0_117] : memref<128x384xbf16, #tpu.memory_space<vmem>>, vector<128x384xbf16>
    %cst_118 = arith.constant dense<0.000000e+00> : vector<16x384xf32>
    %390 = tpu.matmul %388, %389, %cst_118 {dimension_numbers = #tpu.dot_dimension_numbers<[1], [0], [0], [1], [0, 0, 1, 1], [], []>} : vector<16x128xbf16>, vector<128x384xbf16>, vector<16x384xf32> -> vector<16x384xf32>
    %391 = vector.extract_strided_slice %387 {offsets = [0, 0], sizes = [16, 128], strides = [1, 1]} : vector<16x384xf32> to vector<16x128xf32>
    %392 = vector.extract_strided_slice %390 {offsets = [0, 0], sizes = [16, 128], strides = [1, 1]} : vector<16x384xf32> to vector<16x128xf32>
    %393 = arith.addf %391, %392 : vector<16x128xf32>
    %394 = arith.negf %393 : vector<16x128xf32>
    %395 = math.exp %394 : vector<16x128xf32>
    %cst_119 = arith.constant 1.000000e+00 : f32
    %396 = vector.broadcast %cst_119 : f32 to vector<16x128xf32>
    %397 = arith.addf %396, %395 : vector<16x128xf32>
    %398 = arith.divf %396, %397 : vector<16x128xf32>
    %399 = vector.extract_strided_slice %387 {offsets = [0, 128], sizes = [16, 128], strides = [1, 1]} : vector<16x384xf32> to vector<16x128xf32>
    %400 = vector.extract_strided_slice %390 {offsets = [0, 128], sizes = [16, 128], strides = [1, 1]} : vector<16x384xf32> to vector<16x128xf32>
    %401 = arith.addf %399, %400 : vector<16x128xf32>
    %402 = arith.negf %401 : vector<16x128xf32>
    %403 = math.exp %402 : vector<16x128xf32>
    %cst_120 = arith.constant 1.000000e+00 : f32
    %404 = vector.broadcast %cst_120 : f32 to vector<16x128xf32>
    %405 = arith.addf %404, %403 : vector<16x128xf32>
    %406 = arith.divf %404, %405 : vector<16x128xf32>
    %407 = vector.extract_strided_slice %387 {offsets = [0, 256], sizes = [16, 128], strides = [1, 1]} : vector<16x384xf32> to vector<16x128xf32>
    %408 = vector.extract_strided_slice %390 {offsets = [0, 256], sizes = [16, 128], strides = [1, 1]} : vector<16x384xf32> to vector<16x128xf32>
    %409 = vector.broadcast %4 : vector<1x128xf32> to vector<16x128xf32>
    %410 = arith.addf %408, %409 : vector<16x128xf32>
    %411 = arith.mulf %398, %410 : vector<16x128xf32>
    %412 = arith.addf %407, %411 : vector<16x128xf32>
    %413 = math.tanh %412 : vector<16x128xf32>
    %cst_121 = arith.constant 1.000000e+00 : f32
    %414 = vector.broadcast %cst_121 : f32 to vector<16x128xf32>
    %415 = arith.subf %414, %406 : vector<16x128xf32>
    %416 = arith.mulf %415, %413 : vector<16x128xf32>
    %417 = arith.mulf %406, %385 : vector<16x128xf32>
    %418 = arith.addf %416, %417 : vector<16x128xf32>
    %c8_i32 = arith.constant 8 : i32
    %419 = vector.broadcast %c8_i32 : i32 to vector<16x1xi32>
    %420 = arith.cmpi sgt, %7, %419 : vector<16x1xi32>
    %cst_122 = arith.constant 0.000000e+00 : f32
    %421 = vector.shape_cast %420 : vector<16x1xi1> to vector<16x1xi1>
    %422 = vector.broadcast %421 : vector<16x1xi1> to vector<16x128xi1>
    %423 = vector.broadcast %cst_122 : f32 to vector<16x128xf32>
    %424 = arith.select %422, %418, %423 : vector<16x128xi1>, vector<16x128xf32>
    %425 = arith.truncf %424 : vector<16x128xf32> to vector<16x128xbf16>
    %c8_123 = arith.constant 8 : index
    %c0_124 = arith.constant 0 : index
    %c0_125 = arith.constant 0 : index
    %426 = vector.load %arg8[%c8_123, %c0_124, %c0_125] : memref<16x16x128xbf16, #tpu.memory_space<vmem>>, vector<1x16x128xbf16>
    %427 = vector.shape_cast %426 : vector<1x16x128xbf16> to vector<16x128xbf16>
    %428 = vector.shape_cast %425 : vector<16x128xbf16> to vector<1x16x128xbf16>
    tpu.vector_store %arg8[%c8_123, %c0_124, %c0_125], %428 {strides = array<i32>} : memref<16x16x128xbf16, #tpu.memory_space<vmem>>, vector<1x16x128xbf16>,
    %429 = vector.shape_cast %420 : vector<16x1xi1> to vector<16x1xi1>
    %430 = vector.broadcast %429 : vector<16x1xi1> to vector<16x128xi1>
    %431 = arith.select %430, %418, %385 : vector<16x128xi1>, vector<16x128xf32>
    %c9 = arith.constant 9 : index
    %c0_126 = arith.constant 0 : index
    %c0_127 = arith.constant 0 : index
    %432 = vector.load %arg11[%c9, %c0_126, %c0_127] : memref<16x16x384xf32, #tpu.memory_space<vmem>>, vector<1x16x384xf32>
    %433 = vector.shape_cast %432 : vector<1x16x384xf32> to vector<16x384xf32>
    %434 = arith.truncf %431 : vector<16x128xf32> to vector<16x128xbf16>
    %c0_128 = arith.constant 0 : index
    %c0_129 = arith.constant 0 : index
    %435 = vector.load %arg7[%c0_128, %c0_129] : memref<128x384xbf16, #tpu.memory_space<vmem>>, vector<128x384xbf16>
    %cst_130 = arith.constant dense<0.000000e+00> : vector<16x384xf32>
    %436 = tpu.matmul %434, %435, %cst_130 {dimension_numbers = #tpu.dot_dimension_numbers<[1], [0], [0], [1], [0, 0, 1, 1], [], []>} : vector<16x128xbf16>, vector<128x384xbf16>, vector<16x384xf32> -> vector<16x384xf32>
    %437 = vector.extract_strided_slice %433 {offsets = [0, 0], sizes = [16, 128], strides = [1, 1]} : vector<16x384xf32> to vector<16x128xf32>
    %438 = vector.extract_strided_slice %436 {offsets = [0, 0], sizes = [16, 128], strides = [1, 1]} : vector<16x384xf32> to vector<16x128xf32>
    %439 = arith.addf %437, %438 : vector<16x128xf32>
    %440 = arith.negf %439 : vector<16x128xf32>
    %441 = math.exp %440 : vector<16x128xf32>
    %cst_131 = arith.constant 1.000000e+00 : f32
    %442 = vector.broadcast %cst_131 : f32 to vector<16x128xf32>
    %443 = arith.addf %442, %441 : vector<16x128xf32>
    %444 = arith.divf %442, %443 : vector<16x128xf32>
    %445 = vector.extract_strided_slice %433 {offsets = [0, 128], sizes = [16, 128], strides = [1, 1]} : vector<16x384xf32> to vector<16x128xf32>
    %446 = vector.extract_strided_slice %436 {offsets = [0, 128], sizes = [16, 128], strides = [1, 1]} : vector<16x384xf32> to vector<16x128xf32>
    %447 = arith.addf %445, %446 : vector<16x128xf32>
    %448 = arith.negf %447 : vector<16x128xf32>
    %449 = math.exp %448 : vector<16x128xf32>
    %cst_132 = arith.constant 1.000000e+00 : f32
    %450 = vector.broadcast %cst_132 : f32 to vector<16x128xf32>
    %451 = arith.addf %450, %449 : vector<16x128xf32>
    %452 = arith.divf %450, %451 : vector<16x128xf32>
    %453 = vector.extract_strided_slice %433 {offsets = [0, 256], sizes = [16, 128], strides = [1, 1]} : vector<16x384xf32> to vector<16x128xf32>
    %454 = vector.extract_strided_slice %436 {offsets = [0, 256], sizes = [16, 128], strides = [1, 1]} : vector<16x384xf32> to vector<16x128xf32>
    %455 = vector.broadcast %4 : vector<1x128xf32> to vector<16x128xf32>
    %456 = arith.addf %454, %455 : vector<16x128xf32>
    %457 = arith.mulf %444, %456 : vector<16x128xf32>
    %458 = arith.addf %453, %457 : vector<16x128xf32>
    %459 = math.tanh %458 : vector<16x128xf32>
    %cst_133 = arith.constant 1.000000e+00 : f32
    %460 = vector.broadcast %cst_133 : f32 to vector<16x128xf32>
    %461 = arith.subf %460, %452 : vector<16x128xf32>
    %462 = arith.mulf %461, %459 : vector<16x128xf32>
    %463 = arith.mulf %452, %431 : vector<16x128xf32>
    %464 = arith.addf %462, %463 : vector<16x128xf32>
    %c9_i32 = arith.constant 9 : i32
    %465 = vector.broadcast %c9_i32 : i32 to vector<16x1xi32>
    %466 = arith.cmpi sgt, %7, %465 : vector<16x1xi32>
    %cst_134 = arith.constant 0.000000e+00 : f32
    %467 = vector.shape_cast %466 : vector<16x1xi1> to vector<16x1xi1>
    %468 = vector.broadcast %467 : vector<16x1xi1> to vector<16x128xi1>
    %469 = vector.broadcast %cst_134 : f32 to vector<16x128xf32>
    %470 = arith.select %468, %464, %469 : vector<16x128xi1>, vector<16x128xf32>
    %471 = arith.truncf %470 : vector<16x128xf32> to vector<16x128xbf16>
    %c9_135 = arith.constant 9 : index
    %c0_136 = arith.constant 0 : index
    %c0_137 = arith.constant 0 : index
    %472 = vector.load %arg8[%c9_135, %c0_136, %c0_137] : memref<16x16x128xbf16, #tpu.memory_space<vmem>>, vector<1x16x128xbf16>
    %473 = vector.shape_cast %472 : vector<1x16x128xbf16> to vector<16x128xbf16>
    %474 = vector.shape_cast %471 : vector<16x128xbf16> to vector<1x16x128xbf16>
    tpu.vector_store %arg8[%c9_135, %c0_136, %c0_137], %474 {strides = array<i32>} : memref<16x16x128xbf16, #tpu.memory_space<vmem>>, vector<1x16x128xbf16>,
    %475 = vector.shape_cast %466 : vector<16x1xi1> to vector<16x1xi1>
    %476 = vector.broadcast %475 : vector<16x1xi1> to vector<16x128xi1>
    %477 = arith.select %476, %464, %431 : vector<16x128xi1>, vector<16x128xf32>
    %c10 = arith.constant 10 : index
    %c0_138 = arith.constant 0 : index
    %c0_139 = arith.constant 0 : index
    %478 = vector.load %arg11[%c10, %c0_138, %c0_139] : memref<16x16x384xf32, #tpu.memory_space<vmem>>, vector<1x16x384xf32>
    %479 = vector.shape_cast %478 : vector<1x16x384xf32> to vector<16x384xf32>
    %480 = arith.truncf %477 : vector<16x128xf32> to vector<16x128xbf16>
    %c0_140 = arith.constant 0 : index
    %c0_141 = arith.constant 0 : index
    %481 = vector.load %arg7[%c0_140, %c0_141] : memref<128x384xbf16, #tpu.memory_space<vmem>>, vector<128x384xbf16>
    %cst_142 = arith.constant dense<0.000000e+00> : vector<16x384xf32>
    %482 = tpu.matmul %480, %481, %cst_142 {dimension_numbers = #tpu.dot_dimension_numbers<[1], [0], [0], [1], [0, 0, 1, 1], [], []>} : vector<16x128xbf16>, vector<128x384xbf16>, vector<16x384xf32> -> vector<16x384xf32>
    %483 = vector.extract_strided_slice %479 {offsets = [0, 0], sizes = [16, 128], strides = [1, 1]} : vector<16x384xf32> to vector<16x128xf32>
    %484 = vector.extract_strided_slice %482 {offsets = [0, 0], sizes = [16, 128], strides = [1, 1]} : vector<16x384xf32> to vector<16x128xf32>
    %485 = arith.addf %483, %484 : vector<16x128xf32>
    %486 = arith.negf %485 : vector<16x128xf32>
    %487 = math.exp %486 : vector<16x128xf32>
    %cst_143 = arith.constant 1.000000e+00 : f32
    %488 = vector.broadcast %cst_143 : f32 to vector<16x128xf32>
    %489 = arith.addf %488, %487 : vector<16x128xf32>
    %490 = arith.divf %488, %489 : vector<16x128xf32>
    %491 = vector.extract_strided_slice %479 {offsets = [0, 128], sizes = [16, 128], strides = [1, 1]} : vector<16x384xf32> to vector<16x128xf32>
    %492 = vector.extract_strided_slice %482 {offsets = [0, 128], sizes = [16, 128], strides = [1, 1]} : vector<16x384xf32> to vector<16x128xf32>
    %493 = arith.addf %491, %492 : vector<16x128xf32>
    %494 = arith.negf %493 : vector<16x128xf32>
    %495 = math.exp %494 : vector<16x128xf32>
    %cst_144 = arith.constant 1.000000e+00 : f32
    %496 = vector.broadcast %cst_144 : f32 to vector<16x128xf32>
    %497 = arith.addf %496, %495 : vector<16x128xf32>
    %498 = arith.divf %496, %497 : vector<16x128xf32>
    %499 = vector.extract_strided_slice %479 {offsets = [0, 256], sizes = [16, 128], strides = [1, 1]} : vector<16x384xf32> to vector<16x128xf32>
    %500 = vector.extract_strided_slice %482 {offsets = [0, 256], sizes = [16, 128], strides = [1, 1]} : vector<16x384xf32> to vector<16x128xf32>
    %501 = vector.broadcast %4 : vector<1x128xf32> to vector<16x128xf32>
    %502 = arith.addf %500, %501 : vector<16x128xf32>
    %503 = arith.mulf %490, %502 : vector<16x128xf32>
    %504 = arith.addf %499, %503 : vector<16x128xf32>
    %505 = math.tanh %504 : vector<16x128xf32>
    %cst_145 = arith.constant 1.000000e+00 : f32
    %506 = vector.broadcast %cst_145 : f32 to vector<16x128xf32>
    %507 = arith.subf %506, %498 : vector<16x128xf32>
    %508 = arith.mulf %507, %505 : vector<16x128xf32>
    %509 = arith.mulf %498, %477 : vector<16x128xf32>
    %510 = arith.addf %508, %509 : vector<16x128xf32>
    %c10_i32 = arith.constant 10 : i32
    %511 = vector.broadcast %c10_i32 : i32 to vector<16x1xi32>
    %512 = arith.cmpi sgt, %7, %511 : vector<16x1xi32>
    %cst_146 = arith.constant 0.000000e+00 : f32
    %513 = vector.shape_cast %512 : vector<16x1xi1> to vector<16x1xi1>
    %514 = vector.broadcast %513 : vector<16x1xi1> to vector<16x128xi1>
    %515 = vector.broadcast %cst_146 : f32 to vector<16x128xf32>
    %516 = arith.select %514, %510, %515 : vector<16x128xi1>, vector<16x128xf32>
    %517 = arith.truncf %516 : vector<16x128xf32> to vector<16x128xbf16>
    %c10_147 = arith.constant 10 : index
    %c0_148 = arith.constant 0 : index
    %c0_149 = arith.constant 0 : index
    %518 = vector.load %arg8[%c10_147, %c0_148, %c0_149] : memref<16x16x128xbf16, #tpu.memory_space<vmem>>, vector<1x16x128xbf16>
    %519 = vector.shape_cast %518 : vector<1x16x128xbf16> to vector<16x128xbf16>
    %520 = vector.shape_cast %517 : vector<16x128xbf16> to vector<1x16x128xbf16>
    tpu.vector_store %arg8[%c10_147, %c0_148, %c0_149], %520 {strides = array<i32>} : memref<16x16x128xbf16, #tpu.memory_space<vmem>>, vector<1x16x128xbf16>,
    %521 = vector.shape_cast %512 : vector<16x1xi1> to vector<16x1xi1>
    %522 = vector.broadcast %521 : vector<16x1xi1> to vector<16x128xi1>
    %523 = arith.select %522, %510, %477 : vector<16x128xi1>, vector<16x128xf32>
    %c11 = arith.constant 11 : index
    %c0_150 = arith.constant 0 : index
    %c0_151 = arith.constant 0 : index
    %524 = vector.load %arg11[%c11, %c0_150, %c0_151] : memref<16x16x384xf32, #tpu.memory_space<vmem>>, vector<1x16x384xf32>
    %525 = vector.shape_cast %524 : vector<1x16x384xf32> to vector<16x384xf32>
    %526 = arith.truncf %523 : vector<16x128xf32> to vector<16x128xbf16>
    %c0_152 = arith.constant 0 : index
    %c0_153 = arith.constant 0 : index
    %527 = vector.load %arg7[%c0_152, %c0_153] : memref<128x384xbf16, #tpu.memory_space<vmem>>, vector<128x384xbf16>
    %cst_154 = arith.constant dense<0.000000e+00> : vector<16x384xf32>
    %528 = tpu.matmul %526, %527, %cst_154 {dimension_numbers = #tpu.dot_dimension_numbers<[1], [0], [0], [1], [0, 0, 1, 1], [], []>} : vector<16x128xbf16>, vector<128x384xbf16>, vector<16x384xf32> -> vector<16x384xf32>
    %529 = vector.extract_strided_slice %525 {offsets = [0, 0], sizes = [16, 128], strides = [1, 1]} : vector<16x384xf32> to vector<16x128xf32>
    %530 = vector.extract_strided_slice %528 {offsets = [0, 0], sizes = [16, 128], strides = [1, 1]} : vector<16x384xf32> to vector<16x128xf32>
    %531 = arith.addf %529, %530 : vector<16x128xf32>
    %532 = arith.negf %531 : vector<16x128xf32>
    %533 = math.exp %532 : vector<16x128xf32>
    %cst_155 = arith.constant 1.000000e+00 : f32
    %534 = vector.broadcast %cst_155 : f32 to vector<16x128xf32>
    %535 = arith.addf %534, %533 : vector<16x128xf32>
    %536 = arith.divf %534, %535 : vector<16x128xf32>
    %537 = vector.extract_strided_slice %525 {offsets = [0, 128], sizes = [16, 128], strides = [1, 1]} : vector<16x384xf32> to vector<16x128xf32>
    %538 = vector.extract_strided_slice %528 {offsets = [0, 128], sizes = [16, 128], strides = [1, 1]} : vector<16x384xf32> to vector<16x128xf32>
    %539 = arith.addf %537, %538 : vector<16x128xf32>
    %540 = arith.negf %539 : vector<16x128xf32>
    %541 = math.exp %540 : vector<16x128xf32>
    %cst_156 = arith.constant 1.000000e+00 : f32
    %542 = vector.broadcast %cst_156 : f32 to vector<16x128xf32>
    %543 = arith.addf %542, %541 : vector<16x128xf32>
    %544 = arith.divf %542, %543 : vector<16x128xf32>
    %545 = vector.extract_strided_slice %525 {offsets = [0, 256], sizes = [16, 128], strides = [1, 1]} : vector<16x384xf32> to vector<16x128xf32>
    %546 = vector.extract_strided_slice %528 {offsets = [0, 256], sizes = [16, 128], strides = [1, 1]} : vector<16x384xf32> to vector<16x128xf32>
    %547 = vector.broadcast %4 : vector<1x128xf32> to vector<16x128xf32>
    %548 = arith.addf %546, %547 : vector<16x128xf32>
    %549 = arith.mulf %536, %548 : vector<16x128xf32>
    %550 = arith.addf %545, %549 : vector<16x128xf32>
    %551 = math.tanh %550 : vector<16x128xf32>
    %cst_157 = arith.constant 1.000000e+00 : f32
    %552 = vector.broadcast %cst_157 : f32 to vector<16x128xf32>
    %553 = arith.subf %552, %544 : vector<16x128xf32>
    %554 = arith.mulf %553, %551 : vector<16x128xf32>
    %555 = arith.mulf %544, %523 : vector<16x128xf32>
    %556 = arith.addf %554, %555 : vector<16x128xf32>
    %c11_i32 = arith.constant 11 : i32
    %557 = vector.broadcast %c11_i32 : i32 to vector<16x1xi32>
    %558 = arith.cmpi sgt, %7, %557 : vector<16x1xi32>
    %cst_158 = arith.constant 0.000000e+00 : f32
    %559 = vector.shape_cast %558 : vector<16x1xi1> to vector<16x1xi1>
    %560 = vector.broadcast %559 : vector<16x1xi1> to vector<16x128xi1>
    %561 = vector.broadcast %cst_158 : f32 to vector<16x128xf32>
    %562 = arith.select %560, %556, %561 : vector<16x128xi1>, vector<16x128xf32>
    %563 = arith.truncf %562 : vector<16x128xf32> to vector<16x128xbf16>
    %c11_159 = arith.constant 11 : index
    %c0_160 = arith.constant 0 : index
    %c0_161 = arith.constant 0 : index
    %564 = vector.load %arg8[%c11_159, %c0_160, %c0_161] : memref<16x16x128xbf16, #tpu.memory_space<vmem>>, vector<1x16x128xbf16>
    %565 = vector.shape_cast %564 : vector<1x16x128xbf16> to vector<16x128xbf16>
    %566 = vector.shape_cast %563 : vector<16x128xbf16> to vector<1x16x128xbf16>
    tpu.vector_store %arg8[%c11_159, %c0_160, %c0_161], %566 {strides = array<i32>} : memref<16x16x128xbf16, #tpu.memory_space<vmem>>, vector<1x16x128xbf16>,
    %567 = vector.shape_cast %558 : vector<16x1xi1> to vector<16x1xi1>
    %568 = vector.broadcast %567 : vector<16x1xi1> to vector<16x128xi1>
    %569 = arith.select %568, %556, %523 : vector<16x128xi1>, vector<16x128xf32>
    %c12 = arith.constant 12 : index
    %c0_162 = arith.constant 0 : index
    %c0_163 = arith.constant 0 : index
    %570 = vector.load %arg11[%c12, %c0_162, %c0_163] : memref<16x16x384xf32, #tpu.memory_space<vmem>>, vector<1x16x384xf32>
    %571 = vector.shape_cast %570 : vector<1x16x384xf32> to vector<16x384xf32>
    %572 = arith.truncf %569 : vector<16x128xf32> to vector<16x128xbf16>
    %c0_164 = arith.constant 0 : index
    %c0_165 = arith.constant 0 : index
    %573 = vector.load %arg7[%c0_164, %c0_165] : memref<128x384xbf16, #tpu.memory_space<vmem>>, vector<128x384xbf16>
    %cst_166 = arith.constant dense<0.000000e+00> : vector<16x384xf32>
    %574 = tpu.matmul %572, %573, %cst_166 {dimension_numbers = #tpu.dot_dimension_numbers<[1], [0], [0], [1], [0, 0, 1, 1], [], []>} : vector<16x128xbf16>, vector<128x384xbf16>, vector<16x384xf32> -> vector<16x384xf32>
    %575 = vector.extract_strided_slice %571 {offsets = [0, 0], sizes = [16, 128], strides = [1, 1]} : vector<16x384xf32> to vector<16x128xf32>
    %576 = vector.extract_strided_slice %574 {offsets = [0, 0], sizes = [16, 128], strides = [1, 1]} : vector<16x384xf32> to vector<16x128xf32>
    %577 = arith.addf %575, %576 : vector<16x128xf32>
    %578 = arith.negf %577 : vector<16x128xf32>
    %579 = math.exp %578 : vector<16x128xf32>
    %cst_167 = arith.constant 1.000000e+00 : f32
    %580 = vector.broadcast %cst_167 : f32 to vector<16x128xf32>
    %581 = arith.addf %580, %579 : vector<16x128xf32>
    %582 = arith.divf %580, %581 : vector<16x128xf32>
    %583 = vector.extract_strided_slice %571 {offsets = [0, 128], sizes = [16, 128], strides = [1, 1]} : vector<16x384xf32> to vector<16x128xf32>
    %584 = vector.extract_strided_slice %574 {offsets = [0, 128], sizes = [16, 128], strides = [1, 1]} : vector<16x384xf32> to vector<16x128xf32>
    %585 = arith.addf %583, %584 : vector<16x128xf32>
    %586 = arith.negf %585 : vector<16x128xf32>
    %587 = math.exp %586 : vector<16x128xf32>
    %cst_168 = arith.constant 1.000000e+00 : f32
    %588 = vector.broadcast %cst_168 : f32 to vector<16x128xf32>
    %589 = arith.addf %588, %587 : vector<16x128xf32>
    %590 = arith.divf %588, %589 : vector<16x128xf32>
    %591 = vector.extract_strided_slice %571 {offsets = [0, 256], sizes = [16, 128], strides = [1, 1]} : vector<16x384xf32> to vector<16x128xf32>
    %592 = vector.extract_strided_slice %574 {offsets = [0, 256], sizes = [16, 128], strides = [1, 1]} : vector<16x384xf32> to vector<16x128xf32>
    %593 = vector.broadcast %4 : vector<1x128xf32> to vector<16x128xf32>
    %594 = arith.addf %592, %593 : vector<16x128xf32>
    %595 = arith.mulf %582, %594 : vector<16x128xf32>
    %596 = arith.addf %591, %595 : vector<16x128xf32>
    %597 = math.tanh %596 : vector<16x128xf32>
    %cst_169 = arith.constant 1.000000e+00 : f32
    %598 = vector.broadcast %cst_169 : f32 to vector<16x128xf32>
    %599 = arith.subf %598, %590 : vector<16x128xf32>
    %600 = arith.mulf %599, %597 : vector<16x128xf32>
    %601 = arith.mulf %590, %569 : vector<16x128xf32>
    %602 = arith.addf %600, %601 : vector<16x128xf32>
    %c12_i32 = arith.constant 12 : i32
    %603 = vector.broadcast %c12_i32 : i32 to vector<16x1xi32>
    %604 = arith.cmpi sgt, %7, %603 : vector<16x1xi32>
    %cst_170 = arith.constant 0.000000e+00 : f32
    %605 = vector.shape_cast %604 : vector<16x1xi1> to vector<16x1xi1>
    %606 = vector.broadcast %605 : vector<16x1xi1> to vector<16x128xi1>
    %607 = vector.broadcast %cst_170 : f32 to vector<16x128xf32>
    %608 = arith.select %606, %602, %607 : vector<16x128xi1>, vector<16x128xf32>
    %609 = arith.truncf %608 : vector<16x128xf32> to vector<16x128xbf16>
    %c12_171 = arith.constant 12 : index
    %c0_172 = arith.constant 0 : index
    %c0_173 = arith.constant 0 : index
    %610 = vector.load %arg8[%c12_171, %c0_172, %c0_173] : memref<16x16x128xbf16, #tpu.memory_space<vmem>>, vector<1x16x128xbf16>
    %611 = vector.shape_cast %610 : vector<1x16x128xbf16> to vector<16x128xbf16>
    %612 = vector.shape_cast %609 : vector<16x128xbf16> to vector<1x16x128xbf16>
    tpu.vector_store %arg8[%c12_171, %c0_172, %c0_173], %612 {strides = array<i32>} : memref<16x16x128xbf16, #tpu.memory_space<vmem>>, vector<1x16x128xbf16>,
    %613 = vector.shape_cast %604 : vector<16x1xi1> to vector<16x1xi1>
    %614 = vector.broadcast %613 : vector<16x1xi1> to vector<16x128xi1>
    %615 = arith.select %614, %602, %569 : vector<16x128xi1>, vector<16x128xf32>
    %c13 = arith.constant 13 : index
    %c0_174 = arith.constant 0 : index
    %c0_175 = arith.constant 0 : index
    %616 = vector.load %arg11[%c13, %c0_174, %c0_175] : memref<16x16x384xf32, #tpu.memory_space<vmem>>, vector<1x16x384xf32>
    %617 = vector.shape_cast %616 : vector<1x16x384xf32> to vector<16x384xf32>
    %618 = arith.truncf %615 : vector<16x128xf32> to vector<16x128xbf16>
    %c0_176 = arith.constant 0 : index
    %c0_177 = arith.constant 0 : index
    %619 = vector.load %arg7[%c0_176, %c0_177] : memref<128x384xbf16, #tpu.memory_space<vmem>>, vector<128x384xbf16>
    %cst_178 = arith.constant dense<0.000000e+00> : vector<16x384xf32>
    %620 = tpu.matmul %618, %619, %cst_178 {dimension_numbers = #tpu.dot_dimension_numbers<[1], [0], [0], [1], [0, 0, 1, 1], [], []>} : vector<16x128xbf16>, vector<128x384xbf16>, vector<16x384xf32> -> vector<16x384xf32>
    %621 = vector.extract_strided_slice %617 {offsets = [0, 0], sizes = [16, 128], strides = [1, 1]} : vector<16x384xf32> to vector<16x128xf32>
    %622 = vector.extract_strided_slice %620 {offsets = [0, 0], sizes = [16, 128], strides = [1, 1]} : vector<16x384xf32> to vector<16x128xf32>
    %623 = arith.addf %621, %622 : vector<16x128xf32>
    %624 = arith.negf %623 : vector<16x128xf32>
    %625 = math.exp %624 : vector<16x128xf32>
    %cst_179 = arith.constant 1.000000e+00 : f32
    %626 = vector.broadcast %cst_179 : f32 to vector<16x128xf32>
    %627 = arith.addf %626, %625 : vector<16x128xf32>
    %628 = arith.divf %626, %627 : vector<16x128xf32>
    %629 = vector.extract_strided_slice %617 {offsets = [0, 128], sizes = [16, 128], strides = [1, 1]} : vector<16x384xf32> to vector<16x128xf32>
    %630 = vector.extract_strided_slice %620 {offsets = [0, 128], sizes = [16, 128], strides = [1, 1]} : vector<16x384xf32> to vector<16x128xf32>
    %631 = arith.addf %629, %630 : vector<16x128xf32>
    %632 = arith.negf %631 : vector<16x128xf32>
    %633 = math.exp %632 : vector<16x128xf32>
    %cst_180 = arith.constant 1.000000e+00 : f32
    %634 = vector.broadcast %cst_180 : f32 to vector<16x128xf32>
    %635 = arith.addf %634, %633 : vector<16x128xf32>
    %636 = arith.divf %634, %635 : vector<16x128xf32>
    %637 = vector.extract_strided_slice %617 {offsets = [0, 256], sizes = [16, 128], strides = [1, 1]} : vector<16x384xf32> to vector<16x128xf32>
    %638 = vector.extract_strided_slice %620 {offsets = [0, 256], sizes = [16, 128], strides = [1, 1]} : vector<16x384xf32> to vector<16x128xf32>
    %639 = vector.broadcast %4 : vector<1x128xf32> to vector<16x128xf32>
    %640 = arith.addf %638, %639 : vector<16x128xf32>
    %641 = arith.mulf %628, %640 : vector<16x128xf32>
    %642 = arith.addf %637, %641 : vector<16x128xf32>
    %643 = math.tanh %642 : vector<16x128xf32>
    %cst_181 = arith.constant 1.000000e+00 : f32
    %644 = vector.broadcast %cst_181 : f32 to vector<16x128xf32>
    %645 = arith.subf %644, %636 : vector<16x128xf32>
    %646 = arith.mulf %645, %643 : vector<16x128xf32>
    %647 = arith.mulf %636, %615 : vector<16x128xf32>
    %648 = arith.addf %646, %647 : vector<16x128xf32>
    %c13_i32 = arith.constant 13 : i32
    %649 = vector.broadcast %c13_i32 : i32 to vector<16x1xi32>
    %650 = arith.cmpi sgt, %7, %649 : vector<16x1xi32>
    %cst_182 = arith.constant 0.000000e+00 : f32
    %651 = vector.shape_cast %650 : vector<16x1xi1> to vector<16x1xi1>
    %652 = vector.broadcast %651 : vector<16x1xi1> to vector<16x128xi1>
    %653 = vector.broadcast %cst_182 : f32 to vector<16x128xf32>
    %654 = arith.select %652, %648, %653 : vector<16x128xi1>, vector<16x128xf32>
    %655 = arith.truncf %654 : vector<16x128xf32> to vector<16x128xbf16>
    %c13_183 = arith.constant 13 : index
    %c0_184 = arith.constant 0 : index
    %c0_185 = arith.constant 0 : index
    %656 = vector.load %arg8[%c13_183, %c0_184, %c0_185] : memref<16x16x128xbf16, #tpu.memory_space<vmem>>, vector<1x16x128xbf16>
    %657 = vector.shape_cast %656 : vector<1x16x128xbf16> to vector<16x128xbf16>
    %658 = vector.shape_cast %655 : vector<16x128xbf16> to vector<1x16x128xbf16>
    tpu.vector_store %arg8[%c13_183, %c0_184, %c0_185], %658 {strides = array<i32>} : memref<16x16x128xbf16, #tpu.memory_space<vmem>>, vector<1x16x128xbf16>,
    %659 = vector.shape_cast %650 : vector<16x1xi1> to vector<16x1xi1>
    %660 = vector.broadcast %659 : vector<16x1xi1> to vector<16x128xi1>
    %661 = arith.select %660, %648, %615 : vector<16x128xi1>, vector<16x128xf32>
    %c14 = arith.constant 14 : index
    %c0_186 = arith.constant 0 : index
    %c0_187 = arith.constant 0 : index
    %662 = vector.load %arg11[%c14, %c0_186, %c0_187] : memref<16x16x384xf32, #tpu.memory_space<vmem>>, vector<1x16x384xf32>
    %663 = vector.shape_cast %662 : vector<1x16x384xf32> to vector<16x384xf32>
    %664 = arith.truncf %661 : vector<16x128xf32> to vector<16x128xbf16>
    %c0_188 = arith.constant 0 : index
    %c0_189 = arith.constant 0 : index
    %665 = vector.load %arg7[%c0_188, %c0_189] : memref<128x384xbf16, #tpu.memory_space<vmem>>, vector<128x384xbf16>
    %cst_190 = arith.constant dense<0.000000e+00> : vector<16x384xf32>
    %666 = tpu.matmul %664, %665, %cst_190 {dimension_numbers = #tpu.dot_dimension_numbers<[1], [0], [0], [1], [0, 0, 1, 1], [], []>} : vector<16x128xbf16>, vector<128x384xbf16>, vector<16x384xf32> -> vector<16x384xf32>
    %667 = vector.extract_strided_slice %663 {offsets = [0, 0], sizes = [16, 128], strides = [1, 1]} : vector<16x384xf32> to vector<16x128xf32>
    %668 = vector.extract_strided_slice %666 {offsets = [0, 0], sizes = [16, 128], strides = [1, 1]} : vector<16x384xf32> to vector<16x128xf32>
    %669 = arith.addf %667, %668 : vector<16x128xf32>
    %670 = arith.negf %669 : vector<16x128xf32>
    %671 = math.exp %670 : vector<16x128xf32>
    %cst_191 = arith.constant 1.000000e+00 : f32
    %672 = vector.broadcast %cst_191 : f32 to vector<16x128xf32>
    %673 = arith.addf %672, %671 : vector<16x128xf32>
    %674 = arith.divf %672, %673 : vector<16x128xf32>
    %675 = vector.extract_strided_slice %663 {offsets = [0, 128], sizes = [16, 128], strides = [1, 1]} : vector<16x384xf32> to vector<16x128xf32>
    %676 = vector.extract_strided_slice %666 {offsets = [0, 128], sizes = [16, 128], strides = [1, 1]} : vector<16x384xf32> to vector<16x128xf32>
    %677 = arith.addf %675, %676 : vector<16x128xf32>
    %678 = arith.negf %677 : vector<16x128xf32>
    %679 = math.exp %678 : vector<16x128xf32>
    %cst_192 = arith.constant 1.000000e+00 : f32
    %680 = vector.broadcast %cst_192 : f32 to vector<16x128xf32>
    %681 = arith.addf %680, %679 : vector<16x128xf32>
    %682 = arith.divf %680, %681 : vector<16x128xf32>
    %683 = vector.extract_strided_slice %663 {offsets = [0, 256], sizes = [16, 128], strides = [1, 1]} : vector<16x384xf32> to vector<16x128xf32>
    %684 = vector.extract_strided_slice %666 {offsets = [0, 256], sizes = [16, 128], strides = [1, 1]} : vector<16x384xf32> to vector<16x128xf32>
    %685 = vector.broadcast %4 : vector<1x128xf32> to vector<16x128xf32>
    %686 = arith.addf %684, %685 : vector<16x128xf32>
    %687 = arith.mulf %674, %686 : vector<16x128xf32>
    %688 = arith.addf %683, %687 : vector<16x128xf32>
    %689 = math.tanh %688 : vector<16x128xf32>
    %cst_193 = arith.constant 1.000000e+00 : f32
    %690 = vector.broadcast %cst_193 : f32 to vector<16x128xf32>
    %691 = arith.subf %690, %682 : vector<16x128xf32>
    %692 = arith.mulf %691, %689 : vector<16x128xf32>
    %693 = arith.mulf %682, %661 : vector<16x128xf32>
    %694 = arith.addf %692, %693 : vector<16x128xf32>
    %c14_i32 = arith.constant 14 : i32
    %695 = vector.broadcast %c14_i32 : i32 to vector<16x1xi32>
    %696 = arith.cmpi sgt, %7, %695 : vector<16x1xi32>
    %cst_194 = arith.constant 0.000000e+00 : f32
    %697 = vector.shape_cast %696 : vector<16x1xi1> to vector<16x1xi1>
    %698 = vector.broadcast %697 : vector<16x1xi1> to vector<16x128xi1>
    %699 = vector.broadcast %cst_194 : f32 to vector<16x128xf32>
    %700 = arith.select %698, %694, %699 : vector<16x128xi1>, vector<16x128xf32>
    %701 = arith.truncf %700 : vector<16x128xf32> to vector<16x128xbf16>
    %c14_195 = arith.constant 14 : index
    %c0_196 = arith.constant 0 : index
    %c0_197 = arith.constant 0 : index
    %702 = vector.load %arg8[%c14_195, %c0_196, %c0_197] : memref<16x16x128xbf16, #tpu.memory_space<vmem>>, vector<1x16x128xbf16>
    %703 = vector.shape_cast %702 : vector<1x16x128xbf16> to vector<16x128xbf16>
    %704 = vector.shape_cast %701 : vector<16x128xbf16> to vector<1x16x128xbf16>
    tpu.vector_store %arg8[%c14_195, %c0_196, %c0_197], %704 {strides = array<i32>} : memref<16x16x128xbf16, #tpu.memory_space<vmem>>, vector<1x16x128xbf16>,
    %705 = vector.shape_cast %696 : vector<16x1xi1> to vector<16x1xi1>
    %706 = vector.broadcast %705 : vector<16x1xi1> to vector<16x128xi1>
    %707 = arith.select %706, %694, %661 : vector<16x128xi1>, vector<16x128xf32>
    %c15 = arith.constant 15 : index
    %c0_198 = arith.constant 0 : index
    %c0_199 = arith.constant 0 : index
    %708 = vector.load %arg11[%c15, %c0_198, %c0_199] : memref<16x16x384xf32, #tpu.memory_space<vmem>>, vector<1x16x384xf32>
    %709 = vector.shape_cast %708 : vector<1x16x384xf32> to vector<16x384xf32>
    %710 = arith.truncf %707 : vector<16x128xf32> to vector<16x128xbf16>
    %c0_200 = arith.constant 0 : index
    %c0_201 = arith.constant 0 : index
    %711 = vector.load %arg7[%c0_200, %c0_201] : memref<128x384xbf16, #tpu.memory_space<vmem>>, vector<128x384xbf16>
    %cst_202 = arith.constant dense<0.000000e+00> : vector<16x384xf32>
    %712 = tpu.matmul %710, %711, %cst_202 {dimension_numbers = #tpu.dot_dimension_numbers<[1], [0], [0], [1], [0, 0, 1, 1], [], []>} : vector<16x128xbf16>, vector<128x384xbf16>, vector<16x384xf32> -> vector<16x384xf32>
    %713 = vector.extract_strided_slice %709 {offsets = [0, 0], sizes = [16, 128], strides = [1, 1]} : vector<16x384xf32> to vector<16x128xf32>
    %714 = vector.extract_strided_slice %712 {offsets = [0, 0], sizes = [16, 128], strides = [1, 1]} : vector<16x384xf32> to vector<16x128xf32>
    %715 = arith.addf %713, %714 : vector<16x128xf32>
    %716 = arith.negf %715 : vector<16x128xf32>
    %717 = math.exp %716 : vector<16x128xf32>
    %cst_203 = arith.constant 1.000000e+00 : f32
    %718 = vector.broadcast %cst_203 : f32 to vector<16x128xf32>
    %719 = arith.addf %718, %717 : vector<16x128xf32>
    %720 = arith.divf %718, %719 : vector<16x128xf32>
    %721 = vector.extract_strided_slice %709 {offsets = [0, 128], sizes = [16, 128], strides = [1, 1]} : vector<16x384xf32> to vector<16x128xf32>
    %722 = vector.extract_strided_slice %712 {offsets = [0, 128], sizes = [16, 128], strides = [1, 1]} : vector<16x384xf32> to vector<16x128xf32>
    %723 = arith.addf %721, %722 : vector<16x128xf32>
    %724 = arith.negf %723 : vector<16x128xf32>
    %725 = math.exp %724 : vector<16x128xf32>
    %cst_204 = arith.constant 1.000000e+00 : f32
    %726 = vector.broadcast %cst_204 : f32 to vector<16x128xf32>
    %727 = arith.addf %726, %725 : vector<16x128xf32>
    %728 = arith.divf %726, %727 : vector<16x128xf32>
    %729 = vector.extract_strided_slice %709 {offsets = [0, 256], sizes = [16, 128], strides = [1, 1]} : vector<16x384xf32> to vector<16x128xf32>
    %730 = vector.extract_strided_slice %712 {offsets = [0, 256], sizes = [16, 128], strides = [1, 1]} : vector<16x384xf32> to vector<16x128xf32>
    %731 = vector.broadcast %4 : vector<1x128xf32> to vector<16x128xf32>
    %732 = arith.addf %730, %731 : vector<16x128xf32>
    %733 = arith.mulf %720, %732 : vector<16x128xf32>
    %734 = arith.addf %729, %733 : vector<16x128xf32>
    %735 = math.tanh %734 : vector<16x128xf32>
    %cst_205 = arith.constant 1.000000e+00 : f32
    %736 = vector.broadcast %cst_205 : f32 to vector<16x128xf32>
    %737 = arith.subf %736, %728 : vector<16x128xf32>
    %738 = arith.mulf %737, %735 : vector<16x128xf32>
    %739 = arith.mulf %728, %707 : vector<16x128xf32>
    %740 = arith.addf %738, %739 : vector<16x128xf32>
    %c15_i32 = arith.constant 15 : i32
    %741 = vector.broadcast %c15_i32 : i32 to vector<16x1xi32>
    %742 = arith.cmpi sgt, %7, %741 : vector<16x1xi32>
    %cst_206 = arith.constant 0.000000e+00 : f32
    %743 = vector.shape_cast %742 : vector<16x1xi1> to vector<16x1xi1>
    %744 = vector.broadcast %743 : vector<16x1xi1> to vector<16x128xi1>
    %745 = vector.broadcast %cst_206 : f32 to vector<16x128xf32>
    %746 = arith.select %744, %740, %745 : vector<16x128xi1>, vector<16x128xf32>
    %747 = arith.truncf %746 : vector<16x128xf32> to vector<16x128xbf16>
    %c15_207 = arith.constant 15 : index
    %c0_208 = arith.constant 0 : index
    %c0_209 = arith.constant 0 : index
    %748 = vector.load %arg8[%c15_207, %c0_208, %c0_209] : memref<16x16x128xbf16, #tpu.memory_space<vmem>>, vector<1x16x128xbf16>
    %749 = vector.shape_cast %748 : vector<1x16x128xbf16> to vector<16x128xbf16>
    %750 = vector.shape_cast %747 : vector<16x128xbf16> to vector<1x16x128xbf16>
    tpu.vector_store %arg8[%c15_207, %c0_208, %c0_209], %750 {strides = array<i32>} : memref<16x16x128xbf16, #tpu.memory_space<vmem>>, vector<1x16x128xbf16>,
    %751 = vector.shape_cast %742 : vector<16x1xi1> to vector<16x1xi1>
    %752 = vector.broadcast %751 : vector<16x1xi1> to vector<16x128xi1>
    %753 = arith.select %752, %740, %707 : vector<16x128xi1>, vector<16x128xf32>
    %c0_210 = arith.constant 0 : index
    %c0_211 = arith.constant 0 : index
    %754 = vector.load %arg10[%c0_210, %c0_211] : memref<16x128xf32, #tpu.memory_space<vmem>>, vector<16x128xf32>
    tpu.vector_store %arg10[%c0_210, %c0_211], %753 {strides = array<i32>} : memref<16x128xf32, #tpu.memory_space<vmem>>, vector<16x128xf32>,
    %c1_i32_212 = arith.constant 1 : i32
    %755 = arith.cmpi eq, %arg0, %c1_i32_212 : i32
    %756 = arith.extui %755 : i1 to i32
    %c0_i32_213 = arith.constant 0 : i32
    %757 = arith.cmpi ne, %756, %c0_i32_213 : i32
    scf.if %757 {
      %c0_214 = arith.constant 0 : index
      %c0_215 = arith.constant 0 : index
      %c0_216 = arith.constant 0 : index
      %758 = vector.load %arg9[%c0_214, %c0_215, %c0_216] : memref<1x16x128xf32, #tpu.memory_space<vmem>>, vector<1x16x128xf32>
      %759 = vector.shape_cast %758 : vector<1x16x128xf32> to vector<16x128xf32>
      %760 = vector.shape_cast %753 : vector<16x128xf32> to vector<1x16x128xf32>
      tpu.vector_store %arg9[%c0_214, %c0_215, %c0_216], %760 {strides = array<i32>} : memref<1x16x128xf32, #tpu.memory_space<vmem>>, vector<1x16x128xf32>,
    } else {
    }
    return
  }
  func.func @transform_0(%arg0: i32) -> (i32, i32, i32) {
    %c0_i32 = arith.constant 0 : i32
    %c0_i32_0 = arith.constant 0 : i32
    %c0_i32_1 = arith.constant 0 : i32
    return %arg0, %c0_i32, %c0_i32_0 : i32, i32, i32
  }
  func.func @transform_1(%arg0: i32) -> (i32, i32) {
    %c0_i32 = arith.constant 0 : i32
    %c0_i32_0 = arith.constant 0 : i32
    %c0_i32_1 = arith.constant 0 : i32
    return %c0_i32, %c0_i32_0 : i32, i32
  }
  func.func @transform_2(%arg0: i32) -> (i32, i32, i32) {
    %c0_i32 = arith.constant 0 : i32
    %c0_i32_0 = arith.constant 0 : i32
    %c0_i32_1 = arith.constant 0 : i32
    %c0_i32_2 = arith.constant 0 : i32
    return %c0_i32, %c0_i32_0, %c0_i32_1 : i32, i32, i32
  }
  func.func @transform_3(%arg0: i32) -> (i32, i32) {
    %c0_i32 = arith.constant 0 : i32
    %c0_i32_0 = arith.constant 0 : i32
    %c0_i32_1 = arith.constant 0 : i32
    return %c0_i32, %c0_i32_0 : i32, i32
  }
  func.func @transform_4(%arg0: i32) -> (i32, i32) {
    %c0_i32 = arith.constant 0 : i32
    %c0_i32_0 = arith.constant 0 : i32
    %c0_i32_1 = arith.constant 0 : i32
    return %c0_i32, %c0_i32_0 : i32, i32
  }
  func.func @transform_5(%arg0: i32) -> (i32, i32) {
    %c0_i32 = arith.constant 0 : i32
    %c0_i32_0 = arith.constant 0 : i32
    %c0_i32_1 = arith.constant 0 : i32
    return %c0_i32, %c0_i32_0 : i32, i32
  }
  func.func @transform_6(%arg0: i32) -> (i32, i32) {
    %c0_i32 = arith.constant 0 : i32
    %c0_i32_0 = arith.constant 0 : i32
    %c0_i32_1 = arith.constant 0 : i32
    return %c0_i32, %c0_i32_0 : i32, i32
  }
  func.func @transform_7(%arg0: i32) -> (i32, i32, i32) {
    %c0_i32 = arith.constant 0 : i32
    %c0_i32_0 = arith.constant 0 : i32
    %c0_i32_1 = arith.constant 0 : i32
    return %arg0, %c0_i32, %c0_i32_0 : i32, i32, i32
  }
  func.func @transform_8(%arg0: i32) -> (i32, i32, i32) {
    %c0_i32 = arith.constant 0 : i32
    %c0_i32_0 = arith.constant 0 : i32
    %c0_i32_1 = arith.constant 0 : i32
    %c0_i32_2 = arith.constant 0 : i32
    return %c0_i32, %c0_i32_0, %c0_i32_1 : i32, i32, i32
  }
}

</mosaic_0001>

<bundles_post_ra>
// kernel: context_rnn_pallas.1
= control target key start
LH: loop header
LB: loop body
LE: loop exit
PB: predicated region body
PF: predicated region fallthrough
CT: control target
= control target key end

     0   :  { %s8849_s27 = smov 0   ;;  %s12637_s0 = inlined_call_operand.vmem [shape: bf16[32,16,16], index: 0, kind: input, shape index: {}]   ;;  %s12638_s1 = inlined_call_operand.vmem [shape: s32[16,1], index: 1, kind: input, shape index: {}]   ;;  %s12639_s2 = inlined_call_operand.vmem [shape: f32[1,16,128], index: 2, kind: input, shape index: {}]   ;;  %s12640_s3 = inlined_call_operand.vmem [shape: f32[1,384], index: 3, kind: input, shape index: {}]   ;;  %s12641_s4 = inlined_call_operand.vmem [shape: f32[1,128], index: 4, kind: input, shape index: {}]   ;;  %s12642_s5 = inlined_call_operand.vmem [shape: bf16[16,384], index: 5, kind: input, shape index: {}]   ;;  %s12643_s6 = inlined_call_operand.vmem [shape: bf16[128,384], index: 6, kind: input, shape index: {}]   ;;  %s12644_s7 = inlined_call_operand.vmem [shape: bf16[32,16,128], index: 7, kind: output, shape index: {0}]   ;;  %s12645_s8 = inlined_call_operand.vmem [shape: f32[1,16,128], index: 8, kind: output, shape index: {1}]  }
   0x1 LB: > { %s8855_s28 = sadd.s32 4294967295, %s8801_s27   ;;  %p6191_p0 = scmp.ge.s32.totalorder %s8801_s27, 1  ;;  %s8801_s27 = sphi %s8849_s27, %s19_s27  }
   0x2   : > { %p262_p1 = scmp.lt.s32.totalorder %s8801_s27, 3 }
   0x4   : > { %p263_p2 = pnand %p6191_p0, %p262_p1 }
   0x6   : > { %266 = sbr.rel (%p263_p2) target bundleno = 3074 (0xc02), region = 48 }
   0xb   : > { %s8860_s29 = sshll.u32 %s8855_s28, 4  ;;  %p6198_p4 = scmp.ne.s32.totalorder %s8855_s28, 0 }
   0xc   : > { %p299_p3 = scmp.lt.s32.totalorder %s8860_s29, 31 }
   0xd   : > { %316 = sbr.rel (%p6198_p4) target bundleno = 21 (0x15), region = 52 }
   0xe   : > { %s300_s30 = scalar_select %p299_p3, %s8860_s29, 31 }
  0x10   : > { %s7957_s9 = sshll.u32 %s300_s30, 3 }
  0x11   : > { %s8867_s12 = scalar_lea.vmem %s12637_s0, %s7957_s9  ;;  %s8872_s15 = scalar_lea.vmem %s12644_s7, %s7957_s9 }
  0x12   : > { %v317_v0 = vld [vmem:[%s12639_s2] sm:$0xff]  ;;  %v318_v1 = vld [vmem:[%s12639_s2 + $0x8] sm:$0xff] }
  0x13   : > { %319 = vst [vmem:[#allocation2] sm:$0xff] %v317_v0 }
  0x14   : > { %320 = vst [vmem:[#allocation2 + $0x8] sm:$0xff] %v318_v1 }
  0x15 PF: > { %v6410_v2 = vld [vmem:[%s12643_s6 + $0xa8] sm:$0xf]  ;;  %v8000_v3 = vld [vmem:[%s12643_s6 + $0xb0] sm:$0xf0]  ;;  %v6398_v4 = vld [vmem:[%s12643_s6 + $0x90] sm:$0xf]  ;;  %v325_v16 = vstv %s8860_s29 }
  0x16   : > { %v6411_v5 = vor.u32 %v8000_v3, %v6410_v2  ;;  %v7997_v6 = vld [vmem:[%s12643_s6 + $0x98] sm:$0xf0]  ;;  %v6386_v8 = vld [vmem:[%s12643_s6 + $0x78] sm:$0xf]  ;;  %v7994_v9 = vld [vmem:[%s12643_s6 + $0x80] sm:$0xf0] }
  0x17   : > { %v6399_v7 = vor.u32 %v7997_v6, %v6398_v4  ;;  %v6387_v10 = vor.u32 %v7994_v9, %v6386_v8  ;;  %v6266_v11 = vld [vmem:[%s12642_s5] sm:$0xf]  ;;  %v7976_v12 = vld [vmem:[%s12642_s5 + $0x8] sm:$0xf0]  ;;  %v8803_v18 = vmov 0   ;;  %vm468_vm0 = vcmask 130048  }
  0x18   : > { %1049 = vmatpush.bf16.msra.mxu3 %v6411_v5  ;;  %v6374_v13 = vld [vmem:[%s12643_s6 + $0x60] sm:$0xf]  ;;  %v7991_v14 = vld [vmem:[%s12643_s6 + $0x68] sm:$0xf0]  ;;  %v6267_v15 = vor.u32 %v7976_v12, %v6266_v11  ;;  %8466 = vset.pattern.permute.xlu0 %v8803_v18  ;;  %v6362_v22 = vld [vmem:[%s12643_s6 + $0x48] sm:$0xf] }
  0x19   : > { %v8913_v17 = vld [vmem:[%s8867_s12] sm:$0xff]  ;;  %8467 = vset.pattern.permute.xlu1 %v8803_v18  ;;  %8468 = vset.pattern.permute.xlu2 %v8803_v18  ;;  %v6375_v21 = vor.u32 %v7991_v14, %v6374_v13  ;;  %v7988_v23 = vld [vmem:[%s12643_s6 + $0x50] sm:$0xf0]  ;;  %v6350_v26 = vld [vmem:[%s12643_s6 + $0x30] sm:$0xf]  ;;  %p7954_p5 = scmp.ne.s32.totalorder %s8855_s28, 1 }
  0x1a   : > { %v321_v19 = vld [vmem:[%s12638_s1] sm:$0xff]  ;;  %524 = vmatpush.bf16.msra.mxu0 %v6267_v15  ;;  %v6363_v25 = vor.u32 %v7988_v23, %v6362_v22  ;;  %v7985_v27 = vld [vmem:[%s12643_s6 + $0x38] sm:$0xf0]  ;;  %v322_v28 = vld [vmem:[%s12638_s1 + $0x8] sm:$0xff] }
  0x1b   : > { %v8920_v20 = vsub.s32 %v321_v19, %v325_v16  ;;  %v8942_v29 = vsub.s32 %v322_v28, %v325_v16  ;;  %v6351_v30 = vor.u32 %v7985_v27, %v6350_v26  ;;  %v6338_v31 = vld [vmem:[%s12643_s6 + $0x18] sm:$0xf]  ;;  %v7982_v32 = vld [vmem:[%s12643_s6 + $0x20] sm:$0xf0]  ;;  %v6326_v35 = vld [vmem:[%s12643_s6] sm:$0xf] }
  0x1c   : > { %1050 = vmatpush.bf16.msra.mxu3 %v6399_v7  ;;  %v6339_v34 = vor.u32 %v7982_v32, %v6338_v31  ;;  %v7979_v36 = vld [vmem:[%s12643_s6 + $0x8] sm:$0xf0]  ;;  %v6412_v38 = vld [vmem:[%s12643_s6 + $0xb4] sm:$0xf0]  ;;  %v8964_v40 = vld [vmem:[#allocation2] sm:$0xff] }
  0x1d   : > { %vm1190_vm1 = vcmp.gt.s32.totalorder %v8920_v20, 0  ;;  %6276 = vmatmul.msk.bf16.vlgmr.msra.gmra.mxu0 %vm468_vm0, %v8913_v17  ;;  %vm1191_vm2 = vcmp.gt.s32.totalorder %v8942_v29, 0  ;;  %v7999_v37 = vld [vmem:[%s12643_s6 + $0xac] sm:$0xf]  ;;  %v6327_v39 = vor.u32 %v7979_v36, %v6326_v35  ;;  %vm2170_vm3 = vcmp.gt.s32.totalorder %v8920_v20, 3 }
  0x1e   : > { %v1192_v24 = vsel %vm1190_vm1, 1, %v8803_v18  ;;  %v1193_v33 = vsel %vm1191_vm2, 1, %v8803_v18  ;;  %v8966_v41 = vld [vmem:[#allocation2 + $0x8] sm:$0xff]  ;;  %v6415_v42 = vor.u32 %v7999_v37, %v6412_v38  ;;  %v7996_v43 = vld [vmem:[%s12643_s6 + $0x94] sm:$0xf]  ;;  %v2172_v44 = vsel %vm2170_vm3, 1, %v8803_v18 }
  0x1f   : > { %1195 = vperm.xlu0 %8466, %v1192_v24   ;;  %v6400_v45 = vld [vmem:[%s12643_s6 + $0x9c] sm:$0xf0]  ;;  %v7975_v46 = vld [vmem:[%s12642_s5 + $0x4] sm:$0xf]  ;;  %v6268_v47 = vld [vmem:[%s12642_s5 + $0xc] sm:$0xf0]  ;;  %v8984_v48 = vpack.c.bf16 %v8966_v41, %v8964_v40 }
  0x20   : > { %1051 = vmatpush.bf16.msra.mxu3 %v6387_v10  ;;  %v6271_v49 = vor.u32 %v7975_v46, %v6268_v47  ;;  %v6403_v50 = vor.u32 %v7996_v43, %v6400_v45  ;;  %v7993_v51 = vld [vmem:[%s12643_s6 + $0x7c] sm:$0xf]  ;;  %v6388_v52 = vld [vmem:[%s12643_s6 + $0x84] sm:$0xf0]  ;;  %vm2498_vm4 = vcmp.gt.s32.totalorder %v8942_v29, 4  ;;  %vm3151_vm5 = vcmp.gt.s32.totalorder %v8920_v20, 6 }
  0x21   : > { %v6391_v53 = vor.u32 %v7993_v51, %v6388_v52  ;;  %v2500_v54 = vsel %vm2498_vm4, 1, %v8803_v18  ;;  %v7990_v55 = vld [vmem:[%s12643_s6 + $0x64] sm:$0xf]  ;;  %v6376_v56 = vld [vmem:[%s12643_s6 + $0x6c] sm:$0xf0]  ;;  %v3153_v61 = vsel %vm3151_vm5, 1, %v8803_v18 }
  0x22   : > { %613 = vmatpush.bf16.msra.mxu1 %v6271_v49  ;;  %v6379_v57 = vor.u32 %v7990_v55, %v6376_v56  ;;  %v7987_v58 = vld [vmem:[%s12643_s6 + $0x4c] sm:$0xf]  ;;  %v6364_v59 = vld [vmem:[%s12643_s6 + $0x54] sm:$0xf0]  ;;  %v7984_v62 = vld [vmem:[%s12643_s6 + $0x34] sm:$0xf] }
  0x23   : > { %v6367_v60 = vor.u32 %v7987_v58, %v6364_v59  ;;  %v6352_v63 = vld [vmem:[%s12643_s6 + $0x3c] sm:$0xf0]  ;;  %v6274_v1 = vld [vmem:[%s12642_s5 + $0x8] sm:$0xf]  ;;  %v7977_v2 = vld [vmem:[%s12642_s5 + $0x10] sm:$0xf0] }
  0x24   : > { %1052 = vmatpush.bf16.msra.mxu3 %v6375_v21  ;;  %v6355_v0 = vor.u32 %v7984_v62, %v6352_v63  ;;  %v7981_v3 = vld [vmem:[%s12643_s6 + $0x1c] sm:$0xf]  ;;  %v6340_v4 = vld [vmem:[%s12643_s6 + $0x24] sm:$0xf0]  ;;  %v6275_v5 = vor.u32 %v7977_v2, %v6274_v1  ;;  %vm3479_vm6 = vcmp.gt.s32.totalorder %v8942_v29, 7  ;;  %vm4132_vm7 = vcmp.gt.s32.totalorder %v8920_v20, 9 }
  0x25   : > { %6292 = vmatmul.msk.bf16.vlgmr.msra.gmra.mxu1 %vm468_vm0, %v8913_v17  ;;  %v6343_v6 = vor.u32 %v7981_v3, %v6340_v4  ;;  %v3481_v7 = vsel %vm3479_vm6, 1, %v8803_v18  ;;  %v7978_v8 = vld [vmem:[%s12643_s6 + $0x4] sm:$0xf]  ;;  %v6328_v9 = vld [vmem:[%s12643_s6 + $0xc] sm:$0xf0]  ;;  %v4134_v16 = vsel %vm4132_vm7, 1, %v8803_v18 }
  0x26   : > { %702 = vmatpush.bf16.msra.mxu2 %v6275_v5  ;;  %v6418_v10 = vld [vmem:[%s12643_s6 + $0xb0] sm:$0xf]  ;;  %v8001_v11 = vld [vmem:[%s12643_s6 + $0xb8] sm:$0xf0]  ;;  %v6331_v12 = vor.u32 %v7978_v8, %v6328_v9  ;;  %v6406_v14 = vld [vmem:[%s12643_s6 + $0x98] sm:$0xf] }
  0x27   : > { %1198 = vperm.xlu0 %8466, %v1193_v33   ;;  %v6419_v13 = vor.u32 %v8001_v11, %v6418_v10  ;;  %v7998_v15 = vld [vmem:[%s12643_s6 + $0xa0] sm:$0xf0]  ;;  %v7995_v21 = vld [vmem:[%s12643_s6 + $0x88] sm:$0xf0]  ;;  %vm4460_vm8 = vcmp.gt.s32.totalorder %v8942_v29, 10  ;;  %vm5113_vm9 = vcmp.gt.s32.totalorder %v8920_v20, 12 }
  0x28   : > { %1053 = vmatpush.bf16.msra.mxu3 %v6363_v25  ;;  %v6407_v19 = vor.u32 %v7998_v15, %v6406_v14  ;;  %v6382_v23 = vld [vmem:[%s12643_s6 + $0x68] sm:$0xf]  ;;  %v7992_v24 = vld [vmem:[%s12643_s6 + $0x70] sm:$0xf0]  ;;  %v4462_v25 = vsel %vm4460_vm8, 1, %v8803_v18  ;;  %v5115_v33 = vsel %vm5113_vm9, 1, %v8803_v18 }
  0x29   : > { %6308 = vmatmul.msk.bf16.vlgmr.msra.gmra.mxu2 %vm468_vm0, %v8913_v17  ;;  %v6394_v17 = vld [vmem:[%s12643_s6 + $0x80] sm:$0xf]  ;;  %v6383_v26 = vor.u32 %v7992_v24, %v6382_v23  ;;  %v6370_v27 = vld [vmem:[%s12643_s6 + $0x50] sm:$0xf]  ;;  %v7989_v28 = vld [vmem:[%s12643_s6 + $0x58] sm:$0xf0] }
  0x2a   : > { %v6395_v22 = vor.u32 %v7995_v21, %v6394_v17  ;;  %v6358_v31 = vld [vmem:[%s12643_s6 + $0x38] sm:$0xf]  ;;  %v7986_v32 = vld [vmem:[%s12643_s6 + $0x40] sm:$0xf0]  ;;  %v6346_v35 = vld [vmem:[%s12643_s6 + $0x20] sm:$0xf] }
  0x2b   : > { %v7983_v36 = vld [vmem:[%s12643_s6 + $0x28] sm:$0xf0]  ;;  %vm5441_vm10 = vcmp.gt.s32.totalorder %v8942_v29, 13  ;;  %v6334_v38 = vld [vmem:[%s12643_s6 + $0x8] sm:$0xf]  ;;  %vm6094_vm11 = vcmp.gt.s32.totalorder %v8920_v20, 15 }
  0x2c   : > { %1054 = vmatpush.bf16.msra.mxu3 %v6351_v30  ;;  %v6371_v30 = vor.u32 %v7989_v28, %v6370_v27  ;;  %v6347_v37 = vor.u32 %v7983_v36, %v6346_v35  ;;  %v6510_v45 = vld [vmem:[%s12643_s6 + $0xa8] sm:$0xf]  ;;  %v8024_v46 = vld [vmem:[%s12643_s6 + $0xb0] sm:$0xf0]  ;;  %v9108_v49 = vld [vmem:[%s12640_s3] sm:$0x7] }
  0x2d   : > { %v6511_v47 = vor.u32 %v8024_v46, %v6510_v45  ;;  %v9117_v52 = vperm.slane %v9108_v49, 0  ;;  %v8018_v55 = vld [vmem:[%s12643_s6 + $0x80] sm:$0xf0]  ;;  %v6474_v59 = vld [vmem:[%s12643_s6 + $0x60] sm:$0xf]  ;;  %v9156_v15 = vperm.slane %v9108_v49, 1 }
  0x2e   : > { %v8012_v1 = vld [vmem:[%s12643_s6 + $0x50] sm:$0xf0]  ;;  %v6438_v11 = vld [vmem:[%s12643_s6 + $0x18] sm:$0xf]  ;;  %v8003_v17 = vld [vmem:[%s12643_s6 + $0x8] sm:$0xf0] }
  0x2f   : > { %2175 = vperm.xlu0 %8466, %v2172_v44   ;;  %v6096_v44 = vsel %vm6094_vm11, 1, %v8803_v18  ;;  %v8023_v24 = vld [vmem:[%s12643_s6 + $0xac] sm:$0xf]  ;;  %v8014_v45 = vld [vmem:[%s12643_s6 + $0x64] sm:$0xf]  ;;  %vm1516_vm12 = vcmp.gt.s32.totalorder %v8920_v20, 1 }
  0x30   : > { %1055 = vmatpush.bf16.msra.mxu3 %v6339_v34  ;;  %v6359_v34 = vor.u32 %v7986_v32, %v6358_v31  ;;  %v6500_v31 = vld [vmem:[%s12643_s6 + $0x9c] sm:$0xf0]  ;;  %v6476_v46 = vld [vmem:[%s12643_s6 + $0x6c] sm:$0xf0]  ;;  %vm1517_vm13 = vcmp.gt.s32.totalorder %v8942_v29, 1  ;;  %vm2171_vm2 = vcmp.gt.s32.totalorder %v8942_v29, 3 }
  0x34   : > { %1056 = vmatpush.bf16.msra.mxu3 %v6327_v39  ;;  %v7980_v39 = vld [vmem:[%s12643_s6 + $0x10] sm:$0xf0] }
  0x35   : > { %v6335_v43 = vor.u32 %v7980_v39, %v6334_v38  ;;  %v8017_v38 = vld [vmem:[%s12643_s6 + $0x7c] sm:$0xf]  ;;  %v6488_v39 = vld [vmem:[%s12643_s6 + $0x84] sm:$0xf0] }
  0x37   : > { %1057 = vmatmul.bf16.vlgmr.msra.gmra.mxu3 %v8984_v48  ;;  %2505 = vperm.xlu0 %8466, %v2500_v54   ;;  %v6486_v54 = vld [vmem:[%s12643_s6 + $0x78] sm:$0xf] }
  0x38   : > { %1063 = vmatpush.bf16.msrb.mxu3 %v6415_v42  ;;  %v5443_v42 = vsel %vm5441_vm10, 1, %v8803_v18  ;;  %v6487_v56 = vor.u32 %v8018_v55, %v6486_v54  ;;  %vm2824_vm10 = vcmp.gt.s32.totalorder %v8920_v20, 5 }
  0x3c   : > { %1064 = vmatpush.bf16.msrb.mxu3 %v6403_v50  ;;  %v8021_v50 = vld [vmem:[%s12643_s6 + $0x98] sm:$0xf0] }
  0x3f   : > { %3156 = vperm.xlu0 %8466, %v3153_v61   ;;  %v7960_v61 = vld [vmem:[%s8867_s12 + $0x8] sm:$0xff] }
  0x40   : > { %1065 = vmatpush.bf16.msrb.mxu3 %v6391_v53  ;;  %6277 = vmatmul.msk.bf16.gmra.mxu0 %vm468_vm0, %v7960_v61 }
  0x41   : > { %6293 = vmatmul.msk.bf16.gmra.mxu1 %vm468_vm0, %v7960_v61  ;;  %6309 = vmatmul.msk.bf16.gmra.mxu2 %vm468_vm0, %v7960_v61  ;;  %v1518_v61 = vsel %vm1516_vm12, 1, %v8803_v18 }
  0x42   : > { %1521 = vperm.xlu1 %8467, %v1518_v61   ;;  %v8046_v61 = vld [vmem:[%s12643_s6 + $0xa0] sm:$0xf0] }
  0x44   : > { %1066 = vmatpush.bf16.msrb.mxu3 %v6379_v57 }
  0x47   : > { %3486 = vperm.xlu0 %8466, %v3481_v7   ;;  %v8009_v7 = vld [vmem:[%s12643_s6 + $0x38] sm:$0xf0] }
  0x48   : > { %1067 = vmatpush.bf16.msrb.mxu3 %v6367_v60  ;;  %v8015_v60 = vld [vmem:[%s12643_s6 + $0x68] sm:$0xf0] }
  0x49   : > { %v6475_v62 = vor.u32 %v8015_v60, %v6474_v59  ;;  %v6464_v59 = vld [vmem:[%s12643_s6 + $0x54] sm:$0xf0] }
  0x4c   : > { %1068 = vmatpush.bf16.msrb.mxu3 %v6355_v0  ;;  %v6462_v0 = vld [vmem:[%s12643_s6 + $0x48] sm:$0xf] }
  0x4d   : > { %v6463_v3 = vor.u32 %v8012_v1, %v6462_v0  ;;  %v6452_v0 = vld [vmem:[%s12643_s6 + $0x3c] sm:$0xf0] }
  0x4f   : > { %4137 = vperm.xlu0 %8466, %v4134_v16  }
  0x50   : > { %1069 = vmatpush.bf16.msrb.mxu3 %v6343_v6  ;;  %v6450_v6 = vld [vmem:[%s12643_s6 + $0x30] sm:$0xf] }
  0x51   : > { %v6451_v9 = vor.u32 %v8009_v7, %v6450_v6  ;;  %v8049_v6 = vld [vmem:[%s12643_s6 + $0xb8] sm:$0xf0] }
  0x52   : > { %v8005_v7 = vld [vmem:[%s12643_s6 + $0x1c] sm:$0xf] }
  0x54   : > { %1070 = vmatpush.bf16.msrb.mxu3 %v6331_v12  ;;  %v8006_v12 = vld [vmem:[%s12643_s6 + $0x20] sm:$0xf0] }
  0x57   : > { %1071 = vmatmul.bf16.vlgmr.msrb.gmra.mxu3 %v8984_v48  ;;  %4467 = vperm.xlu0 %8466, %v4462_v25   ;;  %v6512_v25 = vld [vmem:[%s12643_s6 + $0xb4] sm:$0xf0] }
  0x58   : > { %1077 = vmatpush.bf16.msra.mxu3 %v6419_v13  ;;  %v6439_v13 = vor.u32 %v8006_v12, %v6438_v11  ;;  %v6440_v12 = vld [vmem:[%s12643_s6 + $0x24] sm:$0xf0] }
  0x5c   : > { %1078 = vmatpush.bf16.msra.mxu3 %v6407_v19  ;;  %v6426_v19 = vld [vmem:[%s12643_s6] sm:$0xf] }
  0x5d   : > { %v6427_v23 = vor.u32 %v8003_v17, %v6426_v19  ;;  %v8002_v17 = vld [vmem:[%s12643_s6 + $0x4] sm:$0xf] }
  0x5f   : > { %5118 = vperm.xlu0 %8466, %v5115_v33  }
  0x60   : > { %1079 = vmatpush.bf16.msra.mxu3 %v6395_v22  ;;  %v7961_v22 = vld [vmem:[%s8867_s12 + $0x10] sm:$0xff] }
  0x61   : > { %6278 = vmatmul.msk.bf16.gmra.mxu0 %vm468_vm0, %v7961_v22  ;;  %6294 = vmatmul.msk.bf16.gmra.mxu1 %vm468_vm0, %v7961_v22 }
  0x62   : > { %6310 = vmatmul.msk.bf16.gmra.mxu2 %vm468_vm0, %v7961_v22 }
  0x64   : > { %1080 = vmatpush.bf16.msra.mxu3 %v6383_v26  ;;  %v6515_v26 = vor.u32 %v8023_v24, %v6512_v25 }
  0x67   : > { %5448 = vperm.xlu0 %8466, %v5443_v42  }
  0x68   : > { %1081 = vmatpush.bf16.msra.mxu3 %v6371_v30  ;;  %v8020_v30 = vld [vmem:[%s12643_s6 + $0x94] sm:$0xf] }
  0x69   : > { %v6503_v33 = vor.u32 %v8020_v30, %v6500_v31  ;;  %v9272_v30 = vld [vmem:[%s12641_s4] ss:$0 sm:$0xff] }
  0x6c   : > { %1082 = vmatpush.bf16.msra.mxu3 %v6359_v34 }
  0x6f   : > { %6099 = vperm.xlu0 %8466, %v6096_v44  }
  0x70   : > { %1083 = vmatpush.bf16.msra.mxu3 %v6347_v37 }
  0x74   : > { %1084 = vmatpush.bf16.msra.mxu3 %v6335_v43  ;;  %v6491_v43 = vor.u32 %v8017_v38, %v6488_v39 }
  0x77   : > { %1085 = vmatmul.bf16.vlgmr.msra.gmra.mxu3 %v8984_v48  ;;  %v6498_v48 = vld [vmem:[%s12643_s6 + $0x90] sm:$0xf] }
  0x78   : > { %1378 = vmatpush.bf16.msrb.mxu3 %v6511_v47  ;;  %v6499_v51 = vor.u32 %v8021_v50, %v6498_v48  ;;  %v6479_v50 = vor.u32 %v8014_v45, %v6476_v46 }
  0x7c   : > { %1379 = vmatpush.bf16.msrb.mxu3 %v6499_v51 }
  0x80   : > { %1380 = vmatpush.bf16.msrb.mxu3 %v6487_v56  ;;  %v7962_v56 = vld [vmem:[%s8867_s12 + $0x18] sm:$0xff] }
  0x81   : > { %6279 = vmatmul.msk.bf16.gmra.mxu0 %vm468_vm0, %v7962_v56  ;;  %6295 = vmatmul.msk.bf16.gmra.mxu1 %vm468_vm0, %v7962_v56 }
  0x82   : > { %6311 = vmatmul.msk.bf16.gmra.mxu2 %vm468_vm0, %v7962_v56 }
  0x84   : > { %1381 = vmatpush.bf16.msrb.mxu3 %v6475_v62 }
  0x88   : > { %1382 = vmatpush.bf16.msrb.mxu3 %v6463_v3 }
  0x8c   : > { %1383 = vmatpush.bf16.msrb.mxu3 %v6451_v9 }
  0x90   : > { %1384 = vmatpush.bf16.msrb.mxu3 %v6439_v13  ;;  %v6443_v13 = vor.u32 %v8005_v7, %v6440_v12 }
  0x94   : > { %1385 = vmatpush.bf16.msrb.mxu3 %v6427_v23 }
  0x98   : > { %1392 = vmatpush.bf16.msra.mxu3 %v6515_v26 }
  0x9a   : > { %v526_v53 = vpop.f32.mrf.mxu0 }
  0x9b   : > { %v527_v57 = vadd.f32 %v526_v53, %v9117_v52 }
  0x9c   : > { %1393 = vmatpush.bf16.msra.mxu3 %v6503_v33 }
  0xa0   : > { %1394 = vmatpush.bf16.msra.mxu3 %v6491_v43 }
  0xa2   : > { %v528_v2 = vpop.f32.mrf.mxu0  ;;  %v615_v14 = vpop.f32.mrf.mxu1 }
  0xa3   : > { %v529_v5 = vadd.f32 %v528_v2, %v9117_v52  ;;  %v616_v27 = vadd.f32 %v615_v14, %v9156_v15  ;;  %v1519_v14 = vsel %vm1517_vm13, 1, %v8803_v18 }
  0xa4   : > { %1395 = vmatpush.bf16.msra.mxu3 %v6479_v50  ;;  %1524 = vperm.xlu1 %8467, %v1519_v14  }
  0xaa   : > { %v617_v35 = vpop.f32.mrf.mxu1 }
  0xab   : > { %v618_v42 = vadd.f32 %v617_v35, %v9156_v15 }
  0xba   : > { %v1058_v58 = vpop.f32.mrf.mxu3 }
  0xbb   : > { %v1091_v63 = vadd.f32 %v1058_v58, %v527_v57  ;;  %v8011_v57 = vld [vmem:[%s12643_s6 + $0x4c] sm:$0xf] }
  0xbc   : > { %v6467_v60 = vor.u32 %v8011_v57, %v6464_v59 }
  0xbd   : > { %v6420_v4 = vmul.f32 -1.442695, %v1091_v63  ;;  %v8008_v63 = vld [vmem:[%s12643_s6 + $0x34] sm:$0xf] }
  0xbe   : > { %1396 = vmatpush.bf16.msra.mxu3 %v6467_v60  ;;  %v6455_v2 = vor.u32 %v8008_v63, %v6452_v0 }
  0xbf   : > { %8470 = vpow2.f32 %v6420_v4 }
  0xc2   : > { %v1060_v8 = vpop.f32.mrf.mxu3  ;;  %1397 = vmatpush.bf16.msra.mxu3 %v6455_v2  ;;  %v2826_v2 = vsel %vm2824_vm10, 1, %v8803_v18  ;;  %vm6095_vm10 = vcmp.gt.s32.totalorder %v8942_v29, 15 }
  0xc3   : > { %v1092_v10 = vadd.f32 %v1060_v8, %v529_v5  ;;  %v6620_v5 = vld [vmem:[%s12643_s6 + $0xb0] sm:$0xf] }
  0xc4   : > { %v6621_v11 = vor.u32 %v8049_v6, %v6620_v5  ;;  %v6470_v6 = vld [vmem:[%s12643_s6 + $0x50] sm:$0xf] }
  0xc5   : > { %v6421_v16 = vmul.f32 -1.442695, %v1092_v10  ;;  %v8471_v21 = vpop.eup %8470 }
  0xc6   : > { %v9173_v28 = vadd.f32 1.0, %v8471_v21  ;;  %1733 = vmatpush.bf16.msrb.mxu0 %v6621_v11  ;;  %1398 = vmatpush.bf16.msra.mxu3 %v6443_v13  ;;  %v6428_v21 = vld [vmem:[%s12643_s6 + $0xc] sm:$0xf0] }
  0xc7   : > { %8472 = vpow2.f32 %v6421_v16  ;;  %v6431_v25 = vor.u32 %v8002_v17, %v6428_v21  ;;  %v1196_v21 = vpop.permute.xlu0 %1195 }
  0xc8   : > { %8474 = vrcp.f32 %v9173_v28  ;;  %vm1106_vm14 = vweird.f32 %v9173_v28  ;;  %v1112_v19 = vand.u32 2147483648, %v9173_v28  ;;  %v1110_v23 = vand.u32 2147483647, %v9173_v28 }
  0xca   : > { %v1113_v33 = vor.u32 1.1754944e-38, %v1112_v19  ;;  %1399 = vmatpush.bf16.msra.mxu3 %v6431_v25  ;;  %vm9281_vm3 = vcmp.eq.f32.partialorder %v1110_v23, 8.507059e+37 }
  0xcd   : > { %v8473_v37 = vpop.eup %8472 }
  0xce   : > { %v9191_v44 = vadd.f32 1.0, %v8473_v37  ;;  %v9199_v47 = vpop.eup %8474  ;;  %v2173_v37 = vsel %vm2171_vm2, 1, %v8803_v18 }
  0xcf   : > { %v1102_v55 = vmul.f32 %v9199_v47, %v9173_v28  ;;  %vm1107_vm15 = vweird.f32 %v9199_v47  ;;  %2178 = vperm.xlu1 %8467, %v2173_v37   ;;  %v8025_v37 = vld [vmem:[%s12643_s6 + $0xb8] sm:$0xf0] }
  0xd0   : > { %vm9262_vm1 = vmor %vm1106_vm14, %vm1107_vm15  ;;  %vm1121_vm4 = vweird.f32 %v9191_v44  ;;  %v1127_v46 = vand.u32 2147483648, %v9191_v44 }
  0xd1   : > { %v1103_v62 = vsub.f32 1.0, %v1102_v55 }
  0xd2   : > { %v1128_v57 = vor.u32 1.1754944e-38, %v1127_v46 }
  0xd3   : > { %v1104_v4 = vmul.f32 %v9199_v47, %v1103_v62 }
  0xd5   : > { %v1105_v22 = vadd.f32 %v9199_v47, %v1104_v4 }
  0xd7   : > { %v1109_v35 = vsel %vm9262_vm1, %v9199_v47, %v1105_v22  ;;  %2829 = vperm.xlu1 %8467, %v2826_v2   ;;  %v7964_v22 = vld [vmem:[%s8867_s12 + $0x28] sm:$0xff]  ;;  %vm3152_vm1 = vcmp.gt.s32.totalorder %v8942_v29, 6 }
  0xd8   : > { %v1114_v50 = vsel %vm9281_vm3, %v1113_v33, %v1109_v35  ;;  %v3154_v25 = vsel %vm3152_vm1, 1, %v8803_v18  ;;  %vm3805_vm3 = vcmp.gt.s32.totalorder %v8920_v20, 8  ;;  %v6482_v2 = vld [vmem:[%s12643_s6 + $0x68] sm:$0xf] }
  0xda   : > { %v1072_v32 = vpop.f32.mrf.mxu3 }
  0xdb   : > { %v1131_v34 = vadd.f32 %v1072_v32, %v616_v27  ;;  %v9267_v27 = vperm.slane %v9108_v49, 2  ;;  %v704_v32 = vpop.f32.mrf.mxu2 }
  0xdd   : > { %v6422_v36 = vmul.f32 -1.442695, %v1131_v34  ;;  %v7963_v34 = vld [vmem:[%s8867_s12 + $0x20] sm:$0xff]  ;;  %v705_v43 = vadd.f32 %v704_v32, %v9267_v27 }
  0xde   : > { %6280 = vmatmul.msk.bf16.gmra.mxu0 %vm468_vm0, %v7963_v34  ;;  %6296 = vmatmul.msk.bf16.gmra.mxu1 %vm468_vm0, %v7963_v34 }
  0xdf   : > { %8476 = vpow2.f32 %v6422_v36  ;;  %6312 = vmatmul.msk.bf16.gmra.mxu2 %vm468_vm0, %v7963_v34  ;;  %3159 = vperm.xlu1 %8467, %v3154_v25   ;;  %v6572_v25 = vld [vmem:[%s12643_s6 + $0x50] sm:$0xf] }
  0xe0   : > { %8478 = vrcp.f32 %v9191_v44 }
  0xe2   : > { %v1074_v48 = vpop.f32.mrf.mxu3 }
  0xe3   : > { %v1132_v51 = vadd.f32 %v1074_v48, %v618_v42  ;;  %v1125_v42 = vand.u32 2147483647, %v9191_v44  ;;  %v706_v4 = vpop.f32.mrf.mxu2 }
  0xe4   : > { %v707_v13 = vadd.f32 %v706_v4, %v9267_v27 }
  0xe5   : > { %v8477_v53 = vpop.eup %8476  ;;  %v6423_v54 = vmul.f32 -1.442695, %v1132_v51  ;;  %vm9309_vm8 = vcmp.eq.f32.partialorder %v1125_v42, 8.507059e+37 }
  0xe6   : > { %v9208_v58 = vadd.f32 1.0, %v8477_v53  ;;  %v9225_v1 = vpop.eup %8478 }
  0xe7   : > { %8480 = vpow2.f32 %v6423_v54  ;;  %v1117_v10 = vmul.f32 %v9225_v1, %v9191_v44  ;;  %vm1122_vm5 = vweird.f32 %v9225_v1  ;;  %v6608_v44 = vld [vmem:[%s12643_s6 + $0x98] sm:$0xf]  ;;  %v8022_v54 = vld [vmem:[%s12643_s6 + $0xa0] sm:$0xf0] }
  0xe8   : > { %8482 = vrcp.f32 %v9208_v58  ;;  %vm9304_vm6 = vmor %vm1121_vm4, %vm1122_vm5  ;;  %vm1146_vm7 = vweird.f32 %v9208_v58  ;;  %v1152_v62 = vand.u32 2147483648, %v9208_v58  ;;  %v6609_v0 = vor.u32 %v8046_v61, %v6608_v44  ;;  %v8019_v44 = vld [vmem:[%s12643_s6 + $0x88] sm:$0xf0]  ;;  %v6584_v61 = vld [vmem:[%s12643_s6 + $0x68] sm:$0xf] }
  0xe9   : > { %v1118_v24 = vsub.f32 1.0, %v1117_v10  ;;  %vm1200_vm4 = vcmp.eq.s32.totalorder %v1196_v21, 1  ;;  %v8004_v21 = vld [vmem:[%s12643_s6 + $0x10] sm:$0xf0] }
  0xea   : > { %1734 = vmatpush.bf16.msrb.mxu0 %v6609_v0  ;;  %v1153_v11 = vor.u32 1.1754944e-38, %v1152_v62  ;;  %v8040_v62 = vld [vmem:[%s12643_s6 + $0x70] sm:$0xf0] }
  0xeb   : > { %v1119_v36 = vmul.f32 %v9225_v1, %v1118_v24  ;;  %v6585_v0 = vor.u32 %v8040_v62, %v6584_v61  ;;  %v8034_v61 = vld [vmem:[%s12643_s6 + $0x40] sm:$0xf0] }
  0xed   : > { %v8481_v3 = vpop.eup %8480  ;;  %v1120_v53 = vadd.f32 %v9225_v1, %v1119_v36  ;;  %v6518_v36 = vld [vmem:[%s12643_s6 + $0xb0] sm:$0xf] }
  0xee   : > { %v9237_v8 = vpop.eup %8482  ;;  %v9239_v9 = vadd.f32 1.0, %v8481_v3  ;;  %v1150_v3 = vand.u32 2147483647, %v9208_v58  ;;  %6281 = vmatmul.msk.bf16.gmra.mxu0 %vm468_vm0, %v7964_v22  ;;  %6297 = vmatmul.msk.bf16.gmra.mxu1 %vm468_vm0, %v7964_v22 }
  0xef   : > { %v1142_v16 = vmul.f32 %v9237_v8, %v9208_v58  ;;  %vm1147_vm9 = vweird.f32 %v9237_v8  ;;  %v1124_v63 = vsel %vm9304_vm6, %v9225_v1, %v1120_v53  ;;  %6313 = vmatmul.msk.bf16.gmra.mxu2 %vm468_vm0, %v7964_v22  ;;  %v6506_v53 = vld [vmem:[%s12643_s6 + $0x98] sm:$0xf]  ;;  %vm4133_vm6 = vcmp.gt.s32.totalorder %v8942_v29, 9 }
  0xf0   : > { %8484 = vrcp.f32 %v9239_v9  ;;  %vm9331_vm11 = vmor %vm1146_vm7, %vm1147_vm9  ;;  %v1129_v58 = vsel %vm9309_vm8, %v1128_v57, %v1124_v63  ;;  %v1167_v12 = vand.u32 2147483648, %v9239_v9  ;;  %vm1151_vm13 = vcmp.eq.f32.partialorder %v1150_v3, 8.507059e+37  ;;  %v8016_v3 = vld [vmem:[%s12643_s6 + $0x70] sm:$0xf0] }
  0xf1   : > { %v1143_v31 = vsub.f32 1.0, %v1142_v16  ;;  %vm1161_vm14 = vweird.f32 %v9239_v9  ;;  %v1165_v16 = vand.u32 2147483647, %v9239_v9  ;;  %v6507_v56 = vor.u32 %v8022_v54, %v6506_v53  ;;  %v6716_v53 = vld [vmem:[%s12643_s6 + $0xb4] sm:$0xf0] }
  0xf2   : > { %v1168_v24 = vor.u32 1.1754944e-38, %v1167_v12  ;;  %v4135_v57 = vsel %vm4133_vm6, 1, %v8803_v18  ;;  %vm4786_vm7 = vcmp.gt.s32.totalorder %v8920_v20, 11  ;;  %v6483_v4 = vor.u32 %v8016_v3, %v6482_v2  ;;  %v8042_v2 = vld [vmem:[%s12643_s6 + $0x80] sm:$0xf0] }
  0xf3   : > { %v1144_v47 = vmul.f32 %v9237_v8, %v1143_v31  ;;  %vm1166_vm2 = vcmp.eq.f32.partialorder %v1165_v16, 8.507059e+37  ;;  %vm5114_vm8 = vcmp.gt.s32.totalorder %v8942_v29, 12  ;;  %v8007_v16 = vld [vmem:[%s12643_s6 + $0x28] sm:$0xf0]  ;;  %vm5767_vm9 = vcmp.gt.s32.totalorder %v8920_v20, 14 }
  0xf4   : > { %v5769_v22 = vsel %vm5767_vm9, 1, %v8803_v18 }
  0xf5   : > { %v1145_v59 = vadd.f32 %v9237_v8, %v1144_v47 }
  0xf6   : > { %v9276_v28 = vpop.eup %8484 }
  0xf7   : > { %v1157_v38 = vmul.f32 %v9276_v28, %v9239_v9  ;;  %vm1162_vm12 = vweird.f32 %v9276_v28  ;;  %v1149_v10 = vsel %vm9331_vm11, %v9237_v8, %v1145_v59 }
  0xf8   : > { %vm1163_vm15 = vmor %vm1161_vm14, %vm1162_vm12  ;;  %v1154_v19 = vsel %vm1151_vm13, %v1153_v11, %v1149_v10  ;;  %v6458_v10 = vld [vmem:[%s12643_s6 + $0x38] sm:$0xf] }
  0xf9   : > { %v1158_v48 = vsub.f32 1.0, %v1157_v38  ;;  %v1182_v26 = vsub.f32 1.0, %v1154_v19  ;;  %v1186_v32 = vmul.f32 %v1154_v19, %v8964_v40  ;;  %v3807_v38 = vsel %vm3805_vm3, 1, %v8803_v18  ;;  %v7966_v11 = vld [vmem:[%s8867_s12 + $0x38] sm:$0xff] }
  0xfa   : > { %v1086_v39 = vpop.f32.mrf.mxu3  ;;  %3810 = vperm.xlu1 %8467, %v3807_v38  }
  0xfb   : > { %v1174_v45 = vadd.f32 %v9272_v30, %v1086_v39  ;;  %v1159_v60 = vmul.f32 %v9276_v28, %v1158_v48  ;;  %v1199_v39 = vpop.permute.xlu0 %1198 }
  0xfc   : > { %vm1201_vm5 = vcmp.eq.s32.totalorder %v1199_v39, 1  ;;  %v9481_v39 = vpop.f32.mrf.mxu1 }
  0xfd   : > { %v1176_v51 = vmul.f32 %v1174_v45, %v1114_v50  ;;  %v1160_v1 = vadd.f32 %v9276_v28, %v1159_v60  ;;  %v6494_v60 = vld [vmem:[%s12643_s6 + $0x80] sm:$0xf] }
  0xfe   : > { %v6495_v63 = vor.u32 %v8019_v44, %v6494_v60  ;;  %v8045_v60 = vld [vmem:[%s12643_s6 + $0x98] sm:$0xf0]  ;;  %v6560_v44 = vld [vmem:[%s12643_s6 + $0x38] sm:$0xf] }
  0xff   : > { %v1178_v55 = vadd.f32 %v1176_v51, %v705_v43  ;;  %v1164_v8 = vsel %vm1163_vm15, %v9276_v28, %v1160_v1  ;;  %v6519_v43 = vor.u32 %v8025_v37, %v6518_v36  ;;  %v7971_v37 = vld [vmem:[%s8867_s12 + $0x60] sm:$0xff] }
 0x100   : > { %v1169_v31 = vsel %vm1166_vm2, %v1168_v24, %v1164_v8  ;;  %v6097_v24 = vsel %vm6095_vm10, 1, %v8803_v18 }
 0x101   : > { %8486 = vtanh.f32 %v1178_v55  ;;  %v1183_v33 = vsub.f32 1.0, %v1169_v31  ;;  %v1187_v49 = vmul.f32 %v1169_v31, %v8966_v41  ;;  %v7965_v55 = vld [vmem:[%s8867_s12 + $0x30] sm:$0xff] }
 0x102   : > { %v1088_v5 = vpop.f32.mrf.mxu3  ;;  %6282 = vmatmul.msk.bf16.gmra.mxu0 %vm468_vm0, %v7965_v55  ;;  %4140 = vperm.xlu1 %8467, %v4135_v57  }
 0x103   : > { %v1175_v7 = vadd.f32 %v9272_v30, %v1088_v5  ;;  %6298 = vmatmul.msk.bf16.gmra.mxu1 %vm468_vm0, %v7965_v55  ;;  %6314 = vmatmul.msk.bf16.gmra.mxu2 %vm468_vm0, %v7965_v55  ;;  %v4788_v5 = vsel %vm4786_vm7, 1, %v8803_v18  ;;  %v6612_v55 = vld [vmem:[%s12643_s6 + $0xa8] sm:$0xf] }
 0x105   : > { %v1177_v14 = vmul.f32 %v1175_v7, %v1129_v58  ;;  %v8013_v7 = vld [vmem:[%s12643_s6 + $0x58] sm:$0xf0]  ;;  %v8010_v58 = vld [vmem:[%s12643_s6 + $0x40] sm:$0xf0] }
 0x106   : > { %v6471_v1 = vor.u32 %v8013_v7, %v6470_v6  ;;  %v6459_v12 = vor.u32 %v8010_v58, %v6458_v10  ;;  %v6576_v6 = vld [vmem:[%s12643_s6 + $0x60] sm:$0xf]  ;;  %v8039_v7 = vld [vmem:[%s12643_s6 + $0x68] sm:$0xf0] }
 0x107   : > { %v1179_v17 = vadd.f32 %v1177_v14, %v707_v13  ;;  %v8487_v23 = vpop.eup %8486  ;;  %v5116_v13 = vsel %vm5114_vm8, 1, %v8803_v18  ;;  %v6446_v14 = vld [vmem:[%s12643_s6 + $0x20] sm:$0xf]  ;;  %v6577_v58 = vor.u32 %v8039_v7, %v6576_v6  ;;  %v8068_v6 = vld [vmem:[%s12643_s6 + $0x94] sm:$0xf]  ;;  %vm1843_vm8 = vcmp.gt.s32.totalorder %v8920_v20, 2 }
 0x108   : > { %v1184_v9 = vmul.f32 %v8487_v23, %v1182_v26  ;;  %v6447_v19 = vor.u32 %v8007_v16, %v6446_v14  ;;  %v7967_v23 = vld [vmem:[%s8867_s12 + $0x40] sm:$0xff]  ;;  %v8037_v26 = vld [vmem:[%s12643_s6 + $0x58] sm:$0xf0]  ;;  %v8036_v14 = vld [vmem:[%s12643_s6 + $0x50] sm:$0xf0] }
 0x109   : > { %8488 = vtanh.f32 %v1179_v17  ;;  %v6434_v17 = vld [vmem:[%s12643_s6 + $0x8] sm:$0xf]  ;;  %v6573_v31 = vor.u32 %v8037_v26, %v6572_v25  ;;  %v6704_v7 = vld [vmem:[%s12643_s6 + $0x9c] sm:$0xf0] }
 0x10a   : > { %v1188_v28 = vadd.f32 %v1186_v32, %v1184_v9  ;;  %4791 = vperm.xlu1 %8467, %v4788_v5   ;;  %v6435_v8 = vor.u32 %v8004_v21, %v6434_v17  ;;  %v7968_v9 = vld [vmem:[%s8867_s12 + $0x48] sm:$0xff]  ;;  %v531_v32 = vpop.f32.mrf.mxu0  ;;  %v9531_v5 = vld [vmem:[%s8867_s12 + $0x70] sm:$0xff] }
 0x10b   : > { %v6552_v21 = vld [vmem:[%s12643_s6 + $0x30] sm:$0xf] }
 0x10c   : > { %v1202_v45 = vsel %vm1200_vm4, %v1188_v28, 0.0  ;;  %v9365_v47 = vsel %vm1200_vm4, %v1188_v28, %v8964_v40  ;;  %v6596_v40 = vld [vmem:[%s12643_s6 + $0x80] sm:$0xf] }
 0x10f   : > { %v8489_v34 = vpop.eup %8488 }
 0x110   : > { %v1185_v35 = vmul.f32 %v8489_v34, %v1183_v33  ;;  %v7969_v34 = vld [vmem:[%s8867_s12 + $0x50] sm:$0xff] }
 0x112   : > { %v1189_v42 = vadd.f32 %v1187_v49, %v1185_v35  ;;  %6283 = vmatmul.msk.bf16.gmra.mxu0 %vm468_vm0, %v7966_v11  ;;  %5121 = vperm.xlu1 %8467, %v5116_v13   ;;  %v9459_v33 = vpop.f32.mrf.mxu0  ;;  %v7970_v35 = vld [vmem:[%s8867_s12 + $0x58] sm:$0xff]  ;;  %v6564_v13 = vld [vmem:[%s12643_s6 + $0x48] sm:$0xf] }
 0x113   : > { %6299 = vmatmul.msk.bf16.gmra.mxu1 %vm468_vm0, %v7966_v11  ;;  %6315 = vmatmul.msk.bf16.gmra.mxu2 %vm468_vm0, %v7966_v11 }
 0x114   : > { %v1203_v46 = vsel %vm1201_vm5, %v1189_v42, 0.0  ;;  %v9368_v48 = vsel %vm1201_vm5, %v1189_v42, %v8966_v41  ;;  %v8043_v41 = vld [vmem:[%s12643_s6 + $0x88] sm:$0xf0] }
 0x115   : > { %v8365_v50 = vpack.c.bf16 %v1203_v46, %v1202_v45  ;;  %v1217_v51 = vpack.c.bf16 %v9368_v48, %v9365_v47  ;;  %v6597_v59 = vor.u32 %v8043_v41, %v6596_v40  ;;  %v8072_v45 = vld [vmem:[%s12643_s6 + $0xb0] sm:$0xf0]  ;;  %v7972_v46 = vld [vmem:[%s8867_s12 + $0x68] sm:$0xff]  ;;  %v9505_v41 = vpop.f32.mrf.mxu1 }
 0x116   : > { %v8048_v40 = vld [vmem:[%s12643_s6 + $0xb0] sm:$0xf0] }
 0x117   : > { %8366 = vst [vmem:[%s8872_s15] sm:$0xff] %v8365_v50   ;;  %1386 = vmatmul.bf16.vlgmr.msrb.gmra.mxu3 %v1217_v51  ;;  %1735 = vmatpush.bf16.msrb.mxu0 %v6597_v59  ;;  %v6600_v59 = vld [vmem:[%s12643_s6 + $0x90] sm:$0xf] }
 0x118   : > { %1406 = vmatpush.bf16.msrb.mxu3 %v6519_v43  ;;  %v6714_v43 = vld [vmem:[%s12643_s6 + $0xa8] sm:$0xf]  ;;  %v6601_v62 = vor.u32 %v8045_v60, %v6600_v59 }
 0x119   : > { %v6715_v50 = vor.u32 %v8072_v45, %v6714_v43  ;;  %v6528_v43 = vld [vmem:[%s12643_s6] sm:$0xf]  ;;  %v9578_v45 = vld [vmem:[%s8867_s12 + $0x78] sm:$0xff] }
 0x11a   : > { %5772 = vperm.xlu1 %8467, %v5769_v22   ;;  %v9464_v28 = vpop.f32.mrf.mxu0  ;;  %v534_v22 = vadd.f32 %v9459_v33, %v9117_v52  ;;  %v621_v33 = vadd.f32 %v9481_v39, %v9156_v15 }
 0x11b   : > { %1736 = vmatpush.bf16.msrb.mxu0 %v6585_v0  ;;  %2032 = vmatpush.bf16.msrb.mxu1 %v6715_v50  ;;  %v6588_v0 = vld [vmem:[%s12643_s6 + $0x78] sm:$0xf]  ;;  %v8047_v50 = vld [vmem:[%s12643_s6 + $0xac] sm:$0xf] }
 0x11c   : > { %1407 = vmatpush.bf16.msrb.mxu3 %v6507_v56  ;;  %v6613_v56 = vor.u32 %v8048_v40, %v6612_v55  ;;  %v6589_v3 = vor.u32 %v8042_v2, %v6588_v0  ;;  %v8069_v0 = vld [vmem:[%s12643_s6 + $0x98] sm:$0xf0]  ;;  %v6602_v2 = vld [vmem:[%s12643_s6 + $0x9c] sm:$0xf0] }
 0x11f   : > { %1737 = vmatpush.bf16.msrb.mxu0 %v6573_v31  ;;  %v6540_v31 = vld [vmem:[%s12643_s6 + $0x18] sm:$0xf] }
 0x120   : > { %1408 = vmatpush.bf16.msrb.mxu3 %v6495_v63  ;;  %v6561_v63 = vor.u32 %v8034_v61, %v6560_v44  ;;  %v8044_v61 = vld [vmem:[%s12643_s6 + $0x94] sm:$0xf] }
 0x122   : > { %6284 = vmatmul.msk.bf16.gmra.mxu0 %vm468_vm0, %v7967_v23  ;;  %6102 = vperm.xlu1 %8467, %v6097_v24   ;;  %v9468_v49 = vpop.f32.mrf.mxu0 }
 0x123   : > { %6300 = vmatmul.msk.bf16.gmra.mxu1 %vm468_vm0, %v7967_v23  ;;  %6316 = vmatmul.msk.bf16.gmra.mxu2 %vm468_vm0, %v7967_v23 }
 0x124   : > { %1409 = vmatpush.bf16.msrb.mxu3 %v6483_v4  ;;  %1738 = vmatpush.bf16.msrb.mxu0 %v6561_v63  ;;  %v9528_v4 = vpop.f32.mrf.mxu2  ;;  %v6702_v63 = vld [vmem:[%s12643_s6 + $0x90] sm:$0xf] }
 0x127   : > { %1400 = vmatmul.bf16.vlgmr.msra.gmra.mxu3 %v1217_v51 }
 0x128   : > { %1410 = vmatpush.bf16.msrb.mxu3 %v6471_v1  ;;  %v532_v1 = vadd.f32 %v531_v32, %v9117_v52 }
 0x12a   : > { %v9473_v36 = vpop.f32.mrf.mxu0 }
 0x12c   : > { %1411 = vmatpush.bf16.msrb.mxu3 %v6459_v12  ;;  %v9550_v17 = vpop.f32.mrf.mxu2 }
 0x130   : > { %1412 = vmatpush.bf16.msrb.mxu3 %v6447_v19  ;;  %v6565_v19 = vor.u32 %v8036_v14, %v6564_v13  ;;  %v8031_v14 = vld [vmem:[%s12643_s6 + $0x28] sm:$0xf0] }
 0x132   : > { %6285 = vmatmul.msk.bf16.gmra.mxu0 %vm468_vm0, %v7968_v9  ;;  %v9477_v38 = vpop.f32.mrf.mxu0 }
 0x133   : > { %6301 = vmatmul.msk.bf16.gmra.mxu1 %vm468_vm0, %v7968_v9  ;;  %6317 = vmatmul.msk.bf16.gmra.mxu2 %vm468_vm0, %v7968_v9  ;;  %v8030_v9 = vld [vmem:[%s12643_s6 + $0x20] sm:$0xf0] }
 0x134   : > { %1413 = vmatpush.bf16.msrb.mxu3 %v6435_v8  ;;  %v8033_v8 = vld [vmem:[%s12643_s6 + $0x38] sm:$0xf0] }
 0x135   : > { %v6553_v23 = vor.u32 %v8033_v8, %v6552_v21 }
 0x137   : > { %1414 = vmatmul.bf16.vlgmr.msrb.gmra.mxu3 %v1217_v51  ;;  %v8071_v51 = vld [vmem:[%s12643_s6 + $0xac] sm:$0xf] }
 0x138   : > { %v6719_v54 = vor.u32 %v8071_v51, %v6716_v53  ;;  %1705 = vmatpush.bf16.msra.mxu3 %v6613_v56  ;;  %v6614_v53 = vld [vmem:[%s12643_s6 + $0xb4] sm:$0xf0] }
 0x139   : > { %v6617_v55 = vor.u32 %v8047_v50, %v6614_v53 }
 0x13a   : > { %2046 = vmatpush.bf16.msrb.mxu2 %v6719_v54 }
 0x13c   : > { %1706 = vmatpush.bf16.msra.mxu3 %v6601_v62 }
 0x140   : > { %1707 = vmatpush.bf16.msra.mxu3 %v6589_v3  ;;  %v6703_v3 = vor.u32 %v8069_v0, %v6702_v63  ;;  %v8066_v63 = vld [vmem:[%s12643_s6 + $0x80] sm:$0xf0]  ;;  %v6530_v0 = vld [vmem:[%s12643_s6 + $0xc] sm:$0xf0] }
 0x142   : > { %6286 = vmatmul.msk.bf16.gmra.mxu0 %vm468_vm0, %v7969_v34  ;;  %2033 = vmatpush.bf16.msrb.mxu1 %v6703_v3 }
 0x143   : > { %6302 = vmatmul.msk.bf16.gmra.mxu1 %vm468_vm0, %v7969_v34  ;;  %6318 = vmatmul.msk.bf16.gmra.mxu2 %vm468_vm0, %v7969_v34 }
 0x144   : > { %1708 = vmatpush.bf16.msra.mxu3 %v6577_v58 }
 0x148   : > { %1709 = vmatpush.bf16.msra.mxu3 %v6565_v19  ;;  %v8041_v19 = vld [vmem:[%s12643_s6 + $0x7c] sm:$0xf] }
 0x14c   : > { %1710 = vmatpush.bf16.msra.mxu3 %v6553_v23 }
 0x152   : > { %6287 = vmatmul.msk.bf16.gmra.mxu0 %vm468_vm0, %v7970_v35 }
 0x153   : > { %6303 = vmatmul.msk.bf16.gmra.mxu1 %vm468_vm0, %v7970_v35  ;;  %6319 = vmatmul.msk.bf16.gmra.mxu2 %vm468_vm0, %v7970_v35  ;;  %v6541_v35 = vor.u32 %v8030_v9, %v6540_v31 }
 0x155   : > { %1711 = vmatpush.bf16.msra.mxu3 %v6541_v35 }
 0x15b   : > { %v9483_v42 = vpop.f32.mrf.mxu0 }
 0x162   : > { %6288 = vmatmul.msk.bf16.gmra.mxu0 %vm468_vm0, %v7971_v37 }
 0x163   : > { %6304 = vmatmul.msk.bf16.gmra.mxu1 %vm468_vm0, %v7971_v37  ;;  %6320 = vmatmul.msk.bf16.gmra.mxu2 %vm468_vm0, %v7971_v37  ;;  %v9508_v57 = vpop.f32.mrf.mxu0 }
 0x16b   : > { %v9540_v10 = vpop.f32.mrf.mxu0 }
 0x172   : > { %6289 = vmatmul.msk.bf16.gmra.mxu0 %vm468_vm0, %v7972_v46 }
 0x173   : > { %6305 = vmatmul.msk.bf16.gmra.mxu1 %vm468_vm0, %v7972_v46  ;;  %6321 = vmatmul.msk.bf16.gmra.mxu2 %vm468_vm0, %v7972_v46  ;;  %v9561_v26 = vpop.f32.mrf.mxu0  ;;  %v8027_v46 = vld [vmem:[%s12643_s6 + $0x8] sm:$0xf0] }
 0x174   : > { %v6529_v39 = vor.u32 %v8027_v46, %v6528_v43 }
 0x176   : > { %1712 = vmatpush.bf16.msra.mxu3 %v6529_v39 }
 0x17a   : > { %1719 = vmatpush.bf16.msrb.mxu3 %v6617_v55  ;;  %v8035_v55 = vld [vmem:[%s12643_s6 + $0x4c] sm:$0xf] }
 0x17f   : > { %v9591_v59 = vpop.f32.mrf.mxu0 }
 0x182   : > { %6290 = vmatmul.msk.bf16.gmra.mxu0 %vm468_vm0, %v9531_v5 }
 0x187   : > { %v9649_v46 = vpop.f32.mrf.mxu0 }
 0x192   : > { %6291 = vmatmul.msk.bf16.gmra.mxu0 %vm468_vm0, %v9578_v45 }
 0x19a   : > { %v1387_v11 = vpop.f32.mrf.mxu3 }
 0x19b   : > { %v1420_v12 = vadd.f32 %v1387_v11, %v532_v1  ;;  %v623_v1 = vadd.f32 %v9505_v41, %v9156_v15  ;;  %v6707_v11 = vor.u32 %v8068_v6, %v6704_v7  ;;  %v6590_v41 = vld [vmem:[%s12643_s6 + $0x84] sm:$0xf0] }
 0x19c   : > { %v6593_v23 = vor.u32 %v8041_v19, %v6590_v41 }
 0x19d   : > { %v6520_v16 = vmul.f32 -1.442695, %v1420_v12  ;;  %v6548_v12 = vld [vmem:[%s12643_s6 + $0x20] sm:$0xf]  ;;  %2047 = vmatpush.bf16.msrb.mxu2 %v6707_v11 }
 0x19f   : > { %8490 = vpow2.f32 %v6520_v16  ;;  %v6605_v16 = vor.u32 %v8044_v61, %v6602_v2 }
 0x1a1   : > { %1720 = vmatpush.bf16.msrb.mxu3 %v6605_v16 }
 0x1a2   : > { %v1389_v24 = vpop.f32.mrf.mxu3 }
 0x1a3   : > { %v1421_v25 = vadd.f32 %v1389_v24, %v534_v22  ;;  %v6549_v22 = vor.u32 %v8031_v14, %v6548_v12  ;;  %v6536_v24 = vld [vmem:[%s12643_s6 + $0x8] sm:$0xf]  ;;  %v8032_v14 = vld [vmem:[%s12643_s6 + $0x34] sm:$0xf] }
 0x1a5   : > { %v8491_v32 = vpop.eup %8490  ;;  %v6521_v34 = vmul.f32 -1.442695, %v1421_v25  ;;  %v8028_v25 = vld [vmem:[%s12643_s6 + $0x10] sm:$0xf0]  ;;  %1739 = vmatpush.bf16.msrb.mxu0 %v6549_v22  ;;  %1721 = vmatpush.bf16.msrb.mxu3 %v6593_v23 }
 0x1a6   : > { %v9569_v37 = vadd.f32 1.0, %v8491_v32  ;;  %v8038_v32 = vld [vmem:[%s12643_s6 + $0x64] sm:$0xf]  ;;  %v6537_v43 = vor.u32 %v8028_v25, %v6536_v24  ;;  %v710_v24 = vadd.f32 %v9528_v4, %v9267_v27  ;;  %v8029_v4 = vld [vmem:[%s12643_s6 + $0x1c] sm:$0xf] }
 0x1a7   : > { %8492 = vpow2.f32 %v6521_v34  ;;  %v6578_v34 = vld [vmem:[%s12643_s6 + $0x6c] sm:$0xf0] }
 0x1a8   : > { %8494 = vrcp.f32 %v9569_v37  ;;  %v6581_v39 = vor.u32 %v8038_v32, %v6578_v34  ;;  %v1441_v53 = vand.u32 2147483648, %v9569_v37  ;;  %vm1435_vm12 = vweird.f32 %v9569_v37  ;;  %v9712_v34 = vpop.f32.mrf.mxu0 }
 0x1a9   : > { %v1439_v61 = vand.u32 2147483647, %v9569_v37  ;;  %1740 = vmatpush.bf16.msrb.mxu0 %v6537_v43  ;;  %v6542_v43 = vld [vmem:[%s12643_s6 + $0x24] sm:$0xf0] }
 0x1aa   : > { %v1401_v51 = vpop.f32.mrf.mxu3  ;;  %1722 = vmatpush.bf16.msrb.mxu3 %v6581_v39  ;;  %v1442_v12 = vor.u32 1.1754944e-38, %v1441_v53 }
 0x1ab   : > { %v1460_v54 = vadd.f32 %v1401_v51, %v621_v33  ;;  %vm1440_vm15 = vcmp.eq.f32.partialorder %v1439_v61, 8.507059e+37 }
 0x1ad   : > { %v8493_v40 = vpop.eup %8492  ;;  %v6522_v56 = vmul.f32 -1.442695, %v1460_v54 }
 0x1ae   : > { %v9593_v60 = vpop.eup %8494  ;;  %v9595_v44 = vadd.f32 1.0, %v8493_v40  ;;  %v6566_v40 = vld [vmem:[%s12643_s6 + $0x54] sm:$0xf0] }
 0x1af   : > { %8496 = vpow2.f32 %v6522_v56  ;;  %v1431_v62 = vmul.f32 %v9593_v60, %v9569_v37  ;;  %vm1436_vm11 = vweird.f32 %v9593_v60  ;;  %v8065_v37 = vld [vmem:[%s12643_s6 + $0x7c] sm:$0xf] }
 0x1b0   : > { %8498 = vrcp.f32 %v9595_v44  ;;  %vm9671_vm13 = vmor %vm1435_vm12, %vm1436_vm11  ;;  %v1454_v41 = vand.u32 2147483647, %v9595_v44  ;;  %vm1450_vm1 = vweird.f32 %v9595_v44  ;;  %vm1844_vm12 = vcmp.gt.s32.totalorder %v8942_v29, 2 }
 0x1b1   : > { %v1432_v58 = vsub.f32 1.0, %v1431_v62  ;;  %v6690_v62 = vld [vmem:[%s12643_s6 + $0x78] sm:$0xf] }
 0x1b2   : > { %v1403_v13 = vpop.f32.mrf.mxu3  ;;  %v6691_v3 = vor.u32 %v8066_v63, %v6690_v62  ;;  %vm1455_vm3 = vcmp.eq.f32.partialorder %v1454_v41, 8.507059e+37  ;;  %v8026_v63 = vld [vmem:[%s12643_s6 + $0x4] sm:$0xf]  ;;  %v1845_v41 = vsel %vm1843_vm8, 1, %v8803_v18  ;;  %vm5768_vm8 = vcmp.gt.s32.totalorder %v8942_v29, 14 }
 0x1b3   : > { %v1461_v21 = vadd.f32 %v1403_v13, %v623_v1  ;;  %v1433_v8 = vmul.f32 %v9593_v60, %v1432_v58  ;;  %v6569_v1 = vor.u32 %v8035_v55, %v6566_v40  ;;  %v6692_v58 = vld [vmem:[%s12643_s6 + $0x84] sm:$0xf0]  ;;  %1848 = vperm.xlu2 %8468, %v1845_v41   ;;  %v6654_v41 = vld [vmem:[%s12643_s6 + $0x30] sm:$0xf] }
 0x1b4   : > { %2034 = vmatpush.bf16.msrb.mxu1 %v6691_v3  ;;  %v6695_v16 = vor.u32 %v8065_v37, %v6692_v58 }
 0x1b5   : > { %v8497_v31 = vpop.eup %8496  ;;  %v6523_v9 = vmul.f32 -1.442695, %v1461_v21  ;;  %v1434_v51 = vadd.f32 %v9593_v60, %v1433_v8  ;;  %v1456_v8 = vand.u32 2147483648, %v9595_v44  ;;  %1723 = vmatpush.bf16.msrb.mxu3 %v6569_v1  ;;  %v6533_v1 = vor.u32 %v8026_v63, %v6530_v0 }
 0x1b6   : > { %v9645_v35 = vpop.eup %8498  ;;  %v9647_v33 = vadd.f32 1.0, %v8497_v31  ;;  %2048 = vmatpush.bf16.msrb.mxu2 %v6695_v16 }
 0x1b7   : > { %8500 = vpow2.f32 %v6523_v9  ;;  %v1446_v50 = vmul.f32 %v9645_v35, %v9595_v44  ;;  %v1438_v6 = vsel %vm9671_vm13, %v9593_v60, %v1434_v51  ;;  %vm1451_vm14 = vweird.f32 %v9645_v35  ;;  %v6554_v60 = vld [vmem:[%s12643_s6 + $0x3c] sm:$0xf0] }
 0x1b8   : > { %8502 = vrcp.f32 %v9647_v33  ;;  %v1443_v23 = vsel %vm1440_vm15, %v1442_v12, %v1438_v6  ;;  %vm9705_vm2 = vmor %vm1450_vm1, %vm1451_vm14  ;;  %v6557_v9 = vor.u32 %v8032_v14, %v6554_v60  ;;  %v1457_v39 = vor.u32 1.1754944e-38, %v1456_v8  ;;  %v1522_v14 = vpop.permute.xlu1 %1521  ;;  %v8062_v8 = vld [vmem:[%s12643_s6 + $0x64] sm:$0xf] }
 0x1b9   : > { %v1447_v54 = vsub.f32 1.0, %v1446_v50  ;;  %v1481_v50 = vand.u32 2147483648, %v9647_v33  ;;  %vm1475_vm5 = vweird.f32 %v9647_v33  ;;  %vm1526_vm14 = vcmp.eq.s32.totalorder %v1522_v14, 1 }
 0x1ba   : > { %v1415_v56 = vpop.f32.mrf.mxu3  ;;  %1724 = vmatpush.bf16.msrb.mxu3 %v6557_v9  ;;  %vm2497_vm1 = vcmp.gt.s32.totalorder %v8920_v20, 4 }
 0x1bb   : > { %v1448_v2 = vmul.f32 %v9645_v35, %v1447_v54  ;;  %v1500_v7 = vadd.f32 %v9272_v30, %v1415_v56  ;;  %v1479_v54 = vand.u32 2147483647, %v9647_v33  ;;  %v6545_v56 = vor.u32 %v8029_v4, %v6542_v43 }
 0x1bc   : > { %v1482_v3 = vor.u32 1.1754944e-38, %v1481_v50 }
 0x1bd   : > { %v8501_v11 = vpop.eup %8500  ;;  %v1449_v13 = vadd.f32 %v9645_v35, %v1448_v2  ;;  %v1502_v25 = vmul.f32 %v1500_v7, %v1443_v23  ;;  %vm1480_vm7 = vcmp.eq.f32.partialorder %v1479_v54, 8.507059e+37 }
 0x1be   : > { %v8503_v19 = vpop.eup %8502  ;;  %v9694_v21 = vadd.f32 1.0, %v8501_v11  ;;  %1725 = vmatpush.bf16.msrb.mxu3 %v6545_v56 }
 0x1bf   : > { %v1471_v22 = vmul.f32 %v8503_v19, %v9647_v33  ;;  %v1453_v44 = vsel %vm9705_vm2, %v9645_v35, %v1449_v13  ;;  %vm1476_vm4 = vweird.f32 %v8503_v19  ;;  %v1504_v55 = vadd.f32 %v1502_v25, %v710_v24  ;;  %v8063_v13 = vld [vmem:[%s12643_s6 + $0x68] sm:$0xf0] }
 0x1c0   : > { %8504 = vrcp.f32 %v9694_v21  ;;  %v1458_v40 = vsel %vm1455_vm3, %v1457_v39, %v1453_v44  ;;  %vm1477_vm6 = vmor %vm1475_vm5, %vm1476_vm4  ;;  %v1494_v11 = vand.u32 2147483647, %v9694_v21  ;;  %v1496_v12 = vand.u32 2147483648, %v9694_v21 }
 0x1c1   : > { %v1472_v32 = vsub.f32 1.0, %v1471_v22  ;;  %8506 = vtanh.f32 %v1504_v55  ;;  %v6680_v22 = vld [vmem:[%s12643_s6 + $0x6c] sm:$0xf0]  ;;  %vm1490_vm10 = vweird.f32 %v9694_v21  ;;  %vm2825_vm2 = vcmp.gt.s32.totalorder %v8942_v29, 5 }
 0x1c2   : > { %v1417_v51 = vpop.f32.mrf.mxu3  ;;  %1726 = vmatpush.bf16.msrb.mxu3 %v6533_v1  ;;  %v6683_v24 = vor.u32 %v8062_v8, %v6680_v22  ;;  %v1497_v9 = vor.u32 1.1754944e-38, %v1496_v12  ;;  %vm1495_vm13 = vcmp.eq.f32.partialorder %v1494_v11, 8.507059e+37  ;;  %vm3478_vm3 = vcmp.gt.s32.totalorder %v8920_v20, 7  ;;  %v8057_v8 = vld [vmem:[%s12643_s6 + $0x38] sm:$0xf0] }
 0x1c3   : > { %v1473_v53 = vmul.f32 %v8503_v19, %v1472_v32  ;;  %v1501_v35 = vadd.f32 %v9272_v30, %v1417_v51  ;;  %v712_v30 = vadd.f32 %v9550_v17, %v9267_v27  ;;  %v6678_v17 = vld [vmem:[%s12643_s6 + $0x60] sm:$0xf]  ;;  %v1846_v51 = vsel %vm1844_vm12, 1, %v8803_v18 }
 0x1c4   : > { %v6679_v23 = vor.u32 %v8063_v13, %v6678_v17  ;;  %2049 = vmatpush.bf16.msrb.mxu2 %v6683_v24  ;;  %1851 = vperm.xlu2 %8468, %v1846_v51   ;;  %v3480_v11 = vsel %vm3478_vm3, 1, %v8803_v18  ;;  %vm3806_vm4 = vcmp.gt.s32.totalorder %v8942_v29, 8  ;;  %v9791_v17 = vpop.f32.mrf.mxu1  ;;  %vm4459_vm5 = vcmp.gt.s32.totalorder %v8920_v20, 10 }
 0x1c5   : > { %v1474_v61 = vadd.f32 %v8503_v19, %v1473_v53  ;;  %v1503_v62 = vmul.f32 %v1501_v35, %v1458_v40  ;;  %v1525_v35 = vpop.permute.xlu1 %1524  ;;  %v3808_v12 = vsel %vm3806_vm4, 1, %v8803_v18  ;;  %v4461_v14 = vsel %vm4459_vm5, 1, %v8803_v18 }
 0x1c6   : > { %v8505_v2 = vpop.eup %8504  ;;  %2035 = vmatpush.bf16.msrb.mxu1 %v6679_v23  ;;  %vm1527_vm15 = vcmp.eq.s32.totalorder %v1525_v35, 1  ;;  %v6655_v22 = vor.u32 %v8057_v8, %v6654_v41 }
 0x1c7   : > { %v1486_v37 = vmul.f32 %v8505_v2, %v9694_v21  ;;  %v1478_v6 = vsel %vm1477_vm6, %v8503_v19, %v1474_v61  ;;  %v1505_v7 = vadd.f32 %v1503_v62, %v712_v30  ;;  %vm1491_vm9 = vweird.f32 %v8505_v2  ;;  %v9742_v19 = vpop.f32.mrf.mxu0  ;;  %v8507_v31 = vpop.eup %8506  ;;  %v6666_v30 = vld [vmem:[%s12643_s6 + $0x48] sm:$0xf] }
 0x1c8   : > { %v1483_v33 = vsel %vm1480_vm7, %v1482_v3, %v1478_v6  ;;  %vm1492_vm11 = vmor %vm1490_vm10, %vm1491_vm9  ;;  %v2499_v3 = vsel %vm2497_vm1, 1, %v8803_v18  ;;  %v2827_v6 = vsel %vm2825_vm2, 1, %v8803_v18  ;;  %vm4787_vm6 = vcmp.gt.s32.totalorder %v8942_v29, 11 }
 0x1c9   : > { %v1487_v58 = vsub.f32 1.0, %v1486_v37  ;;  %v1508_v16 = vsub.f32 1.0, %v1483_v33  ;;  %8508 = vtanh.f32 %v1505_v7  ;;  %v1512_v43 = vmul.f32 %v1483_v33, %v9365_v47  ;;  %v8060_v37 = vld [vmem:[%s12643_s6 + $0x50] sm:$0xf0]  ;;  %v8059_v33 = vld [vmem:[%s12643_s6 + $0x4c] sm:$0xf] }
 0x1ca   : > { %v6668_v7 = vld [vmem:[%s12643_s6 + $0x54] sm:$0xf0]  ;;  %v4789_v24 = vsel %vm4787_vm6, 1, %v8803_v18  ;;  %vm5440_vm7 = vcmp.gt.s32.totalorder %v8920_v20, 13 }
 0x1cb   : > { %v1488_v60 = vmul.f32 %v8505_v2, %v1487_v58  ;;  %v1510_v32 = vmul.f32 %v8507_v31, %v1508_v16  ;;  %v6671_v1 = vor.u32 %v8059_v33, %v6668_v7  ;;  %v9799_v16 = vpop.f32.mrf.mxu2  ;;  %v6656_v31 = vld [vmem:[%s12643_s6 + $0x3c] sm:$0xf0]  ;;  %v6722_v7 = vld [vmem:[%s12643_s6 + $0xb0] sm:$0xf] }
 0x1cc   : > { %2502 = vperm.xlu2 %8468, %v2499_v3  }
 0x1cd   : > { %v1489_v25 = vadd.f32 %v8505_v2, %v1488_v60  ;;  %v1514_v53 = vadd.f32 %v1512_v43, %v1510_v32  ;;  %2050 = vmatpush.bf16.msrb.mxu2 %v6671_v1  ;;  %v9797_v60 = vpop.f32.mrf.mxu1  ;;  %6306 = vmatmul.msk.bf16.gmra.mxu1 %vm468_vm0, %v9531_v5  ;;  %v5442_v43 = vsel %vm5440_vm7, 1, %v8803_v18  ;;  %v8073_v1 = vld [vmem:[%s12643_s6 + $0xb8] sm:$0xf0] }
 0x1cf   : > { %v1493_v44 = vsel %vm1492_vm11, %v8505_v2, %v1489_v25  ;;  %v8509_v39 = vpop.eup %8508  ;;  %v9756_v55 = vpop.f32.mrf.mxu0  ;;  %v1528_v56 = vsel %vm1526_vm14, %v1514_v53, 0.0  ;;  %v9760_v62 = vsel %vm1526_vm14, %v1514_v53, %v9365_v47  ;;  %v6667_v47 = vor.u32 %v8060_v37, %v6666_v30  ;;  %v8056_v25 = vld [vmem:[%s12643_s6 + $0x34] sm:$0xf] }
 0x1d0   : > { %v1498_v4 = vsel %vm1495_vm13, %v1497_v9, %v1493_v44  ;;  %v6659_v44 = vor.u32 %v8056_v25, %v6656_v31  ;;  %v8053_v31 = vld [vmem:[%s12643_s6 + $0x1c] sm:$0xf] }
 0x1d1   : > { %v1509_v50 = vsub.f32 1.0, %v1498_v4  ;;  %v1513_v21 = vmul.f32 %v1498_v4, %v9368_v48  ;;  %2036 = vmatpush.bf16.msrb.mxu1 %v6667_v47 }
 0x1d2   : > { %2051 = vmatpush.bf16.msrb.mxu2 %v6659_v44  ;;  %v6644_v44 = vld [vmem:[%s12643_s6 + $0x24] sm:$0xf0] }
 0x1d3   : > { %v1511_v54 = vmul.f32 %v8509_v39, %v1509_v50  ;;  %v9821_v32 = vpop.f32.mrf.mxu2  ;;  %6322 = vmatmul.msk.bf16.gmra.mxu2 %vm468_vm0, %v9531_v5  ;;  %v5770_v39 = vsel %vm5768_vm8, 1, %v8803_v18 }
 0x1d4   : > { %2832 = vperm.xlu2 %8468, %v2827_v6   ;;  %v537_v6 = vadd.f32 %v9464_v28, %v9117_v52  ;;  %v6642_v28 = vld [vmem:[%s12643_s6 + $0x18] sm:$0xf] }
 0x1d5   : > { %v1515_v40 = vadd.f32 %v1513_v21, %v1511_v54  ;;  %2037 = vmatpush.bf16.msrb.mxu1 %v6655_v22  ;;  %v9819_v9 = vpop.f32.mrf.mxu1  ;;  %v8054_v22 = vld [vmem:[%s12643_s6 + $0x20] sm:$0xf0] }
 0x1d6   : > { %v6643_v25 = vor.u32 %v8054_v22, %v6642_v28 }
 0x1d7   : > { %v1529_v61 = vsel %vm1527_vm15, %v1515_v40, 0.0  ;;  %v9763_v63 = vsel %vm1527_vm15, %v1515_v40, %v9368_v48  ;;  %v9776_v48 = vpop.f32.mrf.mxu0 }
 0x1d8   : > { %v8370_v0 = vpack.c.bf16 %v1529_v61, %v1528_v56  ;;  %v1544_v2 = vpack.c.bf16 %v9763_v63, %v9760_v62 }
 0x1d9   : > { %2038 = vmatpush.bf16.msrb.mxu1 %v6643_v25 }
 0x1da   : > { %8442 = vst [vmem:[%s8872_s15 + $0x8] sm:$0xff] %v8370_v0   ;;  %1713 = vmatmul.bf16.vlgmr.msra.gmra.mxu3 %v1544_v2  ;;  %1741 = vmatmul.bf16.vlgmr.msrb.gmra.mxu0 %v1544_v2 }
 0x1db   : > { %v9831_v51 = vpop.f32.mrf.mxu2 }
 0x1dc   : > { %3483 = vperm.xlu2 %8468, %v3480_v11  }
 0x1dd   : > { %v9829_v50 = vpop.f32.mrf.mxu1  ;;  %6307 = vmatmul.msk.bf16.gmra.mxu1 %vm468_vm0, %v9578_v45 }
 0x1df   : > { %v9786_v58 = vpop.f32.mrf.mxu0 }
 0x1e0   : > { %12660 = vst [vmem:[#allocation4_spill] sm:$0xff] %v9786_v58 }
 0x1e3   : > { %v9839_v53 = vpop.f32.mrf.mxu2  ;;  %6323 = vmatmul.msk.bf16.gmra.mxu2 %vm468_vm0, %v9578_v45 }
 0x1e4   : > { %3813 = vperm.xlu2 %8468, %v3808_v12   ;;  %v6723_v12 = vor.u32 %v8073_v1, %v6722_v7  ;;  %v539_v1 = vadd.f32 %v9468_v49, %v9117_v52  ;;  %v6686_v49 = vld [vmem:[%s12643_s6 + $0x68] sm:$0xf] }
 0x1e5   : > { %v9849_v35 = vpop.f32.mrf.mxu1 }
 0x1e6   : > { %2060 = vmatpush.bf16.msra.mxu3 %v6723_v12  ;;  %v6698_v12 = vld [vmem:[%s12643_s6 + $0x80] sm:$0xf] }
 0x1e7   : > { %v9793_v13 = vpop.f32.mrf.mxu0 }
 0x1e8   : > { %12661 = vst [vmem:[#allocation5_spill] sm:$0xff] %v9793_v13 }
 0x1ea   : > { %1727 = vmatmul.bf16.vlgmr.msrb.gmra.mxu3 %v1544_v2 }
 0x1eb   : > { %v9855_v56 = vpop.f32.mrf.mxu2 }
 0x1ec   : > { %4464 = vperm.xlu2 %8468, %v4461_v14  }
 0x1ed   : > { %v9853_v29 = vpop.f32.mrf.mxu1 }
 0x1ef   : > { %v9809_v23 = vpop.f32.mrf.mxu0 }
 0x1f0   : > { %12662 = vst [vmem:[#allocation6_spill] sm:$0xff] %v9809_v23 }
 0x1f3   : > { %v9861_v45 = vpop.f32.mrf.mxu2 }
 0x1f4   : > { %4794 = vperm.xlu2 %8468, %v4789_v24  }
 0x1f5   : > { %v9859_v61 = vpop.f32.mrf.mxu1 }
 0x1f7   : > { %v9826_v4 = vpop.f32.mrf.mxu0 }
 0x1f8   : > { %12663 = vst [vmem:[#allocation7_spill] sm:$0xff] %v9826_v4 }
 0x1fb   : > { %v9865_v2 = vpop.f32.mrf.mxu2 }
 0x1fc   : > { %5445 = vperm.xlu2 %8468, %v5442_v43   ;;  %v6647_v43 = vor.u32 %v8053_v31, %v6644_v44 }
 0x1fd   : > { %v9863_v0 = vpop.f32.mrf.mxu1 }
 0x1fe   : > { %2052 = vmatpush.bf16.msrb.mxu2 %v6647_v43 }
 0x1ff   : > { %v9836_v5 = vpop.f32.mrf.mxu0 }
 0x200   : > { %12664 = vst [vmem:[#allocation8_spill] sm:$0xff] %v9836_v5 }
 0x203   : > { %v9871_v37 = vpop.f32.mrf.mxu2 }
 0x204   : > { %5775 = vperm.xlu2 %8468, %v5770_v39   ;;  %v6710_v39 = vld [vmem:[%s12643_s6 + $0x98] sm:$0xf] }
 0x205   : > { %v9869_v30 = vpop.f32.mrf.mxu1 }
 0x207   : > { %v9843_v20 = vpop.f32.mrf.mxu0 }
 0x208   : > { %12665 = vst [vmem:[#allocation9_spill] sm:$0xff] %v9843_v20 }
 0x20b   : > { %v9877_v33 = vpop.f32.mrf.mxu2 }
 0x20d   : > { %v9885_v41 = vpop.f32.mrf.mxu1 }
 0x20f   : > { %v9845_v54 = vpop.f32.mrf.mxu0 }
 0x210   : > { %12666 = vst [vmem:[#allocation10_spill] sm:$0xff] %v9845_v54 }
 0x215   : > { %v9917_v44 = vpop.f32.mrf.mxu1 }
 0x217   : > { %v9847_v21 = vpop.f32.mrf.mxu0 }
 0x218   : > { %12667 = vst [vmem:[#allocation11_spill] sm:$0xff] %v9847_v21  ;;  %v6638_v21 = vld [vmem:[%s12643_s6 + $0x8] sm:$0xf] }
 0x21f   : > { %v9851_v40 = vpop.f32.mrf.mxu0 }
 0x220   : > { %12668 = vst [vmem:[#allocation12_spill] sm:$0xff] %v9851_v40  ;;  %v6650_v40 = vld [vmem:[%s12643_s6 + $0x20] sm:$0xf] }
 0x227   : > { %v9857_v18 = vpop.f32.mrf.mxu0 }
 0x228   : > { %12669 = vst [vmem:[#allocation13_spill] sm:$0xff] %v9857_v18 }
 0x22f   : > { %v9867_v3 = vpop.f32.mrf.mxu0 }
 0x230   : > { %12670 = vst [vmem:[#allocation14_spill] sm:$0xff] %v9867_v3 }
 0x237   : > { %v9873_v47 = vpop.f32.mrf.mxu0 }
 0x238   : > { %12671 = vst [vmem:[#allocation15_spill] sm:$0xff] %v9873_v47 }
 0x23f   : > { %v9893_v24 = vpop.f32.mrf.mxu0 }
 0x240   : > { %12672 = vst [vmem:[#allocation16_spill] sm:$0xff] %v9893_v24 }
 0x25d   : > { %v1714_v11 = vpop.f32.mrf.mxu3 }
 0x25e   : > { %v1747_v14 = vadd.f32 %v1714_v11, %v537_v6  ;;  %v8070_v6 = vld [vmem:[%s12643_s6 + $0xa0] sm:$0xf0]  ;;  %v9909_v11 = vpop.f32.mrf.mxu2 }
 0x25f   : > { %v6711_v7 = vor.u32 %v8070_v6, %v6710_v39  ;;  %v8064_v39 = vld [vmem:[%s12643_s6 + $0x70] sm:$0xf0] }
 0x260   : > { %v6622_v8 = vmul.f32 -1.442695, %v1747_v14  ;;  %v8067_v14 = vld [vmem:[%s12643_s6 + $0x88] sm:$0xf0]  ;;  %v6687_v6 = vor.u32 %v8064_v39, %v6686_v49  ;;  %v8058_v39 = vld [vmem:[%s12643_s6 + $0x40] sm:$0xf0] }
 0x261   : > { %2061 = vmatpush.bf16.msra.mxu3 %v6711_v7  ;;  %v6699_v28 = vor.u32 %v8067_v14, %v6698_v12  ;;  %v9927_v7 = vpop.f32.mrf.mxu0  ;;  %v6674_v12 = vld [vmem:[%s12643_s6 + $0x50] sm:$0xf]  ;;  %v8061_v14 = vld [vmem:[%s12643_s6 + $0x58] sm:$0xf0] }
 0x262   : > { %8510 = vpow2.f32 %v6622_v8  ;;  %12673 = vst [vmem:[#allocation17_spill] sm:$0xff] %v9927_v7 }
 0x265   : > { %v1716_v8 = vpop.f32.mrf.mxu3  ;;  %2062 = vmatpush.bf16.msra.mxu3 %v6699_v28  ;;  %v6675_v28 = vor.u32 %v8061_v14, %v6674_v12  ;;  %v8051_v12 = vld [vmem:[%s12643_s6 + $0x8] sm:$0xf0]  ;;  %v9955_v14 = vpop.f32.mrf.mxu1 }
 0x266   : > { %v1748_v22 = vadd.f32 %v1716_v8, %v539_v1  ;;  %v626_v1 = vadd.f32 %v9791_v17, %v9156_v15  ;;  %v6662_v17 = vld [vmem:[%s12643_s6 + $0x38] sm:$0xf] }
 0x267   : > { %v6663_v47 = vor.u32 %v8058_v39, %v6662_v17 }
 0x268   : > { %v8511_v25 = vpop.eup %8510  ;;  %v6623_v31 = vmul.f32 -1.442695, %v1748_v22 }
 0x269   : > { %v9922_v43 = vadd.f32 1.0, %v8511_v25  ;;  %2063 = vmatpush.bf16.msra.mxu3 %v6687_v6  ;;  %v9938_v25 = vpop.f32.mrf.mxu2  ;;  %v1742_v17 = vpop.f32.mrf.mxu0 }
 0x26a   : > { %8512 = vpow2.f32 %v6623_v31 }
 0x26b   : > { %8514 = vrcp.f32 %v9922_v43  ;;  %v1768_v39 = vand.u32 2147483648, %v9922_v43  ;;  %vm1762_vm9 = vweird.f32 %v9922_v43 }
 0x26d   : > { %v1728_v8 = vpop.f32.mrf.mxu3  ;;  %2064 = vmatpush.bf16.msra.mxu3 %v6675_v28  ;;  %v628_v28 = vadd.f32 %v9797_v60, %v9156_v15  ;;  %v8055_v60 = vld [vmem:[%s12643_s6 + $0x28] sm:$0xf0]  ;;  %v9993_v13 = vpop.f32.mrf.mxu1 }
 0x26e   : > { %v1787_v22 = vadd.f32 %v1728_v8, %v626_v1  ;;  %v6630_v1 = vld [vmem:[%s12643_s6] sm:$0xf]  ;;  %v8050_v8 = vld [vmem:[%s12643_s6 + $0x4] sm:$0xf] }
 0x270   : > { %v8513_v31 = vpop.eup %8512  ;;  %v6624_v49 = vmul.f32 -1.442695, %v1787_v22 }
 0x271   : > { %v8515_v7 = vpop.eup %8514  ;;  %v9946_v24 = vadd.f32 1.0, %v8513_v31  ;;  %v6631_v31 = vor.u32 %v8051_v12, %v6630_v1  ;;  %2065 = vmatpush.bf16.msra.mxu3 %v6663_v47  ;;  %v1766_v1 = vand.u32 2147483647, %v9922_v43  ;;  %v8052_v47 = vld [vmem:[%s12643_s6 + $0x10] sm:$0xf0]  ;;  %v9981_v20 = vpop.f32.mrf.mxu2 }
 0x272   : > { %v1758_v6 = vmul.f32 %v8515_v7, %v9922_v43  ;;  %8516 = vpow2.f32 %v6624_v49  ;;  %v6632_v49 = vld [vmem:[%s12643_s6 + $0xc] sm:$0xf0]  ;;  %vm1763_vm0 = vweird.f32 %v8515_v7 }
 0x273   : > { %8518 = vrcp.f32 %v9946_v24  ;;  %v6635_v18 = vor.u32 %v8050_v8, %v6632_v49  ;;  %2039 = vmatpush.bf16.msrb.mxu1 %v6631_v31  ;;  %v6651_v8 = vor.u32 %v8055_v60, %v6650_v40  ;;  %vm1764_vm10 = vmor %vm1762_vm9, %vm1763_vm0  ;;  %v1769_v31 = vor.u32 1.1754944e-38, %v1768_v39 }
 0x274   : > { %v1759_v22 = vsub.f32 1.0, %v1758_v6  ;;  %v6639_v40 = vor.u32 %v8052_v47, %v6638_v21  ;;  %vm1767_vm11 = vcmp.eq.f32.partialorder %v1766_v1, 8.507059e+37  ;;  %v1744_v21 = vpop.f32.mrf.mxu0  ;;  %vm1777_vm13 = vweird.f32 %v9946_v24 }
 0x275   : > { %v1730_v3 = vpop.f32.mrf.mxu3  ;;  %2053 = vmatpush.bf16.msrb.mxu2 %v6635_v18  ;;  %2066 = vmatpush.bf16.msra.mxu3 %v6651_v8 }
 0x276   : > { %v1760_v6 = vmul.f32 %v8515_v7, %v1759_v22  ;;  %v1788_v12 = vadd.f32 %v1730_v3, %v628_v28  ;;  %v9986_v3 = vld [vmem:[%s12641_s4] ss:$0 sm:$0xff] }
 0x277   : > { %v1827_v28 = vadd.f32 %v9986_v3, %v1742_v17  ;;  %v1783_v17 = vand.u32 2147483648, %v9946_v24 }
 0x278   : > { %v8517_v49 = vpop.eup %8516  ;;  %v1761_v54 = vadd.f32 %v8515_v7, %v1760_v6  ;;  %v6625_v22 = vmul.f32 -1.442695, %v1788_v12  ;;  %v715_v12 = vadd.f32 %v9799_v16, %v9267_v27 }
 0x279   : > { %v8519_v5 = vpop.eup %8518  ;;  %v1795_v18 = vadd.f32 1.0, %v8517_v49  ;;  %2067 = vmatpush.bf16.msra.mxu3 %v6639_v40  ;;  %v1784_v16 = vor.u32 1.1754944e-38, %v1783_v17  ;;  %v9999_v40 = vpop.f32.mrf.mxu2 }
 0x27a   : > { %v1765_v60 = vsel %vm1764_vm10, %v8515_v7, %v1761_v54  ;;  %v1773_v43 = vmul.f32 %v8519_v5, %v9946_v24  ;;  %8520 = vpow2.f32 %v6625_v22  ;;  %vm1778_vm12 = vweird.f32 %v8519_v5 }
 0x27b   : > { %v1770_v6 = vsel %vm1767_vm11, %v1769_v31, %v1765_v60  ;;  %8522 = vrcp.f32 %v1795_v18  ;;  %v1781_v54 = vand.u32 2147483647, %v9946_v24  ;;  %vm1779_vm14 = vmor %vm1777_vm13, %vm1778_vm12  ;;  %v1828_v22 = vadd.f32 %v9986_v3, %v1744_v21 }
 0x27c   : > { %v1829_v4 = vmul.f32 %v1827_v28, %v1770_v6  ;;  %v1774_v23 = vsub.f32 1.0, %v1773_v43  ;;  %v1808_v6 = vand.u32 2147483648, %v1795_v18  ;;  %v1806_v17 = vand.u32 2147483647, %v1795_v18 }
 0x27d   : > { %vm1782_vm15 = vcmp.eq.f32.partialorder %v1781_v54, 8.507059e+37  ;;  %vm1802_vm2 = vweird.f32 %v1795_v18 }
 0x27e   : > { %v1831_v39 = vadd.f32 %v1829_v4, %v715_v12  ;;  %v1775_v8 = vmul.f32 %v8519_v5, %v1774_v23  ;;  %v717_v4 = vadd.f32 %v9821_v32, %v9267_v27  ;;  %v1809_v21 = vor.u32 1.1754944e-38, %v1808_v6 }
 0x27f   : > { %vm1807_vm4 = vcmp.eq.f32.partialorder %v1806_v17, 8.507059e+37 }
 0x280   : > { %v8521_v7 = vpop.eup %8520  ;;  %v1776_v1 = vadd.f32 %v8519_v5, %v1775_v8  ;;  %v10003_v8 = vpop.f32.mrf.mxu1 }
 0x281   : > { %v8523_v47 = vpop.eup %8522  ;;  %v1796_v49 = vadd.f32 1.0, %v8521_v7 }
 0x282   : > { %v1780_v28 = vsel %vm1779_vm14, %v8519_v5, %v1776_v1  ;;  %v1798_v31 = vmul.f32 %v8523_v47, %v1795_v18  ;;  %vm1803_vm1 = vweird.f32 %v8523_v47 }
 0x283   : > { %v1785_v23 = vsel %vm1782_vm15, %v1784_v16, %v1780_v28  ;;  %8524 = vrcp.f32 %v1796_v49  ;;  %vm1804_vm3 = vmor %vm1802_vm2, %vm1803_vm1  ;;  %v10005_v28 = vpop.f32.mrf.mxu2  ;;  %vm1817_vm6 = vweird.f32 %v1796_v49 }
 0x284   : > { %v1830_v60 = vmul.f32 %v1828_v22, %v1785_v23  ;;  %v1799_v43 = vsub.f32 1.0, %v1798_v31  ;;  %8526 = vtanh.f32 %v1831_v39  ;;  %v1821_v23 = vand.u32 2147483647, %v1796_v49 }
 0x286   : > { %v1832_v24 = vadd.f32 %v1830_v60, %v717_v4  ;;  %v1800_v12 = vmul.f32 %v8523_v47, %v1799_v43  ;;  %v1823_v4 = vand.u32 2147483648, %v1796_v49  ;;  %v1849_v60 = vpop.permute.xlu2 %1848  ;;  %vm1822_vm8 = vcmp.eq.f32.partialorder %v1821_v23, 8.507059e+37 }
 0x287   : > { %vm1853_vm0 = vcmp.eq.s32.totalorder %v1849_v60, 1 }
 0x288   : > { %v1801_v5 = vadd.f32 %v8523_v47, %v1800_v12  ;;  %8528 = vtanh.f32 %v1832_v24  ;;  %v10008_v6 = vpop.f32.mrf.mxu1  ;;  %v1824_v17 = vor.u32 1.1754944e-38, %v1823_v4 }
 0x289   : > { %v8525_v54 = vpop.eup %8524 }
 0x28a   : > { %v1805_v7 = vsel %vm1804_vm3, %v8523_v47, %v1801_v5  ;;  %v1813_v1 = vmul.f32 %v8525_v54, %v1796_v49  ;;  %v8527_v31 = vpop.eup %8526  ;;  %vm1818_vm5 = vweird.f32 %v8525_v54 }
 0x28b   : > { %v1810_v16 = vsel %vm1807_vm4, %v1809_v21, %v1805_v7  ;;  %vm1819_vm7 = vmor %vm1817_vm6, %vm1818_vm5 }
 0x28c   : > { %v1814_v32 = vsub.f32 1.0, %v1813_v1  ;;  %v1835_v22 = vsub.f32 1.0, %v1810_v16  ;;  %v1839_v18 = vmul.f32 %v1810_v16, %v9760_v62 }
 0x28e   : > { %v1815_v43 = vmul.f32 %v8525_v54, %v1814_v32  ;;  %v1837_v39 = vmul.f32 %v8527_v31, %v1835_v22  ;;  %v8529_v1 = vpop.eup %8528  ;;  %v10011_v22 = vpop.f32.mrf.mxu2 }
 0x28f   : > { %v1852_v24 = vpop.permute.xlu2 %1851 }
 0x290   : > { %v1816_v12 = vadd.f32 %v8525_v54, %v1815_v43  ;;  %v1841_v47 = vadd.f32 %v1839_v18, %v1837_v39  ;;  %vm1854_vm9 = vcmp.eq.s32.totalorder %v1852_v24, 1  ;;  %v10019_v23 = vpop.f32.mrf.mxu1 }
 0x292   : > { %v1820_v5 = vsel %vm1819_vm7, %v8525_v54, %v1816_v12  ;;  %v1855_v49 = vsel %vm1853_vm0, %v1841_v47, 0.0  ;;  %v10014_v43 = vsel %vm1853_vm0, %v1841_v47, %v9760_v62 }
 0x293   : > { %v1825_v21 = vsel %vm1822_vm8, %v1824_v17, %v1820_v5 }
 0x294   : > { %v1836_v7 = vsub.f32 1.0, %v1825_v21  ;;  %v1840_v32 = vmul.f32 %v1825_v21, %v9763_v63 }
 0x296   : > { %v1838_v58 = vmul.f32 %v8529_v1, %v1836_v7 }
 0x298   : > { %v1842_v16 = vadd.f32 %v1840_v32, %v1838_v58  ;;  %v10024_v58 = vpop.f32.mrf.mxu2  ;;  %v10026_v60 = vpop.f32.mrf.mxu1 }
 0x299   : > { %12674 = vst [vmem:[#allocation18_spill] sm:$0xff] %v10024_v58 }
 0x29a   : > { %v1856_v31 = vsel %vm1854_vm9, %v1842_v16, 0.0  ;;  %v10017_v54 = vsel %vm1854_vm9, %v1842_v16, %v9763_v63  ;;  %12675 = vst [vmem:[#allocation19_spill] sm:$0xff] %v10026_v60 }
 0x29b   : > { %v8375_v4 = vpack.c.bf16 %v1856_v31, %v1855_v49  ;;  %v1871_v39 = vpack.c.bf16 %v10017_v54, %v10014_v43 }
 0x29d   : > { %8443 = vst [vmem:[%s8872_s15 + $0x10] sm:$0xff] %v8375_v4   ;;  %2040 = vmatmul.bf16.vlgmr.msrb.gmra.mxu1 %v1871_v39  ;;  %2054 = vmatmul.bf16.vlgmr.msrb.gmra.mxu2 %v1871_v39 }
 0x29e   : > { %2068 = vmatmul.bf16.vlgmr.msra.gmra.mxu3 %v1871_v39 }
 0x2a0   : > { %v10028_v18 = vpop.f32.mrf.mxu2  ;;  %v10030_v62 = vpop.f32.mrf.mxu1 }
 0x2a1   : > { %12676 = vst [vmem:[#allocation20_spill] sm:$0xff] %v10028_v18 }
 0x2a2   : > { %12677 = vst [vmem:[#allocation21_spill] sm:$0xff] %v10030_v62 }
 0x2a8   : > { %v10032_v63 = vpop.f32.mrf.mxu2  ;;  %v10034_v12 = vpop.f32.mrf.mxu1 }
 0x2a9   : > { %12678 = vst [vmem:[#allocation22_spill] sm:$0xff] %v10032_v63 }
 0x2aa   : > { %12679 = vst [vmem:[#allocation23_spill] sm:$0xff] %v10034_v12  ;;  %v8084_v12 = vld [vmem:[%s12643_s6 + $0x50] sm:$0xf0] }
 0x2b0   : > { %v10036_v47 = vpop.f32.mrf.mxu2  ;;  %v10038_v17 = vpop.f32.mrf.mxu1 }
 0x2b1   : > { %12680 = vst [vmem:[#allocation24_spill] sm:$0xff] %v10036_v47 }
 0x2b2   : > { %12681 = vst [vmem:[#allocation25_spill] sm:$0xff] %v10038_v17  ;;  %v8089_v17 = vld [vmem:[%s12643_s6 + $0x7c] sm:$0xf] }
 0x2b8   : > { %v10040_v5 = vpop.f32.mrf.mxu2  ;;  %v10042_v21 = vpop.f32.mrf.mxu1 }
 0x2b9   : > { %12682 = vst [vmem:[#allocation26_spill] sm:$0xff] %v10040_v5 }
 0x2ba   : > { %12683 = vst [vmem:[#allocation27_spill] sm:$0xff] %v10042_v21 }
 0x2c0   : > { %v10044_v7 = vpop.f32.mrf.mxu2  ;;  %v10046_v1 = vpop.f32.mrf.mxu1 }
 0x2c1   : > { %12684 = vst [vmem:[#allocation28_spill] sm:$0xff] %v10044_v7 }
 0x2c2   : > { %12685 = vst [vmem:[#allocation29_spill] sm:$0xff] %v10046_v1 }
 0x2c8   : > { %v10048_v32 = vpop.f32.mrf.mxu2  ;;  %v10050_v24 = vpop.f32.mrf.mxu1 }
 0x2c9   : > { %12686 = vst [vmem:[#allocation30_spill] sm:$0xff] %v10048_v32 }
 0x2ca   : > { %12687 = vst [vmem:[#allocation31_spill] sm:$0xff] %v10050_v24 }
 0x2d0   : > { %v10052_v16 = vpop.f32.mrf.mxu2  ;;  %v10054_v49 = vpop.f32.mrf.mxu1 }
 0x2d1   : > { %12688 = vst [vmem:[#allocation32_spill] sm:$0xff] %v10052_v16  ;;  %v6816_v16 = vld [vmem:[%s12643_s6 + $0xa8] sm:$0xf] }
 0x2d2   : > { %12689 = vst [vmem:[#allocation33_spill] sm:$0xff] %v10054_v49  ;;  %v8092_v49 = vld [vmem:[%s12643_s6 + $0x94] sm:$0xf] }
 0x2d8   : > { %v10056_v31 = vpop.f32.mrf.mxu2  ;;  %v10058_v4 = vpop.f32.mrf.mxu1 }
 0x2d9   : > { %12690 = vst [vmem:[#allocation34_spill] sm:$0xff] %v10056_v31 }
 0x2da   : > { %12691 = vst [vmem:[#allocation35_spill] sm:$0xff] %v10058_v4  ;;  %v8096_v4 = vld [vmem:[%s12643_s6 + $0xb0] sm:$0xf0] }
 0x2e0   : > { %v10060_v39 = vpop.f32.mrf.mxu2  ;;  %v10062_v5 = vpop.f32.mrf.mxu1 }
 0x2e1   : > { %12692 = vst [vmem:[#allocation36_spill] sm:$0xff] %v10060_v39  ;;  %v8095_v39 = vld [vmem:[%s12643_s6 + $0xac] sm:$0xf] }
 0x2e2   : > { %12693 = vst [vmem:[#allocation37_spill] sm:$0xff] %v10062_v5  ;;  %v6817_v5 = vor.u32 %v8096_v4, %v6816_v16  ;;  %v6804_v16 = vld [vmem:[%s12643_s6 + $0x90] sm:$0xf]  ;;  %v8093_v4 = vld [vmem:[%s12643_s6 + $0x98] sm:$0xf0] }
 0x2e3   : > { %v6805_v47 = vor.u32 %v8093_v4, %v6804_v16  ;;  %v6792_v4 = vld [vmem:[%s12643_s6 + $0x78] sm:$0xf] }
 0x2e4   : > { %2359 = vmatpush.bf16.msra.mxu0 %v6817_v5  ;;  %v6806_v5 = vld [vmem:[%s12643_s6 + $0x9c] sm:$0xf0] }
 0x2e8   : > { %v10064_v21 = vpop.f32.mrf.mxu2  ;;  %v10066_v7 = vpop.f32.mrf.mxu1  ;;  %2360 = vmatpush.bf16.msra.mxu0 %v6805_v47  ;;  %v6794_v47 = vld [vmem:[%s12643_s6 + $0x84] sm:$0xf0] }
 0x2e9   : > { %12694 = vst [vmem:[#allocation38_spill] sm:$0xff] %v10064_v21 }
 0x2ea   : > { %12695 = vst [vmem:[#allocation39_spill] sm:$0xff] %v10066_v7  ;;  %v6818_v7 = vld [vmem:[%s12643_s6 + $0xb4] sm:$0xf0] }
 0x2eb   : > { %v6821_v21 = vor.u32 %v8095_v39, %v6818_v7  ;;  %v8094_v7 = vld [vmem:[%s12643_s6 + $0xa0] sm:$0xf0] }
 0x2ed   : > { %2373 = vmatpush.bf16.msra.mxu1 %v6821_v21  ;;  %v6812_v21 = vld [vmem:[%s12643_s6 + $0x98] sm:$0xf] }
 0x2f0   : > { %v10068_v1 = vpop.f32.mrf.mxu2  ;;  %v10070_v32 = vpop.f32.mrf.mxu1 }
 0x2f1   : > { %12696 = vst [vmem:[#allocation40_spill] sm:$0xff] %v10068_v1  ;;  %v6824_v1 = vld [vmem:[%s12643_s6 + $0xb0] sm:$0xf] }
 0x2f2   : > { %12697 = vst [vmem:[#allocation41_spill] sm:$0xff] %v10070_v32  ;;  %v8097_v32 = vld [vmem:[%s12643_s6 + $0xb8] sm:$0xf0] }
 0x2f3   : > { %v6825_v31 = vor.u32 %v8097_v32, %v6824_v1  ;;  %v542_v1 = vadd.f32 %v9473_v36, %v9117_v52  ;;  %v6809_v32 = vor.u32 %v8092_v49, %v6806_v5  ;;  %v6800_v49 = vld [vmem:[%s12643_s6 + $0x80] sm:$0xf]  ;;  %v8091_v5 = vld [vmem:[%s12643_s6 + $0x88] sm:$0xf0] }
 0x2f5   : > { %2387 = vmatpush.bf16.msra.mxu2 %v6825_v31  ;;  %v6813_v31 = vor.u32 %v8094_v7, %v6812_v21  ;;  %2374 = vmatpush.bf16.msra.mxu1 %v6809_v32  ;;  %v6797_v7 = vor.u32 %v8089_v17, %v6794_v47  ;;  %v631_v32 = vadd.f32 %v9819_v9, %v9156_v15  ;;  %v8086_v17 = vld [vmem:[%s12643_s6 + $0x64] sm:$0xf]  ;;  %v6782_v9 = vld [vmem:[%s12643_s6 + $0x6c] sm:$0xf0] }
 0x2f6   : > { %v544_v47 = vadd.f32 %v9477_v38, %v9117_v52  ;;  %v8083_v38 = vld [vmem:[%s12643_s6 + $0x4c] sm:$0xf] }
 0x2f8   : > { %v10099_v24 = vpop.f32.mrf.mxu2 }
 0x2f9   : > { %12698 = vst [vmem:[#allocation42_spill] sm:$0xff] %v10099_v24  ;;  %2388 = vmatpush.bf16.msra.mxu2 %v6813_v31  ;;  %v8090_v24 = vld [vmem:[%s12643_s6 + $0x80] sm:$0xf0]  ;;  %2375 = vmatpush.bf16.msra.mxu1 %v6797_v7  ;;  %v8087_v31 = vld [vmem:[%s12643_s6 + $0x68] sm:$0xf0] }
 0x2fa   : > { %v6793_v36 = vor.u32 %v8090_v24, %v6792_v4  ;;  %v6780_v24 = vld [vmem:[%s12643_s6 + $0x60] sm:$0xf]  ;;  %v6788_v4 = vld [vmem:[%s12643_s6 + $0x68] sm:$0xf] }
 0x2fc   : > { %2361 = vmatpush.bf16.msra.mxu0 %v6793_v36  ;;  %v8088_v36 = vld [vmem:[%s12643_s6 + $0x70] sm:$0xf0] }
 0x31a   : > { %v2041_v39 = vpop.f32.mrf.mxu1 }
 0x31b   : > { %v2074_v16 = vadd.f32 %v2041_v39, %v542_v1  ;;  %v6801_v1 = vor.u32 %v8091_v5, %v6800_v49  ;;  %v6785_v5 = vor.u32 %v8086_v17, %v6782_v9  ;;  %v6776_v17 = vld [vmem:[%s12643_s6 + $0x50] sm:$0xf] }
 0x31d   : > { %v6724_v21 = vmul.f32 -1.442695, %v2074_v16  ;;  %2389 = vmatpush.bf16.msra.mxu2 %v6801_v1  ;;  %v6781_v16 = vor.u32 %v8087_v31, %v6780_v24  ;;  %2376 = vmatpush.bf16.msra.mxu1 %v6785_v5  ;;  %v6768_v31 = vld [vmem:[%s12643_s6 + $0x48] sm:$0xf]  ;;  %v8081_v5 = vld [vmem:[%s12643_s6 + $0x38] sm:$0xf0] }
 0x31e   : > { %v6769_v63 = vor.u32 %v8084_v12, %v6768_v31  ;;  %v8085_v12 = vld [vmem:[%s12643_s6 + $0x58] sm:$0xf0]  ;;  %v6764_v31 = vld [vmem:[%s12643_s6 + $0x38] sm:$0xf] }
 0x31f   : > { %8530 = vpow2.f32 %v6724_v21  ;;  %v6789_v21 = vor.u32 %v8088_v36, %v6788_v4  ;;  %2362 = vmatpush.bf16.msra.mxu0 %v6781_v16  ;;  %v6777_v36 = vor.u32 %v8085_v12, %v6776_v17 }
 0x320   : > { %v2055_v39 = vpop.f32.mrf.mxu2 }
 0x321   : > { %v2114_v49 = vadd.f32 %v2055_v39, %v631_v32  ;;  %2390 = vmatpush.bf16.msra.mxu2 %v6789_v21  ;;  %v6770_v32 = vld [vmem:[%s12643_s6 + $0x54] sm:$0xf0]  ;;  %v8080_v21 = vld [vmem:[%s12643_s6 + $0x34] sm:$0xf] }
 0x322   : > { %v2043_v7 = vpop.f32.mrf.mxu1  ;;  %v6773_v9 = vor.u32 %v8083_v38, %v6770_v32  ;;  %v8082_v38 = vld [vmem:[%s12643_s6 + $0x40] sm:$0xf0] }
 0x323   : > { %v6726_v1 = vmul.f32 -1.442695, %v2114_v49  ;;  %v2075_v24 = vadd.f32 %v2043_v7, %v544_v47  ;;  %2363 = vmatpush.bf16.msra.mxu0 %v6769_v63  ;;  %v633_v47 = vadd.f32 %v9829_v50, %v9156_v15  ;;  %v6756_v49 = vld [vmem:[%s12643_s6 + $0x30] sm:$0xf]  ;;  %v6758_v50 = vld [vmem:[%s12643_s6 + $0x3c] sm:$0xf0]  ;;  %v6765_v32 = vor.u32 %v8082_v38, %v6764_v31 }
 0x324   : > { %2377 = vmatpush.bf16.msra.mxu1 %v6773_v9  ;;  %v8078_v9 = vld [vmem:[%s12643_s6 + $0x20] sm:$0xf0]  ;;  %v6732_v38 = vld [vmem:[%s12643_s6] sm:$0xf] }
 0x325   : > { %v8531_v39 = vpop.eup %8530  ;;  %8532 = vpow2.f32 %v6726_v1  ;;  %v6725_v16 = vmul.f32 -1.442695, %v2075_v24  ;;  %2391 = vmatpush.bf16.msra.mxu2 %v6777_v36  ;;  %v6757_v1 = vor.u32 %v8081_v5, %v6756_v49  ;;  %v6761_v24 = vor.u32 %v8080_v21, %v6758_v50  ;;  %v6746_v49 = vld [vmem:[%s12643_s6 + $0x24] sm:$0xf0]  ;;  %v8079_v50 = vld [vmem:[%s12643_s6 + $0x28] sm:$0xf0] }
 0x326   : > { %v10170_v4 = vadd.f32 1.0, %v8531_v39 }
 0x327   : > { %8534 = vpow2.f32 %v6725_v16  ;;  %2364 = vmatpush.bf16.msra.mxu0 %v6757_v1  ;;  %v6744_v16 = vld [vmem:[%s12643_s6 + $0x18] sm:$0xf] }
 0x328   : > { %8536 = vrcp.f32 %v10170_v4  ;;  %v2057_v63 = vpop.f32.mrf.mxu2  ;;  %2378 = vmatpush.bf16.msra.mxu1 %v6761_v24  ;;  %v6745_v36 = vor.u32 %v8078_v9, %v6744_v16  ;;  %v6734_v16 = vld [vmem:[%s12643_s6 + $0xc] sm:$0xf0]  ;;  %vm2089_vm11 = vweird.f32 %v10170_v4 }
 0x329   : > { %v2115_v7 = vadd.f32 %v2057_v63, %v633_v47  ;;  %2392 = vmatpush.bf16.msra.mxu2 %v6765_v32  ;;  %v8077_v47 = vld [vmem:[%s12643_s6 + $0x1c] sm:$0xf]  ;;  %v6752_v63 = vld [vmem:[%s12643_s6 + $0x20] sm:$0xf]  ;;  %v8075_v32 = vld [vmem:[%s12643_s6 + $0x8] sm:$0xf0] }
 0x32a   : > { %v6749_v21 = vor.u32 %v8077_v47, %v6746_v49  ;;  %v6753_v31 = vor.u32 %v8079_v50, %v6752_v63  ;;  %v2095_v47 = vand.u32 2147483648, %v10170_v4  ;;  %v2069_v63 = vpop.f32.mrf.mxu3 }
 0x32b   : > { %v8533_v17 = vpop.eup %8532  ;;  %v6727_v39 = vmul.f32 -1.442695, %v2115_v7  ;;  %2365 = vmatpush.bf16.msra.mxu0 %v6745_v36  ;;  %v6740_v36 = vld [vmem:[%s12643_s6 + $0x8] sm:$0xf] }
 0x32c   : > { %v10199_v12 = vadd.f32 1.0, %v8533_v17  ;;  %2379 = vmatpush.bf16.msra.mxu1 %v6749_v21  ;;  %v6733_v17 = vor.u32 %v8075_v32, %v6732_v38 }
 0x32d   : > { %v8535_v5 = vpop.eup %8534  ;;  %8538 = vpow2.f32 %v6727_v39  ;;  %v8074_v39 = vld [vmem:[%s12643_s6 + $0x4] sm:$0xf]  ;;  %2393 = vmatpush.bf16.msra.mxu2 %v6753_v31 }
 0x32e   : > { %v8537_v7 = vpop.eup %8536  ;;  %8540 = vrcp.f32 %v10199_v12  ;;  %v10215_v24 = vadd.f32 1.0, %v8535_v5  ;;  %v6737_v49 = vor.u32 %v8074_v39, %v6734_v16  ;;  %v8076_v5 = vld [vmem:[%s12643_s6 + $0x10] sm:$0xf0]  ;;  %v2096_v39 = vor.u32 1.1754944e-38, %v2095_v47 }
 0x32f   : > { %v2085_v1 = vmul.f32 %v8537_v7, %v10170_v4  ;;  %vm2090_vm10 = vweird.f32 %v8537_v7  ;;  %2366 = vmatpush.bf16.msra.mxu0 %v6733_v17  ;;  %v6741_v38 = vor.u32 %v8076_v5, %v6740_v36  ;;  %v2154_v17 = vadd.f32 %v9986_v3, %v2069_v63 }
 0x330   : > { %8542 = vrcp.f32 %v10215_v24  ;;  %2380 = vmatpush.bf16.msra.mxu1 %v6737_v49  ;;  %vm2091_vm12 = vmor %vm2089_vm11, %vm2090_vm10  ;;  %v720_v36 = vadd.f32 %v9831_v51, %v9267_v27  ;;  %v2133_v47 = vand.u32 2147483647, %v10199_v12  ;;  %vm2129_vm15 = vweird.f32 %v10199_v12 }
 0x331   : > { %v2086_v9 = vsub.f32 1.0, %v2085_v1  ;;  %v2093_v1 = vand.u32 2147483647, %v10170_v4  ;;  %2394 = vmatpush.bf16.msra.mxu2 %v6741_v38  ;;  %v2135_v4 = vand.u32 2147483648, %v10199_v12  ;;  %vm2104_vm4 = vweird.f32 %v10215_v24 }
 0x332   : > { %vm2134_vm3 = vcmp.eq.f32.partialorder %v2133_v47, 8.507059e+37 }
 0x333   : > { %v8539_v21 = vpop.eup %8538  ;;  %v2087_v50 = vmul.f32 %v8537_v7, %v2086_v9  ;;  %vm2094_vm13 = vcmp.eq.f32.partialorder %v2093_v1, 8.507059e+37  ;;  %v2136_v63 = vor.u32 1.1754944e-38, %v2135_v4 }
 0x334   : > { %v8541_v31 = vpop.eup %8540  ;;  %v10238_v32 = vadd.f32 1.0, %v8539_v21 }
 0x335   : > { %v2125_v18 = vmul.f32 %v8541_v31, %v10199_v12  ;;  %v2088_v62 = vadd.f32 %v8537_v7, %v2087_v50  ;;  %vm2130_vm14 = vweird.f32 %v8541_v31 }
 0x336   : > { %8544 = vrcp.f32 %v10238_v32  ;;  %v8543_v16 = vpop.eup %8542  ;;  %vm2131_vm1 = vmor %vm2129_vm15, %vm2130_vm14  ;;  %v2150_v47 = vand.u32 2147483648, %v10238_v32  ;;  %vm2144_vm8 = vweird.f32 %v10238_v32 }
 0x337   : > { %v2126_v9 = vsub.f32 1.0, %v2125_v18  ;;  %v2092_v60 = vsel %vm2091_vm12, %v8537_v7, %v2088_v62  ;;  %v2100_v5 = vmul.f32 %v8543_v16, %v10215_v24  ;;  %v2110_v62 = vand.u32 2147483648, %v10215_v24 }
 0x338   : > { %v2097_v49 = vsel %vm2094_vm13, %v2096_v39, %v2092_v60  ;;  %vm2105_vm2 = vweird.f32 %v8543_v16  ;;  %v2108_v60 = vand.u32 2147483647, %v10215_v24 }
 0x339   : > { %v2127_v21 = vmul.f32 %v8541_v31, %v2126_v9  ;;  %v2156_v50 = vmul.f32 %v2154_v17, %v2097_v49  ;;  %v2101_v38 = vsub.f32 1.0, %v2100_v5  ;;  %v2071_v9 = vpop.f32.mrf.mxu3  ;;  %vm2106_vm5 = vmor %vm2104_vm4, %vm2105_vm2  ;;  %v2111_v49 = vor.u32 1.1754944e-38, %v2110_v62 }
 0x33a   : > { %vm2109_vm6 = vcmp.eq.f32.partialorder %v2108_v60, 8.507059e+37  ;;  %v2148_v62 = vand.u32 2147483647, %v10238_v32 }
 0x33b   : > { %v2128_v58 = vadd.f32 %v8541_v31, %v2127_v21  ;;  %v2158_v18 = vadd.f32 %v2156_v50, %v720_v36  ;;  %v2102_v51 = vmul.f32 %v8543_v16, %v2101_v38  ;;  %v2155_v21 = vadd.f32 %v9986_v3, %v2071_v9 }
 0x33c   : > { %v8545_v7 = vpop.eup %8544  ;;  %vm2149_vm9 = vcmp.eq.f32.partialorder %v2148_v62, 8.507059e+37  ;;  %v8121_v62 = vld [vmem:[%s12643_s6 + $0xb8] sm:$0xf0] }
 0x33d   : > { %v2132_v1 = vsel %vm2131_vm1, %v8541_v31, %v2128_v58  ;;  %8546 = vtanh.f32 %v2158_v18  ;;  %v2140_v39 = vmul.f32 %v8545_v7, %v10238_v32  ;;  %v2103_v17 = vadd.f32 %v8543_v16, %v2102_v51 }
 0x33e   : > { %v2137_v12 = vsel %vm2134_vm3, %v2136_v63, %v2132_v1  ;;  %vm2145_vm7 = vweird.f32 %v8545_v7  ;;  %v722_v58 = vadd.f32 %v9839_v53, %v9267_v27 }
 0x33f   : > { %v2141_v36 = vsub.f32 1.0, %v2140_v39  ;;  %v2107_v5 = vsel %vm2106_vm5, %v8543_v16, %v2103_v17  ;;  %v2162_v31 = vsub.f32 1.0, %v2137_v12  ;;  %v2166_v51 = vmul.f32 %v2137_v12, %v10014_v43  ;;  %vm2146_vm0 = vmor %vm2144_vm8, %vm2145_vm7 }
 0x340   : > { %v2112_v4 = vsel %vm2109_vm6, %v2111_v49, %v2107_v5  ;;  %v2151_v39 = vor.u32 1.1754944e-38, %v2150_v47  ;;  %v2176_v5 = vpop.permute.xlu0 %2175  ;;  %v6918_v47 = vld [vmem:[%s12643_s6 + $0xa8] sm:$0xf] }
 0x341   : > { %v2142_v50 = vmul.f32 %v8545_v7, %v2141_v36  ;;  %v2157_v38 = vmul.f32 %v2155_v21, %v2112_v4  ;;  %v2179_v21 = vpop.permute.xlu1 %2178  ;;  %vm2180_vm10 = vcmp.eq.s32.totalorder %v2176_v5, 1 }
 0x342   : > { %vm2181_vm11 = vcmp.eq.s32.totalorder %v2179_v21, 1 }
 0x343   : > { %v8547_v18 = vpop.eup %8546  ;;  %v2143_v24 = vadd.f32 %v8545_v7, %v2142_v50  ;;  %v2159_v60 = vadd.f32 %v2157_v38, %v722_v58 }
 0x344   : > { %v2164_v16 = vmul.f32 %v8547_v18, %v2162_v31  ;;  %v6920_v18 = vld [vmem:[%s12643_s6 + $0xb4] sm:$0xf0] }
 0x345   : > { %v2147_v63 = vsel %vm2146_vm0, %v8545_v7, %v2143_v24  ;;  %8548 = vtanh.f32 %v2159_v60  ;;  %v6926_v24 = vld [vmem:[%s12643_s6 + $0xb0] sm:$0xf]  ;;  %v547_v60 = vadd.f32 %v9483_v42, %v9117_v52 }
 0x346   : > { %v2168_v1 = vadd.f32 %v2166_v51, %v2164_v16  ;;  %v2152_v53 = vsel %vm2149_vm9, %v2151_v39, %v2147_v63  ;;  %v6927_v51 = vor.u32 %v8121_v62, %v6926_v24  ;;  %v636_v63 = vadd.f32 %v9849_v35, %v9156_v15  ;;  %v8117_v39 = vld [vmem:[%s12643_s6 + $0x98] sm:$0xf0]  ;;  %v6908_v35 = vld [vmem:[%s12643_s6 + $0x9c] sm:$0xf0]  ;;  %v8115_v62 = vld [vmem:[%s12643_s6 + $0x88] sm:$0xf0] }
 0x347   : > { %v2163_v9 = vsub.f32 1.0, %v2152_v53  ;;  %v2167_v49 = vmul.f32 %v2152_v53, %v10017_v54  ;;  %v8116_v53 = vld [vmem:[%s12643_s6 + $0x94] sm:$0xf]  ;;  %v6902_v24 = vld [vmem:[%s12643_s6 + $0x80] sm:$0xf] }
 0x348   : > { %v2182_v12 = vsel %vm2180_vm10, %v2168_v1, 0.0  ;;  %v10263_v7 = vsel %vm2180_vm10, %v2168_v1, %v10014_v43  ;;  %v8120_v43 = vld [vmem:[%s12643_s6 + $0xb0] sm:$0xf0]  ;;  %2714 = vmatpush.bf16.msrb.mxu1 %v6927_v51  ;;  %v6906_v1 = vld [vmem:[%s12643_s6 + $0x90] sm:$0xf]  ;;  %v549_v51 = vadd.f32 %v9508_v57, %v9117_v52 }
 0x349   : > { %v6919_v38 = vor.u32 %v8120_v43, %v6918_v47  ;;  %v6907_v42 = vor.u32 %v8117_v39, %v6906_v1  ;;  %v8114_v47 = vld [vmem:[%s12643_s6 + $0x80] sm:$0xf0]  ;;  %v8113_v43 = vld [vmem:[%s12643_s6 + $0x7c] sm:$0xf]  ;;  %v8111_v1 = vld [vmem:[%s12643_s6 + $0x68] sm:$0xf0] }
 0x34a   : > { %v8110_v39 = vld [vmem:[%s12643_s6 + $0x64] sm:$0xf] }
 0x34b   : > { %v8549_v17 = vpop.eup %8548  ;;  %2686 = vmatpush.bf16.msrb.mxu3 %v6919_v38 }
 0x34c   : > { %v2165_v36 = vmul.f32 %v8549_v17, %v2163_v9 }
 0x34e   : > { %v2169_v32 = vadd.f32 %v2167_v49, %v2165_v36  ;;  %v6914_v36 = vld [vmem:[%s12643_s6 + $0x98] sm:$0xf]  ;;  %v8118_v49 = vld [vmem:[%s12643_s6 + $0xa0] sm:$0xf0] }
 0x34f   : > { %2687 = vmatpush.bf16.msrb.mxu3 %v6907_v42  ;;  %v8112_v42 = vld [vmem:[%s12643_s6 + $0x70] sm:$0xf0] }
 0x350   : > { %v2183_v50 = vsel %vm2181_vm11, %v2169_v32, 0.0  ;;  %v10266_v4 = vsel %vm2181_vm11, %v2169_v32, %v10017_v54  ;;  %v8119_v54 = vld [vmem:[%s12643_s6 + $0xac] sm:$0xf]  ;;  %v6911_v32 = vor.u32 %v8116_v53, %v6908_v35 }
 0x351   : > { %v8380_v58 = vpack.c.bf16 %v2183_v50, %v2182_v12  ;;  %v2198_v31 = vpack.c.bf16 %v10266_v4, %v10263_v7  ;;  %v6923_v16 = vor.u32 %v8119_v54, %v6920_v18  ;;  %v6915_v12 = vor.u32 %v8118_v49, %v6914_v36  ;;  %v6896_v54 = vld [vmem:[%s12643_s6 + $0x84] sm:$0xf0] }
 0x352   : > { %v6899_v18 = vor.u32 %v8113_v43, %v6896_v54 }
 0x353   : > { %8444 = vst [vmem:[%s8872_s15 + $0x18] sm:$0xff] %v8380_v58   ;;  %2367 = vmatmul.bf16.vlgmr.msra.gmra.mxu0 %v2198_v31  ;;  %2381 = vmatmul.bf16.vlgmr.msra.gmra.mxu1 %v2198_v31 }
 0x354   : > { %2395 = vmatmul.bf16.vlgmr.msra.gmra.mxu2 %v2198_v31  ;;  %2700 = vmatpush.bf16.msrb.mxu0 %v6923_v16  ;;  %v6894_v31 = vld [vmem:[%s12643_s6 + $0x78] sm:$0xf]  ;;  %v6903_v16 = vor.u32 %v8115_v62, %v6902_v24  ;;  %v6878_v24 = vld [vmem:[%s12643_s6 + $0x50] sm:$0xf]  ;;  %v8109_v62 = vld [vmem:[%s12643_s6 + $0x58] sm:$0xf0] }
 0x355   : > { %2715 = vmatpush.bf16.msrb.mxu1 %v6915_v12  ;;  %v6895_v38 = vor.u32 %v8114_v47, %v6894_v31  ;;  %v6870_v12 = vld [vmem:[%s12643_s6 + $0x48] sm:$0xf]  ;;  %v8108_v47 = vld [vmem:[%s12643_s6 + $0x50] sm:$0xf0] }
 0x356   : > { %v6871_v54 = vor.u32 %v8108_v47, %v6870_v12  ;;  %v6848_v12 = vld [vmem:[%s12643_s6 + $0x24] sm:$0xf0]  ;;  %v6854_v47 = vld [vmem:[%s12643_s6 + $0x20] sm:$0xf] }
 0x357   : > { %2688 = vmatpush.bf16.msrb.mxu3 %v6895_v38  ;;  %v8107_v38 = vld [vmem:[%s12643_s6 + $0x4c] sm:$0xf] }
 0x358   : > { %2701 = vmatpush.bf16.msrb.mxu0 %v6911_v32 }
 0x359   : > { %2716 = vmatpush.bf16.msrb.mxu1 %v6903_v16  ;;  %v6858_v16 = vld [vmem:[%s12643_s6 + $0x30] sm:$0xf] }
 0x35c   : > { %2702 = vmatpush.bf16.msrb.mxu0 %v6899_v18  ;;  %v6872_v18 = vld [vmem:[%s12643_s6 + $0x54] sm:$0xf0] }
 0x3d0   : > { %v2368_v9 = vpop.f32.mrf.mxu0  ;;  %v2382_v17 = vpop.f32.mrf.mxu1 }
 0x3d1   : > { %v2401_v5 = vadd.f32 %v2368_v9, %v547_v60  ;;  %v2441_v21 = vadd.f32 %v2382_v17, %v636_v63  ;;  %v638_v60 = vadd.f32 %v9853_v29, %v9156_v15  ;;  %v6882_v63 = vld [vmem:[%s12643_s6 + $0x60] sm:$0xf]  ;;  %v6884_v29 = vld [vmem:[%s12643_s6 + $0x6c] sm:$0xf0]  ;;  %v6890_v17 = vld [vmem:[%s12643_s6 + $0x68] sm:$0xf] }
 0x3d2   : > { %v6883_v57 = vor.u32 %v8111_v1, %v6882_v63  ;;  %v6887_v49 = vor.u32 %v8110_v39, %v6884_v29  ;;  %v6875_v63 = vor.u32 %v8107_v38, %v6872_v18  ;;  %v6879_v1 = vor.u32 %v8109_v62, %v6878_v24  ;;  %v6860_v39 = vld [vmem:[%s12643_s6 + $0x3c] sm:$0xf0] }
 0x3d3   : > { %v6826_v50 = vmul.f32 -1.442695, %v2401_v5  ;;  %v6828_v58 = vmul.f32 -1.442695, %v2441_v21  ;;  %v6891_v5 = vor.u32 %v8112_v42, %v6890_v17 }
 0x3d4   : > { %2689 = vmatpush.bf16.msrb.mxu3 %v6883_v57  ;;  %2703 = vmatpush.bf16.msrb.mxu0 %v6887_v49  ;;  %v8106_v57 = vld [vmem:[%s12643_s6 + $0x40] sm:$0xf0] }
 0x3d5   : > { %8550 = vpow2.f32 %v6826_v50  ;;  %2717 = vmatpush.bf16.msrb.mxu1 %v6891_v5 }
 0x3d6   : > { %8552 = vpow2.f32 %v6828_v58 }
 0x3d8   : > { %v2370_v53 = vpop.f32.mrf.mxu0  ;;  %v2384_v9 = vpop.f32.mrf.mxu1  ;;  %2690 = vmatpush.bf16.msrb.mxu3 %v6871_v54  ;;  %2704 = vmatpush.bf16.msrb.mxu0 %v6875_v63  ;;  %v8103_v54 = vld [vmem:[%s12643_s6 + $0x28] sm:$0xf0] }
 0x3d9   : > { %v2402_v35 = vadd.f32 %v2370_v53, %v549_v51  ;;  %v2442_v36 = vadd.f32 %v2384_v9, %v638_v60  ;;  %v8105_v51 = vld [vmem:[%s12643_s6 + $0x38] sm:$0xf0]  ;;  %v8104_v60 = vld [vmem:[%s12643_s6 + $0x34] sm:$0xf]  ;;  %v6866_v53 = vld [vmem:[%s12643_s6 + $0x38] sm:$0xf]  ;;  %2718 = vmatpush.bf16.msrb.mxu1 %v6879_v1  ;;  %v6855_v1 = vor.u32 %v8103_v54, %v6854_v47 }
 0x3da   : > { %v6859_v9 = vor.u32 %v8105_v51, %v6858_v16  ;;  %v6863_v17 = vor.u32 %v8104_v60, %v6860_v39  ;;  %v6867_v42 = vor.u32 %v8106_v57, %v6866_v53  ;;  %v2396_v60 = vpop.f32.mrf.mxu2  ;;  %v6834_v39 = vld [vmem:[%s12643_s6] sm:$0xf]  ;;  %v8099_v53 = vld [vmem:[%s12643_s6 + $0x8] sm:$0xf0] }
 0x3db   : > { %v8551_v21 = vpop.eup %8550  ;;  %v6827_v32 = vmul.f32 -1.442695, %v2402_v35  ;;  %v6829_v31 = vmul.f32 -1.442695, %v2442_v36  ;;  %v6846_v35 = vld [vmem:[%s12643_s6 + $0x18] sm:$0xf] }
 0x3dc   : > { %v8553_v50 = vpop.eup %8552  ;;  %v10354_v58 = vadd.f32 1.0, %v8551_v21  ;;  %v8102_v36 = vld [vmem:[%s12643_s6 + $0x20] sm:$0xf0]  ;;  %2691 = vmatpush.bf16.msrb.mxu3 %v6859_v9  ;;  %2705 = vmatpush.bf16.msrb.mxu0 %v6863_v17  ;;  %v6836_v17 = vld [vmem:[%s12643_s6 + $0xc] sm:$0xf0] }
 0x3dd   : > { %v10359_v43 = vadd.f32 1.0, %v8553_v50  ;;  %8554 = vpow2.f32 %v6827_v32  ;;  %v6847_v21 = vor.u32 %v8102_v36, %v6846_v35  ;;  %v8101_v32 = vld [vmem:[%s12643_s6 + $0x1c] sm:$0xf]  ;;  %2719 = vmatpush.bf16.msrb.mxu1 %v6867_v42  ;;  %v6842_v35 = vld [vmem:[%s12643_s6 + $0x8] sm:$0xf] }
 0x3de   : > { %8556 = vrcp.f32 %v10354_v58  ;;  %v6851_v16 = vor.u32 %v8101_v32, %v6848_v12  ;;  %v2422_v63 = vand.u32 2147483648, %v10354_v58  ;;  %v2420_v57 = vand.u32 2147483647, %v10354_v58  ;;  %v8100_v12 = vld [vmem:[%s12643_s6 + $0x10] sm:$0xf0] }
 0x3df   : > { %8558 = vrcp.f32 %v10359_v43  ;;  %vm2416_vm13 = vweird.f32 %v10354_v58  ;;  %v6843_v54 = vor.u32 %v8100_v12, %v6842_v35  ;;  %vm2456_vm2 = vweird.f32 %v10359_v43 }
 0x3e0   : > { %8560 = vpow2.f32 %v6829_v31  ;;  %2692 = vmatpush.bf16.msrb.mxu3 %v6847_v21  ;;  %2706 = vmatpush.bf16.msrb.mxu0 %v6851_v16  ;;  %v6835_v21 = vor.u32 %v8099_v53, %v6834_v39  ;;  %v2423_v47 = vor.u32 1.1754944e-38, %v2422_v63  ;;  %vm2421_vm15 = vcmp.eq.f32.partialorder %v2420_v57, 8.507059e+37 }
 0x3e1   : > { %2720 = vmatpush.bf16.msrb.mxu1 %v6855_v1  ;;  %v725_v1 = vadd.f32 %v9855_v56, %v9267_v27  ;;  %v2462_v39 = vand.u32 2147483648, %v10359_v43 }
 0x3e2   : > { %v2398_v35 = vpop.f32.mrf.mxu2 }
 0x3e3   : > { %v8555_v29 = vpop.eup %8554 }
 0x3e4   : > { %v8557_v49 = vpop.eup %8556  ;;  %v10399_v5 = vadd.f32 1.0, %v8555_v29  ;;  %v8098_v29 = vld [vmem:[%s12643_s6 + $0x4] sm:$0xf]  ;;  %2693 = vmatpush.bf16.msrb.mxu3 %v6835_v21 }
 0x3e5   : > { %v10407_v50 = vpop.eup %8558  ;;  %v2412_v31 = vmul.f32 %v8557_v49, %v10354_v58  ;;  %vm2417_vm12 = vweird.f32 %v8557_v49  ;;  %v6839_v32 = vor.u32 %v8098_v29, %v6836_v17  ;;  %2721 = vmatpush.bf16.msrb.mxu1 %v6843_v54  ;;  %v10468_v54 = vld [vmem:[%s12641_s4] ss:$0 sm:$0xff] }
 0x3e6   : > { %v8561_v38 = vpop.eup %8560  ;;  %v2452_v18 = vmul.f32 %v10407_v50, %v10359_v43  ;;  %8562 = vrcp.f32 %v10399_v5  ;;  %vm2418_vm14 = vmor %vm2416_vm13, %vm2417_vm12  ;;  %vm2457_vm1 = vweird.f32 %v10407_v50  ;;  %v2435_v29 = vand.u32 2147483647, %v10399_v5 }
 0x3e7   : > { %v2413_v24 = vsub.f32 1.0, %v2412_v31  ;;  %v10419_v62 = vadd.f32 1.0, %v8561_v38  ;;  %2707 = vmatpush.bf16.msrb.mxu0 %v6839_v32  ;;  %vm10456_vm3 = vmor %vm2456_vm2, %vm2457_vm1  ;;  %vm2431_vm5 = vweird.f32 %v10399_v5 }
 0x3e8   : > { %v2453_v51 = vsub.f32 1.0, %v2452_v18  ;;  %v2481_v18 = vadd.f32 %v9986_v3, %v2396_v60  ;;  %v2460_v3 = vand.u32 2147483647, %v10359_v43  ;;  %v2437_v60 = vand.u32 2147483648, %v10399_v5 }
 0x3e9   : > { %v2414_v9 = vmul.f32 %v8557_v49, %v2413_v24  ;;  %8564 = vrcp.f32 %v10419_v62  ;;  %v2463_v43 = vor.u32 1.1754944e-38, %v2462_v39  ;;  %vm2436_vm8 = vcmp.eq.f32.partialorder %v2435_v29, 8.507059e+37 }
 0x3ea   : > { %v2454_v42 = vmul.f32 %v10407_v50, %v2453_v51  ;;  %vm2461_vm6 = vcmp.eq.f32.partialorder %v2460_v3, 8.507059e+37  ;;  %v2438_v32 = vor.u32 1.1754944e-38, %v2437_v60  ;;  %vm2471_vm9 = vweird.f32 %v10419_v62 }
 0x3eb   : > { %v2415_v36 = vadd.f32 %v8557_v49, %v2414_v9 }
 0x3ec   : > { %v8563_v31 = vpop.eup %8562  ;;  %v2455_v58 = vadd.f32 %v10407_v50, %v2454_v42 }
 0x3ed   : > { %v2419_v38 = vsel %vm2418_vm14, %v8557_v49, %v2415_v36  ;;  %v2427_v24 = vmul.f32 %v8563_v31, %v10399_v5  ;;  %vm2432_vm4 = vweird.f32 %v8563_v31  ;;  %v727_v5 = vadd.f32 %v9861_v45, %v9267_v27 }
 0x3ee   : > { %v2424_v16 = vsel %vm2421_vm15, %v2423_v47, %v2419_v38  ;;  %v2459_v17 = vsel %vm10456_vm3, %v10407_v50, %v2455_v58  ;;  %vm2433_vm7 = vmor %vm2431_vm5, %vm2432_vm4  ;;  %v2482_v50 = vadd.f32 %v10468_v54, %v2398_v35 }
 0x3ef   : > { %v8565_v51 = vpop.eup %8564  ;;  %v2483_v63 = vmul.f32 %v2481_v18, %v2424_v16  ;;  %v2428_v53 = vsub.f32 1.0, %v2427_v24  ;;  %v2464_v12 = vsel %vm2461_vm6, %v2463_v43, %v2459_v17  ;;  %v2477_v24 = vand.u32 2147483648, %v10419_v62  ;;  %v2506_v17 = vpop.permute.xlu0 %2505 }
 0x3f0   : > { %v2467_v49 = vmul.f32 %v8565_v51, %v10419_v62  ;;  %vm2472_vm0 = vweird.f32 %v8565_v51  ;;  %v2489_v16 = vsub.f32 1.0, %v2464_v12  ;;  %vm2508_vm12 = vcmp.eq.s32.totalorder %v2506_v17, 1 }
 0x3f1   : > { %v2485_v57 = vadd.f32 %v2483_v63, %v725_v1  ;;  %v2429_v56 = vmul.f32 %v8563_v31, %v2428_v53  ;;  %vm2473_vm10 = vmor %vm2471_vm9, %vm2472_vm0  ;;  %v2493_v53 = vmul.f32 %v2464_v12, %v10263_v7  ;;  %v641_v12 = vadd.f32 %v9859_v61, %v9156_v15  ;;  %v7028_v61 = vld [vmem:[%s12643_s6 + $0xb0] sm:$0xf] }
 0x3f2   : > { %v2468_v42 = vsub.f32 1.0, %v2467_v49  ;;  %v2478_v49 = vor.u32 1.1754944e-38, %v2477_v24  ;;  %v8145_v24 = vld [vmem:[%s12643_s6 + $0xb8] sm:$0xf0] }
 0x3f3   : > { %8566 = vtanh.f32 %v2485_v57  ;;  %v2430_v36 = vadd.f32 %v8563_v31, %v2429_v56 }
 0x3f4   : > { %v2469_v21 = vmul.f32 %v8565_v51, %v2468_v42 }
 0x3f5   : > { %v2434_v47 = vsel %vm2433_vm7, %v8563_v31, %v2430_v36  ;;  %v2475_v31 = vand.u32 2147483647, %v10419_v62  ;;  %v2503_v62 = vpop.permute.xlu2 %2502 }
 0x3f6   : > { %v2470_v38 = vadd.f32 %v8565_v51, %v2469_v21  ;;  %v2439_v18 = vsel %vm2436_vm8, %v2438_v32, %v2434_v47  ;;  %vm2507_vm13 = vcmp.eq.s32.totalorder %v2503_v62, 1 }
 0x3f7   : > { %v2484_v58 = vmul.f32 %v2482_v50, %v2439_v18  ;;  %vm2476_vm11 = vcmp.eq.f32.partialorder %v2475_v31, 8.507059e+37  ;;  %v7029_v31 = vor.u32 %v8145_v24, %v7028_v61  ;;  %v6984_v61 = vld [vmem:[%s12643_s6 + $0x60] sm:$0xf]  ;;  %v8135_v24 = vld [vmem:[%s12643_s6 + $0x68] sm:$0xf0] }
 0x3f8   : > { %v2474_v3 = vsel %vm2473_vm10, %v8565_v51, %v2470_v38  ;;  %v8143_v38 = vld [vmem:[%s12643_s6 + $0xac] sm:$0xf] }
 0x3f9   : > { %v8567_v1 = vpop.eup %8566  ;;  %v2486_v39 = vadd.f32 %v2484_v58, %v727_v5  ;;  %v2479_v45 = vsel %vm2476_vm11, %v2478_v49, %v2474_v3  ;;  %v7022_v5 = vld [vmem:[%s12643_s6 + $0xb4] sm:$0xf0]  ;;  %3041 = vmatpush.bf16.msra.mxu0 %v7029_v31 }
 0x3fa   : > { %v2491_v63 = vmul.f32 %v8567_v1, %v2489_v16  ;;  %v2490_v9 = vsub.f32 1.0, %v2479_v45  ;;  %v2494_v29 = vmul.f32 %v2479_v45, %v10266_v4  ;;  %v7025_v16 = vor.u32 %v8143_v38, %v7022_v5  ;;  %v8142_v45 = vld [vmem:[%s12643_s6 + $0xa0] sm:$0xf0] }
 0x3fb   : > { %8568 = vtanh.f32 %v2486_v39  ;;  %v552_v1 = vadd.f32 %v9540_v10, %v9117_v52  ;;  %v7008_v39 = vld [vmem:[%s12643_s6 + $0x90] sm:$0xf]  ;;  %v7010_v10 = vld [vmem:[%s12643_s6 + $0x9c] sm:$0xf0]  ;;  %v554_v5 = vadd.f32 %v9561_v26, %v9117_v52 }
 0x3fc   : > { %v2495_v60 = vadd.f32 %v2493_v53, %v2491_v63  ;;  %3027 = vmatpush.bf16.msra.mxu3 %v7025_v16  ;;  %v8141_v63 = vld [vmem:[%s12643_s6 + $0x98] sm:$0xf0]  ;;  %v8140_v53 = vld [vmem:[%s12643_s6 + $0x94] sm:$0xf]  ;;  %v6986_v26 = vld [vmem:[%s12643_s6 + $0x6c] sm:$0xf0] }
 0x3fd   : > { %v7009_v49 = vor.u32 %v8141_v63, %v7008_v39  ;;  %v6992_v63 = vld [vmem:[%s12643_s6 + $0x68] sm:$0xf] }
 0x3fe   : > { %v2509_v35 = vsel %vm2507_vm13, %v2495_v60, 0.0  ;;  %v10479_v51 = vsel %vm2507_vm13, %v2495_v60, %v10263_v7  ;;  %v7020_v7 = vld [vmem:[%s12643_s6 + $0xa8] sm:$0xf]  ;;  %v7016_v60 = vld [vmem:[%s12643_s6 + $0x98] sm:$0xf] }
 0x401   : > { %v8569_v57 = vpop.eup %8568 }
 0x402   : > { %v2492_v56 = vmul.f32 %v8569_v57, %v2490_v9  ;;  %v643_v9 = vadd.f32 %v9863_v0, %v9156_v15  ;;  %v8137_v0 = vld [vmem:[%s12643_s6 + $0x7c] sm:$0xf] }
 0x404   : > { %v2496_v42 = vadd.f32 %v2494_v29, %v2492_v56  ;;  %v7013_v56 = vor.u32 %v8140_v53, %v7010_v10  ;;  %v7017_v29 = vor.u32 %v8142_v45, %v7016_v60  ;;  %v8136_v53 = vld [vmem:[%s12643_s6 + $0x70] sm:$0xf0]  ;;  %v6972_v60 = vld [vmem:[%s12643_s6 + $0x48] sm:$0xf] }
 0x405   : > { %v8132_v45 = vld [vmem:[%s12643_s6 + $0x50] sm:$0xf0] }
 0x406   : > { %v2510_v43 = vsel %vm2508_vm12, %v2496_v42, 0.0  ;;  %v10482_v36 = vsel %vm2508_vm12, %v2496_v42, %v10266_v4  ;;  %v8144_v4 = vld [vmem:[%s12643_s6 + $0xb0] sm:$0xf0]  ;;  %3028 = vmatpush.bf16.msra.mxu3 %v7013_v56  ;;  %3042 = vmatpush.bf16.msra.mxu0 %v7017_v29  ;;  %v8131_v56 = vld [vmem:[%s12643_s6 + $0x4c] sm:$0xf] }
 0x407   : > { %v8385_v21 = vpack.c.bf16 %v2510_v43, %v2509_v35  ;;  %v2525_v32 = vpack.c.bf16 %v10482_v36, %v10479_v51  ;;  %v7021_v18 = vor.u32 %v8144_v4, %v7020_v7  ;;  %v6996_v35 = vld [vmem:[%s12643_s6 + $0x78] sm:$0xf]  ;;  %v8138_v43 = vld [vmem:[%s12643_s6 + $0x80] sm:$0xf0]  ;;  %v8139_v4 = vld [vmem:[%s12643_s6 + $0x88] sm:$0xf0] }
 0x408   : > { %v6974_v29 = vld [vmem:[%s12643_s6 + $0x54] sm:$0xf0] }
 0x409   : > { %8445 = vst [vmem:[%s8872_s15 + $0x20] sm:$0xff] %v8385_v21   ;;  %2694 = vmatmul.bf16.vlgmr.msrb.gmra.mxu3 %v2525_v32  ;;  %2708 = vmatmul.bf16.vlgmr.msrb.gmra.mxu0 %v2525_v32  ;;  %v6997_v21 = vor.u32 %v8138_v43, %v6996_v35  ;;  %v8133_v35 = vld [vmem:[%s12643_s6 + $0x58] sm:$0xf0]  ;;  %v6960_v43 = vld [vmem:[%s12643_s6 + $0x30] sm:$0xf] }
 0x40a   : > { %2722 = vmatmul.bf16.vlgmr.msrb.gmra.mxu1 %v2525_v32  ;;  %3013 = vmatpush.bf16.msrb.mxu2 %v7021_v18  ;;  %v6998_v32 = vld [vmem:[%s12643_s6 + $0x84] sm:$0xf0] }
 0x40b   : > { %v7001_v7 = vor.u32 %v8137_v0, %v6998_v32 }
 0x40d   : > { %3029 = vmatpush.bf16.msra.mxu3 %v7001_v7 }
 0x40e   : > { %3014 = vmatpush.bf16.msrb.mxu2 %v7009_v49 }
 0x412   : > { %3015 = vmatpush.bf16.msrb.mxu2 %v6997_v21  ;;  %v8129_v21 = vld [vmem:[%s12643_s6 + $0x38] sm:$0xf0] }
 0x413   : > { %v6961_v7 = vor.u32 %v8129_v21, %v6960_v43 }
 0x486   : > { %v2709_v47 = vpop.f32.mrf.mxu0 }
 0x487   : > { %v2768_v50 = vadd.f32 %v2709_v47, %v641_v12  ;;  %v7004_v12 = vld [vmem:[%s12643_s6 + $0x80] sm:$0xf] }
 0x488   : > { %v7005_v18 = vor.u32 %v8139_v4, %v7004_v12 }
 0x489   : > { %v6930_v58 = vmul.f32 -1.442695, %v2768_v50 }
 0x48a   : > { %3043 = vmatpush.bf16.msra.mxu0 %v7005_v18  ;;  %v6968_v18 = vld [vmem:[%s12643_s6 + $0x38] sm:$0xf] }
 0x48b   : > { %8570 = vpow2.f32 %v6930_v58  ;;  %v8134_v58 = vld [vmem:[%s12643_s6 + $0x64] sm:$0xf] }
 0x48c   : > { %v2695_v3 = vpop.f32.mrf.mxu3  ;;  %v6989_v39 = vor.u32 %v8134_v58, %v6986_v26  ;;  %v8125_v26 = vld [vmem:[%s12643_s6 + $0x1c] sm:$0xf] }
 0x48d   : > { %v2728_v57 = vadd.f32 %v2695_v3, %v552_v1  ;;  %v6985_v1 = vor.u32 %v8135_v24, %v6984_v61  ;;  %v6993_v3 = vor.u32 %v8136_v53, %v6992_v63  ;;  %v6948_v61 = vld [vmem:[%s12643_s6 + $0x18] sm:$0xf]  ;;  %v6956_v63 = vld [vmem:[%s12643_s6 + $0x20] sm:$0xf] }
 0x48e   : > { %v2711_v17 = vpop.f32.mrf.mxu0  ;;  %3030 = vmatpush.bf16.msra.mxu3 %v6989_v39  ;;  %v6950_v39 = vld [vmem:[%s12643_s6 + $0x24] sm:$0xf0] }
 0x48f   : > { %v6928_v62 = vmul.f32 -1.442695, %v2728_v57  ;;  %v2769_v42 = vadd.f32 %v2711_v17, %v643_v9  ;;  %3016 = vmatpush.bf16.msrb.mxu2 %v6985_v1  ;;  %3044 = vmatpush.bf16.msra.mxu0 %v6993_v3  ;;  %v6973_v57 = vor.u32 %v8132_v45, %v6972_v60  ;;  %v6936_v60 = vld [vmem:[%s12643_s6] sm:$0xf] }
 0x491   : > { %v8571_v47 = vpop.eup %8570  ;;  %8572 = vpow2.f32 %v6928_v62  ;;  %v6931_v50 = vmul.f32 -1.442695, %v2769_v42  ;;  %v6977_v62 = vor.u32 %v8131_v56, %v6974_v29  ;;  %v6980_v42 = vld [vmem:[%s12643_s6 + $0x50] sm:$0xf]  ;;  %v8123_v56 = vld [vmem:[%s12643_s6 + $0x8] sm:$0xf0] }
 0x492   : > { %v10547_v38 = vadd.f32 1.0, %v8571_v47  ;;  %v6981_v12 = vor.u32 %v8133_v35, %v6980_v42  ;;  %v8128_v47 = vld [vmem:[%s12643_s6 + $0x34] sm:$0xf]  ;;  %v8122_v29 = vld [vmem:[%s12643_s6 + $0x4] sm:$0xf]  ;;  %v6937_v43 = vor.u32 %v8123_v56, %v6936_v60 }
 0x493   : > { %8574 = vpow2.f32 %v6931_v50  ;;  %3017 = vmatpush.bf16.msrb.mxu2 %v6973_v57  ;;  %3031 = vmatpush.bf16.msra.mxu3 %v6977_v62  ;;  %v6962_v50 = vld [vmem:[%s12643_s6 + $0x3c] sm:$0xf0] }
 0x494   : > { %v2697_v16 = vpop.f32.mrf.mxu3  ;;  %8576 = vrcp.f32 %v10547_v38  ;;  %v6965_v4 = vor.u32 %v8128_v47, %v6962_v50  ;;  %3045 = vmatpush.bf16.msra.mxu0 %v6981_v12  ;;  %v6944_v12 = vld [vmem:[%s12643_s6 + $0x8] sm:$0xf]  ;;  %v8124_v47 = vld [vmem:[%s12643_s6 + $0x10] sm:$0xf0]  ;;  %v2723_v50 = vpop.f32.mrf.mxu1  ;;  %v2789_v60 = vand.u32 2147483648, %v10547_v38  ;;  %vm2783_vm4 = vweird.f32 %v10547_v38 }
 0x495   : > { %v2729_v31 = vadd.f32 %v2697_v16, %v554_v5  ;;  %v8130_v5 = vld [vmem:[%s12643_s6 + $0x40] sm:$0xf0] }
 0x496   : > { %v6969_v58 = vor.u32 %v8130_v5, %v6968_v18  ;;  %v8126_v16 = vld [vmem:[%s12643_s6 + $0x20] sm:$0xf0] }
 0x497   : > { %v8573_v49 = vpop.eup %8572  ;;  %v6929_v10 = vmul.f32 -1.442695, %v2729_v31  ;;  %3018 = vmatpush.bf16.msrb.mxu2 %v6961_v7  ;;  %3032 = vmatpush.bf16.msra.mxu3 %v6965_v4  ;;  %v6949_v1 = vor.u32 %v8126_v16, %v6948_v61 }
 0x498   : > { %v10576_v9 = vadd.f32 1.0, %v8573_v49  ;;  %v6953_v49 = vor.u32 %v8125_v26, %v6950_v39  ;;  %3046 = vmatpush.bf16.msra.mxu0 %v6969_v58 }
 0x499   : > { %v8575_v17 = vpop.eup %8574  ;;  %8578 = vpow2.f32 %v6929_v10  ;;  %v8127_v10 = vld [vmem:[%s12643_s6 + $0x28] sm:$0xf0] }
 0x49a   : > { %8580 = vrcp.f32 %v10576_v9  ;;  %v10597_v0 = vpop.eup %8576  ;;  %v10599_v32 = vadd.f32 1.0, %v8575_v17  ;;  %v6957_v57 = vor.u32 %v8127_v10, %v6956_v63  ;;  %v6938_v17 = vld [vmem:[%s12643_s6 + $0xc] sm:$0xf0]  ;;  %v2749_v7 = vand.u32 2147483648, %v10576_v9 }
 0x49b   : > { %v2779_v24 = vmul.f32 %v10597_v0, %v10547_v38  ;;  %3019 = vmatpush.bf16.msrb.mxu2 %v6949_v1  ;;  %3033 = vmatpush.bf16.msra.mxu3 %v6953_v49  ;;  %v6941_v21 = vor.u32 %v8122_v29, %v6938_v17  ;;  %v2747_v18 = vand.u32 2147483647, %v10576_v9  ;;  %vm2743_vm15 = vweird.f32 %v10576_v9 }
 0x49c   : > { %8582 = vrcp.f32 %v10599_v32  ;;  %3047 = vmatpush.bf16.msra.mxu0 %v6957_v57  ;;  %v2750_v26 = vor.u32 1.1754944e-38, %v2749_v7  ;;  %vm2784_vm3 = vweird.f32 %v10597_v0  ;;  %vm2798_vm11 = vweird.f32 %v10599_v32 }
 0x49d   : > { %v2780_v62 = vsub.f32 1.0, %v2779_v24  ;;  %v6945_v24 = vor.u32 %v8124_v47, %v6944_v12  ;;  %vm2748_vm2 = vcmp.eq.f32.partialorder %v2747_v18, 8.507059e+37  ;;  %vm10674_vm5 = vmor %vm2783_vm4, %vm2784_vm3  ;;  %v2790_v12 = vor.u32 1.1754944e-38, %v2789_v60 }
 0x49f   : > { %v8579_v31 = vpop.eup %8578  ;;  %v2781_v5 = vmul.f32 %v10597_v0, %v2780_v62  ;;  %3020 = vmatpush.bf16.msrb.mxu2 %v6937_v43  ;;  %3034 = vmatpush.bf16.msra.mxu3 %v6941_v21  ;;  %v2725_v21 = vpop.f32.mrf.mxu1 }
 0x4a0   : > { %v8581_v53 = vpop.eup %8580  ;;  %v10631_v3 = vadd.f32 1.0, %v8579_v31  ;;  %v2808_v31 = vadd.f32 %v10468_v54, %v2723_v50  ;;  %3048 = vmatpush.bf16.msra.mxu0 %v6945_v24  ;;  %v2809_v7 = vadd.f32 %v10468_v54, %v2725_v21  ;;  %v7124_v21 = vld [vmem:[%s12643_s6 + $0xb4] sm:$0xf0] }
 0x4a1   : > { %v2739_v45 = vmul.f32 %v8581_v53, %v10576_v9  ;;  %vm2744_vm14 = vweird.f32 %v8581_v53  ;;  %v2782_v63 = vadd.f32 %v10597_v0, %v2781_v5  ;;  %v730_v9 = vadd.f32 %v9865_v2, %v9267_v27 }
 0x4a2   : > { %8584 = vrcp.f32 %v10631_v3  ;;  %v10650_v42 = vpop.eup %8582  ;;  %vm2745_vm1 = vmor %vm2743_vm15, %vm2744_vm14  ;;  %v2764_v56 = vand.u32 2147483648, %v10631_v3  ;;  %vm2758_vm7 = vweird.f32 %v10631_v3  ;;  %v732_v5 = vadd.f32 %v9871_v37, %v9267_v27 }
 0x4a3   : > { %v2740_v35 = vsub.f32 1.0, %v2739_v45  ;;  %v2794_v61 = vmul.f32 %v10650_v42, %v10599_v32  ;;  %v2786_v2 = vsel %vm10674_vm5, %v10597_v0, %v2782_v63  ;;  %vm2799_vm10 = vweird.f32 %v10650_v42 }
 0x4a4   : > { %v2765_v47 = vor.u32 1.1754944e-38, %v2764_v56  ;;  %vm2800_vm12 = vmor %vm2798_vm11, %vm2799_vm10 }
 0x4a5   : > { %v2741_v4 = vmul.f32 %v8581_v53, %v2740_v35  ;;  %v2795_v10 = vsub.f32 1.0, %v2794_v61  ;;  %v2762_v35 = vand.u32 2147483647, %v10631_v3  ;;  %v2804_v61 = vand.u32 2147483648, %v10599_v32 }
 0x4a7   : > { %v2742_v58 = vadd.f32 %v8581_v53, %v2741_v4  ;;  %v2796_v43 = vmul.f32 %v10650_v42, %v2795_v10  ;;  %vm2763_vm9 = vcmp.eq.f32.partialorder %v2762_v35, 8.507059e+37  ;;  %v2805_v63 = vor.u32 1.1754944e-38, %v2804_v61 }
 0x4a8   : > { %v8585_v16 = vpop.eup %8584 }
 0x4a9   : > { %v2746_v1 = vsel %vm2745_vm1, %v8581_v53, %v2742_v58  ;;  %v2754_v39 = vmul.f32 %v8585_v16, %v10631_v3  ;;  %v2787_v53 = vand.u32 2147483647, %v10547_v38  ;;  %vm2759_vm6 = vweird.f32 %v8585_v16 }
 0x4aa   : > { %v2751_v49 = vsel %vm2748_vm2, %v2750_v26, %v2746_v1  ;;  %vm2760_vm0 = vmor %vm2758_vm7, %vm2759_vm6  ;;  %v2797_v18 = vadd.f32 %v10650_v42, %v2796_v43  ;;  %v2802_v58 = vand.u32 2147483647, %v10599_v32  ;;  %v2830_v32 = vpop.permute.xlu1 %2829 }
 0x4ab   : > { %v2810_v45 = vmul.f32 %v2808_v31, %v2751_v49  ;;  %v2755_v57 = vsub.f32 1.0, %v2754_v39  ;;  %vm2788_vm8 = vcmp.eq.f32.partialorder %v2787_v53, 8.507059e+37  ;;  %vm2834_vm14 = vcmp.eq.s32.totalorder %v2830_v32, 1  ;;  %v7106_v32 = vld [vmem:[%s12643_s6 + $0x80] sm:$0xf] }
 0x4ac   : > { %v2791_v50 = vsel %vm2788_vm8, %v2790_v12, %v2786_v2  ;;  %v2801_v1 = vsel %vm2800_vm12, %v10650_v42, %v2797_v18  ;;  %vm2803_vm13 = vcmp.eq.f32.partialorder %v2802_v58, 8.507059e+37  ;;  %v7122_v2 = vld [vmem:[%s12643_s6 + $0xa8] sm:$0xf]  ;;  %v7130_v12 = vld [vmem:[%s12643_s6 + $0xb0] sm:$0xf] }
 0x4ad   : > { %v2812_v17 = vadd.f32 %v2810_v45, %v730_v9  ;;  %v2756_v62 = vmul.f32 %v8585_v16, %v2755_v57  ;;  %v2816_v3 = vsub.f32 1.0, %v2791_v50  ;;  %v2820_v31 = vmul.f32 %v2791_v50, %v10479_v51  ;;  %v2833_v57 = vpop.permute.xlu2 %2832  ;;  %v7110_v18 = vld [vmem:[%s12643_s6 + $0x90] sm:$0xf]  ;;  %v8166_v58 = vld [vmem:[%s12643_s6 + $0xa0] sm:$0xf0] }
 0x4ae   : > { %v2806_v49 = vsel %vm2803_vm13, %v2805_v63, %v2801_v1  ;;  %vm2835_vm15 = vcmp.eq.s32.totalorder %v2833_v57, 1  ;;  %v8163_v57 = vld [vmem:[%s12643_s6 + $0x88] sm:$0xf0] }
 0x4af   : > { %8586 = vtanh.f32 %v2812_v17  ;;  %v2757_v38 = vadd.f32 %v8585_v16, %v2756_v62  ;;  %v2817_v10 = vsub.f32 1.0, %v2806_v49  ;;  %v2821_v60 = vmul.f32 %v2806_v49, %v10482_v36  ;;  %v8162_v49 = vld [vmem:[%s12643_s6 + $0x80] sm:$0xf0] }
 0x4b1   : > { %v2761_v4 = vsel %vm2760_vm0, %v8585_v16, %v2757_v38  ;;  %v8169_v38 = vld [vmem:[%s12643_s6 + $0xb8] sm:$0xf0] }
 0x4b2   : > { %v2766_v0 = vsel %vm2763_vm9, %v2765_v47, %v2761_v4  ;;  %v7131_v50 = vor.u32 %v8169_v38, %v7130_v12  ;;  %v646_v4 = vadd.f32 %v9869_v30, %v9156_v15  ;;  %v7112_v30 = vld [vmem:[%s12643_s6 + $0x9c] sm:$0xf0] }
 0x4b3   : > { %v2811_v24 = vmul.f32 %v2809_v7, %v2766_v0  ;;  %v557_v7 = vadd.f32 %v9591_v59, %v9117_v52  ;;  %v8165_v0 = vld [vmem:[%s12643_s6 + $0x98] sm:$0xf0] }
 0x4b4   : > { %3368 = vmatpush.bf16.msrb.mxu3 %v7131_v50  ;;  %v7111_v59 = vor.u32 %v8165_v0, %v7110_v18  ;;  %v7074_v18 = vld [vmem:[%s12643_s6 + $0x48] sm:$0xf] }
 0x4b5   : > { %v8587_v26 = vpop.eup %8586  ;;  %v2813_v16 = vadd.f32 %v2811_v24, %v732_v5  ;;  %v8164_v5 = vld [vmem:[%s12643_s6 + $0x94] sm:$0xf] }
 0x4b6   : > { %v2818_v39 = vmul.f32 %v8587_v26, %v2816_v3  ;;  %v7118_v3 = vld [vmem:[%s12643_s6 + $0x98] sm:$0xf] }
 0x4b7   : > { %8588 = vtanh.f32 %v2813_v16  ;;  %v7119_v1 = vor.u32 %v8166_v58, %v7118_v3  ;;  %v8155_v3 = vld [vmem:[%s12643_s6 + $0x4c] sm:$0xf]  ;;  %v7076_v58 = vld [vmem:[%s12643_s6 + $0x54] sm:$0xf0] }
 0x4b8   : > { %v2822_v37 = vadd.f32 %v2820_v31, %v2818_v39  ;;  %v7115_v31 = vor.u32 %v8164_v5, %v7112_v30 }
 0x4b9   : > { %3369 = vmatpush.bf16.msrb.mxu3 %v7119_v1  ;;  %v7079_v1 = vor.u32 %v8155_v3, %v7076_v58 }
 0x4ba   : > { %v2836_v56 = vsel %vm2834_vm14, %v2822_v37, 0.0  ;;  %v10696_v42 = vsel %vm2834_vm14, %v2822_v37, %v10479_v51  ;;  %v8168_v51 = vld [vmem:[%s12643_s6 + $0xb0] sm:$0xf0]  ;;  %v7098_v37 = vld [vmem:[%s12643_s6 + $0x78] sm:$0xf] }
 0x4bb   : > { %v7123_v43 = vor.u32 %v8168_v51, %v7122_v2  ;;  %v8158_v2 = vld [vmem:[%s12643_s6 + $0x64] sm:$0xf] }
 0x4bd   : > { %v8589_v9 = vpop.eup %8588  ;;  %3340 = vmatpush.bf16.msra.mxu1 %v7123_v43  ;;  %v7094_v43 = vld [vmem:[%s12643_s6 + $0x68] sm:$0xf] }
 0x4be   : > { %v2819_v45 = vmul.f32 %v8589_v9, %v2817_v10  ;;  %v8161_v10 = vld [vmem:[%s12643_s6 + $0x7c] sm:$0xf]  ;;  %v7100_v9 = vld [vmem:[%s12643_s6 + $0x84] sm:$0xf0] }
 0x4c0   : > { %v2823_v53 = vadd.f32 %v2821_v60, %v2819_v45  ;;  %v7099_v60 = vor.u32 %v8162_v49, %v7098_v37  ;;  %v7103_v45 = vor.u32 %v8161_v10, %v7100_v9  ;;  %v7064_v10 = vld [vmem:[%s12643_s6 + $0x3c] sm:$0xf0]  ;;  %v7070_v9 = vld [vmem:[%s12643_s6 + $0x38] sm:$0xf] }
 0x4c1   : > { %3341 = vmatpush.bf16.msra.mxu1 %v7111_v59 }
 0x4c2   : > { %v2837_v29 = vsel %vm2835_vm15, %v2823_v53, 0.0  ;;  %v10699_v17 = vsel %vm2835_vm15, %v2823_v53, %v10482_v36  ;;  %v8167_v36 = vld [vmem:[%s12643_s6 + $0xac] sm:$0xf]  ;;  %v7107_v53 = vor.u32 %v8163_v57, %v7106_v32  ;;  %v7050_v32 = vld [vmem:[%s12643_s6 + $0x18] sm:$0xf] }
 0x4c3   : > { %v8390_v62 = vpack.c.bf16 %v2837_v29, %v2836_v56  ;;  %v2852_v35 = vpack.c.bf16 %v10699_v17, %v10696_v42  ;;  %v7127_v47 = vor.u32 %v8167_v36, %v7124_v21  ;;  %v559_v56 = vadd.f32 %v9649_v46, %v9117_v52  ;;  %v8160_v21 = vld [vmem:[%s12643_s6 + $0x70] sm:$0xf0]  ;;  %v8150_v57 = vld [vmem:[%s12643_s6 + $0x20] sm:$0xf0] }
 0x4c4   : > { %v648_v29 = vadd.f32 %v9885_v41, %v9156_v15  ;;  %3370 = vmatpush.bf16.msrb.mxu3 %v7107_v53  ;;  %v7088_v41 = vld [vmem:[%s12643_s6 + $0x6c] sm:$0xf0]  ;;  %v7095_v50 = vor.u32 %v8160_v21, %v7094_v43  ;;  %v7038_v21 = vld [vmem:[%s12643_s6] sm:$0xf] }
 0x4c5   : > { %8446 = vst [vmem:[%s8872_s15 + $0x28] sm:$0xff] %v8390_v62   ;;  %3021 = vmatmul.bf16.vlgmr.msrb.gmra.mxu2 %v2852_v35  ;;  %3035 = vmatmul.bf16.vlgmr.msra.gmra.mxu3 %v2852_v35  ;;  %v7086_v62 = vld [vmem:[%s12643_s6 + $0x60] sm:$0xf] }
 0x4c6   : > { %3049 = vmatmul.bf16.vlgmr.msra.gmra.mxu0 %v2852_v35  ;;  %3354 = vmatpush.bf16.msra.mxu2 %v7127_v47  ;;  %v8159_v35 = vld [vmem:[%s12643_s6 + $0x68] sm:$0xf0]  ;;  %v7091_v47 = vor.u32 %v8158_v2, %v7088_v41 }
 0x4c7   : > { %3342 = vmatpush.bf16.msra.mxu1 %v7099_v60  ;;  %v7087_v46 = vor.u32 %v8159_v35, %v7086_v62  ;;  %v8149_v62 = vld [vmem:[%s12643_s6 + $0x1c] sm:$0xf]  ;;  %v7052_v35 = vld [vmem:[%s12643_s6 + $0x24] sm:$0xf0] }
 0x4c8   : > { %3371 = vmatpush.bf16.msrb.mxu3 %v7095_v50  ;;  %v7055_v50 = vor.u32 %v8149_v62, %v7052_v35 }
 0x4ca   : > { %3355 = vmatpush.bf16.msra.mxu2 %v7115_v31  ;;  %v7062_v31 = vld [vmem:[%s12643_s6 + $0x30] sm:$0xf] }
 0x4cb   : > { %3343 = vmatpush.bf16.msra.mxu1 %v7087_v46  ;;  %v8151_v46 = vld [vmem:[%s12643_s6 + $0x28] sm:$0xf0] }
 0x4ce   : > { %3356 = vmatpush.bf16.msra.mxu2 %v7103_v45  ;;  %v8154_v45 = vld [vmem:[%s12643_s6 + $0x40] sm:$0xf0] }
 0x4d2   : > { %3357 = vmatpush.bf16.msra.mxu2 %v7091_v47 }
 0x4d6   : > { %3358 = vmatpush.bf16.msra.mxu2 %v7079_v1 }
 0x548   : > { %v3022_v61 = vpop.f32.mrf.mxu2  ;;  %v3036_v24 = vpop.f32.mrf.mxu3 }
 0x549   : > { %v3055_v26 = vadd.f32 %v3022_v61, %v557_v7  ;;  %v3095_v16 = vadd.f32 %v3036_v24, %v646_v4  ;;  %v8156_v24 = vld [vmem:[%s12643_s6 + $0x50] sm:$0xf0] }
 0x54a   : > { %v7075_v30 = vor.u32 %v8156_v24, %v7074_v18  ;;  %v3050_v24 = vpop.f32.mrf.mxu0 }
 0x54b   : > { %v7030_v39 = vmul.f32 -1.442695, %v3055_v26  ;;  %v7032_v63 = vmul.f32 -1.442695, %v3095_v16  ;;  %v7082_v26 = vld [vmem:[%s12643_s6 + $0x50] sm:$0xf] }
 0x54c   : > { %v8157_v16 = vld [vmem:[%s12643_s6 + $0x58] sm:$0xf0]  ;;  %3344 = vmatpush.bf16.msra.mxu1 %v7075_v30 }
 0x54d   : > { %8590 = vpow2.f32 %v7030_v39  ;;  %v8153_v39 = vld [vmem:[%s12643_s6 + $0x38] sm:$0xf0]  ;;  %v7083_v37 = vor.u32 %v8157_v16, %v7082_v26  ;;  %v7046_v26 = vld [vmem:[%s12643_s6 + $0x8] sm:$0xf]  ;;  %v8148_v16 = vld [vmem:[%s12643_s6 + $0x10] sm:$0xf0] }
 0x54e   : > { %8592 = vpow2.f32 %v7032_v63  ;;  %v8152_v63 = vld [vmem:[%s12643_s6 + $0x34] sm:$0xf]  ;;  %v7063_v49 = vor.u32 %v8153_v39, %v7062_v31 }
 0x54f   : > { %v7067_v60 = vor.u32 %v8152_v63, %v7064_v10  ;;  %3372 = vmatpush.bf16.msrb.mxu3 %v7083_v37 }
 0x550   : > { %v3024_v51 = vpop.f32.mrf.mxu2  ;;  %v3038_v36 = vpop.f32.mrf.mxu3  ;;  %3345 = vmatpush.bf16.msra.mxu1 %v7063_v49  ;;  %v7047_v49 = vor.u32 %v8148_v16, %v7046_v26 }
 0x551   : > { %v3056_v12 = vadd.f32 %v3024_v51, %v559_v56  ;;  %v3096_v38 = vadd.f32 %v3038_v36, %v648_v29  ;;  %v7071_v56 = vor.u32 %v8154_v45, %v7070_v9  ;;  %v7051_v29 = vor.u32 %v8150_v57, %v7050_v32  ;;  %v7058_v36 = vld [vmem:[%s12643_s6 + $0x20] sm:$0xf]  ;;  %3359 = vmatpush.bf16.msra.mxu2 %v7067_v60 }
 0x552   : > { %v7059_v18 = vor.u32 %v8151_v46, %v7058_v36  ;;  %v3135_v60 = vadd.f32 %v10468_v54, %v3050_v24 }
 0x553   : > { %v8591_v7 = vpop.eup %8590  ;;  %v7031_v4 = vmul.f32 -1.442695, %v3056_v12  ;;  %v7033_v61 = vmul.f32 -1.442695, %v3096_v38  ;;  %v8147_v12 = vld [vmem:[%s12643_s6 + $0x8] sm:$0xf0]  ;;  %3373 = vmatpush.bf16.msrb.mxu3 %v7071_v56 }
 0x554   : > { %v8593_v0 = vpop.eup %8592  ;;  %v10787_v5 = vadd.f32 1.0, %v8591_v7  ;;  %3346 = vmatpush.bf16.msra.mxu1 %v7051_v29  ;;  %v7039_v58 = vor.u32 %v8147_v12, %v7038_v21  ;;  %v7232_v21 = vld [vmem:[%s12643_s6 + $0xb0] sm:$0xf] }
 0x555   : > { %v10792_v59 = vadd.f32 1.0, %v8593_v0  ;;  %8594 = vpow2.f32 %v7031_v4  ;;  %v8146_v0 = vld [vmem:[%s12643_s6 + $0x4] sm:$0xf]  ;;  %3360 = vmatpush.bf16.msra.mxu2 %v7055_v50 }
 0x556   : > { %8596 = vrcp.f32 %v10787_v5  ;;  %v3076_v30 = vand.u32 2147483648, %v10787_v5  ;;  %v3074_v1 = vand.u32 2147483647, %v10787_v5  ;;  %vm3070_vm2 = vweird.f32 %v10787_v5 }
 0x557   : > { %8598 = vrcp.f32 %v10792_v59  ;;  %3374 = vmatpush.bf16.msrb.mxu3 %v7059_v18  ;;  %v3116_v62 = vand.u32 2147483648, %v10792_v59  ;;  %vm3110_vm6 = vweird.f32 %v10792_v59 }
 0x558   : > { %8600 = vpow2.f32 %v7033_v61  ;;  %v7040_v61 = vld [vmem:[%s12643_s6 + $0xc] sm:$0xf0]  ;;  %3347 = vmatpush.bf16.msra.mxu1 %v7039_v58  ;;  %v3077_v9 = vor.u32 1.1754944e-38, %v3076_v30  ;;  %vm3075_vm4 = vcmp.eq.f32.partialorder %v3074_v1, 8.507059e+37 }
 0x559   : > { %v7043_v63 = vor.u32 %v8146_v0, %v7040_v61 }
 0x55b   : > { %v8595_v53 = vpop.eup %8594  ;;  %3361 = vmatpush.bf16.msra.mxu2 %v7043_v63  ;;  %3375 = vmatpush.bf16.msrb.mxu3 %v7047_v49 }
 0x55c   : > { %v8597_v2 = vpop.eup %8596  ;;  %v10838_v51 = vadd.f32 1.0, %v8595_v53 }
 0x55d   : > { %v10846_v41 = vpop.eup %8598  ;;  %v3066_v43 = vmul.f32 %v8597_v2, %v10787_v5  ;;  %vm3071_vm1 = vweird.f32 %v8597_v2  ;;  %v735_v5 = vadd.f32 %v9877_v33, %v9267_v27 }
 0x55e   : > { %v8601_v38 = vpop.eup %8600  ;;  %v3106_v47 = vmul.f32 %v10846_v41, %v10792_v59  ;;  %8602 = vrcp.f32 %v10838_v51  ;;  %vm3072_vm3 = vmor %vm3070_vm2, %vm3071_vm1  ;;  %vm3111_vm5 = vweird.f32 %v10846_v41  ;;  %v3091_v36 = vand.u32 2147483648, %v10838_v51 }
 0x55f   : > { %v3067_v7 = vsub.f32 1.0, %v3066_v43  ;;  %v10858_v4 = vadd.f32 1.0, %v8601_v38  ;;  %vm10888_vm7 = vmor %vm3110_vm6, %vm3111_vm5  ;;  %v3089_v33 = vand.u32 2147483647, %v10838_v51  ;;  %vm3085_vm0 = vweird.f32 %v10838_v51 }
 0x560   : > { %v3107_v3 = vsub.f32 1.0, %v3106_v47  ;;  %v3052_v47 = vpop.f32.mrf.mxu0  ;;  %v3092_v18 = vor.u32 1.1754944e-38, %v3091_v36  ;;  %v7224_v36 = vld [vmem:[%s12643_s6 + $0xa8] sm:$0xf] }
 0x561   : > { %v3068_v31 = vmul.f32 %v8597_v2, %v3067_v7  ;;  %8604 = vrcp.f32 %v10858_v4  ;;  %v3136_v24 = vadd.f32 %v10468_v54, %v3052_v47  ;;  %vm3090_vm11 = vcmp.eq.f32.partialorder %v3089_v33, 8.507059e+37 }
 0x562   : > { %v3108_v39 = vmul.f32 %v10846_v41, %v3107_v3  ;;  %v3131_v16 = vand.u32 2147483648, %v10858_v4  ;;  %vm3125_vm13 = vweird.f32 %v10858_v4  ;;  %v562_v47 = vadd.f32 %v9712_v34, %v9117_v52  ;;  %v7214_v34 = vld [vmem:[%s12643_s6 + $0x9c] sm:$0xf0] }
 0x563   : > { %v3069_v37 = vadd.f32 %v8597_v2, %v3068_v31 }
 0x564   : > { %v8603_v10 = vpop.eup %8602  ;;  %v3109_v53 = vadd.f32 %v10846_v41, %v3108_v39  ;;  %v3132_v49 = vor.u32 1.1754944e-38, %v3131_v16  ;;  %v8186_v16 = vld [vmem:[%s12643_s6 + $0x80] sm:$0xf0] }
 0x565   : > { %v3073_v45 = vsel %vm3072_vm3, %v8597_v2, %v3069_v37  ;;  %v3081_v32 = vmul.f32 %v8603_v10, %v10838_v51  ;;  %v3114_v2 = vand.u32 2147483647, %v10792_v59  ;;  %vm3086_vm8 = vweird.f32 %v8603_v10 }
 0x566   : > { %v3078_v57 = vsel %vm3075_vm4, %v3077_v9, %v3073_v45  ;;  %v3113_v38 = vsel %vm10888_vm7, %v10846_v41, %v3109_v53  ;;  %v3117_v59 = vor.u32 1.1754944e-38, %v3116_v62  ;;  %vm3087_vm10 = vmor %vm3085_vm0, %vm3086_vm8  ;;  %v737_v41 = vadd.f32 %v9909_v11, %v9267_v27 }
 0x567   : > { %v8605_v56 = vpop.eup %8604  ;;  %v3137_v29 = vmul.f32 %v3135_v60, %v3078_v57  ;;  %v3082_v35 = vsub.f32 1.0, %v3081_v32  ;;  %vm3115_vm9 = vcmp.eq.f32.partialorder %v3114_v2, 8.507059e+37  ;;  %v3129_v51 = vand.u32 2147483647, %v10858_v4  ;;  %v3157_v57 = vpop.permute.xlu0 %3156 }
 0x568   : > { %v3121_v46 = vmul.f32 %v8605_v56, %v10858_v4  ;;  %v3118_v61 = vsel %vm3115_vm9, %v3117_v59, %v3113_v38  ;;  %vm3126_vm12 = vweird.f32 %v8605_v56  ;;  %v3160_v4 = vpop.permute.xlu1 %3159  ;;  %vm3161_vm1 = vcmp.eq.s32.totalorder %v3157_v57, 1  ;;  %v8189_v59 = vld [vmem:[%s12643_s6 + $0x98] sm:$0xf0] }
 0x569   : > { %v3139_v43 = vadd.f32 %v3137_v29, %v735_v5  ;;  %v3083_v12 = vmul.f32 %v8603_v10, %v3082_v35  ;;  %v3143_v31 = vsub.f32 1.0, %v3118_v61  ;;  %vm3127_vm14 = vmor %vm3125_vm13, %vm3126_vm12  ;;  %v3147_v54 = vmul.f32 %v3118_v61, %v10696_v42  ;;  %v7220_v61 = vld [vmem:[%s12643_s6 + $0x98] sm:$0xf] }
 0x56a   : > { %v3122_v50 = vsub.f32 1.0, %v3121_v46  ;;  %vm3130_vm15 = vcmp.eq.f32.partialorder %v3129_v51, 8.507059e+37  ;;  %vm3162_vm2 = vcmp.eq.s32.totalorder %v3160_v4, 1  ;;  %v8185_v51 = vld [vmem:[%s12643_s6 + $0x7c] sm:$0xf] }
 0x56b   : > { %8606 = vtanh.f32 %v3139_v43  ;;  %v3084_v7 = vadd.f32 %v8603_v10, %v3083_v12  ;;  %v7226_v43 = vld [vmem:[%s12643_s6 + $0xb4] sm:$0xf0]  ;;  %v8193_v12 = vld [vmem:[%s12643_s6 + $0xb8] sm:$0xf0]  ;;  %v7196_v4 = vld [vmem:[%s12643_s6 + $0x68] sm:$0xf] }
 0x56c   : > { %v3123_v0 = vmul.f32 %v8605_v56, %v3122_v50  ;;  %v7233_v38 = vor.u32 %v8193_v12, %v7232_v21  ;;  %v7212_v50 = vld [vmem:[%s12643_s6 + $0x90] sm:$0xf]  ;;  %v8179_v12 = vld [vmem:[%s12643_s6 + $0x4c] sm:$0xf] }
 0x56d   : > { %v3088_v30 = vsel %vm3087_vm10, %v8603_v10, %v3084_v7  ;;  %v8188_v7 = vld [vmem:[%s12643_s6 + $0x94] sm:$0xf] }
 0x56e   : > { %v3093_v3 = vsel %vm3090_vm11, %v3092_v18, %v3088_v30  ;;  %v3124_v58 = vadd.f32 %v8605_v56, %v3123_v0  ;;  %3695 = vmatpush.bf16.msrb.mxu2 %v7233_v38  ;;  %v7213_v0 = vor.u32 %v8189_v59, %v7212_v50  ;;  %v653_v38 = vadd.f32 %v9955_v14, %v9156_v15  ;;  %v7184_v50 = vld [vmem:[%s12643_s6 + $0x50] sm:$0xf]  ;;  %v8181_v59 = vld [vmem:[%s12643_s6 + $0x58] sm:$0xf0] }
 0x56f   : > { %v3138_v26 = vmul.f32 %v3136_v24, %v3093_v3  ;;  %v8190_v24 = vld [vmem:[%s12643_s6 + $0xa0] sm:$0xf0]  ;;  %v7217_v3 = vor.u32 %v8188_v7, %v7214_v34  ;;  %v7164_v14 = vld [vmem:[%s12643_s6 + $0x30] sm:$0xf]  ;;  %v8177_v34 = vld [vmem:[%s12643_s6 + $0x38] sm:$0xf0] }
 0x570   : > { %v3128_v63 = vsel %vm3127_vm14, %v8605_v56, %v3124_v58  ;;  %v7221_v58 = vor.u32 %v8190_v24, %v7220_v61  ;;  %v8176_v61 = vld [vmem:[%s12643_s6 + $0x34] sm:$0xf]  ;;  %v7165_v24 = vor.u32 %v8177_v34, %v7164_v14  ;;  %v11087_v34 = vld [vmem:[%s12641_s4] ss:$0 sm:$0xff] }
 0x571   : > { %v8607_v1 = vpop.eup %8606  ;;  %v3140_v39 = vadd.f32 %v3138_v26, %v737_v41  ;;  %v3133_v11 = vsel %vm3130_vm15, %v3132_v49, %v3128_v63  ;;  %v7200_v26 = vld [vmem:[%s12643_s6 + $0x78] sm:$0xf] }
 0x572   : > { %v3145_v37 = vmul.f32 %v8607_v1, %v3143_v31  ;;  %v3144_v9 = vsub.f32 1.0, %v3133_v11  ;;  %v3148_v45 = vmul.f32 %v3133_v11, %v10699_v17  ;;  %3696 = vmatpush.bf16.msrb.mxu2 %v7221_v58  ;;  %v7201_v31 = vor.u32 %v8186_v16, %v7200_v26  ;;  %v7202_v1 = vld [vmem:[%s12643_s6 + $0x84] sm:$0xf0]  ;;  %v8178_v16 = vld [vmem:[%s12643_s6 + $0x40] sm:$0xf0] }
 0x573   : > { %8608 = vtanh.f32 %v3140_v39  ;;  %v7208_v39 = vld [vmem:[%s12643_s6 + $0x80] sm:$0xf]  ;;  %v7205_v63 = vor.u32 %v8185_v51, %v7202_v1  ;;  %v564_v11 = vadd.f32 %v9742_v19, %v9117_v52  ;;  %v7190_v19 = vld [vmem:[%s12643_s6 + $0x6c] sm:$0xf0] }
 0x574   : > { %v3149_v10 = vadd.f32 %v3147_v54, %v3145_v37  ;;  %v651_v54 = vadd.f32 %v9917_v44, %v9156_v15  ;;  %v8187_v37 = vld [vmem:[%s12643_s6 + $0x88] sm:$0xf0] }
 0x575   : > { %v8183_v44 = vld [vmem:[%s12643_s6 + $0x68] sm:$0xf0] }
 0x576   : > { %v3163_v5 = vsel %vm3161_vm1, %v3149_v10, 0.0  ;;  %v10906_v56 = vsel %vm3161_vm1, %v3149_v10, %v10696_v42  ;;  %v8192_v42 = vld [vmem:[%s12643_s6 + $0xb0] sm:$0xf0]  ;;  %v7209_v10 = vor.u32 %v8187_v37, %v7208_v39  ;;  %v7152_v39 = vld [vmem:[%s12643_s6 + $0x18] sm:$0xf] }
 0x577   : > { %v7225_v46 = vor.u32 %v8192_v42, %v7224_v36 }
 0x578   : > { %3697 = vmatpush.bf16.msrb.mxu2 %v7209_v10 }
 0x579   : > { %v8609_v60 = vpop.eup %8608  ;;  %3667 = vmatpush.bf16.msrb.mxu0 %v7225_v46  ;;  %v8180_v46 = vld [vmem:[%s12643_s6 + $0x50] sm:$0xf0] }
 0x57a   : > { %v3146_v32 = vmul.f32 %v8609_v60, %v3144_v9  ;;  %v7188_v60 = vld [vmem:[%s12643_s6 + $0x60] sm:$0xf] }
 0x57b   : > { %v7189_v57 = vor.u32 %v8183_v44, %v7188_v60  ;;  %v7160_v60 = vld [vmem:[%s12643_s6 + $0x20] sm:$0xf]  ;;  %v8175_v44 = vld [vmem:[%s12643_s6 + $0x28] sm:$0xf0] }
 0x57c   : > { %v3150_v53 = vadd.f32 %v3148_v45, %v3146_v32  ;;  %v8182_v45 = vld [vmem:[%s12643_s6 + $0x64] sm:$0xf] }
 0x57d   : > { %3668 = vmatpush.bf16.msrb.mxu0 %v7213_v0  ;;  %v7185_v0 = vor.u32 %v8181_v59, %v7184_v50 }
 0x57e   : > { %v3164_v29 = vsel %vm3162_vm2, %v3150_v53, 0.0  ;;  %v10909_v62 = vsel %vm3162_vm2, %v3150_v53, %v10699_v17  ;;  %v8191_v17 = vld [vmem:[%s12643_s6 + $0xac] sm:$0xf]  ;;  %v8184_v53 = vld [vmem:[%s12643_s6 + $0x70] sm:$0xf0] }
 0x57f   : > { %v8395_v35 = vpack.c.bf16 %v3164_v29, %v3163_v5  ;;  %v3179_v2 = vpack.c.bf16 %v10909_v62, %v10906_v56  ;;  %v7229_v33 = vor.u32 %v8191_v17, %v7226_v43  ;;  %v7176_v17 = vld [vmem:[%s12643_s6 + $0x48] sm:$0xf] }
 0x580   : > { %v7177_v21 = vor.u32 %v8180_v46, %v7176_v17  ;;  %v7142_v17 = vld [vmem:[%s12643_s6 + $0xc] sm:$0xf0]  ;;  %v7148_v46 = vld [vmem:[%s12643_s6 + $0x8] sm:$0xf] }
 0x581   : > { %8447 = vst [vmem:[%s8872_s15 + $0x30] sm:$0xff] %v8395_v35   ;;  %3348 = vmatmul.bf16.vlgmr.msra.gmra.mxu1 %v3179_v2  ;;  %3362 = vmatmul.bf16.vlgmr.msra.gmra.mxu2 %v3179_v2  ;;  %v7193_v35 = vor.u32 %v8182_v45, %v7190_v19  ;;  %v7140_v19 = vld [vmem:[%s12643_s6] sm:$0xf] }
 0x582   : > { %3376 = vmatmul.bf16.vlgmr.msrb.gmra.mxu3 %v3179_v2  ;;  %3681 = vmatpush.bf16.msrb.mxu1 %v7229_v33  ;;  %v7197_v2 = vor.u32 %v8184_v53, %v7196_v4  ;;  %v7178_v33 = vld [vmem:[%s12643_s6 + $0x54] sm:$0xf0]  ;;  %v8171_v53 = vld [vmem:[%s12643_s6 + $0x8] sm:$0xf0] }
 0x583   : > { %3669 = vmatpush.bf16.msrb.mxu0 %v7201_v31 }
 0x584   : > { %3698 = vmatpush.bf16.msrb.mxu2 %v7197_v2 }
 0x586   : > { %3682 = vmatpush.bf16.msrb.mxu1 %v7217_v3  ;;  %v7172_v3 = vld [vmem:[%s12643_s6 + $0x38] sm:$0xf] }
 0x587   : > { %3670 = vmatpush.bf16.msrb.mxu0 %v7189_v57  ;;  %v7173_v51 = vor.u32 %v8178_v16, %v7172_v3 }
 0x588   : > { %3699 = vmatpush.bf16.msrb.mxu2 %v7185_v0 }
 0x58a   : > { %3683 = vmatpush.bf16.msrb.mxu1 %v7205_v63  ;;  %v8173_v63 = vld [vmem:[%s12643_s6 + $0x1c] sm:$0xf] }
 0x58b   : > { %3671 = vmatpush.bf16.msrb.mxu0 %v7177_v21 }
 0x58c   : > { %3700 = vmatpush.bf16.msrb.mxu2 %v7173_v51 }
 0x58e   : > { %3684 = vmatpush.bf16.msrb.mxu1 %v7193_v35 }
 0x58f   : > { %3672 = vmatpush.bf16.msrb.mxu0 %v7165_v24 }
 0x5fe   : > { %v3349_v18 = vpop.f32.mrf.mxu1 }
 0x5ff   : > { %v3382_v30 = vadd.f32 %v3349_v18, %v562_v47  ;;  %v7181_v47 = vor.u32 %v8179_v12, %v7178_v33 }
 0x601   : > { %v7132_v41 = vmul.f32 -1.442695, %v3382_v30  ;;  %3685 = vmatpush.bf16.msrb.mxu1 %v7181_v47  ;;  %v7166_v30 = vld [vmem:[%s12643_s6 + $0x3c] sm:$0xf0] }
 0x602   : > { %v7169_v26 = vor.u32 %v8176_v61, %v7166_v30 }
 0x603   : > { %8610 = vpow2.f32 %v7132_v41 }
 0x604   : > { %v3363_v49 = vpop.f32.mrf.mxu2 }
 0x605   : > { %v3422_v9 = vadd.f32 %v3363_v49, %v651_v54  ;;  %3686 = vmatpush.bf16.msrb.mxu1 %v7169_v26  ;;  %v8174_v54 = vld [vmem:[%s12643_s6 + $0x20] sm:$0xf0]  ;;  %v7154_v49 = vld [vmem:[%s12643_s6 + $0x24] sm:$0xf0]  ;;  %v3377_v35 = vpop.f32.mrf.mxu3 }
 0x606   : > { %v3351_v32 = vpop.f32.mrf.mxu1  ;;  %v7157_v45 = vor.u32 %v8173_v63, %v7154_v49  ;;  %v3462_v61 = vadd.f32 %v11087_v34, %v3377_v35 }
 0x607   : > { %v7134_v5 = vmul.f32 -1.442695, %v3422_v9  ;;  %v3383_v29 = vadd.f32 %v3351_v32, %v564_v11  ;;  %v7153_v9 = vor.u32 %v8174_v54, %v7152_v39  ;;  %v7161_v32 = vor.u32 %v8175_v44, %v7160_v60 }
 0x609   : > { %v8611_v36 = vpop.eup %8610  ;;  %8612 = vpow2.f32 %v7134_v5  ;;  %v7133_v42 = vmul.f32 -1.442695, %v3383_v29  ;;  %3673 = vmatpush.bf16.msrb.mxu0 %v7153_v9  ;;  %3687 = vmatpush.bf16.msrb.mxu1 %v7157_v45  ;;  %v8170_v5 = vld [vmem:[%s12643_s6 + $0x4] sm:$0xf] }
 0x60a   : > { %v10998_v43 = vadd.f32 1.0, %v8611_v36  ;;  %3701 = vmatpush.bf16.msrb.mxu2 %v7161_v32  ;;  %v7145_v33 = vor.u32 %v8170_v5, %v7142_v17 }
 0x60b   : > { %8614 = vpow2.f32 %v7133_v42  ;;  %v7141_v42 = vor.u32 %v8171_v53, %v7140_v19  ;;  %v742_v53 = vadd.f32 %v9981_v20, %v9267_v27 }
 0x60c   : > { %8616 = vrcp.f32 %v10998_v43  ;;  %v3365_v7 = vpop.f32.mrf.mxu2  ;;  %v3403_v4 = vand.u32 2147483648, %v10998_v43  ;;  %v3401_v36 = vand.u32 2147483647, %v10998_v43  ;;  %vm3397_vm4 = vweird.f32 %v10998_v43 }
 0x60d   : > { %v3423_v18 = vadd.f32 %v3365_v7, %v653_v38  ;;  %v8172_v38 = vld [vmem:[%s12643_s6 + $0x10] sm:$0xf0]  ;;  %3674 = vmatpush.bf16.msrb.mxu0 %v7141_v42  ;;  %3688 = vmatpush.bf16.msrb.mxu1 %v7145_v33  ;;  %v3379_v9 = vpop.f32.mrf.mxu3 }
 0x60e   : > { %v7149_v59 = vor.u32 %v8172_v38, %v7148_v46  ;;  %v3404_v7 = vor.u32 1.1754944e-38, %v3403_v4  ;;  %vm3402_vm6 = vcmp.eq.f32.partialorder %v3401_v36, 8.507059e+37 }
 0x60f   : > { %v8613_v58 = vpop.eup %8612  ;;  %v7135_v41 = vmul.f32 -1.442695, %v3423_v18 }
 0x610   : > { %v11033_v31 = vadd.f32 1.0, %v8613_v58  ;;  %3702 = vmatpush.bf16.msrb.mxu2 %v7149_v59 }
 0x611   : > { %v8615_v1 = vpop.eup %8614  ;;  %8618 = vpow2.f32 %v7135_v41 }
 0x612   : > { %v8617_v37 = vpop.eup %8616  ;;  %8620 = vrcp.f32 %v11033_v31  ;;  %v11049_v11 = vadd.f32 1.0, %v8615_v1  ;;  %v3443_v58 = vand.u32 2147483648, %v11033_v31  ;;  %v3441_v26 = vand.u32 2147483647, %v11033_v31 }
 0x613   : > { %v3393_v10 = vmul.f32 %v8617_v37, %v10998_v43  ;;  %vm3398_vm3 = vweird.f32 %v8617_v37  ;;  %v740_v43 = vadd.f32 %v9938_v25, %v9267_v27  ;;  %vm3437_vm8 = vweird.f32 %v11033_v31 }
 0x614   : > { %8622 = vrcp.f32 %v11049_v11  ;;  %vm3399_vm5 = vmor %vm3397_vm4, %vm3398_vm3  ;;  %v3418_v39 = vand.u32 2147483648, %v11049_v11  ;;  %v3416_v63 = vand.u32 2147483647, %v11049_v11  ;;  %vm3442_vm10 = vcmp.eq.f32.partialorder %v3441_v26, 8.507059e+37  ;;  %v7328_v26 = vld [vmem:[%s12643_s6 + $0xb4] sm:$0xf0] }
 0x615   : > { %v3394_v57 = vsub.f32 1.0, %v3393_v10  ;;  %vm3412_vm11 = vweird.f32 %v11049_v11 }
 0x616   : > { %v3419_v45 = vor.u32 1.1754944e-38, %v3418_v39  ;;  %vm3417_vm13 = vcmp.eq.f32.partialorder %v3416_v63, 8.507059e+37  ;;  %v7314_v63 = vld [vmem:[%s12643_s6 + $0x90] sm:$0xf] }
 0x617   : > { %v8619_v29 = vpop.eup %8618  ;;  %v3395_v2 = vmul.f32 %v8617_v37, %v3394_v57  ;;  %v3463_v57 = vadd.f32 %v11087_v34, %v3379_v9 }
 0x618   : > { %v8621_v21 = vpop.eup %8620  ;;  %v11075_v12 = vadd.f32 1.0, %v8619_v29 }
 0x619   : > { %v3433_v47 = vmul.f32 %v8621_v21, %v11033_v31  ;;  %v3396_v50 = vadd.f32 %v8617_v37, %v3395_v2  ;;  %vm3438_vm7 = vweird.f32 %v8621_v21 }
 0x61a   : > { %8624 = vrcp.f32 %v11075_v12  ;;  %v8623_v18 = vpop.eup %8622  ;;  %vm3439_vm0 = vmor %vm3437_vm8, %vm3438_vm7  ;;  %v3458_v29 = vand.u32 2147483648, %v11075_v12  ;;  %vm3452_vm15 = vweird.f32 %v11075_v12  ;;  %v3456_v36 = vand.u32 2147483647, %v11075_v12 }
 0x61b   : > { %v3434_v0 = vsub.f32 1.0, %v3433_v47  ;;  %v3400_v14 = vsel %vm3399_vm5, %v8617_v37, %v3396_v50  ;;  %v3408_v30 = vmul.f32 %v8623_v18, %v11049_v11  ;;  %vm3413_vm9 = vweird.f32 %v8623_v18 }
 0x61c   : > { %v3405_v24 = vsel %vm3402_vm6, %v3404_v7, %v3400_v14  ;;  %v3444_v37 = vor.u32 1.1754944e-38, %v3443_v58  ;;  %vm3414_vm12 = vmor %vm3412_vm11, %vm3413_vm9  ;;  %v3459_v38 = vor.u32 1.1754944e-38, %v3458_v29  ;;  %vm3457_vm2 = vcmp.eq.f32.partialorder %v3456_v36, 8.507059e+37  ;;  %v7326_v58 = vld [vmem:[%s12643_s6 + $0xa8] sm:$0xf] }
 0x61d   : > { %v3435_v3 = vmul.f32 %v8621_v21, %v3434_v0  ;;  %v3464_v41 = vmul.f32 %v3462_v61, %v3405_v24  ;;  %v3409_v16 = vsub.f32 1.0, %v3408_v30  ;;  %v3484_v0 = vpop.permute.xlu2 %3483  ;;  %v8209_v29 = vld [vmem:[%s12643_s6 + $0x7c] sm:$0xf]  ;;  %v7310_v36 = vld [vmem:[%s12643_s6 + $0x80] sm:$0xf] }
 0x61e   : > { %vm3488_vm4 = vcmp.eq.s32.totalorder %v3484_v0, 1 }
 0x61f   : > { %v3436_v51 = vadd.f32 %v8621_v21, %v3435_v3  ;;  %v3466_v1 = vadd.f32 %v3464_v41, %v740_v43  ;;  %v3410_v25 = vmul.f32 %v8623_v18, %v3409_v16  ;;  %v7334_v16 = vld [vmem:[%s12643_s6 + $0xb0] sm:$0xf] }
 0x620   : > { %v8625_v54 = vpop.eup %8624 }
 0x621   : > { %v3440_v49 = vsel %vm3439_vm0, %v8621_v21, %v3436_v51  ;;  %8626 = vtanh.f32 %v3466_v1  ;;  %v3448_v10 = vmul.f32 %v8625_v54, %v11075_v12  ;;  %v3411_v60 = vadd.f32 %v8623_v18, %v3410_v25  ;;  %v8217_v51 = vld [vmem:[%s12643_s6 + $0xb8] sm:$0xf0] }
 0x622   : > { %v3445_v31 = vsel %vm3442_vm10, %v3444_v37, %v3440_v49  ;;  %vm3453_vm14 = vweird.f32 %v8625_v54  ;;  %v7335_v39 = vor.u32 %v8217_v51, %v7334_v16  ;;  %v656_v25 = vadd.f32 %v9993_v13, %v9156_v15  ;;  %v8213_v37 = vld [vmem:[%s12643_s6 + $0x98] sm:$0xf0]  ;;  %v8212_v49 = vld [vmem:[%s12643_s6 + $0x94] sm:$0xf]  ;;  %v7316_v13 = vld [vmem:[%s12643_s6 + $0x9c] sm:$0xf0] }
 0x623   : > { %v3449_v44 = vsub.f32 1.0, %v3448_v10  ;;  %v3415_v32 = vsel %vm3414_vm12, %v8623_v18, %v3411_v60  ;;  %v3470_v5 = vsub.f32 1.0, %v3445_v31  ;;  %v3474_v17 = vmul.f32 %v3445_v31, %v10906_v56  ;;  %vm3454_vm1 = vmor %vm3452_vm15, %vm3453_vm14  ;;  %v3487_v18 = vpop.permute.xlu0 %3486  ;;  %v7322_v60 = vld [vmem:[%s12643_s6 + $0x98] sm:$0xf]  ;;  %v8214_v31 = vld [vmem:[%s12643_s6 + $0xa0] sm:$0xf0] }
 0x624   : > { %v3420_v4 = vsel %vm3417_vm13, %v3419_v45, %v3415_v32  ;;  %vm3489_vm3 = vcmp.eq.s32.totalorder %v3487_v18, 1  ;;  %4022 = vmatpush.bf16.msra.mxu1 %v7335_v39  ;;  %v7319_v32 = vor.u32 %v8212_v49, %v7316_v13  ;;  %v8203_v51 = vld [vmem:[%s12643_s6 + $0x4c] sm:$0xf]  ;;  %v7286_v39 = vld [vmem:[%s12643_s6 + $0x50] sm:$0xf] }
 0x625   : > { %v3450_v19 = vmul.f32 %v8625_v54, %v3449_v44  ;;  %v3465_v35 = vmul.f32 %v3463_v57, %v3420_v4  ;;  %v7323_v57 = vor.u32 %v8214_v31, %v7322_v60  ;;  %v8202_v60 = vld [vmem:[%s12643_s6 + $0x40] sm:$0xf0] }
 0x627   : > { %v8627_v2 = vpop.eup %8626  ;;  %v3451_v11 = vadd.f32 %v8625_v54, %v3450_v19  ;;  %v3467_v46 = vadd.f32 %v3465_v35, %v742_v53  ;;  %v7302_v53 = vld [vmem:[%s12643_s6 + $0x78] sm:$0xf]  ;;  %v7304_v35 = vld [vmem:[%s12643_s6 + $0x84] sm:$0xf0] }
 0x628   : > { %v3472_v42 = vmul.f32 %v8627_v2, %v3470_v5  ;;  %4023 = vmatpush.bf16.msra.mxu1 %v7323_v57  ;;  %v8210_v5 = vld [vmem:[%s12643_s6 + $0x80] sm:$0xf0] }
 0x629   : > { %v3455_v21 = vsel %vm3454_vm1, %v8625_v54, %v3451_v11  ;;  %8628 = vtanh.f32 %v3467_v46  ;;  %v567_v54 = vadd.f32 %v9756_v55, %v9117_v52  ;;  %v7315_v55 = vor.u32 %v8213_v37, %v7314_v63  ;;  %v8201_v63 = vld [vmem:[%s12643_s6 + $0x38] sm:$0xf0]  ;;  %v8200_v37 = vld [vmem:[%s12643_s6 + $0x34] sm:$0xf]  ;;  %v8198_v57 = vld [vmem:[%s12643_s6 + $0x20] sm:$0xf0] }
 0x62a   : > { %v3476_v33 = vadd.f32 %v3474_v17, %v3472_v42  ;;  %v3460_v20 = vsel %vm3457_vm2, %v3459_v38, %v3455_v21  ;;  %v7303_v2 = vor.u32 %v8210_v5, %v7302_v53  ;;  %v7307_v11 = vor.u32 %v8209_v29, %v7304_v35  ;;  %v8211_v42 = vld [vmem:[%s12643_s6 + $0x88] sm:$0xf0]  ;;  %v8197_v5 = vld [vmem:[%s12643_s6 + $0x1c] sm:$0xf]  ;;  %v7256_v29 = vld [vmem:[%s12643_s6 + $0x24] sm:$0xf0] }
 0x62b   : > { %v3471_v47 = vsub.f32 1.0, %v3460_v20  ;;  %v3475_v7 = vmul.f32 %v3460_v20, %v10909_v62  ;;  %v7311_v17 = vor.u32 %v8211_v42, %v7310_v36  ;;  %v569_v46 = vadd.f32 %v9776_v48, %v9117_v52  ;;  %v8207_v38 = vld [vmem:[%s12643_s6 + $0x68] sm:$0xf0]  ;;  %v8206_v20 = vld [vmem:[%s12643_s6 + $0x64] sm:$0xf] }
 0x62c   : > { %v3490_v14 = vsel %vm3488_vm4, %v3476_v33, 0.0  ;;  %v11109_v43 = vsel %vm3488_vm4, %v3476_v33, %v10906_v56  ;;  %v8216_v56 = vld [vmem:[%s12643_s6 + $0xb0] sm:$0xf0]  ;;  %v658_v21 = vadd.f32 %v10003_v8, %v9156_v15  ;;  %v7290_v33 = vld [vmem:[%s12643_s6 + $0x60] sm:$0xf] }
 0x62d   : > { %v7327_v41 = vor.u32 %v8216_v56, %v7326_v58  ;;  %4024 = vmatpush.bf16.msra.mxu1 %v7311_v17  ;;  %v7291_v48 = vor.u32 %v8207_v38, %v7290_v33  ;;  %v7292_v8 = vld [vmem:[%s12643_s6 + $0x6c] sm:$0xf0]  ;;  %v8199_v36 = vld [vmem:[%s12643_s6 + $0x28] sm:$0xf0]  ;;  %v7259_v33 = vor.u32 %v8197_v5, %v7256_v29 }
 0x62f   : > { %v8629_v50 = vpop.eup %8628  ;;  %3994 = vmatpush.bf16.msra.mxu3 %v7327_v41  ;;  %v8204_v41 = vld [vmem:[%s12643_s6 + $0x50] sm:$0xf0] }
 0x630   : > { %v3473_v59 = vmul.f32 %v8629_v50, %v3471_v47 }
 0x632   : > { %v3477_v12 = vadd.f32 %v3475_v7, %v3473_v59  ;;  %v7298_v59 = vld [vmem:[%s12643_s6 + $0x68] sm:$0xf]  ;;  %v8208_v7 = vld [vmem:[%s12643_s6 + $0x70] sm:$0xf0] }
 0x633   : > { %3995 = vmatpush.bf16.msra.mxu3 %v7315_v55  ;;  %v7274_v55 = vld [vmem:[%s12643_s6 + $0x38] sm:$0xf] }
 0x634   : > { %v3491_v61 = vsel %vm3489_vm3, %v3477_v12, 0.0  ;;  %v11112_v24 = vsel %vm3489_vm3, %v3477_v12, %v10909_v62  ;;  %v8215_v62 = vld [vmem:[%s12643_s6 + $0xac] sm:$0xf]  ;;  %v7295_v12 = vor.u32 %v8206_v20, %v7292_v8 }
 0x635   : > { %v8400_v30 = vpack.c.bf16 %v3491_v61, %v3490_v14  ;;  %v3506_v3 = vpack.c.bf16 %v11112_v24, %v11109_v43  ;;  %v7331_v1 = vor.u32 %v8215_v62, %v7328_v26  ;;  %v7299_v14 = vor.u32 %v8208_v7, %v7298_v59  ;;  %v8195_v8 = vld [vmem:[%s12643_s6 + $0x8] sm:$0xf0] }
 0x637   : > { %8448 = vst [vmem:[%s8872_s15 + $0x38] sm:$0xff] %v8400_v30   ;;  %3675 = vmatmul.bf16.vlgmr.msrb.gmra.mxu0 %v3506_v3  ;;  %3689 = vmatmul.bf16.vlgmr.msrb.gmra.mxu1 %v3506_v3 }
 0x638   : > { %3703 = vmatmul.bf16.vlgmr.msrb.gmra.mxu2 %v3506_v3  ;;  %4008 = vmatpush.bf16.msra.mxu0 %v7331_v1  ;;  %v7278_v3 = vld [vmem:[%s12643_s6 + $0x48] sm:$0xf]  ;;  %v7280_v1 = vld [vmem:[%s12643_s6 + $0x54] sm:$0xf0] }
 0x639   : > { %3996 = vmatpush.bf16.msra.mxu3 %v7303_v2  ;;  %4025 = vmatpush.bf16.msra.mxu1 %v7299_v14  ;;  %v7279_v16 = vor.u32 %v8204_v41, %v7278_v3  ;;  %v7283_v49 = vor.u32 %v8203_v51, %v7280_v1  ;;  %v7250_v14 = vld [vmem:[%s12643_s6 + $0x8] sm:$0xf] }
 0x63c   : > { %4009 = vmatpush.bf16.msra.mxu0 %v7319_v32  ;;  %v7254_v32 = vld [vmem:[%s12643_s6 + $0x18] sm:$0xf] }
 0x63d   : > { %3997 = vmatpush.bf16.msra.mxu3 %v7291_v48  ;;  %v7255_v53 = vor.u32 %v8198_v57, %v7254_v32  ;;  %v7242_v48 = vld [vmem:[%s12643_s6] sm:$0xf] }
 0x640   : > { %4010 = vmatpush.bf16.msra.mxu0 %v7307_v11  ;;  %v7262_v11 = vld [vmem:[%s12643_s6 + $0x20] sm:$0xf] }
 0x641   : > { %3998 = vmatpush.bf16.msra.mxu3 %v7279_v16 }
 0x644   : > { %4011 = vmatpush.bf16.msra.mxu0 %v7295_v12 }
 0x648   : > { %4012 = vmatpush.bf16.msra.mxu0 %v7283_v49 }
 0x6b4   : > { %v3676_v10 = vpop.f32.mrf.mxu0  ;;  %v3690_v9 = vpop.f32.mrf.mxu1 }
 0x6b5   : > { %v3709_v44 = vadd.f32 %v3676_v10, %v567_v54  ;;  %v3749_v45 = vadd.f32 %v3690_v9, %v656_v25  ;;  %v8205_v54 = vld [vmem:[%s12643_s6 + $0x58] sm:$0xf0]  ;;  %v7266_v25 = vld [vmem:[%s12643_s6 + $0x30] sm:$0xf]  ;;  %v7268_v9 = vld [vmem:[%s12643_s6 + $0x3c] sm:$0xf0] }
 0x6b6   : > { %v7287_v10 = vor.u32 %v8205_v54, %v7286_v39  ;;  %v7267_v13 = vor.u32 %v8201_v63, %v7266_v25  ;;  %v745_v63 = vadd.f32 %v9999_v40, %v9267_v27 }
 0x6b7   : > { %v7234_v19 = vmul.f32 -1.442695, %v3709_v44  ;;  %v7236_v4 = vmul.f32 -1.442695, %v3749_v45  ;;  %v7271_v44 = vor.u32 %v8200_v37, %v7268_v9  ;;  %v7275_v45 = vor.u32 %v8202_v60, %v7274_v55  ;;  %v8237_v60 = vld [vmem:[%s12643_s6 + $0x98] sm:$0xf0] }
 0x6b8   : > { %4026 = vmatpush.bf16.msra.mxu1 %v7287_v10  ;;  %3999 = vmatpush.bf16.msra.mxu3 %v7267_v13 }
 0x6b9   : > { %8630 = vpow2.f32 %v7234_v19  ;;  %4013 = vmatpush.bf16.msra.mxu0 %v7271_v44 }
 0x6ba   : > { %8632 = vpow2.f32 %v7236_v4 }
 0x6bb   : > { %v3704_v20 = vpop.f32.mrf.mxu2 }
 0x6bc   : > { %v3678_v47 = vpop.f32.mrf.mxu0  ;;  %v3692_v50 = vpop.f32.mrf.mxu1  ;;  %4027 = vmatpush.bf16.msra.mxu1 %v7275_v45  ;;  %4000 = vmatpush.bf16.msra.mxu3 %v7255_v53  ;;  %v3789_v1 = vadd.f32 %v11087_v34, %v3704_v20 }
 0x6bd   : > { %v3710_v18 = vadd.f32 %v3678_v47, %v569_v46  ;;  %v3750_v0 = vadd.f32 %v3692_v50, %v658_v21  ;;  %v7263_v50 = vor.u32 %v8199_v36, %v7262_v11  ;;  %4014 = vmatpush.bf16.msra.mxu0 %v7259_v33 }
 0x6bf   : > { %v8631_v61 = vpop.eup %8630  ;;  %v7235_v30 = vmul.f32 -1.442695, %v3710_v18  ;;  %v7237_v62 = vmul.f32 -1.442695, %v3750_v0  ;;  %v8194_v18 = vld [vmem:[%s12643_s6 + $0x4] sm:$0xf] }
 0x6c0   : > { %v8633_v58 = vpop.eup %8632  ;;  %v11200_v56 = vadd.f32 1.0, %v8631_v61  ;;  %v7244_v0 = vld [vmem:[%s12643_s6 + $0xc] sm:$0xf0]  ;;  %4028 = vmatpush.bf16.msra.mxu1 %v7263_v50 }
 0x6c1   : > { %v11205_v26 = vadd.f32 1.0, %v8633_v58  ;;  %8634 = vpow2.f32 %v7235_v30  ;;  %v7243_v30 = vor.u32 %v8195_v8, %v7242_v48  ;;  %v7247_v3 = vor.u32 %v8194_v18, %v7244_v0  ;;  %v8196_v58 = vld [vmem:[%s12643_s6 + $0x10] sm:$0xf0] }
 0x6c2   : > { %8636 = vrcp.f32 %v11200_v56  ;;  %v3730_v47 = vand.u32 2147483648, %v11200_v56  ;;  %v3728_v7 = vand.u32 2147483647, %v11200_v56  ;;  %vm3724_vm6 = vweird.f32 %v11200_v56 }
 0x6c3   : > { %8638 = vrcp.f32 %v11205_v26  ;;  %v7251_v16 = vor.u32 %v8196_v58, %v7250_v14  ;;  %4001 = vmatpush.bf16.msra.mxu3 %v7243_v30  ;;  %v3770_v37 = vand.u32 2147483648, %v11205_v26  ;;  %4015 = vmatpush.bf16.msra.mxu0 %v7247_v3  ;;  %vm3764_vm9 = vweird.f32 %v11205_v26  ;;  %v3706_v57 = vpop.f32.mrf.mxu2  ;;  %v3811_v14 = vpop.permute.xlu1 %3810 }
 0x6c4   : > { %8640 = vpow2.f32 %v7237_v62  ;;  %v3731_v41 = vor.u32 1.1754944e-38, %v3730_v47  ;;  %vm3729_vm8 = vcmp.eq.f32.partialorder %v3728_v7, 8.507059e+37  ;;  %v3768_v9 = vand.u32 2147483647, %v11205_v26 }
 0x6c5   : > { %4029 = vmatpush.bf16.msra.mxu1 %v7251_v16  ;;  %v3790_v11 = vadd.f32 %v11087_v34, %v3706_v57  ;;  %v8238_v57 = vld [vmem:[%s12643_s6 + $0xa0] sm:$0xf0] }
 0x6c6   : > { %vm3769_vm13 = vcmp.eq.f32.partialorder %v3768_v9, 8.507059e+37  ;;  %v12707_v9 = vld [vmem:[#allocation4_spill] sm:$0xff] }
 0x6c7   : > { %v8635_v31 = vpop.eup %8634 }
 0x6c8   : > { %v8637_v19 = vpop.eup %8636  ;;  %v11245_v4 = vadd.f32 1.0, %v8635_v31 }
 0x6c9   : > { %v11253_v35 = vpop.eup %8638  ;;  %v3720_v2 = vmul.f32 %v8637_v19, %v11200_v56  ;;  %vm3725_vm5 = vweird.f32 %v8637_v19 }
 0x6ca   : > { %v8641_v42 = vpop.eup %8640  ;;  %v3760_v17 = vmul.f32 %v11253_v35, %v11205_v26  ;;  %8642 = vrcp.f32 %v11245_v4  ;;  %vm3726_vm7 = vmor %vm3724_vm6, %vm3725_vm5  ;;  %vm3765_vm0 = vweird.f32 %v11253_v35  ;;  %v3745_v13 = vand.u32 2147483648, %v11245_v4 }
 0x6cb   : > { %v3721_v46 = vsub.f32 1.0, %v3720_v2  ;;  %v11265_v21 = vadd.f32 1.0, %v8641_v42  ;;  %vm11302_vm10 = vmor %vm3764_vm9, %vm3765_vm0  ;;  %v3743_v44 = vand.u32 2147483647, %v11245_v4  ;;  %v3771_v26 = vor.u32 1.1754944e-38, %v3770_v37 }
 0x6cc   : > { %v3761_v38 = vsub.f32 1.0, %v3760_v17  ;;  %vm3739_vm12 = vweird.f32 %v11245_v4  ;;  %v3746_v5 = vor.u32 1.1754944e-38, %v3745_v13  ;;  %vm3815_vm5 = vcmp.eq.s32.totalorder %v3811_v14, 1  ;;  %v7416_v13 = vld [vmem:[%s12643_s6 + $0x90] sm:$0xf] }
 0x6cd   : > { %v3722_v59 = vmul.f32 %v8637_v19, %v3721_v46  ;;  %8644 = vrcp.f32 %v11265_v21  ;;  %vm3744_vm15 = vcmp.eq.f32.partialorder %v3743_v44, 8.507059e+37  ;;  %v3785_v17 = vand.u32 2147483648, %v11265_v21 }
 0x6ce   : > { %v3762_v12 = vmul.f32 %v11253_v35, %v3761_v38  ;;  %vm3779_vm2 = vweird.f32 %v11265_v21  ;;  %v7417_v44 = vor.u32 %v8237_v60, %v7416_v13  ;;  %v8224_v13 = vld [vmem:[%s12643_s6 + $0x34] sm:$0xf]  ;;  %v7370_v60 = vld [vmem:[%s12643_s6 + $0x3c] sm:$0xf0] }
 0x6cf   : > { %v3723_v61 = vadd.f32 %v8637_v19, %v3722_v59  ;;  %v3786_v8 = vor.u32 1.1754944e-38, %v3785_v17  ;;  %v7406_v17 = vld [vmem:[%s12643_s6 + $0x84] sm:$0xf0] }
 0x6d0   : > { %v8643_v62 = vpop.eup %8642  ;;  %v3763_v56 = vadd.f32 %v11253_v35, %v3762_v12 }
 0x6d1   : > { %v3727_v51 = vsel %vm3726_vm7, %v8637_v19, %v3723_v61  ;;  %v3735_v39 = vmul.f32 %v8643_v62, %v11245_v4  ;;  %vm3740_vm11 = vweird.f32 %v8643_v62  ;;  %v3783_v4 = vand.u32 2147483647, %v11265_v21 }
 0x6d2   : > { %v3732_v54 = vsel %vm3729_vm8, %v3731_v41, %v3727_v51  ;;  %v3767_v45 = vsel %vm11302_vm10, %v11253_v35, %v3763_v56  ;;  %vm3741_vm14 = vmor %vm3739_vm12, %vm3740_vm11  ;;  %v747_v35 = vadd.f32 %v10005_v28, %v9267_v27  ;;  %v661_v51 = vadd.f32 %v10008_v6, %v9156_v15  ;;  %v8239_v56 = vld [vmem:[%s12643_s6 + $0xac] sm:$0xf]  ;;  %v7436_v6 = vld [vmem:[%s12643_s6 + $0xb0] sm:$0xf] }
 0x6d3   : > { %v8645_v25 = vpop.eup %8644  ;;  %v3791_v49 = vmul.f32 %v3789_v1, %v3732_v54  ;;  %v3736_v10 = vsub.f32 1.0, %v3735_v39  ;;  %v3772_v29 = vsel %vm3769_vm13, %v3771_v26, %v3767_v45  ;;  %vm3784_vm4 = vcmp.eq.f32.partialorder %v3783_v4, 8.507059e+37  ;;  %v7418_v45 = vld [vmem:[%s12643_s6 + $0x9c] sm:$0xf0] }
 0x6d4   : > { %v3775_v55 = vmul.f32 %v8645_v25, %v11265_v21  ;;  %vm3780_vm1 = vweird.f32 %v8645_v25  ;;  %v3797_v33 = vsub.f32 1.0, %v3772_v29  ;;  %v3801_v50 = vmul.f32 %v3772_v29, %v11109_v43  ;;  %v3814_v21 = vpop.permute.xlu2 %3813 }
 0x6d5   : > { %v3793_v31 = vadd.f32 %v3791_v49, %v745_v63  ;;  %v3737_v40 = vmul.f32 %v8643_v62, %v3736_v10  ;;  %vm3781_vm3 = vmor %vm3779_vm2, %vm3780_vm1  ;;  %vm3816_vm6 = vcmp.eq.s32.totalorder %v3814_v21, 1  ;;  %v8241_v63 = vld [vmem:[%s12643_s6 + $0xb8] sm:$0xf0]  ;;  %v663_v26 = vadd.f32 %v10019_v23, %v9156_v15 }
 0x6d6   : > { %v3776_v32 = vsub.f32 1.0, %v3775_v55  ;;  %v7437_v10 = vor.u32 %v8241_v63, %v7436_v6  ;;  %v572_v55 = vadd.f32 %v12707_v9, %v9117_v52  ;;  %v8233_v23 = vld [vmem:[%s12643_s6 + $0x7c] sm:$0xf]  ;;  %v7388_v6 = vld [vmem:[%s12643_s6 + $0x50] sm:$0xf] }
 0x6d7   : > { %8646 = vtanh.f32 %v3793_v31  ;;  %v3738_v19 = vadd.f32 %v8643_v62, %v3737_v40  ;;  %v8236_v31 = vld [vmem:[%s12643_s6 + $0x94] sm:$0xf]  ;;  %v8229_v63 = vld [vmem:[%s12643_s6 + $0x58] sm:$0xf0] }
 0x6d8   : > { %v3777_v53 = vmul.f32 %v8645_v25, %v3776_v32  ;;  %4349 = vmatpush.bf16.msrb.mxu0 %v7437_v10  ;;  %v7424_v32 = vld [vmem:[%s12643_s6 + $0x98] sm:$0xf] }
 0x6d9   : > { %v3742_v2 = vsel %vm3741_vm14, %v8643_v62, %v3738_v19 }
 0x6da   : > { %v3778_v36 = vadd.f32 %v8645_v25, %v3777_v53  ;;  %v3747_v42 = vsel %vm3744_vm15, %v3746_v5, %v3742_v2  ;;  %v7421_v53 = vor.u32 %v8236_v31, %v7418_v45  ;;  %v7425_v5 = vor.u32 %v8238_v57, %v7424_v32  ;;  %v8226_v45 = vld [vmem:[%s12643_s6 + $0x40] sm:$0xf0]  ;;  %v7356_v32 = vld [vmem:[%s12643_s6 + $0x18] sm:$0xf] }
 0x6db   : > { %v3792_v46 = vmul.f32 %v3790_v11, %v3747_v42  ;;  %v8234_v42 = vld [vmem:[%s12643_s6 + $0x80] sm:$0xf0] }
 0x6dc   : > { %v3782_v48 = vsel %vm3781_vm3, %v8645_v25, %v3778_v36  ;;  %v7430_v25 = vld [vmem:[%s12643_s6 + $0xb4] sm:$0xf0]  ;;  %4350 = vmatpush.bf16.msrb.mxu0 %v7425_v5 }
 0x6dd   : > { %v8647_v38 = vpop.eup %8646  ;;  %v3794_v20 = vadd.f32 %v3792_v46, %v747_v35  ;;  %v3787_v28 = vsel %vm3784_vm4, %v3786_v8, %v3782_v48  ;;  %v7433_v49 = vor.u32 %v8239_v56, %v7430_v25  ;;  %v7404_v36 = vld [vmem:[%s12643_s6 + $0x78] sm:$0xf]  ;;  %v7412_v46 = vld [vmem:[%s12643_s6 + $0x80] sm:$0xf] }
 0x6de   : > { %v3799_v47 = vmul.f32 %v8647_v38, %v3797_v33  ;;  %v3798_v7 = vsub.f32 1.0, %v3787_v28  ;;  %v3802_v12 = vmul.f32 %v3787_v28, %v11112_v24  ;;  %v7405_v35 = vor.u32 %v8234_v42, %v7404_v36  ;;  %v12708_v48 = vld [vmem:[#allocation5_spill] sm:$0xff]  ;;  %v8231_v28 = vld [vmem:[%s12643_s6 + $0x68] sm:$0xf0] }
 0x6df   : > { %8648 = vtanh.f32 %v3794_v20  ;;  %4335 = vmatpush.bf16.msrb.mxu3 %v7433_v49  ;;  %v7409_v38 = vor.u32 %v8233_v23, %v7406_v17  ;;  %v8235_v20 = vld [vmem:[%s12643_s6 + $0x88] sm:$0xf0]  ;;  %v574_v8 = vadd.f32 %v12708_v48, %v9117_v52  ;;  %v7382_v56 = vld [vmem:[%s12643_s6 + $0x54] sm:$0xf0]  ;;  %v8225_v49 = vld [vmem:[%s12643_s6 + $0x38] sm:$0xf0] }
 0x6e0   : > { %v3803_v59 = vadd.f32 %v3801_v50, %v3799_v47  ;;  %v7413_v50 = vor.u32 %v8235_v20, %v7412_v46  ;;  %v8223_v23 = vld [vmem:[%s12643_s6 + $0x28] sm:$0xf0]  ;;  %v7344_v17 = vld [vmem:[%s12643_s6] sm:$0xf]  ;;  %v7346_v20 = vld [vmem:[%s12643_s6 + $0xc] sm:$0xf0] }
 0x6e2   : > { %v3817_v30 = vsel %vm3815_vm5, %v3803_v59, 0.0  ;;  %v11320_v58 = vsel %vm3815_vm5, %v3803_v59, %v11109_v43  ;;  %v7428_v43 = vld [vmem:[%s12643_s6 + $0xa8] sm:$0xf]  ;;  %v7392_v59 = vld [vmem:[%s12643_s6 + $0x60] sm:$0xf]  ;;  %4351 = vmatpush.bf16.msrb.mxu0 %v7413_v50 }
 0x6e3   : > { %4336 = vmatpush.bf16.msrb.mxu3 %v7421_v53  ;;  %v7393_v14 = vor.u32 %v8231_v28, %v7392_v59  ;;  %v8221_v53 = vld [vmem:[%s12643_s6 + $0x1c] sm:$0xf] }
 0x6e5   : > { %v8649_v18 = vpop.eup %8648 }
 0x6e6   : > { %v3800_v0 = vmul.f32 %v8649_v18, %v3798_v7  ;;  %v8230_v7 = vld [vmem:[%s12643_s6 + $0x64] sm:$0xf] }
 0x6e7   : > { %4337 = vmatpush.bf16.msrb.mxu3 %v7409_v38  ;;  %v8218_v38 = vld [vmem:[%s12643_s6 + $0x4] sm:$0xf] }
 0x6e8   : > { %v3804_v61 = vadd.f32 %v3802_v12, %v3800_v0  ;;  %v7394_v0 = vld [vmem:[%s12643_s6 + $0x6c] sm:$0xf0]  ;;  %v7349_v28 = vor.u32 %v8218_v38, %v7346_v20 }
 0x6e9   : > { %v7397_v21 = vor.u32 %v8230_v7, %v7394_v0  ;;  %v7352_v7 = vld [vmem:[%s12643_s6 + $0x8] sm:$0xf] }
 0x6ea   : > { %v3818_v3 = vsel %vm3816_vm6, %v3804_v61, 0.0  ;;  %v11323_v62 = vsel %vm3816_vm6, %v3804_v61, %v11112_v24  ;;  %v8240_v24 = vld [vmem:[%s12643_s6 + $0xb0] sm:$0xf0]  ;;  %v7400_v61 = vld [vmem:[%s12643_s6 + $0x68] sm:$0xf] }
 0x6eb   : > { %v8405_v41 = vpack.c.bf16 %v3818_v3, %v3817_v30  ;;  %v3833_v16 = vpack.c.bf16 %v11323_v62, %v11320_v58  ;;  %v7429_v54 = vor.u32 %v8240_v24, %v7428_v43  ;;  %v8232_v30 = vld [vmem:[%s12643_s6 + $0x70] sm:$0xf0]  ;;  %4338 = vmatpush.bf16.msrb.mxu3 %v7397_v21  ;;  %v8227_v24 = vld [vmem:[%s12643_s6 + $0x4c] sm:$0xf] }
 0x6ec   : > { %v7401_v3 = vor.u32 %v8232_v30, %v7400_v61  ;;  %v7385_v25 = vor.u32 %v8227_v24, %v7382_v56 }
 0x6ed   : > { %8449 = vst [vmem:[%s8872_s15 + $0x40] sm:$0xff] %v8405_v41   ;;  %4002 = vmatmul.bf16.vlgmr.msra.gmra.mxu3 %v3833_v16  ;;  %4016 = vmatmul.bf16.vlgmr.msra.gmra.mxu0 %v3833_v16 }
 0x6ee   : > { %4030 = vmatmul.bf16.vlgmr.msra.gmra.mxu1 %v3833_v16  ;;  %4321 = vmatpush.bf16.msra.mxu2 %v7429_v54 }
 0x6ef   : > { %4352 = vmatpush.bf16.msrb.mxu0 %v7401_v3  ;;  %4339 = vmatpush.bf16.msrb.mxu3 %v7385_v25 }
 0x6f2   : > { %4322 = vmatpush.bf16.msra.mxu2 %v7417_v44  ;;  %v7376_v44 = vld [vmem:[%s12643_s6 + $0x38] sm:$0xf] }
 0x6f6   : > { %4323 = vmatpush.bf16.msra.mxu2 %v7405_v35 }
 0x6fa   : > { %4324 = vmatpush.bf16.msra.mxu2 %v7393_v14 }
 0x76a   : > { %v4017_v1 = vpop.f32.mrf.mxu0 }
 0x76b   : > { %v4076_v39 = vadd.f32 %v4017_v1, %v661_v51  ;;  %v7380_v51 = vld [vmem:[%s12643_s6 + $0x48] sm:$0xf]  ;;  %v8228_v1 = vld [vmem:[%s12643_s6 + $0x50] sm:$0xf0]  ;;  %v4031_v0 = vpop.f32.mrf.mxu1 }
 0x76c   : > { %v7381_v43 = vor.u32 %v8228_v1, %v7380_v51  ;;  %v4116_v1 = vadd.f32 %v11087_v34, %v4031_v0 }
 0x76d   : > { %v7338_v37 = vmul.f32 -1.442695, %v4076_v39 }
 0x76e   : > { %4325 = vmatpush.bf16.msra.mxu2 %v7381_v43 }
 0x76f   : > { %8650 = vpow2.f32 %v7338_v37  ;;  %v7368_v37 = vld [vmem:[%s12643_s6 + $0x30] sm:$0xf] }
 0x770   : > { %v4003_v40 = vpop.f32.mrf.mxu3  ;;  %v7369_v31 = vor.u32 %v8225_v49, %v7368_v37 }
 0x771   : > { %v4036_v19 = vadd.f32 %v4003_v40, %v572_v55  ;;  %v7389_v55 = vor.u32 %v8229_v63, %v7388_v6  ;;  %v7373_v40 = vor.u32 %v8224_v13, %v7370_v60  ;;  %v7520_v13 = vld [vmem:[%s12643_s6 + $0x9c] sm:$0xf0] }
 0x772   : > { %v4019_v29 = vpop.f32.mrf.mxu0  ;;  %4326 = vmatpush.bf16.msra.mxu2 %v7369_v31 }
 0x773   : > { %v7336_v2 = vmul.f32 -1.442695, %v4036_v19  ;;  %v4077_v11 = vadd.f32 %v4019_v29, %v663_v26  ;;  %4353 = vmatpush.bf16.msrb.mxu0 %v7389_v55  ;;  %v7377_v26 = vor.u32 %v8226_v45, %v7376_v44  ;;  %v8222_v19 = vld [vmem:[%s12643_s6 + $0x20] sm:$0xf0]  ;;  %4340 = vmatpush.bf16.msrb.mxu3 %v7373_v40  ;;  %v4033_v45 = vpop.f32.mrf.mxu1 }
 0x774   : > { %v7357_v29 = vor.u32 %v8222_v19, %v7356_v32  ;;  %v4117_v19 = vadd.f32 %v11087_v34, %v4033_v45 }
 0x775   : > { %v8651_v33 = vpop.eup %8650  ;;  %8652 = vpow2.f32 %v7336_v2  ;;  %v7339_v4 = vmul.f32 -1.442695, %v4077_v11  ;;  %v7358_v2 = vld [vmem:[%s12643_s6 + $0x24] sm:$0xf0]  ;;  %v7364_v11 = vld [vmem:[%s12643_s6 + $0x20] sm:$0xf] }
 0x776   : > { %v11388_v47 = vadd.f32 1.0, %v8651_v33  ;;  %v7361_v35 = vor.u32 %v8221_v53, %v7358_v2  ;;  %v7365_v33 = vor.u32 %v8223_v23, %v7364_v11  ;;  %4327 = vmatpush.bf16.msra.mxu2 %v7357_v29  ;;  %v12711_v29 = vld [vmem:[#allocation18_spill] sm:$0xff] }
 0x777   : > { %8654 = vpow2.f32 %v7339_v4  ;;  %4354 = vmatpush.bf16.msrb.mxu0 %v7377_v26  ;;  %v8219_v4 = vld [vmem:[%s12643_s6 + $0x8] sm:$0xf0]  ;;  %v752_v2 = vadd.f32 %v12711_v29, %v9267_v27  ;;  %v7514_v29 = vld [vmem:[%s12643_s6 + $0x80] sm:$0xf] }
 0x778   : > { %v4005_v18 = vpop.f32.mrf.mxu3  ;;  %8656 = vrcp.f32 %v11388_v47  ;;  %4341 = vmatpush.bf16.msrb.mxu3 %v7361_v35  ;;  %v7345_v59 = vor.u32 %v8219_v4, %v7344_v17  ;;  %v4097_v6 = vand.u32 2147483648, %v11388_v47  ;;  %vm4091_vm11 = vweird.f32 %v11388_v47 }
 0x779   : > { %v4037_v12 = vadd.f32 %v4005_v18, %v574_v8  ;;  %v8220_v18 = vld [vmem:[%s12643_s6 + $0x10] sm:$0xf0]  ;;  %v4095_v49 = vand.u32 2147483647, %v11388_v47 }
 0x77a   : > { %v7353_v3 = vor.u32 %v8220_v18, %v7352_v7  ;;  %4328 = vmatpush.bf16.msra.mxu2 %v7345_v59  ;;  %v4098_v32 = vor.u32 1.1754944e-38, %v4097_v6  ;;  %v4141_v7 = vpop.permute.xlu1 %4140  ;;  %v8261_v6 = vld [vmem:[%s12643_s6 + $0x98] sm:$0xf0] }
 0x77b   : > { %v8653_v41 = vpop.eup %8652  ;;  %v7337_v16 = vmul.f32 -1.442695, %v4037_v12  ;;  %4355 = vmatpush.bf16.msrb.mxu0 %v7365_v33  ;;  %vm4096_vm15 = vcmp.eq.f32.partialorder %v4095_v49, 8.507059e+37 }
 0x77c   : > { %v11417_v39 = vadd.f32 1.0, %v8653_v41  ;;  %4342 = vmatpush.bf16.msrb.mxu3 %v7349_v28 }
 0x77d   : > { %v8655_v54 = vpop.eup %8654  ;;  %8658 = vpow2.f32 %v7337_v16 }
 0x77e   : > { %8660 = vrcp.f32 %v11417_v39  ;;  %v11438_v10 = vpop.eup %8656  ;;  %v11440_v9 = vadd.f32 1.0, %v8655_v54  ;;  %v4057_v12 = vand.u32 2147483648, %v11417_v39  ;;  %v4055_v21 = vand.u32 2147483647, %v11417_v39 }
 0x77f   : > { %v4087_v57 = vmul.f32 %v11438_v10, %v11388_v47  ;;  %vm4051_vm8 = vweird.f32 %v11417_v39  ;;  %4356 = vmatpush.bf16.msrb.mxu0 %v7353_v3  ;;  %vm4092_vm10 = vweird.f32 %v11438_v10 }
 0x780   : > { %8662 = vrcp.f32 %v11440_v9  ;;  %v4058_v51 = vor.u32 1.1754944e-38, %v4057_v12  ;;  %vm4056_vm9 = vcmp.eq.f32.partialorder %v4055_v21, 8.507059e+37  ;;  %vm11515_vm12 = vmor %vm4091_vm11, %vm4092_vm10  ;;  %v4112_v11 = vand.u32 2147483648, %v11440_v9 }
 0x781   : > { %v4088_v50 = vsub.f32 1.0, %v4087_v57  ;;  %vm4106_vm4 = vweird.f32 %v11440_v9  ;;  %v4110_v35 = vand.u32 2147483647, %v11440_v9 }
 0x782   : > { %v4113_v4 = vor.u32 1.1754944e-38, %v4112_v11 }
 0x783   : > { %v8659_v5 = vpop.eup %8658  ;;  %v4089_v61 = vmul.f32 %v11438_v10, %v4088_v50  ;;  %vm4111_vm6 = vcmp.eq.f32.partialorder %v4110_v35, 8.507059e+37  ;;  %v12715_v35 = vld [vmem:[#allocation21_spill] sm:$0xff] }
 0x784   : > { %v8661_v36 = vpop.eup %8660  ;;  %v11472_v42 = vadd.f32 1.0, %v8659_v5 }
 0x785   : > { %v4047_v46 = vmul.f32 %v8661_v36, %v11417_v39  ;;  %vm4052_vm7 = vweird.f32 %v8661_v36  ;;  %v4090_v56 = vadd.f32 %v11438_v10, %v4089_v61  ;;  %v750_v39 = vadd.f32 %v10011_v22, %v9267_v27 }
 0x786   : > { %8664 = vrcp.f32 %v11472_v42  ;;  %v11491_v48 = vpop.eup %8662  ;;  %vm4053_vm0 = vmor %vm4051_vm8, %vm4052_vm7  ;;  %v4072_v55 = vand.u32 2147483648, %v11472_v42  ;;  %v4070_v40 = vand.u32 2147483647, %v11472_v42  ;;  %vm4066_vm14 = vweird.f32 %v11472_v42 }
 0x787   : > { %v4048_v8 = vsub.f32 1.0, %v4047_v46  ;;  %v4102_v30 = vmul.f32 %v11491_v48, %v11440_v9  ;;  %v4094_v22 = vsel %vm11515_vm12, %v11438_v10, %v4090_v56  ;;  %vm4107_vm3 = vweird.f32 %v11491_v48  ;;  %v4138_v9 = vpop.permute.xlu0 %4137 }
 0x788   : > { %v4073_v57 = vor.u32 1.1754944e-38, %v4072_v55  ;;  %v4099_v26 = vsel %vm4096_vm15, %v4098_v32, %v4094_v22  ;;  %vm4071_vm2 = vcmp.eq.f32.partialorder %v4070_v40, 8.507059e+37  ;;  %vm4108_vm5 = vmor %vm4106_vm4, %vm4107_vm3  ;;  %vm4142_vm7 = vcmp.eq.s32.totalorder %v4138_v9, 1 }
 0x789   : > { %v4049_v14 = vmul.f32 %v8661_v36, %v4048_v8  ;;  %v4103_v25 = vsub.f32 1.0, %v4102_v30  ;;  %v4128_v17 = vmul.f32 %v4099_v26, %v11320_v58  ;;  %vm4143_vm8 = vcmp.eq.s32.totalorder %v4141_v7, 1  ;;  %v7530_v30 = vld [vmem:[%s12643_s6 + $0xa8] sm:$0xf] }
 0x78b   : > { %v4050_v41 = vadd.f32 %v8661_v36, %v4049_v14  ;;  %v4104_v44 = vmul.f32 %v11491_v48, %v4103_v25 }
 0x78c   : > { %v8665_v16 = vpop.eup %8664 }
 0x78d   : > { %v4054_v43 = vsel %vm4053_vm0, %v8661_v36, %v4050_v41  ;;  %v4062_v24 = vmul.f32 %v8665_v16, %v11472_v42  ;;  %vm4067_vm13 = vweird.f32 %v8665_v16  ;;  %v4105_v5 = vadd.f32 %v11491_v48, %v4104_v44  ;;  %v7532_v41 = vld [vmem:[%s12643_s6 + $0xb4] sm:$0xf0] }
 0x78e   : > { %v4059_v54 = vsel %vm4056_vm9, %v4058_v51, %v4054_v43  ;;  %vm4068_vm1 = vmor %vm4066_vm14, %vm4067_vm13  ;;  %v4124_v42 = vsub.f32 1.0, %v4099_v26  ;;  %v8265_v51 = vld [vmem:[%s12643_s6 + $0xb8] sm:$0xf0]  ;;  %v8258_v26 = vld [vmem:[%s12643_s6 + $0x80] sm:$0xf0] }
 0x78f   : > { %v4118_v63 = vmul.f32 %v4116_v1, %v4059_v54  ;;  %v4063_v37 = vsub.f32 1.0, %v4062_v24  ;;  %v4109_v46 = vsel %vm4108_vm5, %v11491_v48, %v4105_v5  ;;  %v12712_v24 = vld [vmem:[#allocation6_spill] sm:$0xff]  ;;  %v12713_v54 = vld [vmem:[#allocation19_spill] sm:$0xff] }
 0x790   : > { %v4114_v20 = vsel %vm4111_vm6, %v4113_v4, %v4109_v46  ;;  %v577_v56 = vadd.f32 %v12712_v24, %v9117_v52  ;;  %v666_v25 = vadd.f32 %v12713_v54, %v9156_v15  ;;  %v8254_v46 = vld [vmem:[%s12643_s6 + $0x64] sm:$0xf]  ;;  %v8248_v54 = vld [vmem:[%s12643_s6 + $0x34] sm:$0xf] }
 0x791   : > { %v4120_v60 = vadd.f32 %v4118_v63, %v750_v39  ;;  %v4064_v31 = vmul.f32 %v8665_v16, %v4063_v37  ;;  %v4125_v50 = vsub.f32 1.0, %v4114_v20  ;;  %v4129_v59 = vmul.f32 %v4114_v20, %v11323_v62  ;;  %v7518_v39 = vld [vmem:[%s12643_s6 + $0x90] sm:$0xf]  ;;  %v8260_v63 = vld [vmem:[%s12643_s6 + $0x94] sm:$0xf] }
 0x792   : > { %v7519_v55 = vor.u32 %v8261_v6, %v7518_v39  ;;  %v7523_v44 = vor.u32 %v8260_v63, %v7520_v13  ;;  %v7496_v20 = vld [vmem:[%s12643_s6 + $0x6c] sm:$0xf0]  ;;  %v7472_v6 = vld [vmem:[%s12643_s6 + $0x3c] sm:$0xf0]  ;;  %v7478_v63 = vld [vmem:[%s12643_s6 + $0x38] sm:$0xf] }
 0x793   : > { %8666 = vtanh.f32 %v4120_v60  ;;  %v4065_v47 = vadd.f32 %v8665_v16, %v4064_v31  ;;  %v7526_v60 = vld [vmem:[%s12643_s6 + $0x98] sm:$0xf]  ;;  %v8262_v31 = vld [vmem:[%s12643_s6 + $0xa0] sm:$0xf0]  ;;  %v7499_v9 = vor.u32 %v8254_v46, %v7496_v20 }
 0x794   : > { %v7527_v45 = vor.u32 %v8262_v31, %v7526_v60  ;;  %v8246_v13 = vld [vmem:[%s12643_s6 + $0x20] sm:$0xf0] }
 0x795   : > { %v4069_v53 = vsel %vm4068_vm1, %v8665_v16, %v4065_v47  ;;  %v7538_v16 = vld [vmem:[%s12643_s6 + $0xb0] sm:$0xf] }
 0x796   : > { %v4074_v10 = vsel %vm4071_vm2, %v4073_v57, %v4069_v53  ;;  %v7539_v43 = vor.u32 %v8265_v51, %v7538_v16  ;;  %v7506_v57 = vld [vmem:[%s12643_s6 + $0x78] sm:$0xf]  ;;  %v7508_v53 = vld [vmem:[%s12643_s6 + $0x84] sm:$0xf0]  ;;  %v7490_v51 = vld [vmem:[%s12643_s6 + $0x50] sm:$0xf] }
 0x797   : > { %v4119_v36 = vmul.f32 %v4117_v19, %v4074_v10  ;;  %v8257_v19 = vld [vmem:[%s12643_s6 + $0x7c] sm:$0xf]  ;;  %v7507_v5 = vor.u32 %v8258_v26, %v7506_v57  ;;  %v7484_v16 = vld [vmem:[%s12643_s6 + $0x54] sm:$0xf0]  ;;  %v8247_v57 = vld [vmem:[%s12643_s6 + $0x28] sm:$0xf0] }
 0x798   : > { %4676 = vmatpush.bf16.msra.mxu3 %v7539_v43  ;;  %v7511_v10 = vor.u32 %v8257_v19, %v7508_v53  ;;  %v7470_v43 = vld [vmem:[%s12643_s6 + $0x30] sm:$0xf]  ;;  %v7446_v53 = vld [vmem:[%s12643_s6] sm:$0xf] }
 0x799   : > { %v8667_v23 = vpop.eup %8666  ;;  %v4121_v34 = vadd.f32 %v4119_v36, %v752_v2  ;;  %v8259_v2 = vld [vmem:[%s12643_s6 + $0x88] sm:$0xf0] }
 0x79a   : > { %v4126_v33 = vmul.f32 %v8667_v23, %v4124_v42  ;;  %v7515_v11 = vor.u32 %v8259_v2, %v7514_v29  ;;  %v12714_v36 = vld [vmem:[#allocation7_spill] sm:$0xff]  ;;  %v668_v23 = vadd.f32 %v12715_v35, %v9156_v15  ;;  %v8242_v35 = vld [vmem:[%s12643_s6 + $0x4] sm:$0xf] }
 0x79b   : > { %8668 = vtanh.f32 %v4121_v34  ;;  %v579_v42 = vadd.f32 %v12714_v36, %v9117_v52  ;;  %v7494_v34 = vld [vmem:[%s12643_s6 + $0x60] sm:$0xf] }
 0x79c   : > { %v4130_v38 = vadd.f32 %v4128_v17, %v4126_v33  ;;  %4677 = vmatpush.bf16.msra.mxu3 %v7527_v45  ;;  %v8255_v17 = vld [vmem:[%s12643_s6 + $0x68] sm:$0xf0] }
 0x79e   : > { %v4144_v0 = vsel %vm4142_vm7, %v4130_v38, 0.0  ;;  %v11537_v48 = vsel %vm4142_vm7, %v4130_v38, %v11320_v58  ;;  %v8264_v58 = vld [vmem:[%s12643_s6 + $0xb0] sm:$0xf0]  ;;  %v7495_v38 = vor.u32 %v8255_v17, %v7494_v34 }
 0x79f   : > { %v7531_v3 = vor.u32 %v8264_v58, %v7530_v30  ;;  %v8252_v58 = vld [vmem:[%s12643_s6 + $0x50] sm:$0xf0] }
 0x7a0   : > { %4678 = vmatpush.bf16.msra.mxu3 %v7515_v11 }
 0x7a1   : > { %v8669_v8 = vpop.eup %8668  ;;  %4648 = vmatpush.bf16.msrb.mxu1 %v7531_v3 }
 0x7a2   : > { %v4127_v28 = vmul.f32 %v8669_v8, %v4125_v50  ;;  %v7502_v50 = vld [vmem:[%s12643_s6 + $0x68] sm:$0xf]  ;;  %v8256_v8 = vld [vmem:[%s12643_s6 + $0x70] sm:$0xf0] }
 0x7a3   : > { %v7503_v7 = vor.u32 %v8256_v8, %v7502_v50 }
 0x7a4   : > { %v4131_v18 = vadd.f32 %v4129_v59, %v4127_v28 }
 0x7a5   : > { %4649 = vmatpush.bf16.msrb.mxu1 %v7519_v55  ;;  %4679 = vmatpush.bf16.msra.mxu3 %v7503_v7  ;;  %v7458_v55 = vld [vmem:[%s12643_s6 + $0x18] sm:$0xf] }
 0x7a6   : > { %v4145_v12 = vsel %vm4143_vm8, %v4131_v18, 0.0  ;;  %v11540_v14 = vsel %vm4143_vm8, %v4131_v18, %v11323_v62  ;;  %v8263_v62 = vld [vmem:[%s12643_s6 + $0xac] sm:$0xf] }
 0x7a7   : > { %v8410_v21 = vpack.c.bf16 %v4145_v12, %v4144_v0  ;;  %v4160_v61 = vpack.c.bf16 %v11540_v14, %v11537_v48  ;;  %v7535_v1 = vor.u32 %v8263_v62, %v7532_v41  ;;  %v7482_v12 = vld [vmem:[%s12643_s6 + $0x48] sm:$0xf]  ;;  %v8251_v41 = vld [vmem:[%s12643_s6 + $0x4c] sm:$0xf] }
 0x7a8   : > { %v7483_v3 = vor.u32 %v8252_v58, %v7482_v12  ;;  %v7487_v24 = vor.u32 %v8251_v41, %v7484_v16  ;;  %v12716_v41 = vld [vmem:[#allocation20_spill] sm:$0xff] }
 0x7a9   : > { %8450 = vst [vmem:[%s8872_s15 + $0x48] sm:$0xff] %v8410_v21   ;;  %4329 = vmatmul.bf16.vlgmr.msra.gmra.mxu2 %v4160_v61  ;;  %4343 = vmatmul.bf16.vlgmr.msrb.gmra.mxu3 %v4160_v61  ;;  %v755_v16 = vadd.f32 %v12716_v41, %v9267_v27  ;;  %v12720_v41 = vld [vmem:[#allocation8_spill] sm:$0xff] }
 0x7aa   : > { %4357 = vmatmul.bf16.vlgmr.msrb.gmra.mxu0 %v4160_v61  ;;  %4662 = vmatpush.bf16.msrb.mxu2 %v7535_v1  ;;  %v8253_v1 = vld [vmem:[%s12643_s6 + $0x58] sm:$0xf0] }
 0x7ab   : > { %4650 = vmatpush.bf16.msrb.mxu1 %v7507_v5  ;;  %v8243_v5 = vld [vmem:[%s12643_s6 + $0x8] sm:$0xf0] }
 0x7ae   : > { %4663 = vmatpush.bf16.msrb.mxu2 %v7523_v44  ;;  %v7460_v44 = vld [vmem:[%s12643_s6 + $0x24] sm:$0xf0] }
 0x7af   : > { %4651 = vmatpush.bf16.msrb.mxu1 %v7495_v38  ;;  %v8244_v38 = vld [vmem:[%s12643_s6 + $0x10] sm:$0xf0] }
 0x7b2   : > { %4664 = vmatpush.bf16.msrb.mxu2 %v7511_v10 }
 0x7b3   : > { %4652 = vmatpush.bf16.msrb.mxu1 %v7483_v3 }
 0x7b6   : > { %4665 = vmatpush.bf16.msrb.mxu2 %v7499_v9 }
 0x7ba   : > { %4666 = vmatpush.bf16.msrb.mxu2 %v7487_v24 }
 0x827   : > { %v4358_v34 = vpop.f32.mrf.mxu0 }
 0x82c   : > { %v4330_v37 = vpop.f32.mrf.mxu2  ;;  %v4344_v49 = vpop.f32.mrf.mxu3 }
 0x82d   : > { %v4363_v40 = vadd.f32 %v4330_v37, %v577_v56  ;;  %v4403_v22 = vadd.f32 %v4344_v49, %v666_v25  ;;  %v8249_v56 = vld [vmem:[%s12643_s6 + $0x38] sm:$0xf0]  ;;  %v7491_v25 = vor.u32 %v8253_v1, %v7490_v51  ;;  %v7475_v37 = vor.u32 %v8248_v54, %v7472_v6  ;;  %v8250_v49 = vld [vmem:[%s12643_s6 + $0x40] sm:$0xf0] }
 0x82e   : > { %v7471_v39 = vor.u32 %v8249_v56, %v7470_v43  ;;  %v7479_v31 = vor.u32 %v8250_v49, %v7478_v63 }
 0x82f   : > { %v7438_v32 = vmul.f32 -1.442695, %v4363_v40  ;;  %v7440_v47 = vmul.f32 -1.442695, %v4403_v22  ;;  %4680 = vmatpush.bf16.msra.mxu3 %v7491_v25  ;;  %v7459_v40 = vor.u32 %v8246_v13, %v7458_v55  ;;  %v8245_v22 = vld [vmem:[%s12643_s6 + $0x1c] sm:$0xf]  ;;  %4667 = vmatpush.bf16.msrb.mxu2 %v7475_v37  ;;  %v4360_v49 = vpop.f32.mrf.mxu0 }
 0x830   : > { %4653 = vmatpush.bf16.msrb.mxu1 %v7471_v39  ;;  %v7463_v2 = vor.u32 %v8245_v22, %v7460_v44  ;;  %v8286_v39 = vld [vmem:[%s12643_s6 + $0xa0] sm:$0xf0] }
 0x831   : > { %8670 = vpow2.f32 %v7438_v32 }
 0x832   : > { %8672 = vpow2.f32 %v7440_v47  ;;  %v7466_v47 = vld [vmem:[%s12643_s6 + $0x20] sm:$0xf] }
 0x833   : > { %4681 = vmatpush.bf16.msra.mxu3 %v7479_v31  ;;  %4668 = vmatpush.bf16.msrb.mxu2 %v7463_v2 }
 0x834   : > { %v4332_v33 = vpop.f32.mrf.mxu2  ;;  %v4346_v4 = vpop.f32.mrf.mxu3  ;;  %4654 = vmatpush.bf16.msrb.mxu1 %v7459_v40 }
 0x835   : > { %v4364_v59 = vadd.f32 %v4332_v33, %v579_v42  ;;  %v4404_v28 = vadd.f32 %v4346_v4, %v668_v23  ;;  %v7467_v42 = vor.u32 %v8247_v57, %v7466_v47  ;;  %v7448_v23 = vld [vmem:[%s12643_s6 + $0xc] sm:$0xf0]  ;;  %v7447_v33 = vor.u32 %v8243_v5, %v7446_v53  ;;  %v7454_v4 = vld [vmem:[%s12643_s6 + $0x8] sm:$0xf]  ;;  %v12719_v57 = vld [vmem:[#allocation22_spill] sm:$0xff] }
 0x836   : > { %v7455_v9 = vor.u32 %v8244_v38, %v7454_v4  ;;  %v4468_v38 = vpop.permute.xlu0 %4467 }
 0x837   : > { %v8671_v18 = vpop.eup %8670  ;;  %v7439_v0 = vmul.f32 -1.442695, %v4364_v59  ;;  %v7441_v30 = vmul.f32 -1.442695, %v4404_v28  ;;  %v7451_v59 = vor.u32 %v8242_v35, %v7448_v23  ;;  %4682 = vmatpush.bf16.msra.mxu3 %v7467_v42 }
 0x838   : > { %v8673_v21 = vpop.eup %8672  ;;  %v11628_v61 = vadd.f32 1.0, %v8671_v18  ;;  %4655 = vmatpush.bf16.msrb.mxu1 %v7447_v33 }
 0x839   : > { %v11633_v62 = vadd.f32 1.0, %v8673_v21  ;;  %8674 = vpow2.f32 %v7439_v0  ;;  %v11721_v0 = vld [vmem:[%s12641_s4] ss:$0 sm:$0xff]  ;;  %4669 = vmatpush.bf16.msrb.mxu2 %v7451_v59 }
 0x83a   : > { %8676 = vrcp.f32 %v11628_v61  ;;  %v4384_v17 = vand.u32 2147483648, %v11628_v61  ;;  %v4382_v50 = vand.u32 2147483647, %v11628_v61  ;;  %vm4378_vm9 = vweird.f32 %v11628_v61 }
 0x83b   : > { %8678 = vrcp.f32 %v11633_v62  ;;  %v4443_v12 = vadd.f32 %v11721_v0, %v4358_v34  ;;  %v4424_v1 = vand.u32 2147483648, %v11633_v62  ;;  %4683 = vmatpush.bf16.msra.mxu3 %v7455_v9  ;;  %vm4418_vm13 = vweird.f32 %v11633_v62 }
 0x83c   : > { %8680 = vpow2.f32 %v7441_v30  ;;  %v4385_v18 = vor.u32 1.1754944e-38, %v4384_v17  ;;  %vm4383_vm11 = vcmp.eq.f32.partialorder %v4382_v50, 8.507059e+37  ;;  %v4422_v24 = vand.u32 2147483647, %v11633_v62 }
 0x83d   : > { %v4444_v22 = vadd.f32 %v11721_v0, %v4360_v49 }
 0x83e   : > { %vm4423_vm2 = vcmp.eq.f32.partialorder %v4422_v24, 8.507059e+37 }
 0x83f   : > { %v8675_v60 = vpop.eup %8674 }
 0x840   : > { %v8677_v45 = vpop.eup %8676  ;;  %v11679_v32 = vadd.f32 1.0, %v8675_v60 }
 0x841   : > { %v11687_v26 = vpop.eup %8678  ;;  %v4374_v19 = vmul.f32 %v8677_v45, %v11628_v61  ;;  %vm4379_vm0 = vweird.f32 %v8677_v45 }
 0x842   : > { %v8681_v10 = vpop.eup %8680  ;;  %v4414_v29 = vmul.f32 %v11687_v26, %v11633_v62  ;;  %8682 = vrcp.f32 %v11679_v32  ;;  %vm4380_vm10 = vmor %vm4378_vm9, %vm4379_vm0  ;;  %vm4419_vm12 = vweird.f32 %v11687_v26  ;;  %v4399_v56 = vand.u32 2147483648, %v11679_v32 }
 0x843   : > { %v4375_v11 = vsub.f32 1.0, %v4374_v19  ;;  %v11699_v36 = vadd.f32 1.0, %v8681_v10  ;;  %vm11734_vm14 = vmor %vm4418_vm13, %vm4419_vm12  ;;  %v4397_v63 = vand.u32 2147483647, %v11679_v32  ;;  %v4425_v62 = vor.u32 1.1754944e-38, %v4424_v1 }
 0x844   : > { %v4415_v46 = vsub.f32 1.0, %v4414_v29  ;;  %vm4393_vm1 = vweird.f32 %v11679_v32  ;;  %v4400_v60 = vor.u32 1.1754944e-38, %v4399_v56  ;;  %vm4470_vm0 = vcmp.eq.s32.totalorder %v4468_v38, 1  ;;  %v8285_v1 = vld [vmem:[%s12643_s6 + $0x98] sm:$0xf0] }
 0x845   : > { %v4376_v20 = vmul.f32 %v8677_v45, %v4375_v11  ;;  %8684 = vrcp.f32 %v11699_v36  ;;  %vm4398_vm4 = vcmp.eq.f32.partialorder %v4397_v63, 8.507059e+37  ;;  %v4439_v53 = vand.u32 2147483648, %v11699_v36 }
 0x846   : > { %v4416_v8 = vmul.f32 %v11687_v26, %v4415_v46  ;;  %vm4433_vm6 = vweird.f32 %v11699_v36 }
 0x847   : > { %v4377_v28 = vadd.f32 %v8677_v45, %v4376_v20  ;;  %v4440_v35 = vor.u32 1.1754944e-38, %v4439_v53 }
 0x848   : > { %v8683_v7 = vpop.eup %8682  ;;  %v4417_v61 = vadd.f32 %v11687_v26, %v4416_v8 }
 0x849   : > { %v4381_v21 = vsel %vm4380_vm10, %v8677_v45, %v4377_v28  ;;  %v4389_v30 = vmul.f32 %v8683_v7, %v11679_v32  ;;  %vm4394_vm15 = vweird.f32 %v8683_v7  ;;  %v4437_v32 = vand.u32 2147483647, %v11699_v36 }
 0x84a   : > { %v4386_v58 = vsel %vm4383_vm11, %v4385_v18, %v4381_v21  ;;  %v4421_v37 = vsel %vm11734_vm14, %v11687_v26, %v4417_v61  ;;  %vm4395_vm3 = vmor %vm4393_vm1, %vm4394_vm15  ;;  %v757_v26 = vadd.f32 %v12719_v57, %v9267_v27  ;;  %v7632_v18 = vld [vmem:[%s12643_s6 + $0xa8] sm:$0xf]  ;;  %v7634_v21 = vld [vmem:[%s12643_s6 + $0xb4] sm:$0xf0] }
 0x84b   : > { %v8685_v3 = vpop.eup %8684  ;;  %v4445_v51 = vmul.f32 %v4443_v12, %v4386_v58  ;;  %v4390_v43 = vsub.f32 1.0, %v4389_v30  ;;  %v4426_v40 = vsel %vm4423_vm2, %v4425_v62, %v4421_v37  ;;  %vm4438_vm8 = vcmp.eq.f32.partialorder %v4437_v32, 8.507059e+37  ;;  %v7640_v30 = vld [vmem:[%s12643_s6 + $0xb0] sm:$0xf]  ;;  %v8289_v58 = vld [vmem:[%s12643_s6 + $0xb8] sm:$0xf0] }
 0x84c   : > { %v4429_v54 = vmul.f32 %v8685_v3, %v11699_v36  ;;  %vm4434_vm5 = vweird.f32 %v8685_v3  ;;  %v4451_v5 = vsub.f32 1.0, %v4426_v40  ;;  %v4455_v2 = vmul.f32 %v4426_v40, %v11537_v48  ;;  %v4465_v36 = vpop.permute.xlu2 %4464  ;;  %v8282_v62 = vld [vmem:[%s12643_s6 + $0x80] sm:$0xf0]  ;;  %v7616_v40 = vld [vmem:[%s12643_s6 + $0x80] sm:$0xf] }
 0x84d   : > { %v4447_v25 = vadd.f32 %v4445_v51, %v755_v16  ;;  %v4391_v6 = vmul.f32 %v8683_v7, %v4390_v43  ;;  %vm4435_vm7 = vmor %vm4433_vm6, %vm4434_vm5  ;;  %vm4469_vm9 = vcmp.eq.s32.totalorder %v4465_v36, 1  ;;  %v582_v16 = vadd.f32 %v12720_v41, %v9117_v52  ;;  %v7620_v51 = vld [vmem:[%s12643_s6 + $0x90] sm:$0xf]  ;;  %v8284_v43 = vld [vmem:[%s12643_s6 + $0x94] sm:$0xf] }
 0x84e   : > { %v4430_v55 = vsub.f32 1.0, %v4429_v54  ;;  %v7621_v56 = vor.u32 %v8285_v1, %v7620_v51  ;;  %v7622_v54 = vld [vmem:[%s12643_s6 + $0x9c] sm:$0xf0]  ;;  %v7584_v36 = vld [vmem:[%s12643_s6 + $0x48] sm:$0xf] }
 0x84f   : > { %8686 = vtanh.f32 %v4447_v25  ;;  %v4392_v13 = vadd.f32 %v8683_v7, %v4391_v6  ;;  %v7628_v25 = vld [vmem:[%s12643_s6 + $0x98] sm:$0xf]  ;;  %v7625_v63 = vor.u32 %v8284_v43, %v7622_v54  ;;  %v7596_v32 = vld [vmem:[%s12643_s6 + $0x60] sm:$0xf]  ;;  %v8273_v41 = vld [vmem:[%s12643_s6 + $0x38] sm:$0xf0] }
 0x850   : > { %v4431_v31 = vmul.f32 %v8685_v3, %v4430_v55  ;;  %v7629_v37 = vor.u32 %v8286_v39, %v7628_v25  ;;  %v7608_v55 = vld [vmem:[%s12643_s6 + $0x78] sm:$0xf]  ;;  %v7574_v1 = vld [vmem:[%s12643_s6 + $0x3c] sm:$0xf0]  ;;  %v8274_v25 = vld [vmem:[%s12643_s6 + $0x40] sm:$0xf0] }
 0x851   : > { %v4396_v44 = vsel %vm4395_vm3, %v8683_v7, %v4392_v13  ;;  %v7609_v13 = vor.u32 %v8282_v62, %v7608_v55  ;;  %v7580_v43 = vld [vmem:[%s12643_s6 + $0x38] sm:$0xf]  ;;  %v8269_v55 = vld [vmem:[%s12643_s6 + $0x1c] sm:$0xf] }
 0x852   : > { %v4401_v45 = vsel %vm4398_vm4, %v4400_v60, %v4396_v44  ;;  %v4432_v47 = vadd.f32 %v8685_v3, %v4431_v31  ;;  %v8281_v60 = vld [vmem:[%s12643_s6 + $0x7c] sm:$0xf]  ;;  %v7610_v31 = vld [vmem:[%s12643_s6 + $0x84] sm:$0xf0] }
 0x853   : > { %v4446_v19 = vmul.f32 %v4444_v22, %v4401_v45  ;;  %v12721_v22 = vld [vmem:[#allocation23_spill] sm:$0xff]  ;;  %v7613_v45 = vor.u32 %v8281_v60, %v7610_v31 }
 0x854   : > { %v4436_v11 = vsel %vm4435_vm7, %v8685_v3, %v4432_v47  ;;  %v7641_v3 = vor.u32 %v8289_v58, %v7640_v30  ;;  %v671_v44 = vadd.f32 %v12721_v22, %v9156_v15  ;;  %v8283_v47 = vld [vmem:[%s12643_s6 + $0x88] sm:$0xf0]  ;;  %v7568_v22 = vld [vmem:[%s12643_s6 + $0x20] sm:$0xf] }
 0x855   : > { %v8687_v10 = vpop.eup %8686  ;;  %v4448_v29 = vadd.f32 %v4446_v19, %v757_v26  ;;  %v4441_v34 = vsel %vm4438_vm8, %v4440_v35, %v4436_v11  ;;  %v7617_v26 = vor.u32 %v8283_v47, %v7616_v40  ;;  %v12722_v19 = vld [vmem:[#allocation9_spill] sm:$0xff]  ;;  %v7604_v35 = vld [vmem:[%s12643_s6 + $0x68] sm:$0xf] }
 0x856   : > { %v4453_v42 = vmul.f32 %v8687_v10, %v4451_v5  ;;  %v4452_v17 = vsub.f32 1.0, %v4441_v34  ;;  %v4456_v33 = vmul.f32 %v4441_v34, %v11540_v14  ;;  %5003 = vmatpush.bf16.msra.mxu2 %v7641_v3  ;;  %v584_v53 = vadd.f32 %v12722_v19, %v9117_v52  ;;  %v8279_v10 = vld [vmem:[%s12643_s6 + $0x68] sm:$0xf0]  ;;  %v7572_v3 = vld [vmem:[%s12643_s6 + $0x30] sm:$0xf] }
 0x857   : > { %8688 = vtanh.f32 %v4448_v29  ;;  %v8278_v29 = vld [vmem:[%s12643_s6 + $0x64] sm:$0xf]  ;;  %v7597_v11 = vor.u32 %v8279_v10, %v7596_v32  ;;  %v7573_v51 = vor.u32 %v8273_v41, %v7572_v3 }
 0x858   : > { %v4457_v23 = vadd.f32 %v4455_v2, %v4453_v42  ;;  %v7598_v42 = vld [vmem:[%s12643_s6 + $0x6c] sm:$0xf0] }
 0x85a   : > { %v4471_v50 = vsel %vm4469_vm9, %v4457_v23, 0.0  ;;  %v11752_v59 = vsel %vm4469_vm9, %v4457_v23, %v11537_v48  ;;  %v8288_v48 = vld [vmem:[%s12643_s6 + $0xb0] sm:$0xf0]  ;;  %5004 = vmatpush.bf16.msra.mxu2 %v7629_v37  ;;  %v7560_v37 = vld [vmem:[%s12643_s6 + $0x18] sm:$0xf] }
 0x85b   : > { %v7633_v12 = vor.u32 %v8288_v48, %v7632_v18  ;;  %v8280_v23 = vld [vmem:[%s12643_s6 + $0x70] sm:$0xf0]  ;;  %v12723_v18 = vld [vmem:[#allocation25_spill] sm:$0xff] }
 0x85c   : > { %v673_v48 = vadd.f32 %v12723_v18, %v9156_v15  ;;  %v12724_v18 = vld [vmem:[#allocation24_spill] sm:$0xff] }
 0x85d   : > { %v8689_v46 = vpop.eup %8688  ;;  %4975 = vmatpush.bf16.msra.mxu0 %v7633_v12  ;;  %v7592_v12 = vld [vmem:[%s12643_s6 + $0x50] sm:$0xf] }
 0x85e   : > { %v4454_v4 = vmul.f32 %v8689_v46, %v4452_v17  ;;  %5005 = vmatpush.bf16.msra.mxu2 %v7617_v26  ;;  %v7601_v46 = vor.u32 %v8278_v29, %v7598_v42  ;;  %v7548_v26 = vld [vmem:[%s12643_s6] sm:$0xf]  ;;  %v7550_v42 = vld [vmem:[%s12643_s6 + $0xc] sm:$0xf0] }
 0x860   : > { %v4458_v20 = vadd.f32 %v4456_v33, %v4454_v4  ;;  %v7605_v33 = vor.u32 %v8280_v23, %v7604_v35  ;;  %v7556_v35 = vld [vmem:[%s12643_s6 + $0x8] sm:$0xf] }
 0x861   : > { %4976 = vmatpush.bf16.msra.mxu0 %v7621_v56 }
 0x862   : > { %v4472_v8 = vsel %vm4470_vm0, %v4458_v20, 0.0  ;;  %v11755_v28 = vsel %vm4470_vm0, %v4458_v20, %v11540_v14  ;;  %v8287_v14 = vld [vmem:[%s12643_s6 + $0xac] sm:$0xf]  ;;  %v8276_v20 = vld [vmem:[%s12643_s6 + $0x50] sm:$0xf0]  ;;  %5006 = vmatpush.bf16.msra.mxu2 %v7605_v33 }
 0x863   : > { %v8415_v9 = vpack.c.bf16 %v4472_v8, %v4471_v50  ;;  %v4487_v7 = vpack.c.bf16 %v11755_v28, %v11752_v59  ;;  %v7637_v61 = vor.u32 %v8287_v14, %v7634_v21  ;;  %v7585_v8 = vor.u32 %v8276_v20, %v7584_v36  ;;  %v8277_v21 = vld [vmem:[%s12643_s6 + $0x58] sm:$0xf0] }
 0x865   : > { %8451 = vst [vmem:[%s8872_s15 + $0x50] sm:$0xff] %v8415_v9   ;;  %4656 = vmatmul.bf16.vlgmr.msrb.gmra.mxu1 %v4487_v7  ;;  %4670 = vmatmul.bf16.vlgmr.msrb.gmra.mxu2 %v4487_v7  ;;  %v8275_v9 = vld [vmem:[%s12643_s6 + $0x4c] sm:$0xf] }
 0x866   : > { %4684 = vmatmul.bf16.vlgmr.msra.gmra.mxu3 %v4487_v7  ;;  %4989 = vmatpush.bf16.msra.mxu1 %v7637_v61  ;;  %v7586_v7 = vld [vmem:[%s12643_s6 + $0x54] sm:$0xf0]  ;;  %v7593_v61 = vor.u32 %v8277_v21, %v7592_v12 }
 0x867   : > { %4977 = vmatpush.bf16.msra.mxu0 %v7609_v13  ;;  %v7589_v14 = vor.u32 %v8275_v9, %v7586_v7  ;;  %v7562_v13 = vld [vmem:[%s12643_s6 + $0x24] sm:$0xf0] }
 0x868   : > { %5007 = vmatpush.bf16.msra.mxu2 %v7593_v61 }
 0x86a   : > { %4990 = vmatpush.bf16.msra.mxu1 %v7625_v63 }
 0x86b   : > { %4978 = vmatpush.bf16.msra.mxu0 %v7597_v11 }
 0x86e   : > { %4991 = vmatpush.bf16.msra.mxu1 %v7613_v45  ;;  %v7565_v45 = vor.u32 %v8269_v55, %v7562_v13 }
 0x86f   : > { %4979 = vmatpush.bf16.msra.mxu0 %v7585_v8 }
 0x872   : > { %4992 = vmatpush.bf16.msra.mxu1 %v7601_v46  ;;  %v8268_v46 = vld [vmem:[%s12643_s6 + $0x10] sm:$0xf0] }
 0x873   : > { %4980 = vmatpush.bf16.msra.mxu0 %v7573_v51 }
 0x876   : > { %4993 = vmatpush.bf16.msra.mxu1 %v7589_v14 }
 0x8e2   : > { %v4657_v24 = vpop.f32.mrf.mxu1 }
 0x8e3   : > { %v4690_v6 = vadd.f32 %v4657_v24, %v582_v16  ;;  %v8272_v16 = vld [vmem:[%s12643_s6 + $0x34] sm:$0xf] }
 0x8e4   : > { %v7577_v54 = vor.u32 %v8272_v16, %v7574_v1 }
 0x8e5   : > { %v7540_v49 = vmul.f32 -1.442695, %v4690_v6  ;;  %v7581_v6 = vor.u32 %v8274_v25, %v7580_v43 }
 0x8e6   : > { %4994 = vmatpush.bf16.msra.mxu1 %v7577_v54 }
 0x8e7   : > { %8690 = vpow2.f32 %v7540_v49  ;;  %v8270_v49 = vld [vmem:[%s12643_s6 + $0x20] sm:$0xf0]  ;;  %5008 = vmatpush.bf16.msra.mxu2 %v7581_v6 }
 0x8e8   : > { %v4671_v57 = vpop.f32.mrf.mxu2  ;;  %v7561_v40 = vor.u32 %v8270_v49, %v7560_v37 }
 0x8e9   : > { %v4730_v5 = vadd.f32 %v4671_v57, %v671_v44  ;;  %v8271_v44 = vld [vmem:[%s12643_s6 + $0x28] sm:$0xf0]  ;;  %v4685_v10 = vpop.f32.mrf.mxu3 }
 0x8ea   : > { %v4659_v2 = vpop.f32.mrf.mxu1  ;;  %v7569_v47 = vor.u32 %v8271_v44, %v7568_v22  ;;  %4981 = vmatpush.bf16.msra.mxu0 %v7561_v40  ;;  %4995 = vmatpush.bf16.msra.mxu1 %v7565_v45  ;;  %v4770_v7 = vadd.f32 %v11721_v0, %v4685_v10 }
 0x8eb   : > { %v7542_v34 = vmul.f32 -1.442695, %v4730_v5  ;;  %v4691_v17 = vadd.f32 %v4659_v2, %v584_v53  ;;  %v8267_v53 = vld [vmem:[%s12643_s6 + $0x8] sm:$0xf0]  ;;  %v8266_v5 = vld [vmem:[%s12643_s6 + $0x4] sm:$0xf] }
 0x8ec   : > { %5009 = vmatpush.bf16.msra.mxu2 %v7569_v47  ;;  %v7549_v11 = vor.u32 %v8267_v53, %v7548_v26 }
 0x8ed   : > { %v8691_v4 = vpop.eup %8690  ;;  %8692 = vpow2.f32 %v7542_v34  ;;  %v7541_v38 = vmul.f32 -1.442695, %v4691_v17  ;;  %v7553_v17 = vor.u32 %v8266_v5, %v7550_v42 }
 0x8ee   : > { %v11844_v50 = vadd.f32 1.0, %v8691_v4  ;;  %4982 = vmatpush.bf16.msra.mxu0 %v7549_v11 }
 0x8ef   : > { %8694 = vpow2.f32 %v7541_v38  ;;  %v7557_v38 = vor.u32 %v8268_v46, %v7556_v35  ;;  %4996 = vmatpush.bf16.msra.mxu1 %v7553_v17  ;;  %v4795_v17 = vpop.permute.xlu2 %4794 }
 0x8f0   : > { %8696 = vrcp.f32 %v11844_v50  ;;  %v4673_v30 = vpop.f32.mrf.mxu2  ;;  %v4711_v19 = vand.u32 2147483648, %v11844_v50  ;;  %v4709_v2 = vand.u32 2147483647, %v11844_v50  ;;  %vm4705_vm11 = vweird.f32 %v11844_v50 }
 0x8f1   : > { %v4731_v58 = vadd.f32 %v4673_v30, %v673_v48  ;;  %5010 = vmatpush.bf16.msra.mxu2 %v7557_v38  ;;  %v760_v48 = vadd.f32 %v12724_v18, %v9267_v27  ;;  %v4687_v25 = vpop.f32.mrf.mxu3  ;;  %v7742_v18 = vld [vmem:[%s12643_s6 + $0xb0] sm:$0xf] }
 0x8f2   : > { %v4712_v36 = vor.u32 1.1754944e-38, %v4711_v19  ;;  %vm4710_vm13 = vcmp.eq.f32.partialorder %v4709_v2, 8.507059e+37  ;;  %v4771_v55 = vadd.f32 %v11721_v0, %v4687_v25 }
 0x8f3   : > { %v8693_v24 = vpop.eup %8692  ;;  %v7543_v56 = vmul.f32 -1.442695, %v4731_v58 }
 0x8f4   : > { %v11879_v39 = vadd.f32 1.0, %v8693_v24 }
 0x8f5   : > { %v8695_v63 = vpop.eup %8694  ;;  %8698 = vpow2.f32 %v7543_v56 }
 0x8f6   : > { %v8697_v62 = vpop.eup %8696  ;;  %8700 = vrcp.f32 %v11879_v39  ;;  %v11895_v31 = vadd.f32 1.0, %v8695_v63  ;;  %v4751_v21 = vand.u32 2147483648, %v11879_v39  ;;  %v4749_v58 = vand.u32 2147483647, %v11879_v39 }
 0x8f7   : > { %v4701_v60 = vmul.f32 %v8697_v62, %v11844_v50  ;;  %vm4706_vm10 = vweird.f32 %v8697_v62  ;;  %vm4745_vm15 = vweird.f32 %v11879_v39 }
 0x8f8   : > { %8702 = vrcp.f32 %v11895_v31  ;;  %vm4707_vm12 = vmor %vm4705_vm11, %vm4706_vm10  ;;  %v4726_v16 = vand.u32 2147483648, %v11895_v31  ;;  %v4724_v43 = vand.u32 2147483647, %v11895_v31  ;;  %v4752_v24 = vor.u32 1.1754944e-38, %v4751_v21 }
 0x8f9   : > { %v4702_v57 = vsub.f32 1.0, %v4701_v60  ;;  %vm4750_vm3 = vcmp.eq.f32.partialorder %v4749_v58, 8.507059e+37  ;;  %vm4720_vm4 = vweird.f32 %v11895_v31  ;;  %v12725_v60 = vld [vmem:[#allocation26_spill] sm:$0xff]  ;;  %vm4797_vm11 = vcmp.eq.s32.totalorder %v4795_v17, 1 }
 0x8fa   : > { %v4727_v37 = vor.u32 1.1754944e-38, %v4726_v16  ;;  %vm4725_vm6 = vcmp.eq.f32.partialorder %v4724_v43, 8.507059e+37  ;;  %v762_v40 = vadd.f32 %v12725_v60, %v9267_v27  ;;  %v7724_v43 = vld [vmem:[%s12643_s6 + $0x9c] sm:$0xf0] }
 0x8fb   : > { %v8699_v32 = vpop.eup %8698  ;;  %v4703_v29 = vmul.f32 %v8697_v62, %v4702_v57 }
 0x8fc   : > { %v8701_v23 = vpop.eup %8700  ;;  %v11921_v34 = vadd.f32 1.0, %v8699_v32 }
 0x8fd   : > { %v4741_v33 = vmul.f32 %v8701_v23, %v11879_v39  ;;  %v4704_v4 = vadd.f32 %v8697_v62, %v4703_v29  ;;  %vm4746_vm14 = vweird.f32 %v8701_v23 }
 0x8fe   : > { %8704 = vrcp.f32 %v11921_v34  ;;  %v8703_v20 = vpop.eup %8702  ;;  %vm4747_vm1 = vmor %vm4745_vm15, %vm4746_vm14  ;;  %v4766_v44 = vand.u32 2147483648, %v11921_v34  ;;  %vm4760_vm8 = vweird.f32 %v11921_v34  ;;  %v4764_v57 = vand.u32 2147483647, %v11921_v34 }
 0x8ff   : > { %v4742_v8 = vsub.f32 1.0, %v4741_v33  ;;  %v4708_v9 = vsel %vm4707_vm12, %v8697_v62, %v4704_v4  ;;  %v4716_v50 = vmul.f32 %v8703_v20, %v11895_v31  ;;  %vm4721_vm2 = vweird.f32 %v8703_v20 }
 0x900   : > { %v4713_v14 = vsel %vm4710_vm13, %v4712_v36, %v4708_v9  ;;  %vm4722_vm5 = vmor %vm4720_vm4, %vm4721_vm2  ;;  %v4767_v10 = vor.u32 1.1754944e-38, %v4766_v44  ;;  %vm4765_vm9 = vcmp.eq.f32.partialorder %v4764_v57, 8.507059e+37  ;;  %v8307_v44 = vld [vmem:[%s12643_s6 + $0x88] sm:$0xf0]  ;;  %v12729_v57 = vld [vmem:[#allocation29_spill] sm:$0xff] }
 0x901   : > { %v4743_v12 = vmul.f32 %v8701_v23, %v4742_v8  ;;  %v4772_v30 = vmul.f32 %v4770_v7, %v4713_v14  ;;  %v4717_v61 = vsub.f32 1.0, %v4716_v50  ;;  %v7734_v8 = vld [vmem:[%s12643_s6 + $0xa8] sm:$0xf]  ;;  %v7736_v7 = vld [vmem:[%s12643_s6 + $0xb4] sm:$0xf0] }
 0x903   : > { %v4744_v3 = vadd.f32 %v8701_v23, %v4743_v12  ;;  %v4774_v41 = vadd.f32 %v4772_v30, %v760_v48  ;;  %v4718_v1 = vmul.f32 %v8703_v20, %v4717_v61  ;;  %v8313_v48 = vld [vmem:[%s12643_s6 + $0xb8] sm:$0xf0]  ;;  %v12726_v12 = vld [vmem:[#allocation10_spill] sm:$0xff]  ;;  %v12727_v30 = vld [vmem:[#allocation27_spill] sm:$0xff] }
 0x904   : > { %v8705_v51 = vpop.eup %8704  ;;  %v7743_v50 = vor.u32 %v8313_v48, %v7742_v18  ;;  %v587_v21 = vadd.f32 %v12726_v12, %v9117_v52  ;;  %v676_v58 = vadd.f32 %v12727_v30, %v9156_v15  ;;  %v7722_v61 = vld [vmem:[%s12643_s6 + $0x90] sm:$0xf]  ;;  %v8299_v18 = vld [vmem:[%s12643_s6 + $0x4c] sm:$0xf]  ;;  %v7688_v48 = vld [vmem:[%s12643_s6 + $0x54] sm:$0xf0] }
 0x905   : > { %v4748_v56 = vsel %vm4747_vm1, %v8701_v23, %v4744_v3  ;;  %8706 = vtanh.f32 %v4774_v41  ;;  %v4756_v54 = vmul.f32 %v8705_v51, %v11921_v34  ;;  %v4719_v6 = vadd.f32 %v8703_v20, %v4718_v1  ;;  %v4792_v23 = vpop.permute.xlu1 %4791  ;;  %v8309_v3 = vld [vmem:[%s12643_s6 + $0x98] sm:$0xf0]  ;;  %v8308_v41 = vld [vmem:[%s12643_s6 + $0x94] sm:$0xf]  ;;  %v7674_v12 = vld [vmem:[%s12643_s6 + $0x30] sm:$0xf] }
 0x906   : > { %v4753_v39 = vsel %vm4750_vm3, %v4752_v24, %v4748_v56  ;;  %vm4761_vm7 = vweird.f32 %v8705_v51  ;;  %vm4796_vm10 = vcmp.eq.s32.totalorder %v4792_v23, 1  ;;  %5330 = vmatpush.bf16.msrb.mxu1 %v7743_v50  ;;  %v7723_v1 = vor.u32 %v8309_v3, %v7722_v61  ;;  %v7730_v24 = vld [vmem:[%s12643_s6 + $0x98] sm:$0xf]  ;;  %v8310_v56 = vld [vmem:[%s12643_s6 + $0xa0] sm:$0xf0] }
 0x907   : > { %v4757_v63 = vsub.f32 1.0, %v4756_v54  ;;  %v4723_v49 = vsel %vm4722_vm5, %v8703_v20, %v4719_v6  ;;  %v4778_v22 = vsub.f32 1.0, %v4753_v39  ;;  %v4782_v19 = vmul.f32 %v4753_v39, %v11752_v59  ;;  %vm4762_vm0 = vmor %vm4760_vm8, %vm4761_vm7  ;;  %v8301_v50 = vld [vmem:[%s12643_s6 + $0x58] sm:$0xf0]  ;;  %v8296_v30 = vld [vmem:[%s12643_s6 + $0x34] sm:$0xf] }
 0x908   : > { %v4728_v13 = vsel %vm4725_vm6, %v4727_v37, %v4723_v49  ;;  %v7727_v6 = vor.u32 %v8308_v41, %v7724_v43  ;;  %v7731_v39 = vor.u32 %v8310_v56, %v7730_v24  ;;  %v7710_v49 = vld [vmem:[%s12643_s6 + $0x78] sm:$0xf]  ;;  %v7676_v3 = vld [vmem:[%s12643_s6 + $0x3c] sm:$0xf0] }
 0x909   : > { %v4758_v62 = vmul.f32 %v8705_v51, %v4757_v63  ;;  %v4773_v45 = vmul.f32 %v4771_v55, %v4728_v13  ;;  %v8306_v55 = vld [vmem:[%s12643_s6 + $0x80] sm:$0xf0]  ;;  %v7712_v13 = vld [vmem:[%s12643_s6 + $0x84] sm:$0xf0]  ;;  %v7682_v41 = vld [vmem:[%s12643_s6 + $0x38] sm:$0xf]  ;;  %v7679_v43 = vor.u32 %v8296_v30, %v7676_v3 }
 0x90a   : > { %5331 = vmatpush.bf16.msrb.mxu1 %v7731_v39  ;;  %v7711_v60 = vor.u32 %v8306_v55, %v7710_v49  ;;  %v7662_v56 = vld [vmem:[%s12643_s6 + $0x18] sm:$0xf] }
 0x90b   : > { %v8707_v47 = vpop.eup %8706  ;;  %v4759_v31 = vadd.f32 %v8705_v51, %v4758_v62  ;;  %v4775_v53 = vadd.f32 %v4773_v45, %v762_v40  ;;  %v8305_v62 = vld [vmem:[%s12643_s6 + $0x7c] sm:$0xf] }
 0x90c   : > { %v4780_v26 = vmul.f32 %v8707_v47, %v4778_v22  ;;  %v7715_v40 = vor.u32 %v8305_v62, %v7712_v13  ;;  %v7718_v22 = vld [vmem:[%s12643_s6 + $0x80] sm:$0xf]  ;;  %v12728_v47 = vld [vmem:[#allocation11_spill] sm:$0xff] }
 0x90d   : > { %v4763_v5 = vsel %vm4762_vm0, %v8705_v51, %v4759_v31  ;;  %8708 = vtanh.f32 %v4775_v53  ;;  %v7719_v45 = vor.u32 %v8307_v44, %v7718_v22  ;;  %v589_v31 = vadd.f32 %v12728_v47, %v9117_v52  ;;  %v8303_v53 = vld [vmem:[%s12643_s6 + $0x68] sm:$0xf0]  ;;  %v7670_v62 = vld [vmem:[%s12643_s6 + $0x20] sm:$0xf] }
 0x90e   : > { %v4784_v32 = vadd.f32 %v4782_v19, %v4780_v26  ;;  %v4768_v29 = vsel %vm4765_vm9, %v4767_v10, %v4763_v5  ;;  %v678_v26 = vadd.f32 %v12729_v57, %v9156_v15  ;;  %v7698_v19 = vld [vmem:[%s12643_s6 + $0x60] sm:$0xf]  ;;  %v8302_v5 = vld [vmem:[%s12643_s6 + $0x64] sm:$0xf]  ;;  %v8295_v13 = vld [vmem:[%s12643_s6 + $0x28] sm:$0xf0] }
 0x90f   : > { %v4779_v2 = vsub.f32 1.0, %v4768_v29  ;;  %v4783_v35 = vmul.f32 %v4768_v29, %v11755_v28  ;;  %5332 = vmatpush.bf16.msrb.mxu1 %v7719_v45  ;;  %v7699_v29 = vor.u32 %v8303_v53, %v7698_v19  ;;  %v7650_v19 = vld [vmem:[%s12643_s6] sm:$0xf]  ;;  %v8291_v53 = vld [vmem:[%s12643_s6 + $0x8] sm:$0xf0] }
 0x910   : > { %v4798_v46 = vsel %vm4796_vm10, %v4784_v32, 0.0  ;;  %v11950_v4 = vsel %vm4796_vm10, %v4784_v32, %v11752_v59  ;;  %v8312_v59 = vld [vmem:[%s12643_s6 + $0xb0] sm:$0xf0] }
 0x911   : > { %v7735_v9 = vor.u32 %v8312_v59, %v7734_v8 }
 0x913   : > { %v8709_v11 = vpop.eup %8708  ;;  %5302 = vmatpush.bf16.msrb.mxu3 %v7735_v9 }
 0x914   : > { %v4781_v42 = vmul.f32 %v8709_v11, %v4779_v2  ;;  %v7700_v2 = vld [vmem:[%s12643_s6 + $0x6c] sm:$0xf0]  ;;  %v7706_v11 = vld [vmem:[%s12643_s6 + $0x68] sm:$0xf] }
 0x915   : > { %v7703_v17 = vor.u32 %v8302_v5, %v7700_v2 }
 0x916   : > { %v4785_v34 = vadd.f32 %v4783_v35, %v4781_v42  ;;  %v8304_v42 = vld [vmem:[%s12643_s6 + $0x70] sm:$0xf0] }
 0x917   : > { %5303 = vmatpush.bf16.msrb.mxu3 %v7723_v1 }
 0x918   : > { %v4799_v33 = vsel %vm4797_vm11, %v4785_v34, 0.0  ;;  %v11953_v38 = vsel %vm4797_vm11, %v4785_v34, %v11755_v28  ;;  %v8311_v28 = vld [vmem:[%s12643_s6 + $0xac] sm:$0xf]  ;;  %v7707_v34 = vor.u32 %v8304_v42, %v7706_v11  ;;  %v7658_v11 = vld [vmem:[%s12643_s6 + $0x8] sm:$0xf] }
 0x919   : > { %v8420_v36 = vpack.c.bf16 %v4799_v33, %v4798_v46  ;;  %v4814_v20 = vpack.c.bf16 %v11953_v38, %v11950_v4  ;;  %v7739_v14 = vor.u32 %v8311_v28, %v7736_v7  ;;  %v8300_v28 = vld [vmem:[%s12643_s6 + $0x50] sm:$0xf0] }
 0x91a   : > { %5333 = vmatpush.bf16.msrb.mxu1 %v7707_v34 }
 0x91b   : > { %8452 = vst [vmem:[%s8872_s15 + $0x58] sm:$0xff] %v8420_v36   ;;  %4983 = vmatmul.bf16.vlgmr.msra.gmra.mxu0 %v4814_v20  ;;  %4997 = vmatmul.bf16.vlgmr.msra.gmra.mxu1 %v4814_v20  ;;  %v7686_v36 = vld [vmem:[%s12643_s6 + $0x48] sm:$0xf] }
 0x91c   : > { %5011 = vmatmul.bf16.vlgmr.msra.gmra.mxu2 %v4814_v20  ;;  %5316 = vmatpush.bf16.msrb.mxu0 %v7739_v14  ;;  %v7687_v7 = vor.u32 %v8300_v28, %v7686_v36  ;;  %v7694_v14 = vld [vmem:[%s12643_s6 + $0x50] sm:$0xf] }
 0x91d   : > { %5304 = vmatpush.bf16.msrb.mxu3 %v7711_v60  ;;  %v7695_v61 = vor.u32 %v8301_v50, %v7694_v14 }
 0x91f   : > { %5334 = vmatpush.bf16.msrb.mxu1 %v7695_v61  ;;  %v8332_v61 = vld [vmem:[%s12643_s6 + $0x94] sm:$0xf] }
 0x920   : > { %5317 = vmatpush.bf16.msrb.mxu0 %v7727_v6 }
 0x921   : > { %5305 = vmatpush.bf16.msrb.mxu3 %v7699_v29  ;;  %v7652_v29 = vld [vmem:[%s12643_s6 + $0xc] sm:$0xf0] }
 0x924   : > { %5318 = vmatpush.bf16.msrb.mxu0 %v7715_v40 }
 0x925   : > { %5306 = vmatpush.bf16.msrb.mxu3 %v7687_v7 }
 0x928   : > { %5319 = vmatpush.bf16.msrb.mxu0 %v7703_v17  ;;  %v8292_v17 = vld [vmem:[%s12643_s6 + $0x10] sm:$0xf0] }
 0x998   : > { %v4984_v16 = vpop.f32.mrf.mxu0  ;;  %v4998_v51 = vpop.f32.mrf.mxu1 }
 0x999   : > { %v5017_v54 = vadd.f32 %v4984_v16, %v587_v21  ;;  %v5057_v25 = vadd.f32 %v4998_v51, %v676_v58  ;;  %v8297_v21 = vld [vmem:[%s12643_s6 + $0x38] sm:$0xf0]  ;;  %v7691_v58 = vor.u32 %v8299_v18, %v7688_v48  ;;  %v8298_v51 = vld [vmem:[%s12643_s6 + $0x40] sm:$0xf0]  ;;  %v12730_v18 = vld [vmem:[#allocation28_spill] sm:$0xff] }
 0x99a   : > { %v7675_v16 = vor.u32 %v8297_v21, %v7674_v12  ;;  %v7683_v24 = vor.u32 %v8298_v51, %v7682_v41  ;;  %v765_v48 = vadd.f32 %v12730_v18, %v9267_v27  ;;  %v8337_v18 = vld [vmem:[%s12643_s6 + $0xb8] sm:$0xf0] }
 0x99b   : > { %v7642_v63 = vmul.f32 -1.442695, %v5017_v54  ;;  %v7644_v37 = vmul.f32 -1.442695, %v5057_v25  ;;  %5320 = vmatpush.bf16.msrb.mxu0 %v7691_v58  ;;  %v8294_v54 = vld [vmem:[%s12643_s6 + $0x20] sm:$0xf0] }
 0x99c   : > { %5307 = vmatpush.bf16.msrb.mxu3 %v7675_v16  ;;  %v7663_v39 = vor.u32 %v8294_v54, %v7662_v56  ;;  %5335 = vmatpush.bf16.msrb.mxu1 %v7683_v24 }
 0x99d   : > { %8710 = vpow2.f32 %v7642_v63  ;;  %v8293_v63 = vld [vmem:[%s12643_s6 + $0x1c] sm:$0xf] }
 0x99e   : > { %8712 = vpow2.f32 %v7644_v37  ;;  %v7664_v37 = vld [vmem:[%s12643_s6 + $0x24] sm:$0xf0] }
 0x99f   : > { %5321 = vmatpush.bf16.msrb.mxu0 %v7679_v43  ;;  %v7667_v45 = vor.u32 %v8293_v63, %v7664_v37 }
 0x9a0   : > { %v4986_v32 = vpop.f32.mrf.mxu0  ;;  %v5000_v10 = vpop.f32.mrf.mxu1  ;;  %5308 = vmatpush.bf16.msrb.mxu3 %v7663_v39 }
 0x9a1   : > { %v5018_v35 = vadd.f32 %v4986_v32, %v589_v31  ;;  %v5058_v23 = vadd.f32 %v5000_v10, %v678_v26  ;;  %v5012_v31 = vpop.f32.mrf.mxu2  ;;  %v7671_v26 = vor.u32 %v8295_v13, %v7670_v62  ;;  %v8290_v10 = vld [vmem:[%s12643_s6 + $0x4] sm:$0xf] }
 0x9a3   : > { %v8711_v46 = vpop.eup %8710  ;;  %v7643_v33 = vmul.f32 -1.442695, %v5018_v35  ;;  %v7645_v59 = vmul.f32 -1.442695, %v5058_v23  ;;  %5322 = vmatpush.bf16.msrb.mxu0 %v7667_v45  ;;  %5336 = vmatpush.bf16.msrb.mxu1 %v7671_v26  ;;  %v7651_v35 = vor.u32 %v8291_v53, %v7650_v19  ;;  %v7655_v23 = vor.u32 %v8290_v10, %v7652_v29  ;;  %v5119_v29 = vpop.permute.xlu0 %5118 }
 0x9a4   : > { %v8713_v20 = vpop.eup %8712  ;;  %v12041_v8 = vadd.f32 1.0, %v8711_v46 }
 0x9a5   : > { %v12046_v9 = vadd.f32 1.0, %v8713_v20  ;;  %8714 = vpow2.f32 %v7643_v33  ;;  %v7659_v33 = vor.u32 %v8292_v17, %v7658_v11  ;;  %v5097_v20 = vadd.f32 %v11721_v0, %v5012_v31  ;;  %5309 = vmatpush.bf16.msrb.mxu3 %v7651_v35 }
 0x9a6   : > { %8716 = vrcp.f32 %v12041_v8  ;;  %v5038_v57 = vand.u32 2147483648, %v12041_v8  ;;  %v5036_v32 = vand.u32 2147483647, %v12041_v8  ;;  %vm5032_vm13 = vweird.f32 %v12041_v8 }
 0x9a7   : > { %8718 = vrcp.f32 %v12046_v9  ;;  %v5078_v14 = vand.u32 2147483648, %v12046_v9  ;;  %5323 = vmatpush.bf16.msrb.mxu0 %v7655_v23  ;;  %5337 = vmatpush.bf16.msrb.mxu1 %v7659_v33  ;;  %vm5072_vm2 = vweird.f32 %v12046_v9  ;;  %v5076_v21 = vand.u32 2147483647, %v12046_v9 }
 0x9a8   : > { %8720 = vpow2.f32 %v7645_v59  ;;  %v5039_v46 = vor.u32 1.1754944e-38, %v5038_v57  ;;  %vm5037_vm15 = vcmp.eq.f32.partialorder %v5036_v32, 8.507059e+37 }
 0x9a9   : > { %v5014_v43 = vpop.f32.mrf.mxu2  ;;  %vm5077_vm6 = vcmp.eq.f32.partialorder %v5076_v21, 8.507059e+37 }
 0x9aa   : > { %v5098_v63 = vadd.f32 %v11721_v0, %v5014_v43  ;;  %v12736_v43 = vld [vmem:[#allocation33_spill] sm:$0xff] }
 0x9ab   : > { %v8715_v1 = vpop.eup %8714 }
 0x9ac   : > { %v8717_v25 = vpop.eup %8716  ;;  %v12086_v6 = vadd.f32 1.0, %v8715_v1 }
 0x9ad   : > { %v12094_v49 = vpop.eup %8718  ;;  %v5028_v55 = vmul.f32 %v8717_v25, %v12041_v8  ;;  %vm5033_vm12 = vweird.f32 %v8717_v25 }
 0x9ae   : > { %v8721_v60 = vpop.eup %8720  ;;  %v5068_v40 = vmul.f32 %v12094_v49, %v12046_v9  ;;  %8722 = vrcp.f32 %v12086_v6  ;;  %vm5034_vm14 = vmor %vm5032_vm13, %vm5033_vm12  ;;  %vm5073_vm1 = vweird.f32 %v12094_v49  ;;  %v5053_v58 = vand.u32 2147483648, %v12086_v6 }
 0x9af   : > { %v5029_v22 = vsub.f32 1.0, %v5028_v55  ;;  %v12106_v44 = vadd.f32 1.0, %v8721_v60  ;;  %vm12143_vm3 = vmor %vm5072_vm2, %vm5073_vm1  ;;  %v5051_v16 = vand.u32 2147483647, %v12086_v6  ;;  %v5079_v9 = vor.u32 1.1754944e-38, %v5078_v14 }
 0x9b0   : > { %v5069_v47 = vsub.f32 1.0, %v5068_v40  ;;  %vm5047_vm5 = vweird.f32 %v12086_v6  ;;  %v5054_v54 = vor.u32 1.1754944e-38, %v5053_v58  ;;  %vm5123_vm12 = vcmp.eq.s32.totalorder %v5119_v29, 1  ;;  %v8333_v58 = vld [vmem:[%s12643_s6 + $0x98] sm:$0xf0] }
 0x9b1   : > { %v5030_v5 = vmul.f32 %v8717_v25, %v5029_v22  ;;  %8724 = vrcp.f32 %v12106_v44  ;;  %vm5052_vm8 = vcmp.eq.f32.partialorder %v5051_v16, 8.507059e+37  ;;  %v5093_v13 = vand.u32 2147483648, %v12106_v44  ;;  %v7826_v16 = vld [vmem:[%s12643_s6 + $0x9c] sm:$0xf0] }
 0x9b2   : > { %v5070_v2 = vmul.f32 %v12094_v49, %v5069_v47  ;;  %vm5087_vm9 = vweird.f32 %v12106_v44 }
 0x9b3   : > { %v5031_v42 = vadd.f32 %v8717_v25, %v5030_v5  ;;  %v5094_v57 = vor.u32 1.1754944e-38, %v5093_v13  ;;  %v7814_v13 = vld [vmem:[%s12643_s6 + $0x84] sm:$0xf0] }
 0x9b4   : > { %v8723_v34 = vpop.eup %8722  ;;  %v5071_v8 = vadd.f32 %v12094_v49, %v5070_v2 }
 0x9b5   : > { %v5035_v36 = vsel %vm5034_vm14, %v8717_v25, %v5031_v42  ;;  %v5043_v59 = vmul.f32 %v8723_v34, %v12086_v6  ;;  %vm5048_vm4 = vweird.f32 %v8723_v34  ;;  %v5091_v6 = vand.u32 2147483647, %v12106_v44 }
 0x9b6   : > { %v5040_v28 = vsel %vm5037_vm15, %v5039_v46, %v5035_v36  ;;  %v5075_v51 = vsel %vm12143_vm3, %v12094_v49, %v5071_v8  ;;  %vm5049_vm7 = vmor %vm5047_vm5, %vm5048_vm4  ;;  %v12733_v49 = vld [vmem:[#allocation30_spill] sm:$0xff]  ;;  %v12734_v46 = vld [vmem:[#allocation31_spill] sm:$0xff] }
 0x9b7   : > { %v8725_v7 = vpop.eup %8724  ;;  %v5099_v50 = vmul.f32 %v5097_v20, %v5040_v28  ;;  %v5044_v12 = vsub.f32 1.0, %v5043_v59  ;;  %v5080_v25 = vsel %vm5077_vm6, %v5079_v9, %v5075_v51  ;;  %v767_v62 = vadd.f32 %v12733_v49, %v9267_v27  ;;  %v8335_v59 = vld [vmem:[%s12643_s6 + $0xac] sm:$0xf]  ;;  %v7838_v28 = vld [vmem:[%s12643_s6 + $0xb4] sm:$0xf0] }
 0x9b8   : > { %v5083_v30 = vmul.f32 %v8725_v7, %v12106_v44  ;;  %vm5088_vm0 = vweird.f32 %v8725_v7  ;;  %v5105_v40 = vsub.f32 1.0, %v5080_v25  ;;  %v5109_v0 = vmul.f32 %v5080_v25, %v11950_v4  ;;  %v5122_v44 = vpop.permute.xlu1 %5121  ;;  %v7832_v51 = vld [vmem:[%s12643_s6 + $0x98] sm:$0xf] }
 0x9b9   : > { %v5101_v3 = vadd.f32 %v5099_v50, %v765_v48  ;;  %v5045_v41 = vmul.f32 %v8723_v34, %v5044_v12  ;;  %vm5089_vm10 = vmor %vm5087_vm9, %vm5088_vm0  ;;  %vm5092_vm11 = vcmp.eq.f32.partialorder %v5091_v6, 8.507059e+37  ;;  %vm5124_vm13 = vcmp.eq.s32.totalorder %v5122_v44, 1  ;;  %v12735_v12 = vld [vmem:[#allocation12_spill] sm:$0xff] }
 0x9ba   : > { %v5084_v1 = vsub.f32 1.0, %v5083_v30  ;;  %v681_v33 = vadd.f32 %v12734_v46, %v9156_v15  ;;  %v7841_v14 = vor.u32 %v8335_v59, %v7838_v28  ;;  %v592_v21 = vadd.f32 %v12735_v12, %v9117_v52  ;;  %v7824_v30 = vld [vmem:[%s12643_s6 + $0x90] sm:$0xf]  ;;  %v7788_v46 = vld [vmem:[%s12643_s6 + $0x48] sm:$0xf] }
 0x9bb   : > { %8726 = vtanh.f32 %v5101_v3  ;;  %v5046_v24 = vadd.f32 %v8723_v34, %v5045_v41  ;;  %v7825_v41 = vor.u32 %v8333_v58, %v7824_v30  ;;  %v683_v9 = vadd.f32 %v12736_v43, %v9156_v15  ;;  %v7796_v28 = vld [vmem:[%s12643_s6 + $0x50] sm:$0xf]  ;;  %v7778_v30 = vld [vmem:[%s12643_s6 + $0x3c] sm:$0xf0]  ;;  %v8318_v43 = vld [vmem:[%s12643_s6 + $0x20] sm:$0xf0] }
 0x9bc   : > { %v5085_v56 = vmul.f32 %v8725_v7, %v5084_v1  ;;  %5643 = vmatpush.bf16.msra.mxu3 %v7841_v14  ;;  %v8334_v1 = vld [vmem:[%s12643_s6 + $0xa0] sm:$0xf0] }
 0x9bd   : > { %v5050_v39 = vsel %vm5049_vm7, %v8723_v34, %v5046_v24 }
 0x9be   : > { %v5086_v37 = vadd.f32 %v8725_v7, %v5085_v56  ;;  %v5055_v55 = vsel %vm5052_vm8, %v5054_v54, %v5050_v39  ;;  %v7829_v56 = vor.u32 %v8332_v61, %v7826_v16  ;;  %v7833_v54 = vor.u32 %v8334_v1, %v7832_v51  ;;  %v7764_v16 = vld [vmem:[%s12643_s6 + $0x18] sm:$0xf] }
 0x9bf   : > { %v5100_v60 = vmul.f32 %v5098_v63, %v5055_v55  ;;  %v8330_v55 = vld [vmem:[%s12643_s6 + $0x80] sm:$0xf0] }
 0x9c0   : > { %v5090_v31 = vsel %vm5089_vm10, %v8725_v7, %v5086_v37  ;;  %v7844_v7 = vld [vmem:[%s12643_s6 + $0xb0] sm:$0xf]  ;;  %5644 = vmatpush.bf16.msra.mxu3 %v7829_v56  ;;  %v7812_v37 = vld [vmem:[%s12643_s6 + $0x78] sm:$0xf]  ;;  %v7765_v56 = vor.u32 %v8318_v43, %v7764_v16 }
 0x9c1   : > { %v8727_v22 = vpop.eup %8726  ;;  %v5102_v45 = vadd.f32 %v5100_v60, %v767_v62  ;;  %v5095_v19 = vsel %vm5092_vm11, %v5094_v57, %v5090_v31  ;;  %v7845_v50 = vor.u32 %v8337_v18, %v7844_v7  ;;  %v7813_v49 = vor.u32 %v8330_v55, %v7812_v37  ;;  %v8329_v62 = vld [vmem:[%s12643_s6 + $0x7c] sm:$0xf]  ;;  %v7820_v60 = vld [vmem:[%s12643_s6 + $0x80] sm:$0xf]  ;;  %v7776_v18 = vld [vmem:[%s12643_s6 + $0x30] sm:$0xf] }
 0x9c2   : > { %v5107_v47 = vmul.f32 %v8727_v22, %v5105_v40  ;;  %v5106_v53 = vsub.f32 1.0, %v5095_v19  ;;  %v5110_v10 = vmul.f32 %v5095_v19, %v11953_v38  ;;  %v7817_v22 = vor.u32 %v8329_v62, %v7814_v13  ;;  %v12737_v31 = vld [vmem:[#allocation13_spill] sm:$0xff]  ;;  %v8327_v19 = vld [vmem:[%s12643_s6 + $0x68] sm:$0xf0] }
 0x9c3   : > { %8728 = vtanh.f32 %v5102_v45  ;;  %5657 = vmatpush.bf16.msra.mxu0 %v7845_v50  ;;  %v8331_v45 = vld [vmem:[%s12643_s6 + $0x88] sm:$0xf0]  ;;  %v594_v57 = vadd.f32 %v12737_v31, %v9117_v52  ;;  %v8325_v7 = vld [vmem:[%s12643_s6 + $0x58] sm:$0xf0] }
 0x9c4   : > { %v5111_v26 = vadd.f32 %v5109_v0, %v5107_v47  ;;  %v7821_v0 = vor.u32 %v8331_v45, %v7820_v60  ;;  %5645 = vmatpush.bf16.msra.mxu3 %v7817_v22  ;;  %v7797_v12 = vor.u32 %v8325_v7, %v7796_v28  ;;  %v8319_v55 = vld [vmem:[%s12643_s6 + $0x28] sm:$0xf0] }
 0x9c5   : > { %v8315_v60 = vld [vmem:[%s12643_s6 + $0x8] sm:$0xf0] }
 0x9c6   : > { %v5125_v11 = vsel %vm5123_vm12, %v5111_v26, 0.0  ;;  %v12161_v35 = vsel %vm5123_vm12, %v5111_v26, %v11950_v4  ;;  %v7836_v4 = vld [vmem:[%s12643_s6 + $0xa8] sm:$0xf]  ;;  %v7800_v26 = vld [vmem:[%s12643_s6 + $0x60] sm:$0xf] }
 0x9c7   : > { %5658 = vmatpush.bf16.msra.mxu0 %v7833_v54  ;;  %v7801_v29 = vor.u32 %v8327_v19, %v7800_v26  ;;  %v7766_v54 = vld [vmem:[%s12643_s6 + $0x24] sm:$0xf0]  ;;  %v8316_v19 = vld [vmem:[%s12643_s6 + $0x10] sm:$0xf0] }
 0x9c8   : > { %v7760_v26 = vld [vmem:[%s12643_s6 + $0x8] sm:$0xf] }
 0x9c9   : > { %v8729_v5 = vpop.eup %8728 }
 0x9ca   : > { %v5108_v32 = vmul.f32 %v8729_v5, %v5106_v53  ;;  %v8326_v53 = vld [vmem:[%s12643_s6 + $0x64] sm:$0xf] }
 0x9cb   : > { %5659 = vmatpush.bf16.msra.mxu0 %v7821_v0 }
 0x9cc   : > { %v5112_v2 = vadd.f32 %v5110_v10, %v5108_v32  ;;  %v7802_v32 = vld [vmem:[%s12643_s6 + $0x6c] sm:$0xf0] }
 0x9cd   : > { %v7805_v44 = vor.u32 %v8326_v53, %v7802_v32 }
 0x9ce   : > { %v5126_v42 = vsel %vm5124_vm13, %v5112_v2, 0.0  ;;  %v12164_v23 = vsel %vm5124_vm13, %v5112_v2, %v11953_v38  ;;  %v8336_v38 = vld [vmem:[%s12643_s6 + $0xb0] sm:$0xf0]  ;;  %v7808_v2 = vld [vmem:[%s12643_s6 + $0x68] sm:$0xf] }
 0x9cf   : > { %v8425_v17 = vpack.c.bf16 %v5126_v42, %v5125_v11  ;;  %v5141_v34 = vpack.c.bf16 %v12164_v23, %v12161_v35  ;;  %v7837_v8 = vor.u32 %v8336_v38, %v7836_v4  ;;  %v8328_v11 = vld [vmem:[%s12643_s6 + $0x70] sm:$0xf0]  ;;  %5646 = vmatpush.bf16.msra.mxu3 %v7805_v44  ;;  %v8323_v4 = vld [vmem:[%s12643_s6 + $0x4c] sm:$0xf]  ;;  %v7790_v38 = vld [vmem:[%s12643_s6 + $0x54] sm:$0xf0] }
 0x9d0   : > { %v7809_v42 = vor.u32 %v8328_v11, %v7808_v2  ;;  %v7761_v2 = vor.u32 %v8316_v19, %v7760_v26 }
 0x9d1   : > { %8453 = vst [vmem:[%s8872_s15 + $0x60] sm:$0xff] %v8425_v17   ;;  %5310 = vmatmul.bf16.vlgmr.msrb.gmra.mxu3 %v5141_v34  ;;  %5324 = vmatmul.bf16.vlgmr.msrb.gmra.mxu0 %v5141_v34 }
 0x9d2   : > { %5338 = vmatmul.bf16.vlgmr.msrb.gmra.mxu1 %v5141_v34  ;;  %5629 = vmatpush.bf16.msrb.mxu2 %v7837_v8  ;;  %v7793_v8 = vor.u32 %v8323_v4, %v7790_v38 }
 0x9d3   : > { %5660 = vmatpush.bf16.msra.mxu0 %v7809_v42 }
 0x9d4   : > { %5647 = vmatpush.bf16.msra.mxu3 %v7793_v8 }
 0x9d6   : > { %5630 = vmatpush.bf16.msrb.mxu2 %v7825_v41  ;;  %v8322_v41 = vld [vmem:[%s12643_s6 + $0x40] sm:$0xf0] }
 0x9d7   : > { %5661 = vmatpush.bf16.msra.mxu0 %v7797_v12 }
 0x9da   : > { %5631 = vmatpush.bf16.msrb.mxu2 %v7813_v49  ;;  %v7752_v49 = vld [vmem:[%s12643_s6] sm:$0xf] }
 0x9db   : > { %v7753_v31 = vor.u32 %v8315_v60, %v7752_v49 }
 0x9de   : > { %5632 = vmatpush.bf16.msrb.mxu2 %v7801_v29 }
 0xa4e   : > { %v5325_v36 = vpop.f32.mrf.mxu0 }
 0xa4f   : > { %v5384_v20 = vadd.f32 %v5325_v36, %v681_v33  ;;  %v8324_v33 = vld [vmem:[%s12643_s6 + $0x50] sm:$0xf0]  ;;  %v5339_v53 = vpop.f32.mrf.mxu1 }
 0xa51   : > { %v7746_v48 = vmul.f32 -1.442695, %v5384_v20  ;;  %v7789_v20 = vor.u32 %v8324_v33, %v7788_v46 }
 0xa53   : > { %8730 = vpow2.f32 %v7746_v48  ;;  %v8321_v48 = vld [vmem:[%s12643_s6 + $0x38] sm:$0xf0]  ;;  %5633 = vmatpush.bf16.msrb.mxu2 %v7789_v20 }
 0xa54   : > { %v5311_v3 = vpop.f32.mrf.mxu3  ;;  %v7777_v58 = vor.u32 %v8321_v48, %v7776_v18 }
 0xa55   : > { %v5344_v24 = vadd.f32 %v5311_v3, %v592_v21  ;;  %v8320_v21 = vld [vmem:[%s12643_s6 + $0x34] sm:$0xf]  ;;  %v7784_v3 = vld [vmem:[%s12643_s6 + $0x38] sm:$0xf] }
 0xa56   : > { %v5327_v25 = vpop.f32.mrf.mxu0  ;;  %v7781_v61 = vor.u32 %v8320_v21, %v7778_v30  ;;  %v7785_v1 = vor.u32 %v8322_v41, %v7784_v3 }
 0xa57   : > { %v7744_v39 = vmul.f32 -1.442695, %v5344_v24  ;;  %v5385_v63 = vadd.f32 %v5327_v25, %v683_v9  ;;  %v8317_v9 = vld [vmem:[%s12643_s6 + $0x1c] sm:$0xf]  ;;  %5634 = vmatpush.bf16.msrb.mxu2 %v7777_v58  ;;  %v7772_v25 = vld [vmem:[%s12643_s6 + $0x20] sm:$0xf]  ;;  %v5341_v16 = vpop.f32.mrf.mxu1 }
 0xa58   : > { %5648 = vmatpush.bf16.msra.mxu3 %v7781_v61  ;;  %v7769_v37 = vor.u32 %v8317_v9, %v7766_v54  ;;  %5662 = vmatpush.bf16.msra.mxu0 %v7785_v1  ;;  %v7773_v13 = vor.u32 %v8319_v55, %v7772_v25  ;;  %v12741_v54 = vld [vmem:[#allocation34_spill] sm:$0xff] }
 0xa59   : > { %v8731_v40 = vpop.eup %8730  ;;  %8732 = vpow2.f32 %v7744_v39  ;;  %v7747_v6 = vmul.f32 -1.442695, %v5385_v63  ;;  %v772_v25 = vadd.f32 %v12741_v54, %v9267_v27 }
 0xa5a   : > { %v12229_v47 = vadd.f32 1.0, %v8731_v40  ;;  %v8314_v40 = vld [vmem:[%s12643_s6 + $0x4] sm:$0xf] }
 0xa5b   : > { %8734 = vpow2.f32 %v7747_v6  ;;  %v7754_v6 = vld [vmem:[%s12643_s6 + $0xc] sm:$0xf0]  ;;  %5635 = vmatpush.bf16.msrb.mxu2 %v7765_v56 }
 0xa5c   : > { %v5313_v5 = vpop.f32.mrf.mxu3  ;;  %8736 = vrcp.f32 %v12229_v47  ;;  %5649 = vmatpush.bf16.msra.mxu3 %v7769_v37  ;;  %5663 = vmatpush.bf16.msra.mxu0 %v7773_v13  ;;  %v5405_v28 = vand.u32 2147483648, %v12229_v47  ;;  %vm5399_vm4 = vweird.f32 %v12229_v47  ;;  %v5403_v48 = vand.u32 2147483647, %v12229_v47 }
 0xa5d   : > { %v5345_v10 = vadd.f32 %v5313_v5, %v594_v57  ;;  %v7757_v57 = vor.u32 %v8314_v40, %v7754_v6 }
 0xa5e   : > { %vm5404_vm8 = vcmp.eq.f32.partialorder %v5403_v48, 8.507059e+37 }
 0xa5f   : > { %v8733_v17 = vpop.eup %8732  ;;  %v7745_v34 = vmul.f32 -1.442695, %v5345_v10  ;;  %5636 = vmatpush.bf16.msrb.mxu2 %v7753_v31 }
 0xa60   : > { %v12258_v36 = vadd.f32 1.0, %v8733_v17  ;;  %5650 = vmatpush.bf16.msra.mxu3 %v7757_v57  ;;  %5664 = vmatpush.bf16.msra.mxu0 %v7761_v2 }
 0xa61   : > { %v8735_v59 = vpop.eup %8734  ;;  %8738 = vpow2.f32 %v7745_v34  ;;  %v12349_v34 = vld [vmem:[%s12641_s4] ss:$0 sm:$0xff] }
 0xa62   : > { %8740 = vrcp.f32 %v12258_v36  ;;  %v12279_v14 = vpop.eup %8736  ;;  %v12281_v50 = vadd.f32 1.0, %v8735_v59  ;;  %v5365_v5 = vand.u32 2147483648, %v12258_v36  ;;  %v5363_v10 = vand.u32 2147483647, %v12258_v36  ;;  %v12738_v59 = vld [vmem:[#allocation32_spill] sm:$0xff] }
 0xa63   : > { %v5395_v51 = vmul.f32 %v12279_v14, %v12229_v47  ;;  %vm5359_vm15 = vweird.f32 %v12258_v36  ;;  %v5424_v46 = vadd.f32 %v12349_v34, %v5339_v53  ;;  %vm5400_vm3 = vweird.f32 %v12279_v14  ;;  %v5446_v53 = vpop.permute.xlu2 %5445 }
 0xa64   : > { %8742 = vrcp.f32 %v12281_v50  ;;  %v5366_v17 = vor.u32 1.1754944e-38, %v5365_v5  ;;  %vm5364_vm2 = vcmp.eq.f32.partialorder %v5363_v10, 8.507059e+37  ;;  %v770_v8 = vadd.f32 %v12738_v59, %v9267_v27  ;;  %vm12361_vm5 = vmor %vm5399_vm4, %vm5400_vm3  ;;  %v12743_v59 = vld [vmem:[#allocation35_spill] sm:$0xff] }
 0xa65   : > { %v5396_v22 = vsub.f32 1.0, %v5395_v51  ;;  %v5406_v51 = vor.u32 1.1754944e-38, %v5405_v28  ;;  %v5425_v9 = vadd.f32 %v12349_v34, %v5341_v16  ;;  %vm5414_vm11 = vweird.f32 %v12281_v50  ;;  %v7926_v28 = vld [vmem:[%s12643_s6 + $0x90] sm:$0xf] }
 0xa66   : > { %v5418_v55 = vand.u32 2147483647, %v12281_v50 }
 0xa67   : > { %v8739_v24 = vpop.eup %8738  ;;  %v5397_v29 = vmul.f32 %v12279_v14, %v5396_v22 }
 0xa68   : > { %v8741_v39 = vpop.eup %8740  ;;  %v12313_v63 = vadd.f32 1.0, %v8739_v24  ;;  %vm5419_vm13 = vcmp.eq.f32.partialorder %v5418_v55, 8.507059e+37 }
 0xa69   : > { %v5355_v62 = vmul.f32 %v8741_v39, %v12258_v36  ;;  %vm5360_vm14 = vweird.f32 %v8741_v39  ;;  %v5398_v4 = vadd.f32 %v12279_v14, %v5397_v29 }
 0xa6a   : > { %8744 = vrcp.f32 %v12313_v63  ;;  %v12332_v45 = vpop.eup %8742  ;;  %vm5361_vm1 = vmor %vm5359_vm15, %vm5360_vm14  ;;  %v5380_v12 = vand.u32 2147483648, %v12313_v63  ;;  %v5378_v61 = vand.u32 2147483647, %v12313_v63  ;;  %vm5374_vm7 = vweird.f32 %v12313_v63 }
 0xa6b   : > { %v5356_v0 = vsub.f32 1.0, %v5355_v62  ;;  %v5410_v44 = vmul.f32 %v12332_v45, %v12281_v50  ;;  %v5402_v3 = vsel %vm12361_vm5, %v12279_v14, %v5398_v4  ;;  %vm5415_vm10 = vweird.f32 %v12332_v45 }
 0xa6c   : > { %v5381_v1 = vor.u32 1.1754944e-38, %v5380_v12  ;;  %v5407_v43 = vsel %vm5404_vm8, %v5406_v51, %v5402_v3  ;;  %vm5379_vm9 = vcmp.eq.f32.partialorder %v5378_v61, 8.507059e+37  ;;  %vm5416_vm12 = vmor %vm5414_vm11, %vm5415_vm10  ;;  %vm5450_vm15 = vcmp.eq.s32.totalorder %v5446_v53, 1  ;;  %v8358_v61 = vld [vmem:[%s12643_s6 + $0xa0] sm:$0xf0] }
 0xa6d   : > { %v5357_v32 = vmul.f32 %v8741_v39, %v5356_v0  ;;  %v5411_v38 = vsub.f32 1.0, %v5410_v44  ;;  %v5436_v13 = vmul.f32 %v5407_v43, %v12161_v35 }
 0xa6f   : > { %v5358_v11 = vadd.f32 %v8741_v39, %v5357_v32  ;;  %v5412_v41 = vmul.f32 %v12332_v45, %v5411_v38 }
 0xa70   : > { %v8745_v42 = vpop.eup %8744 }
 0xa71   : > { %v5362_v33 = vsel %vm5361_vm1, %v8741_v39, %v5358_v11  ;;  %v5370_v20 = vmul.f32 %v8745_v42, %v12313_v63  ;;  %vm5375_vm6 = vweird.f32 %v8745_v42  ;;  %v5413_v56 = vadd.f32 %v12332_v45, %v5412_v41  ;;  %v7938_v11 = vld [vmem:[%s12643_s6 + $0xa8] sm:$0xf] }
 0xa72   : > { %v5367_v36 = vsel %vm5364_vm2, %v5366_v17, %v5362_v33  ;;  %vm5376_vm0 = vmor %vm5374_vm7, %vm5375_vm6  ;;  %v5420_v39 = vand.u32 2147483648, %v12281_v50  ;;  %v5432_v63 = vsub.f32 1.0, %v5407_v43  ;;  %v5449_v50 = vpop.permute.xlu0 %5448  ;;  %v7940_v17 = vld [vmem:[%s12643_s6 + $0xb4] sm:$0xf0]  ;;  %v8361_v33 = vld [vmem:[%s12643_s6 + $0xb8] sm:$0xf0] }
 0xa73   : > { %v5426_v7 = vmul.f32 %v5424_v46, %v5367_v36  ;;  %v5371_v18 = vsub.f32 1.0, %v5370_v20  ;;  %v5417_v60 = vsel %vm5416_vm12, %v12332_v45, %v5413_v56  ;;  %vm5451_vm14 = vcmp.eq.s32.totalorder %v5449_v50, 1  ;;  %v7946_v46 = vld [vmem:[%s12643_s6 + $0xb0] sm:$0xf]  ;;  %v12742_v36 = vld [vmem:[#allocation14_spill] sm:$0xff] }
 0xa74   : > { %v5421_v6 = vor.u32 1.1754944e-38, %v5420_v39  ;;  %v7947_v4 = vor.u32 %v8361_v33, %v7946_v46  ;;  %v597_v38 = vadd.f32 %v12742_v36, %v9117_v52  ;;  %v7914_v43 = vld [vmem:[%s12643_s6 + $0x78] sm:$0xf]  ;;  %v7916_v56 = vld [vmem:[%s12643_s6 + $0x84] sm:$0xf0] }
 0xa75   : > { %v5428_v30 = vadd.f32 %v5426_v7, %v770_v8  ;;  %v5372_v58 = vmul.f32 %v8745_v42, %v5371_v18  ;;  %v686_v8 = vadd.f32 %v12743_v59, %v9156_v15  ;;  %v8357_v7 = vld [vmem:[%s12643_s6 + $0x98] sm:$0xf0]  ;;  %v8356_v18 = vld [vmem:[%s12643_s6 + $0x94] sm:$0xf]  ;;  %v8355_v39 = vld [vmem:[%s12643_s6 + $0x88] sm:$0xf0] }
 0xa76   : > { %v5422_v0 = vsel %vm5419_vm13, %v5421_v6, %v5417_v60  ;;  %5984 = vmatpush.bf16.msrb.mxu3 %v7947_v4  ;;  %v7927_v21 = vor.u32 %v8357_v7, %v7926_v28  ;;  %v8351_v60 = vld [vmem:[%s12643_s6 + $0x68] sm:$0xf0]  ;;  %v7892_v33 = vld [vmem:[%s12643_s6 + $0x54] sm:$0xf0]  ;;  %v8349_v4 = vld [vmem:[%s12643_s6 + $0x58] sm:$0xf0] }
 0xa77   : > { %8746 = vtanh.f32 %v5428_v30  ;;  %v5373_v47 = vadd.f32 %v8745_v42, %v5372_v58  ;;  %v5433_v31 = vsub.f32 1.0, %v5422_v0  ;;  %v5437_v26 = vmul.f32 %v5422_v0, %v12164_v23  ;;  %v7928_v30 = vld [vmem:[%s12643_s6 + $0x9c] sm:$0xf0]  ;;  %v7934_v58 = vld [vmem:[%s12643_s6 + $0x98] sm:$0xf] }
 0xa78   : > { %v7931_v16 = vor.u32 %v8356_v18, %v7928_v30  ;;  %v7935_v51 = vor.u32 %v8358_v61, %v7934_v58  ;;  %v8347_v46 = vld [vmem:[%s12643_s6 + $0x4c] sm:$0xf]  ;;  %v7878_v36 = vld [vmem:[%s12643_s6 + $0x30] sm:$0xf]  ;;  %v8345_v59 = vld [vmem:[%s12643_s6 + $0x38] sm:$0xf0] }
 0xa79   : > { %v5377_v24 = vsel %vm5376_vm0, %v8745_v42, %v5373_v47  ;;  %v7879_v7 = vor.u32 %v8345_v59, %v7878_v36  ;;  %v7880_v18 = vld [vmem:[%s12643_s6 + $0x3c] sm:$0xf0]  ;;  %v7866_v30 = vld [vmem:[%s12643_s6 + $0x18] sm:$0xf]  ;;  %v8342_v58 = vld [vmem:[%s12643_s6 + $0x20] sm:$0xf0] }
 0xa7a   : > { %v5382_v14 = vsel %vm5379_vm9, %v5381_v1, %v5377_v24  ;;  %5985 = vmatpush.bf16.msrb.mxu3 %v7935_v51  ;;  %v8353_v24 = vld [vmem:[%s12643_s6 + $0x7c] sm:$0xf]  ;;  %v7868_v51 = vld [vmem:[%s12643_s6 + $0x24] sm:$0xf0] }
 0xa7b   : > { %v5427_v37 = vmul.f32 %v5425_v9, %v5382_v14  ;;  %v8354_v9 = vld [vmem:[%s12643_s6 + $0x80] sm:$0xf0]  ;;  %v7919_v54 = vor.u32 %v8353_v24, %v7916_v56 }
 0xa7c   : > { %v7915_v14 = vor.u32 %v8354_v9, %v7914_v43  ;;  %v7874_v43 = vld [vmem:[%s12643_s6 + $0x20] sm:$0xf]  ;;  %v8343_v9 = vld [vmem:[%s12643_s6 + $0x28] sm:$0xf0] }
 0xa7d   : > { %v8747_v49 = vpop.eup %8746  ;;  %v5429_v62 = vadd.f32 %v5427_v37, %v772_v25  ;;  %v7922_v25 = vld [vmem:[%s12643_s6 + $0x80] sm:$0xf] }
 0xa7e   : > { %v5434_v40 = vmul.f32 %v8747_v49, %v5432_v63  ;;  %v7923_v37 = vor.u32 %v8355_v39, %v7922_v25  ;;  %v12744_v63 = vld [vmem:[#allocation15_spill] sm:$0xff]  ;;  %v12745_v49 = vld [vmem:[#allocation37_spill] sm:$0xff] }
 0xa7f   : > { %8748 = vtanh.f32 %v5429_v62  ;;  %v599_v55 = vadd.f32 %v12744_v63, %v9117_v52  ;;  %v688_v62 = vadd.f32 %v12745_v49, %v9156_v15  ;;  %v7875_v49 = vor.u32 %v8343_v9, %v7874_v43  ;;  %v12749_v9 = vld [vmem:[#allocation38_spill] sm:$0xff] }
 0xa80   : > { %v5438_v22 = vadd.f32 %v5436_v13, %v5434_v40  ;;  %v7902_v13 = vld [vmem:[%s12643_s6 + $0x60] sm:$0xf]  ;;  %v8350_v40 = vld [vmem:[%s12643_s6 + $0x64] sm:$0xf]  ;;  %5986 = vmatpush.bf16.msrb.mxu3 %v7923_v37 }
 0xa81   : > { %v7903_v0 = vor.u32 %v8351_v60, %v7902_v13  ;;  %v7856_v13 = vld [vmem:[%s12643_s6 + $0xc] sm:$0xf0] }
 0xa82   : > { %v5452_v32 = vsel %vm5450_vm15, %v5438_v22, 0.0  ;;  %v12383_v45 = vsel %vm5450_vm15, %v5438_v22, %v12161_v35  ;;  %v8360_v35 = vld [vmem:[%s12643_s6 + $0xb0] sm:$0xf0] }
 0xa83   : > { %v7939_v42 = vor.u32 %v8360_v35, %v7938_v11 }
 0xa85   : > { %v8749_v57 = vpop.eup %8748  ;;  %5956 = vmatpush.bf16.msra.mxu1 %v7939_v42 }
 0xa86   : > { %v5435_v19 = vmul.f32 %v8749_v57, %v5433_v31  ;;  %v7904_v31 = vld [vmem:[%s12643_s6 + $0x6c] sm:$0xf0]  ;;  %v7910_v57 = vld [vmem:[%s12643_s6 + $0x68] sm:$0xf] }
 0xa87   : > { %v7907_v53 = vor.u32 %v8350_v40, %v7904_v31  ;;  %v8340_v31 = vld [vmem:[%s12643_s6 + $0x10] sm:$0xf0] }
 0xa88   : > { %v5439_v5 = vadd.f32 %v5437_v26, %v5435_v19  ;;  %v8352_v26 = vld [vmem:[%s12643_s6 + $0x70] sm:$0xf0] }
 0xa89   : > { %5957 = vmatpush.bf16.msra.mxu1 %v7927_v21  ;;  %v8346_v21 = vld [vmem:[%s12643_s6 + $0x40] sm:$0xf0] }
 0xa8a   : > { %v5453_v10 = vsel %vm5451_vm14, %v5439_v5, 0.0  ;;  %v12386_v29 = vsel %vm5451_vm14, %v5439_v5, %v12164_v23  ;;  %v8359_v23 = vld [vmem:[%s12643_s6 + $0xac] sm:$0xf]  ;;  %v7911_v5 = vor.u32 %v8352_v26, %v7910_v57 }
 0xa8b   : > { %v8430_v44 = vpack.c.bf16 %v5453_v10, %v5452_v32  ;;  %v5468_v2 = vpack.c.bf16 %v12386_v29, %v12383_v45  ;;  %v7943_v20 = vor.u32 %v8359_v23, %v7940_v17  ;;  %v8348_v23 = vld [vmem:[%s12643_s6 + $0x50] sm:$0xf0] }
 0xa8c   : > { %5987 = vmatpush.bf16.msrb.mxu3 %v7911_v5 }
 0xa8d   : > { %8454 = vst [vmem:[%s8872_s15 + $0x68] sm:$0xff] %v8430_v44   ;;  %5637 = vmatmul.bf16.vlgmr.msrb.gmra.mxu2 %v5468_v2  ;;  %5651 = vmatmul.bf16.vlgmr.msra.gmra.mxu3 %v5468_v2  ;;  %v7890_v44 = vld [vmem:[%s12643_s6 + $0x48] sm:$0xf] }
 0xa8e   : > { %5665 = vmatmul.bf16.vlgmr.msra.gmra.mxu0 %v5468_v2  ;;  %5970 = vmatpush.bf16.msra.mxu2 %v7943_v20  ;;  %v7891_v17 = vor.u32 %v8348_v23, %v7890_v44  ;;  %v7898_v20 = vld [vmem:[%s12643_s6 + $0x50] sm:$0xf] }
 0xa8f   : > { %5958 = vmatpush.bf16.msra.mxu1 %v7915_v14  ;;  %v7899_v28 = vor.u32 %v8349_v4, %v7898_v20  ;;  %v7854_v14 = vld [vmem:[%s12643_s6] sm:$0xf] }
 0xa91   : > { %5988 = vmatpush.bf16.msrb.mxu3 %v7899_v28 }
 0xa92   : > { %5971 = vmatpush.bf16.msra.mxu2 %v7931_v16  ;;  %v8341_v16 = vld [vmem:[%s12643_s6 + $0x1c] sm:$0xf] }
 0xa93   : > { %5959 = vmatpush.bf16.msra.mxu1 %v7903_v0  ;;  %v7871_v37 = vor.u32 %v8341_v16, %v7868_v51  ;;  %v7862_v0 = vld [vmem:[%s12643_s6 + $0x8] sm:$0xf] }
 0xa94   : > { %v7863_v5 = vor.u32 %v8340_v31, %v7862_v0 }
 0xa96   : > { %5972 = vmatpush.bf16.msra.mxu2 %v7919_v54  ;;  %v8339_v54 = vld [vmem:[%s12643_s6 + $0x8] sm:$0xf0] }
 0xa97   : > { %5960 = vmatpush.bf16.msra.mxu1 %v7891_v17 }
 0xa9a   : > { %5973 = vmatpush.bf16.msra.mxu2 %v7907_v53 }
 0xa9b   : > { %5961 = vmatpush.bf16.msra.mxu1 %v7879_v7 }
 0xb0b   : > { %v5666_v60 = vpop.f32.mrf.mxu0 }
 0xb0c   : > { %v5751_v44 = vadd.f32 %v12349_v34, %v5666_v60 }
 0xb10   : > { %v5638_v48 = vpop.f32.mrf.mxu2  ;;  %v5652_v12 = vpop.f32.mrf.mxu3 }
 0xb11   : > { %v5671_v3 = vadd.f32 %v5638_v48, %v597_v38  ;;  %v5711_v41 = vadd.f32 %v5652_v12, %v686_v8  ;;  %v7895_v38 = vor.u32 %v8347_v46, %v7892_v33  ;;  %v8344_v8 = vld [vmem:[%s12643_s6 + $0x34] sm:$0xf]  ;;  %v7886_v48 = vld [vmem:[%s12643_s6 + $0x38] sm:$0xf] }
 0xb12   : > { %v7883_v12 = vor.u32 %v8344_v8, %v7880_v18 }
 0xb13   : > { %v7846_v47 = vmul.f32 -1.442695, %v5671_v3  ;;  %v7848_v1 = vmul.f32 -1.442695, %v5711_v41  ;;  %5974 = vmatpush.bf16.msra.mxu2 %v7895_v38  ;;  %v7887_v3 = vor.u32 %v8346_v21, %v7886_v48  ;;  %v7867_v41 = vor.u32 %v8342_v58, %v7866_v30  ;;  %v5668_v21 = vpop.f32.mrf.mxu0 }
 0xb14   : > { %v5752_v16 = vadd.f32 %v12349_v34, %v5668_v21 }
 0xb15   : > { %8750 = vpow2.f32 %v7846_v47  ;;  %5989 = vmatpush.bf16.msrb.mxu3 %v7887_v3  ;;  %5962 = vmatpush.bf16.msra.mxu1 %v7867_v41 }
 0xb16   : > { %8752 = vpow2.f32 %v7848_v1 }
 0xb17   : > { %5975 = vmatpush.bf16.msra.mxu2 %v7883_v12 }
 0xb18   : > { %v5640_v6 = vpop.f32.mrf.mxu2  ;;  %v5654_v22 = vpop.f32.mrf.mxu3 }
 0xb19   : > { %v5672_v19 = vadd.f32 %v5640_v6, %v599_v55  ;;  %v5712_v50 = vadd.f32 %v5654_v22, %v688_v62  ;;  %v8338_v62 = vld [vmem:[%s12643_s6 + $0x4] sm:$0xf]  ;;  %v7855_v22 = vor.u32 %v8339_v54, %v7854_v14  ;;  %5990 = vmatpush.bf16.msrb.mxu3 %v7875_v49 }
 0xb1b   : > { %v8751_v32 = vpop.eup %8750  ;;  %v7847_v10 = vmul.f32 -1.442695, %v5672_v19  ;;  %v7849_v35 = vmul.f32 -1.442695, %v5712_v50  ;;  %5976 = vmatpush.bf16.msra.mxu2 %v7871_v37  ;;  %v7859_v50 = vor.u32 %v8338_v62, %v7856_v13  ;;  %5963 = vmatpush.bf16.msra.mxu1 %v7855_v22  ;;  %v5776_v22 = vpop.permute.xlu2 %5775 }
 0xb1c   : > { %v8753_v2 = vpop.eup %8752  ;;  %v12474_v11 = vadd.f32 1.0, %v8751_v32 }
 0xb1d   : > { %v12479_v42 = vadd.f32 1.0, %v8753_v2  ;;  %8754 = vpow2.f32 %v7847_v10  ;;  %5991 = vmatpush.bf16.msrb.mxu3 %v7863_v5 }
 0xb1e   : > { %8756 = vrcp.f32 %v12474_v11  ;;  %v5692_v40 = vand.u32 2147483648, %v12474_v11  ;;  %v5690_v26 = vand.u32 2147483647, %v12474_v11  ;;  %vm5686_vm2 = vweird.f32 %v12474_v11 }
 0xb1f   : > { %8758 = vrcp.f32 %v12479_v42  ;;  %5977 = vmatpush.bf16.msra.mxu2 %v7859_v50  ;;  %v5732_v4 = vand.u32 2147483648, %v12479_v42  ;;  %vm5726_vm6 = vweird.f32 %v12479_v42  ;;  %v5730_v38 = vand.u32 2147483647, %v12479_v42 }
 0xb20   : > { %8760 = vpow2.f32 %v7849_v35  ;;  %v5693_v10 = vor.u32 1.1754944e-38, %v5692_v40  ;;  %vm5691_vm4 = vcmp.eq.f32.partialorder %v5690_v26, 8.507059e+37 }
 0xb21   : > { %vm5731_vm9 = vcmp.eq.f32.partialorder %v5730_v38, 8.507059e+37 }
 0xb23   : > { %v8755_v61 = vpop.eup %8754 }
 0xb24   : > { %v8757_v47 = vpop.eup %8756  ;;  %v12525_v1 = vadd.f32 1.0, %v8755_v61 }
 0xb25   : > { %v12533_v24 = vpop.eup %8758  ;;  %v5682_v56 = vmul.f32 %v8757_v47, %v12474_v11  ;;  %vm5687_vm1 = vweird.f32 %v8757_v47  ;;  %v12746_v11 = vld [vmem:[#allocation36_spill] sm:$0xff] }
 0xb26   : > { %v8761_v25 = vpop.eup %8760  ;;  %v5722_v39 = vmul.f32 %v12533_v24, %v12479_v42  ;;  %8762 = vrcp.f32 %v12525_v1  ;;  %vm5688_vm3 = vmor %vm5686_vm2, %vm5687_vm1  ;;  %vm5727_vm5 = vweird.f32 %v12533_v24  ;;  %v775_v33 = vadd.f32 %v12746_v11, %v9267_v27 }
 0xb27   : > { %v5683_v63 = vsub.f32 1.0, %v5682_v56  ;;  %v12545_v55 = vadd.f32 1.0, %v8761_v25  ;;  %v5707_v59 = vand.u32 2147483648, %v12525_v1  ;;  %vm12575_vm7 = vmor %vm5726_vm6, %vm5727_vm5  ;;  %v5705_v48 = vand.u32 2147483647, %v12525_v1 }
 0xb28   : > { %v5723_v6 = vsub.f32 1.0, %v5722_v39  ;;  %v5733_v42 = vor.u32 1.1754944e-38, %v5732_v4  ;;  %vm5701_vm0 = vweird.f32 %v12525_v1  ;;  %vm5778_vm2 = vcmp.eq.s32.totalorder %v5776_v22, 1 }
 0xb29   : > { %v5684_v57 = vmul.f32 %v8757_v47, %v5683_v63  ;;  %8764 = vrcp.f32 %v12545_v55  ;;  %v5708_v61 = vor.u32 1.1754944e-38, %v5707_v59  ;;  %vm5706_vm11 = vcmp.eq.f32.partialorder %v5705_v48, 8.507059e+37 }
 0xb2a   : > { %v5724_v19 = vmul.f32 %v12533_v24, %v5723_v6  ;;  %v5747_v14 = vand.u32 2147483648, %v12545_v55  ;;  %vm5741_vm13 = vweird.f32 %v12545_v55 }
 0xb2b   : > { %v5685_v53 = vadd.f32 %v8757_v47, %v5684_v57 }
 0xb2c   : > { %v8763_v32 = vpop.eup %8762  ;;  %v5725_v17 = vadd.f32 %v12533_v24, %v5724_v19  ;;  %v5748_v62 = vor.u32 1.1754944e-38, %v5747_v14 }
 0xb2d   : > { %v5689_v2 = vsel %vm5688_vm3, %v8757_v47, %v5685_v53  ;;  %v5697_v35 = vmul.f32 %v8763_v32, %v12525_v1  ;;  %vm5702_vm8 = vweird.f32 %v8763_v32  ;;  %v5745_v1 = vand.u32 2147483647, %v12545_v55 }
 0xb2e   : > { %v5694_v23 = vsel %vm5691_vm4, %v5693_v10, %v5689_v2  ;;  %v5729_v12 = vsel %vm12575_vm7, %v12533_v24, %v5725_v17  ;;  %vm5703_vm10 = vmor %vm5701_vm0, %vm5702_vm8  ;;  %v777_v24 = vadd.f32 %v12749_v9, %v9267_v27  ;;  %v12750_v10 = vld [vmem:[#allocation16_spill] sm:$0xff] }
 0xb2f   : > { %v8765_v46 = vpop.eup %8764  ;;  %v5753_v20 = vmul.f32 %v5751_v44, %v5694_v23  ;;  %v5698_v36 = vsub.f32 1.0, %v5697_v35  ;;  %v5734_v41 = vsel %vm5731_vm9, %v5733_v42, %v5729_v12  ;;  %vm5746_vm15 = vcmp.eq.f32.partialorder %v5745_v1, 8.507059e+37 }
 0xb30   : > { %v5737_v8 = vmul.f32 %v8765_v46, %v12545_v55  ;;  %vm5742_vm12 = vweird.f32 %v8765_v46  ;;  %v5759_v54 = vsub.f32 1.0, %v5734_v41  ;;  %v5763_v37 = vmul.f32 %v5734_v41, %v12383_v45  ;;  %v5773_v55 = vpop.permute.xlu1 %5772 }
 0xb31   : > { %v5755_v28 = vadd.f32 %v5753_v20, %v775_v33  ;;  %v5699_v18 = vmul.f32 %v8763_v32, %v5698_v36  ;;  %vm5743_vm14 = vmor %vm5741_vm13, %vm5742_vm12  ;;  %vm5777_vm1 = vcmp.eq.s32.totalorder %v5773_v55, 1  ;;  %v602_v44 = vadd.f32 %v12750_v10, %v9117_v52 }
 0xb32   : > { %v5738_v30 = vsub.f32 1.0, %v5737_v8 }
 0xb33   : > { %8766 = vtanh.f32 %v5755_v28  ;;  %v5700_v58 = vadd.f32 %v8763_v32, %v5699_v18  ;;  %v12753_v28 = vld [vmem:[#allocation41_spill] sm:$0xff] }
 0xb34   : > { %v5739_v3 = vmul.f32 %v8765_v46, %v5738_v30  ;;  %v693_v7 = vadd.f32 %v12753_v28, %v9156_v15 }
 0xb35   : > { %v5704_v51 = vsel %vm5703_vm10, %v8763_v32, %v5700_v58 }
 0xb36   : > { %v5709_v47 = vsel %vm5706_vm11, %v5708_v61, %v5704_v51  ;;  %v5740_v43 = vadd.f32 %v8765_v46, %v5739_v3 }
 0xb37   : > { %v5754_v56 = vmul.f32 %v5752_v16, %v5709_v47 }
 0xb38   : > { %v5744_v63 = vsel %vm5743_vm14, %v8765_v46, %v5740_v43  ;;  %v12752_v46 = vld [vmem:[#allocation17_spill] sm:$0xff] }
 0xb39   : > { %v8767_v25 = vpop.eup %8766  ;;  %v5756_v39 = vadd.f32 %v5754_v56, %v777_v24  ;;  %v5749_v60 = vsel %vm5746_vm15, %v5748_v62, %v5744_v63  ;;  %v604_v11 = vadd.f32 %v12752_v46, %v9117_v52 }
 0xb3a   : > { %v5761_v49 = vmul.f32 %v8767_v25, %v5759_v54  ;;  %v5760_v40 = vsub.f32 1.0, %v5749_v60  ;;  %v5764_v0 = vmul.f32 %v5749_v60, %v12386_v29 }
 0xb3b   : > { %8768 = vtanh.f32 %v5756_v39 }
 0xb3c   : > { %v5765_v13 = vadd.f32 %v5763_v37, %v5761_v49  ;;  %v12754_v37 = vld [vmem:[#allocation40_spill] sm:$0xff] }
 0xb3d   : > { %v780_v63 = vadd.f32 %v12754_v37, %v9267_v27 }
 0xb3e   : > { %v5779_v26 = vsel %vm5777_vm1, %v5765_v13, 0.0  ;;  %v12593_v50 = vsel %vm5777_vm1, %v5765_v13, %v12383_v45  ;;  %v12751_v45 = vld [vmem:[#allocation39_spill] sm:$0xff] }
 0xb3f   : > { %v691_v17 = vadd.f32 %v12751_v45, %v9156_v15 }
 0xb41   : > { %v8769_v6 = vpop.eup %8768 }
 0xb42   : > { %v5762_v31 = vmul.f32 %v8769_v6, %v5760_v40 }
 0xb44   : > { %v5766_v57 = vadd.f32 %v5764_v0, %v5762_v31 }
 0xb46   : > { %v5780_v19 = vsel %vm5778_vm2, %v5766_v57, 0.0  ;;  %v12596_v53 = vsel %vm5778_vm2, %v5766_v57, %v12386_v29 }
 0xb47   : > { %v8435_v5 = vpack.c.bf16 %v5780_v19, %v5779_v26  ;;  %v5795_v32 = vpack.c.bf16 %v12596_v53, %v12593_v50 }
 0xb49   : > { %8455 = vst [vmem:[%s8872_s15 + $0x70] sm:$0xff] %v8435_v5   ;;  %5964 = vmatmul.bf16.vlgmr.msra.gmra.mxu1 %v5795_v32  ;;  %5978 = vmatmul.bf16.vlgmr.msra.gmra.mxu2 %v5795_v32 }
 0xb4a   : > { %5992 = vmatmul.bf16.vlgmr.msrb.gmra.mxu3 %v5795_v32 }
 0xbc6   : > { %v5965_v2 = vpop.f32.mrf.mxu1 }
 0xbc7   : > { %v5998_v35 = vadd.f32 %v5965_v2, %v602_v44 }
 0xbc9   : > { %v7948_v23 = vmul.f32 -1.442695, %v5998_v35 }
 0xbcb   : > { %8770 = vpow2.f32 %v7948_v23 }
 0xbcc   : > { %v5979_v29 = vpop.f32.mrf.mxu2 }
 0xbcd   : > { %v6038_v33 = vadd.f32 %v5979_v29, %v691_v17  ;;  %v5993_v51 = vpop.f32.mrf.mxu3 }
 0xbce   : > { %v5967_v20 = vpop.f32.mrf.mxu1  ;;  %v6078_v39 = vadd.f32 %v12349_v34, %v5993_v51 }
 0xbcf   : > { %v7950_v4 = vmul.f32 -1.442695, %v6038_v33  ;;  %v5999_v36 = vadd.f32 %v5967_v20, %v604_v11  ;;  %v12755_v33 = vld [vmem:[#allocation42_spill] sm:$0xff] }
 0xbd0   : > { %v782_v20 = vadd.f32 %v12755_v33, %v9267_v27 }
 0xbd1   : > { %v8771_v38 = vpop.eup %8770  ;;  %8772 = vpow2.f32 %v7950_v4  ;;  %v7949_v59 = vmul.f32 -1.442695, %v5999_v36 }
 0xbd2   : > { %v6006_v8 = vadd.f32 1.0, %v8771_v38 }
 0xbd3   : > { %8774 = vpow2.f32 %v7949_v59 }
 0xbd4   : > { %8776 = vrcp.f32 %v6006_v8  ;;  %v5981_v18 = vpop.f32.mrf.mxu2  ;;  %v6019_v41 = vand.u32 2147483648, %v6006_v8  ;;  %v6017_v15 = vand.u32 2147483647, %v6006_v8  ;;  %vm6013_vm4 = vweird.f32 %v6006_v8 }
 0xbd5   : > { %v6039_v48 = vadd.f32 %v5981_v18, %v693_v7  ;;  %v5995_v44 = vpop.f32.mrf.mxu3  ;;  %v6100_v7 = vpop.permute.xlu0 %6099 }
 0xbd6   : > { %v6020_v14 = vor.u32 1.1754944e-38, %v6019_v41  ;;  %vm6018_vm6 = vcmp.eq.f32.partialorder %v6017_v15, 8.507059e+37  ;;  %v6079_v29 = vadd.f32 %v12349_v34, %v5995_v44  ;;  %vm6104_vm2 = vcmp.eq.s32.totalorder %v6100_v7, 1 }
 0xbd7   : > { %v8773_v12 = vpop.eup %8772  ;;  %v7951_v21 = vmul.f32 -1.442695, %v6039_v48 }
 0xbd8   : > { %v6046_v30 = vadd.f32 1.0, %v8773_v12 }
 0xbd9   : > { %v8775_v42 = vpop.eup %8774  ;;  %8778 = vpow2.f32 %v7951_v21 }
 0xbda   : > { %v8777_v52 = vpop.eup %8776  ;;  %8780 = vrcp.f32 %v6046_v30  ;;  %v6007_v61 = vadd.f32 1.0, %v8775_v42  ;;  %v6059_v60 = vand.u32 2147483648, %v6046_v30  ;;  %v6057_v6 = vand.u32 2147483647, %v6046_v30 }
 0xbdb   : > { %v6009_v58 = vmul.f32 %v8777_v52, %v6006_v8  ;;  %vm6014_vm3 = vweird.f32 %v8777_v52  ;;  %vm6053_vm8 = vweird.f32 %v6046_v30 }
 0xbdc   : > { %8782 = vrcp.f32 %v6007_v61  ;;  %vm6015_vm5 = vmor %vm6013_vm4, %vm6014_vm3  ;;  %v6034_v55 = vand.u32 2147483648, %v6007_v61  ;;  %v6032_v19 = vand.u32 2147483647, %v6007_v61  ;;  %v6060_v5 = vor.u32 1.1754944e-38, %v6059_v60 }
 0xbdd   : > { %v6010_v3 = vsub.f32 1.0, %v6009_v58  ;;  %vm6058_vm10 = vcmp.eq.f32.partialorder %v6057_v6, 8.507059e+37  ;;  %vm6028_vm11 = vweird.f32 %v6007_v61 }
 0xbde   : > { %v6035_v45 = vor.u32 1.1754944e-38, %v6034_v55  ;;  %vm6033_vm13 = vcmp.eq.f32.partialorder %v6032_v19, 8.507059e+37 }
 0xbdf   : > { %v8779_v16 = vpop.eup %8778  ;;  %v6011_v47 = vmul.f32 %v8777_v52, %v6010_v3 }
 0xbe0   : > { %v8781_v43 = vpop.eup %8780  ;;  %v12609_v9 = vadd.f32 1.0, %v8779_v16 }
 0xbe1   : > { %v6049_v24 = vmul.f32 %v8781_v43, %v6046_v30  ;;  %v6012_v56 = vadd.f32 %v8777_v52, %v6011_v47  ;;  %vm6054_vm7 = vweird.f32 %v8781_v43 }
 0xbe2   : > { %8784 = vrcp.f32 %v12609_v9  ;;  %v8783_v54 = vpop.eup %8782  ;;  %vm6055_vm0 = vmor %vm6053_vm8, %vm6054_vm7  ;;  %v6074_v36 = vand.u32 2147483648, %v12609_v9  ;;  %vm6068_vm15 = vweird.f32 %v12609_v9  ;;  %v6072_v28 = vand.u32 2147483647, %v12609_v9 }
 0xbe3   : > { %v6050_v1 = vsub.f32 1.0, %v6049_v24  ;;  %v6016_v25 = vsel %vm6015_vm5, %v8777_v52, %v6012_v56  ;;  %v6024_v62 = vmul.f32 %v8783_v54, %v6007_v61  ;;  %vm6029_vm9 = vweird.f32 %v8783_v54  ;;  %v6103_v61 = vpop.permute.xlu1 %6102 }
 0xbe4   : > { %v6021_v49 = vsel %vm6018_vm6, %v6020_v14, %v6016_v25  ;;  %vm6030_vm12 = vmor %vm6028_vm11, %vm6029_vm9  ;;  %v6075_v30 = vor.u32 1.1754944e-38, %v6074_v36  ;;  %vm6073_vm3 = vcmp.eq.f32.partialorder %v6072_v28, 8.507059e+37  ;;  %vm6105_vm4 = vcmp.eq.s32.totalorder %v6103_v61, 1 }
 0xbe5   : > { %v6051_v13 = vmul.f32 %v8781_v43, %v6050_v1  ;;  %v6080_v40 = vmul.f32 %v6078_v39, %v6021_v49  ;;  %v6025_v22 = vsub.f32 1.0, %v6024_v62 }
 0xbe7   : > { %v6052_v0 = vadd.f32 %v8781_v43, %v6051_v13  ;;  %v6082_v31 = vadd.f32 %v6080_v40, %v780_v63  ;;  %v6026_v26 = vmul.f32 %v8783_v54, %v6025_v22 }
 0xbe8   : > { %v8785_v57 = vpop.eup %8784 }
 0xbe9   : > { %v6056_v32 = vsel %vm6055_vm0, %v8781_v43, %v6052_v0  ;;  %8786 = vtanh.f32 %v6082_v31  ;;  %v6064_v10 = vmul.f32 %v8785_v57, %v12609_v9  ;;  %v6027_v2 = vadd.f32 %v8783_v54, %v6026_v26 }
 0xbea   : > { %v6061_v35 = vsel %vm6058_vm10, %v6060_v5, %v6056_v32  ;;  %vm6069_vm14 = vweird.f32 %v8785_v57 }
 0xbeb   : > { %v6065_v23 = vsub.f32 1.0, %v6064_v10  ;;  %v6031_v17 = vsel %vm6030_vm12, %v8783_v54, %v6027_v2  ;;  %v6086_v4 = vsub.f32 1.0, %v6061_v35  ;;  %v6090_v34 = vmul.f32 %v6061_v35, %v12593_v50  ;;  %vm6070_vm1 = vmor %vm6068_vm15, %vm6069_vm14 }
 0xbec   : > { %v6036_v11 = vsel %vm6033_vm13, %v6035_v45, %v6031_v17 }
 0xbed   : > { %v6066_v46 = vmul.f32 %v8785_v57, %v6065_v23  ;;  %v6081_v38 = vmul.f32 %v6079_v29, %v6036_v11 }
 0xbef   : > { %v8787_v59 = vpop.eup %8786  ;;  %v6067_v8 = vadd.f32 %v8785_v57, %v6066_v46  ;;  %v6083_v48 = vadd.f32 %v6081_v38, %v782_v20 }
 0xbf0   : > { %v6088_v18 = vmul.f32 %v8787_v59, %v6086_v4 }
 0xbf1   : > { %v6071_v12 = vsel %vm6070_vm1, %v8785_v57, %v6067_v8  ;;  %8788 = vtanh.f32 %v6083_v48 }
 0xbf2   : > { %v6092_v21 = vadd.f32 %v6090_v34, %v6088_v18  ;;  %v6076_v42 = vsel %vm6073_vm3, %v6075_v30, %v6071_v12 }
 0xbf3   : > { %v6087_v52 = vsub.f32 1.0, %v6076_v42  ;;  %v6091_v41 = vmul.f32 %v6076_v42, %v12596_v53 }
 0xbf4   : > { %v6113_v27 = vsel %vm6104_vm2, %v6092_v21, %v12593_v50  ;;  %v6106_v51 = vsel %vm6104_vm2, %v6092_v21, 0.0 }
 0xbf5   : > { %6115 = vst [vmem:[#allocation2] sm:$0xff] %v6113_v27 }
 0xbf7   : > { %v8789_v58 = vpop.eup %8788 }
 0xbf8   : > { %v6089_v3 = vmul.f32 %v8789_v58, %v6087_v52 }
 0xbfa   : > { %v6093_v16 = vadd.f32 %v6091_v41, %v6089_v3 }
 0xbfb   : > { %6120 = sbr.rel (%p7954_p5) target bundleno = 3074 (0xc02), region = 56 }
 0xbfc   : > { %v6107_v47 = vsel %vm6105_vm4, %v6093_v16, 0.0  ;;  %v6114_v15 = vsel %vm6105_vm4, %v6093_v16, %v12596_v53 }
 0xbfd   : > { %v8440_v43 = vpack.c.bf16 %v6107_v47, %v6106_v51  ;;  %6116 = vst [vmem:[#allocation2 + $0x8] sm:$0xff] %v6114_v15 }
 0xbff   : > { %8456 = vst [vmem:[%s8872_s15 + $0x78] sm:$0xff] %v8440_v43  }
 0xc00   : > { %6121 = vst [vmem:[%s12645_s8] sm:$0xff] %v6113_v27 }
 0xc01   : > { %6122 = vst [vmem:[%s12645_s8 + $0x8] sm:$0xff] %v6114_v15 }
 0xc02 PF: > { %s19_s27 = sadd.s32 1, %s8801_s27  }
 0xc03   : > { %p16_p6 = scmp.ge.s32.totalorder %s19_s27, 4  }
 0xc05   :  { %18 = sbr.rel (!%p16_p6) target bundleno = 1 (0x1), region = 124 }

</bundles_post_ra>
